<compile_context>
chip_gen: v7x
topology: tpu7x:2x2x1
jax: 0.10.0
libtpu: 0.0.40
codegen_flags: <defaults>
</compile_context>

<pallas_src>
import jax
import jax.numpy as jnp
from jax.experimental import pallas as pl
from jax.experimental.pallas import tpu as pltpu


def _make_conv_relu_kernel(KH, KW, th, Wo):
    """Kernel for one (batch n, row-tile i) grid step."""

    def kernel(x_ref, w_ref, b_ref, o_ref):
        # x_ref: (1, Hp, Wp, Cin)    bf16  -- whole padded image of batch n
        # w_ref: (KH*KW, Cin, Cpad)  bf16  -- tap-major flattened conv weight
        # b_ref: (1, Cpad)           f32
        # o_ref: (1, th, Wo, Cpad)   f32   -- lane-dense output tile
        row0 = pl.program_id(1) * th          # first output row of this tile
        cpad = o_ref.shape[-1]

        acc = jnp.zeros((th * Wo, cpad), jnp.float32)
        # Fused im2col: one (th, Wo, Cin) tap per (kh, kw), straight from the
        # resident VMEM image block.  Accumulate bf16 MXU dots in f32.
        for kh in range(KH):
            for kw in range(KW):
                tap = x_ref[0, pl.ds(row0 + kh, th), pl.ds(kw, Wo), :]
                tap = tap.reshape(th * Wo, tap.shape[-1])
                acc = acc + jnp.dot(tap, w_ref[kh * KW + kw],
                                    preferred_element_type=jnp.float32)

        acc = jnp.maximum(acc + b_ref[...], 0.0)        # bias + ReLU, f32
        o_ref[...] = acc.reshape(o_ref.shape).astype(o_ref.dtype)

    return kernel


def _pick_row_tile(Ho, Wo, target_rows):
    """Largest divisor of Ho whose tile has <= target_rows matmul rows."""
    th = 1
    for d in range(1, Ho + 1):
        if Ho % d == 0 and d * Wo <= target_rows:
            th = d
    return th


def conv2d_relu(x, weight, bias, *, stride=1, padding=0, target_rows=512):
    """Conv2d(kernel_size=KHxKW, stride=1, padding) + ReLU, NCHW in/out."""
    N, Cin, H, W = x.shape
    Cout, Cin_w, KH, KW = weight.shape
    assert Cin == Cin_w, "channel mismatch"
    if stride != 1:
        # TODO(synk): only stride=1 (the nn.Conv2d default used by the module)
        # is implemented in the fused kernel; general stride needs strided taps.
        raise NotImplementedError("stride != 1 not supported")

    # ---- host-side glue: NCHW -> NHWC, zero pad, cast to bf16 (one pass) ----
    xn = jnp.transpose(x, (0, 2, 3, 1))                      # (N, H, W, Cin)
    if padding:
        xn = jnp.pad(xn, ((0, 0), (padding, padding),
                          (padding, padding), (0, 0)))
    xn = xn.astype(jnp.bfloat16)
    Hp, Wp = xn.shape[1], xn.shape[2]
    Ho = Hp - KH + 1
    Wo = Wp - KW + 1
    assert Ho > 0 and Wo > 0

    # Lane-dense output channels: pad C_out up to a multiple of 128.
    Cpad = ((Cout + 127) // 128) * 128

    # weight (Cout, Cin, KH, KW) -> (KH*KW, Cin, Cpad), matching the tap order.
    wk = jnp.transpose(weight, (2, 3, 1, 0)).reshape(KH * KW, Cin, Cout)
    wk = jnp.pad(wk, ((0, 0), (0, 0), (0, Cpad - Cout))).astype(jnp.bfloat16)
    bk = jnp.pad(bias.astype(jnp.float32), (0, Cpad - Cout)).reshape(1, Cpad)

    # ---- tiling: th divides Ho; keep >= 2 grid steps for v7x's 2 TCs --------
    th = _pick_row_tile(Ho, Wo, target_rows)
    if N * (Ho // th) < 2:
        for d in range(th - 1, 0, -1):
            if Ho % d == 0:
                th = d
                break
    n_tiles = Ho // th
    grid = (N, n_tiles)

    # ---- VMEM budget: double-buffered blocks + f32 temporaries --------------
    est = 2 * (Hp * Wp * Cin * 2 + KH * KW * Cin * Cpad * 2 + Cpad * 4
               + th * Wo * Cpad * 4) + 4 * th * Wo * Cpad * 4
    # 32 MiB floor is the default scoped limit on v6e/v7x (v7x physical: 64 MiB).
    vmem_limit = int(max(est, 32 * 1024 * 1024))

    kernel = _make_conv_relu_kernel(KH, KW, th, Wo)
    out = pl.pallas_call(
        kernel,
        out_shape=jax.ShapeDtypeStruct((N, Ho, Wo, Cpad), jnp.float32),
        grid_spec=pltpu.PrefetchScalarGridSpec(
            num_scalar_prefetch=0,
            grid=grid,
            in_specs=[
                # whole padded image of batch n, resident across the row tiles
                pl.BlockSpec((1, Hp, Wp, Cin), lambda n, i: (n, 0, 0, 0)),
                pl.BlockSpec((KH * KW, Cin, Cpad), lambda n, i: (0, 0, 0)),
                pl.BlockSpec((1, Cpad), lambda n, i: (0, 0)),
            ],
            out_specs=pl.BlockSpec((1, th, Wo, Cpad),
                                   lambda n, i: (n, i, 0, 0)),
        ),
        compiler_params=pltpu.CompilerParams(
            dimension_semantics=("parallel", "parallel"),
            vmem_limit_bytes=vmem_limit),
    )(xn, wk, bk)

    # Slice off padded channels and return NCHW (single fused XLA copy).
    y = out[..., :Cout]
    return jnp.transpose(y, (0, 3, 1, 2)).astype(x.dtype)


def _reference(x, weight, bias, *, stride=1, padding=0):
    """Pure-JAX reference: conv + relu (NCHW)."""
    h = jax.lax.conv_general_dilated(
        x, weight,
        window_strides=(stride, stride),
        padding=((padding, padding), (padding, padding)),
        dimension_numbers=("NCHW", "OIHW", "NCHW"))
    h = h + bias.reshape(1, -1, 1, 1)
    return jnp.maximum(h, 0.0)


if __name__ == "__main__":
    # Conv2dReLU(n_inputs=4, n_outputs=8, kernel_size=3)
    n_inputs, n_outputs, ksize = 4, 8, 3
    N, H, W = 2, 16, 16

    key = jax.random.PRNGKey(0)
    kx, kwt, kb = jax.random.split(key, 3)

    x = jax.random.normal(kx, (N, n_inputs, H, W), dtype=jnp.float32)
    fan_in = n_inputs * ksize * ksize
    bound = 1.0 / (fan_in ** 0.5)
    weight = jax.random.uniform(kwt, (n_outputs, n_inputs, ksize, ksize),
                                minval=-bound, maxval=bound, dtype=jnp.float32)
    bias = jax.random.uniform(kb, (n_outputs,),
                              minval=-bound, maxval=bound, dtype=jnp.float32)

    y = conv2d_relu(x, weight, bias, stride=1, padding=0)
    y = jax.block_until_ready(y)

    # Reference with the same bf16 operand rounding the kernel applies
    # (f32 accumulation), so the comparison isolates kernel correctness.
    xq = x.astype(jnp.bfloat16).astype(jnp.float32)
    wq = weight.astype(jnp.bfloat16).astype(jnp.float32)
    y_ref = _reference(xq, wq, bias, stride=1, padding=0)

    assert y.shape == (N, n_outputs, H - ksize + 1, W - ksize + 1), y.shape
    err = float(jnp.max(jnp.abs(y - y_ref)))
    assert jnp.allclose(y, y_ref, atol=2e-3, rtol=2e-3), f"mismatch, max|d|={err}"

    print("KERNEL_OK")
</pallas_src>

<mosaic_0001>
module attributes {stable_mosaic.version = 11 : i64} {
  func.func @kernel(%arg0: i32, %arg1: i32, %arg2: memref<1x16x16x4xbf16, #tpu.memory_space<vmem>>, %arg3: memref<9x4x128xbf16, #tpu.memory_space<vmem>>, %arg4: memref<1x128xf32, #tpu.memory_space<vmem>>, %arg5: memref<1x14x14x128xf32, #tpu.memory_space<vmem>>) attributes {dimension_semantics = [#tpu.dimension_semantics<parallel>, #tpu.dimension_semantics<parallel>], iteration_bounds = array<i64: 2, 1>, scalar_prefetch = 0 : i64, scratch_operands = 0 : i64, tpu.core_type = #tpu.core_type<tc>, window_params = [{transform_indices = @transform_0, window_bounds = array<i64: 1, 16, 16, 4>}, {pipeline_mode = #tpu.pipeline_mode<synchronous>, transform_indices = @transform_1, window_bounds = array<i64: 9, 4, 128>}, {pipeline_mode = #tpu.pipeline_mode<synchronous>, transform_indices = @transform_2, window_bounds = array<i64: 1, 128>}, {transform_indices = @transform_3, window_bounds = array<i64: 1, 14, 14, 128>}]} {
    %c14_i32 = arith.constant 14 : i32
    %0 = arith.muli %arg1, %c14_i32 : i32
    %cst = arith.constant 0.000000e+00 : f32
    %1 = vector.broadcast %cst : f32 to vector<196x128xf32>
    %c0_i32 = arith.constant 0 : i32
    %2 = arith.addi %0, %c0_i32 : i32
    %c0 = arith.constant 0 : index
    %3 = arith.index_cast %2 : i32 to index
    %c0_0 = arith.constant 0 : index
    %c0_1 = arith.constant 0 : index
    %4 = vector.load %arg2[%c0, %3, %c0_0, %c0_1] : memref<1x16x16x4xbf16, #tpu.memory_space<vmem>>, vector<1x14x14x4xbf16>
    %5 = vector.shape_cast %4 : vector<1x14x14x4xbf16> to vector<14x14x4xbf16>
    %6 = vector.shape_cast %5 : vector<14x14x4xbf16> to vector<196x4xbf16>
    %c0_2 = arith.constant 0 : index
    %c0_3 = arith.constant 0 : index
    %c0_4 = arith.constant 0 : index
    %7 = vector.load %arg3[%c0_2, %c0_3, %c0_4] : memref<9x4x128xbf16, #tpu.memory_space<vmem>>, vector<1x4x128xbf16>
    %8 = vector.shape_cast %7 : vector<1x4x128xbf16> to vector<4x128xbf16>
    %cst_5 = arith.constant dense<0.000000e+00> : vector<196x128xf32>
    %9 = tpu.matmul %6, %8, %cst_5 {dimension_numbers = #tpu.dot_dimension_numbers<[1], [0], [0], [1], [0, 0, 1, 1], [], []>} : vector<196x4xbf16>, vector<4x128xbf16>, vector<196x128xf32> -> vector<196x128xf32>
    %10 = arith.addf %1, %9 : vector<196x128xf32>
    %c0_i32_6 = arith.constant 0 : i32
    %11 = arith.addi %0, %c0_i32_6 : i32
    %c0_7 = arith.constant 0 : index
    %12 = arith.index_cast %11 : i32 to index
    %c1 = arith.constant 1 : index
    %c0_8 = arith.constant 0 : index
    %13 = vector.load %arg2[%c0_7, %12, %c1, %c0_8] : memref<1x16x16x4xbf16, #tpu.memory_space<vmem>>, vector<1x14x14x4xbf16>
    %14 = vector.shape_cast %13 : vector<1x14x14x4xbf16> to vector<14x14x4xbf16>
    %15 = vector.shape_cast %14 : vector<14x14x4xbf16> to vector<196x4xbf16>
    %c1_9 = arith.constant 1 : index
    %c0_10 = arith.constant 0 : index
    %c0_11 = arith.constant 0 : index
    %16 = vector.load %arg3[%c1_9, %c0_10, %c0_11] : memref<9x4x128xbf16, #tpu.memory_space<vmem>>, vector<1x4x128xbf16>
    %17 = vector.shape_cast %16 : vector<1x4x128xbf16> to vector<4x128xbf16>
    %cst_12 = arith.constant dense<0.000000e+00> : vector<196x128xf32>
    %18 = tpu.matmul %15, %17, %cst_12 {dimension_numbers = #tpu.dot_dimension_numbers<[1], [0], [0], [1], [0, 0, 1, 1], [], []>} : vector<196x4xbf16>, vector<4x128xbf16>, vector<196x128xf32> -> vector<196x128xf32>
    %19 = arith.addf %10, %18 : vector<196x128xf32>
    %c0_i32_13 = arith.constant 0 : i32
    %20 = arith.addi %0, %c0_i32_13 : i32
    %c0_14 = arith.constant 0 : index
    %21 = arith.index_cast %20 : i32 to index
    %c2 = arith.constant 2 : index
    %c0_15 = arith.constant 0 : index
    %22 = vector.load %arg2[%c0_14, %21, %c2, %c0_15] : memref<1x16x16x4xbf16, #tpu.memory_space<vmem>>, vector<1x14x14x4xbf16>
    %23 = vector.shape_cast %22 : vector<1x14x14x4xbf16> to vector<14x14x4xbf16>
    %24 = vector.shape_cast %23 : vector<14x14x4xbf16> to vector<196x4xbf16>
    %c2_16 = arith.constant 2 : index
    %c0_17 = arith.constant 0 : index
    %c0_18 = arith.constant 0 : index
    %25 = vector.load %arg3[%c2_16, %c0_17, %c0_18] : memref<9x4x128xbf16, #tpu.memory_space<vmem>>, vector<1x4x128xbf16>
    %26 = vector.shape_cast %25 : vector<1x4x128xbf16> to vector<4x128xbf16>
    %cst_19 = arith.constant dense<0.000000e+00> : vector<196x128xf32>
    %27 = tpu.matmul %24, %26, %cst_19 {dimension_numbers = #tpu.dot_dimension_numbers<[1], [0], [0], [1], [0, 0, 1, 1], [], []>} : vector<196x4xbf16>, vector<4x128xbf16>, vector<196x128xf32> -> vector<196x128xf32>
    %28 = arith.addf %19, %27 : vector<196x128xf32>
    %c1_i32 = arith.constant 1 : i32
    %29 = arith.addi %0, %c1_i32 : i32
    %c0_20 = arith.constant 0 : index
    %30 = arith.index_cast %29 : i32 to index
    %c0_21 = arith.constant 0 : index
    %c0_22 = arith.constant 0 : index
    %31 = vector.load %arg2[%c0_20, %30, %c0_21, %c0_22] : memref<1x16x16x4xbf16, #tpu.memory_space<vmem>>, vector<1x14x14x4xbf16>
    %32 = vector.shape_cast %31 : vector<1x14x14x4xbf16> to vector<14x14x4xbf16>
    %33 = vector.shape_cast %32 : vector<14x14x4xbf16> to vector<196x4xbf16>
    %c3 = arith.constant 3 : index
    %c0_23 = arith.constant 0 : index
    %c0_24 = arith.constant 0 : index
    %34 = vector.load %arg3[%c3, %c0_23, %c0_24] : memref<9x4x128xbf16, #tpu.memory_space<vmem>>, vector<1x4x128xbf16>
    %35 = vector.shape_cast %34 : vector<1x4x128xbf16> to vector<4x128xbf16>
    %cst_25 = arith.constant dense<0.000000e+00> : vector<196x128xf32>
    %36 = tpu.matmul %33, %35, %cst_25 {dimension_numbers = #tpu.dot_dimension_numbers<[1], [0], [0], [1], [0, 0, 1, 1], [], []>} : vector<196x4xbf16>, vector<4x128xbf16>, vector<196x128xf32> -> vector<196x128xf32>
    %37 = arith.addf %28, %36 : vector<196x128xf32>
    %c1_i32_26 = arith.constant 1 : i32
    %38 = arith.addi %0, %c1_i32_26 : i32
    %c0_27 = arith.constant 0 : index
    %39 = arith.index_cast %38 : i32 to index
    %c1_28 = arith.constant 1 : index
    %c0_29 = arith.constant 0 : index
    %40 = vector.load %arg2[%c0_27, %39, %c1_28, %c0_29] : memref<1x16x16x4xbf16, #tpu.memory_space<vmem>>, vector<1x14x14x4xbf16>
    %41 = vector.shape_cast %40 : vector<1x14x14x4xbf16> to vector<14x14x4xbf16>
    %42 = vector.shape_cast %41 : vector<14x14x4xbf16> to vector<196x4xbf16>
    %c4 = arith.constant 4 : index
    %c0_30 = arith.constant 0 : index
    %c0_31 = arith.constant 0 : index
    %43 = vector.load %arg3[%c4, %c0_30, %c0_31] : memref<9x4x128xbf16, #tpu.memory_space<vmem>>, vector<1x4x128xbf16>
    %44 = vector.shape_cast %43 : vector<1x4x128xbf16> to vector<4x128xbf16>
    %cst_32 = arith.constant dense<0.000000e+00> : vector<196x128xf32>
    %45 = tpu.matmul %42, %44, %cst_32 {dimension_numbers = #tpu.dot_dimension_numbers<[1], [0], [0], [1], [0, 0, 1, 1], [], []>} : vector<196x4xbf16>, vector<4x128xbf16>, vector<196x128xf32> -> vector<196x128xf32>
    %46 = arith.addf %37, %45 : vector<196x128xf32>
    %c1_i32_33 = arith.constant 1 : i32
    %47 = arith.addi %0, %c1_i32_33 : i32
    %c0_34 = arith.constant 0 : index
    %48 = arith.index_cast %47 : i32 to index
    %c2_35 = arith.constant 2 : index
    %c0_36 = arith.constant 0 : index
    %49 = vector.load %arg2[%c0_34, %48, %c2_35, %c0_36] : memref<1x16x16x4xbf16, #tpu.memory_space<vmem>>, vector<1x14x14x4xbf16>
    %50 = vector.shape_cast %49 : vector<1x14x14x4xbf16> to vector<14x14x4xbf16>
    %51 = vector.shape_cast %50 : vector<14x14x4xbf16> to vector<196x4xbf16>
    %c5 = arith.constant 5 : index
    %c0_37 = arith.constant 0 : index
    %c0_38 = arith.constant 0 : index
    %52 = vector.load %arg3[%c5, %c0_37, %c0_38] : memref<9x4x128xbf16, #tpu.memory_space<vmem>>, vector<1x4x128xbf16>
    %53 = vector.shape_cast %52 : vector<1x4x128xbf16> to vector<4x128xbf16>
    %cst_39 = arith.constant dense<0.000000e+00> : vector<196x128xf32>
    %54 = tpu.matmul %51, %53, %cst_39 {dimension_numbers = #tpu.dot_dimension_numbers<[1], [0], [0], [1], [0, 0, 1, 1], [], []>} : vector<196x4xbf16>, vector<4x128xbf16>, vector<196x128xf32> -> vector<196x128xf32>
    %55 = arith.addf %46, %54 : vector<196x128xf32>
    %c2_i32 = arith.constant 2 : i32
    %56 = arith.addi %0, %c2_i32 : i32
    %c0_40 = arith.constant 0 : index
    %57 = arith.index_cast %56 : i32 to index
    %c0_41 = arith.constant 0 : index
    %c0_42 = arith.constant 0 : index
    %58 = vector.load %arg2[%c0_40, %57, %c0_41, %c0_42] : memref<1x16x16x4xbf16, #tpu.memory_space<vmem>>, vector<1x14x14x4xbf16>
    %59 = vector.shape_cast %58 : vector<1x14x14x4xbf16> to vector<14x14x4xbf16>
    %60 = vector.shape_cast %59 : vector<14x14x4xbf16> to vector<196x4xbf16>
    %c6 = arith.constant 6 : index
    %c0_43 = arith.constant 0 : index
    %c0_44 = arith.constant 0 : index
    %61 = vector.load %arg3[%c6, %c0_43, %c0_44] : memref<9x4x128xbf16, #tpu.memory_space<vmem>>, vector<1x4x128xbf16>
    %62 = vector.shape_cast %61 : vector<1x4x128xbf16> to vector<4x128xbf16>
    %cst_45 = arith.constant dense<0.000000e+00> : vector<196x128xf32>
    %63 = tpu.matmul %60, %62, %cst_45 {dimension_numbers = #tpu.dot_dimension_numbers<[1], [0], [0], [1], [0, 0, 1, 1], [], []>} : vector<196x4xbf16>, vector<4x128xbf16>, vector<196x128xf32> -> vector<196x128xf32>
    %64 = arith.addf %55, %63 : vector<196x128xf32>
    %c2_i32_46 = arith.constant 2 : i32
    %65 = arith.addi %0, %c2_i32_46 : i32
    %c0_47 = arith.constant 0 : index
    %66 = arith.index_cast %65 : i32 to index
    %c1_48 = arith.constant 1 : index
    %c0_49 = arith.constant 0 : index
    %67 = vector.load %arg2[%c0_47, %66, %c1_48, %c0_49] : memref<1x16x16x4xbf16, #tpu.memory_space<vmem>>, vector<1x14x14x4xbf16>
    %68 = vector.shape_cast %67 : vector<1x14x14x4xbf16> to vector<14x14x4xbf16>
    %69 = vector.shape_cast %68 : vector<14x14x4xbf16> to vector<196x4xbf16>
    %c7 = arith.constant 7 : index
    %c0_50 = arith.constant 0 : index
    %c0_51 = arith.constant 0 : index
    %70 = vector.load %arg3[%c7, %c0_50, %c0_51] : memref<9x4x128xbf16, #tpu.memory_space<vmem>>, vector<1x4x128xbf16>
    %71 = vector.shape_cast %70 : vector<1x4x128xbf16> to vector<4x128xbf16>
    %cst_52 = arith.constant dense<0.000000e+00> : vector<196x128xf32>
    %72 = tpu.matmul %69, %71, %cst_52 {dimension_numbers = #tpu.dot_dimension_numbers<[1], [0], [0], [1], [0, 0, 1, 1], [], []>} : vector<196x4xbf16>, vector<4x128xbf16>, vector<196x128xf32> -> vector<196x128xf32>
    %73 = arith.addf %64, %72 : vector<196x128xf32>
    %c2_i32_53 = arith.constant 2 : i32
    %74 = arith.addi %0, %c2_i32_53 : i32
    %c0_54 = arith.constant 0 : index
    %75 = arith.index_cast %74 : i32 to index
    %c2_55 = arith.constant 2 : index
    %c0_56 = arith.constant 0 : index
    %76 = vector.load %arg2[%c0_54, %75, %c2_55, %c0_56] : memref<1x16x16x4xbf16, #tpu.memory_space<vmem>>, vector<1x14x14x4xbf16>
    %77 = vector.shape_cast %76 : vector<1x14x14x4xbf16> to vector<14x14x4xbf16>
    %78 = vector.shape_cast %77 : vector<14x14x4xbf16> to vector<196x4xbf16>
    %c8 = arith.constant 8 : index
    %c0_57 = arith.constant 0 : index
    %c0_58 = arith.constant 0 : index
    %79 = vector.load %arg3[%c8, %c0_57, %c0_58] : memref<9x4x128xbf16, #tpu.memory_space<vmem>>, vector<1x4x128xbf16>
    %80 = vector.shape_cast %79 : vector<1x4x128xbf16> to vector<4x128xbf16>
    %cst_59 = arith.constant dense<0.000000e+00> : vector<196x128xf32>
    %81 = tpu.matmul %78, %80, %cst_59 {dimension_numbers = #tpu.dot_dimension_numbers<[1], [0], [0], [1], [0, 0, 1, 1], [], []>} : vector<196x4xbf16>, vector<4x128xbf16>, vector<196x128xf32> -> vector<196x128xf32>
    %82 = arith.addf %73, %81 : vector<196x128xf32>
    %c0_60 = arith.constant 0 : index
    %c0_61 = arith.constant 0 : index
    %83 = vector.load %arg4[%c0_60, %c0_61] : memref<1x128xf32, #tpu.memory_space<vmem>>, vector<1x128xf32>
    %84 = vector.broadcast %83 : vector<1x128xf32> to vector<196x128xf32>
    %85 = arith.addf %82, %84 : vector<196x128xf32>
    %cst_62 = arith.constant 0.000000e+00 : f32
    %86 = vector.broadcast %cst_62 : f32 to vector<196x128xf32>
    %87 = arith.maximumf %85, %86 : vector<196x128xf32>
    %88 = vector.shape_cast %87 : vector<196x128xf32> to vector<1x14x14x128xf32>
    %c0_63 = arith.constant 0 : index
    %c0_64 = arith.constant 0 : index
    %c0_65 = arith.constant 0 : index
    %c0_66 = arith.constant 0 : index
    %89 = vector.load %arg5[%c0_63, %c0_64, %c0_65, %c0_66] : memref<1x14x14x128xf32, #tpu.memory_space<vmem>>, vector<1x14x14x128xf32>
    tpu.vector_store %arg5[%c0_63, %c0_64, %c0_65, %c0_66], %88 {strides = array<i32>} : memref<1x14x14x128xf32, #tpu.memory_space<vmem>>, vector<1x14x14x128xf32>,
    return
  }
  func.func @transform_0(%arg0: i32, %arg1: i32) -> (i32, i32, i32, i32) {
    %c0_i32 = arith.constant 0 : i32
    %c0_i32_0 = arith.constant 0 : i32
    %c0_i32_1 = arith.constant 0 : i32
    %c0_i32_2 = arith.constant 0 : i32
    return %arg0, %c0_i32, %c0_i32_0, %c0_i32_1 : i32, i32, i32, i32
  }
  func.func @transform_1(%arg0: i32, %arg1: i32) -> (i32, i32, i32) {
    %c0_i32 = arith.constant 0 : i32
    %c0_i32_0 = arith.constant 0 : i32
    %c0_i32_1 = arith.constant 0 : i32
    %c0_i32_2 = arith.constant 0 : i32
    return %c0_i32, %c0_i32_0, %c0_i32_1 : i32, i32, i32
  }
  func.func @transform_2(%arg0: i32, %arg1: i32) -> (i32, i32) {
    %c0_i32 = arith.constant 0 : i32
    %c0_i32_0 = arith.constant 0 : i32
    %c0_i32_1 = arith.constant 0 : i32
    return %c0_i32, %c0_i32_0 : i32, i32
  }
  func.func @transform_3(%arg0: i32, %arg1: i32) -> (i32, i32, i32, i32) {
    %c0_i32 = arith.constant 0 : i32
    %c0_i32_0 = arith.constant 0 : i32
    %c0_i32_1 = arith.constant 0 : i32
    return %arg0, %arg1, %c0_i32, %c0_i32_0 : i32, i32, i32, i32
  }
}

</mosaic_0001>

<bundles_post_ra>
// kernel: tpu_custom_call.1
= control target key start
LH: loop header
LB: loop body
LE: loop exit
PB: predicated region body
PF: predicated region fallthrough
CT: control target
= control target key end

     0   :  { %s18691_s12 = smov 0   ;;  %s18693_s13 = smov 0   ;;  %s23247_s0 = inlined_call_operand.vmem [shape: bf16[2,16,16,4], index: 0, kind: input, shape index: {}]   ;;  %s23248_s1 = inlined_call_operand.vmem [shape: bf16[9,4,128], index: 1, kind: input, shape index: {}]   ;;  %s23249_s2 = inlined_call_operand.vmem [shape: f32[1,128], index: 2, kind: input, shape index: {}]   ;;  %s23250_s3 = inlined_call_operand.vmem [shape: f32[2,14,14,128], index: 3, kind: output, shape index: {}]  }
   0x1   :  { %s18695_s14 = smov 0  }
   0x2 LB: > { %s25_s15 = sadd.s32 1, %s18661_s13  ;;  %p17104_p0 = scmp.ge.s32.totalorder %s18665_s14, 1  ;;  %s18665_s14 = sphi %s18695_s14, %s13_s14   ;;  %s18661_s13 = sphi %s18693_s13, %s23493_s13   ;;  %s18657_s12 = sphi %s18691_s12, %s23492_s12  }
   0x3   : > { %p27_p1 = scmp.ge.s32.totalorder %s25_s15, 2  ;;  %p151_p2 = scmp.lt.s32.totalorder %s18665_s14, 3 }
   0x5   : > { %s23495_s15 = smov (%p27_p1, %s25_s15), 0  ;;  %p152_p3 = pnand %p17104_p0, %p151_p2 }
   0x7   : > { %155 = sbr.rel (%p152_p3) target bundleno = 1099 (0x44b), region = 32 }
   0xe   : > { %v17248_v0 = vld [vmem:[%s23248_s1 + $0x2] sm:$0x3]  ;;  %vm2738_vm0 = vcmask 1041408   ;;  %p180_p4 = scmp.lt.s32.totalorder %s18657_s12, 1  ;;  %v268_v1 = vlaneseq  ;;  %v23251_v2 = vmov 0.0   ;;  %vm18669_vm4 = vmmov 0  }
   0xf   : > { %18126 = vmatprep.subr.bf16.mxu0 %v23251_v2  ;;  %18612 = vmatprep.subr.bf16.mxu1 %v23251_v2  ;;  %v2740_v3 = vsel %vm2738_vm0, %v17248_v0, 0  ;;  %vm1280_vm1 = vsmask.f32 256  ;;  %v18668_v4 = vmov 1966171168   ;;  %v23274_v25 = vmov 0 }
  0x10   : > { %18127 = vmatpush3.bf16.msra.mxu0 %v2740_v3  ;;  %18613 = vmatpush3.bf16.msra.mxu1 %v2740_v3  ;;  %s23497_s12 = smov (!%p180_p4, %s18657_s12), 1  ;;  %v266_v5 = vunpack.c.l.s4 %v18668_v4  ;;  %v18717_v6 = vshrl.u32 %v268_v1, 7  ;;  %vm1281_vm2 = vsmask.f32 1284  ;;  %vm1283_vm3 = vsmask.f32 2312 }
  0x11   : > { %18128 = vmatprep.mubr.msk.bf16.mxu0 %vm18669_vm4, %v23251_v2  ;;  %18156 = vmatprep.mubr.msk.bf16.mxu1 %vm18669_vm4, %v23251_v2  ;;  %vm1282_vm5 = vmor %vm1280_vm1, %vm1281_vm2  ;;  %vm1285_vm6 = vsmask.f32 3340  ;;  %vm1287_vm7 = vsmask.f32 4368  ;;  %s17999_s18 = sshll.u32 %s23497_s12, 7  ;;  %vm2698_vm2 = vcmask 31744  }
  0x12   : > { %23273 = vst [vmem:[#allocation2_spill] sm:$0xff] %v18717_v6  ;;  %18234 = vmatprep.subr.bf16.mxu0 %v23251_v2  ;;  %v267_v7 = vunpack.c.0.s8 %v266_v5  ;;  %vm1284_vm8 = vmor %vm1282_vm5, %vm1283_vm3  ;;  %vm1289_vm9 = vsmask.f32 5396  ;;  %18180 = vmatprep.subr.bf16.mxu1 %v23251_v2  ;;  %s18729_s21 = scalar_lea.vmem %s23247_s0, %s17999_s18  ;;  %vm1291_vm11 = vsmask.f32 6424  ;;  %s18614_s17 = smul.u32 224, %s23497_s12 }
  0x13   : > { %vm1286_vm10 = vmor %vm1284_vm8, %vm1285_vm6  ;;  %v17310_v8 = vld [vmem:[%s23248_s1 + $0x4] sm:$0x3]  ;;  %v17108_v9 = vld.sshfl [vmem:[%s18729_s21] sm:$0x33 pattern:$0x75316420] }
  0x14   : > { %v18736_v10 = vsub.s32 %v267_v7, %v18717_v6  ;;  %vm1288_vm12 = vmor %vm1286_vm10, %vm1287_vm7  ;;  %v915_v11 = vld [vmem:[%s23248_s1] sm:$0x3]  ;;  %v17110_v12 = vld.sshfl [vmem:[%s18729_s21 + $0x8] sm:$0x33 pattern:$0x75316420]  ;;  %v264_v13 = vcombine.high %v17108_v9, %v17108_v9  ;;  %s23068_s20 = scalar_lea.vmem %s23250_s3, %s18614_s17 }
  0x15   : > { %vm1290_vm13 = vmor %vm1288_vm12, %vm1289_vm9  ;;  %vm1293_vm14 = vsmask.f32 7452  ;;  %v311_v15 = vcombine.high %v17110_v12, %v17110_v12  ;;  %v17136_v17 = vld.sshfl [vmem:[%s18729_s21 + $0x4] sm:$0x33 pattern:$0x75316420] }
  0x16   : > { %v18743_v14 = vrot.slane %v17108_v9, %v18736_v10  ;;  %v18746_v16 = vrot.slane %v17110_v12, %v18736_v10  ;;  %vm1292_vm15 = vmor %vm1290_vm13, %vm1291_vm11  ;;  %v18750_v18 = vsel %vm2738_vm0, %v17310_v8, 0  ;;  %v18753_v19 = vrot.slane %v264_v13, %v18736_v10  ;;  %v17124_v40 = vld.sshfl [vmem:[%s18729_s21 + $0x40] sm:$0x33 pattern:$0x75316420] }
  0x17   : > { %v951_v20 = vcombine.high %v17136_v17, %v17136_v17  ;;  %v958_v21 = vrot.slane %v17136_v17, %v18736_v10  ;;  %v18757_v22 = vsel %vm2738_vm0, %v915_v11, 0  ;;  %v18762_v24 = vrot.slane %v311_v15, %v18736_v10  ;;  %vm18764_vm1 = vmor %vm1292_vm15, %vm1293_vm14  ;;  %v17126_v53 = vld.sshfl [vmem:[%s18729_s21 + $0x48] sm:$0x33 pattern:$0x75316420] }
  0x18   : > { %v279_v23 = vcombine.high %v18743_v14, %v18743_v14  ;;  %v23275_v25 = vsel %vm18764_vm1, 4294967295, %v23274_v25  ;;  %v1296_v26 = vshrl.u32 %v18743_v14, 16  ;;  %v1353_v27 = vshrl.u32 %v18746_v16, 16 }
  0x19   : > { %23276 = vst [vmem:[#allocation3_spill] sm:$0xff] %v23275_v25  ;;  %v280_v28 = vcombine.high %v18753_v19, %v18753_v19  ;;  %v965_v29 = vrot.slane %v951_v20, %v18736_v10  ;;  %v966_v30 = vcombine.high %v958_v21, %v958_v21  ;;  %v1301_v31 = vshll.u32 %v18753_v19, 16  ;;  %v17144_v58 = vld.sshfl [vmem:[%s18729_s21 + $0x44] sm:$0x33 pattern:$0x75316420] }
  0x1a   : > { %v1304_v32 = vshrl.u32 %v18753_v19, 16  ;;  %v1309_v33 = vshll.u32 %v279_v23, 16  ;;  %v1312_v34 = vshrl.u32 %v279_v23, 16  ;;  %v1325_v35 = vshll.u32 %v958_v21, 16 }
  0x1b   : > { %v967_v36 = vcombine.high %v965_v29, %v965_v29  ;;  %v1303_v37 = vsel %vm18764_vm1, %v1296_v26, %v1301_v31  ;;  %v1317_v38 = vshll.u32 %v280_v28, 16  ;;  %v1320_v39 = vshrl.u32 %v280_v28, 16 }
  0x1c   : > { %v1311_v41 = vsel %vm18764_vm1, %v1304_v32, %v1309_v33  ;;  %v1328_v42 = vshrl.u32 %v958_v21, 16  ;;  %v1333_v43 = vshll.u32 %v965_v29, 16  ;;  %v1336_v44 = vshrl.u32 %v965_v29, 16 }
  0x1d   : > { %v1319_v45 = vsel %vm18764_vm1, %v1312_v34, %v1317_v38  ;;  %v1327_v46 = vsel %vm18764_vm1, %v1320_v39, %v1325_v35  ;;  %v1341_v47 = vshll.u32 %v966_v30, 16  ;;  %v1344_v48 = vshrl.u32 %v966_v30, 16 }
  0x1e   : > { %v1335_v49 = vsel %vm18764_vm1, %v1328_v42, %v1333_v43  ;;  %v1349_v50 = vshll.u32 %v967_v36, 16  ;;  %v1358_v51 = vshll.u32 %v18762_v24, 16  ;;  %v2095_v52 = vcombine.low %v1303_v37, %v1311_v41 }
  0x1f   : > { %v1343_v54 = vsel %vm18764_vm1, %v1336_v44, %v1341_v47  ;;  %v2096_v55 = vcombine.low %v1319_v45, %v1327_v46  ;;  %v640_v56 = vcombine.high %v17124_v40, %v17124_v40  ;;  %v18791_v57 = vrot.slane %v17124_v40, %v18736_v10 }
  0x20   : > { %v1351_v59 = vsel %vm18764_vm1, %v1344_v48, %v1349_v50  ;;  %v1360_v60 = vsel %vm18764_vm1, %v1353_v27, %v1358_v51  ;;  %v2097_v61 = vcombine.low %v1335_v49, %v1343_v54  ;;  %v2105_v62 = vrot.slane %v2095_v52, %v18736_v10 }
  0x21   : > { %v2098_v63 = vcombine.low %v1351_v59, %v1360_v60  ;;  %v2112_v0 = vrot.slane %v2096_v55, %v18736_v10  ;;  %v18801_v1 = vrot.slane %v640_v56, %v18736_v10  ;;  %v655_v3 = vcombine.high %v18791_v57, %v18791_v57 }
  0x22   : > { %v2119_v4 = vrot.slane %v2097_v61, %v18736_v10  ;;  %v687_v5 = vcombine.high %v17126_v53, %v17126_v53  ;;  %v18807_v7 = vrot.slane %v17126_v53, %v18736_v10  ;;  %v1143_v8 = vcombine.high %v17144_v58, %v17144_v58  ;;  %v17112_v53 = vld.sshfl [vmem:[%s18729_s21 + $0x10] sm:$0x33 pattern:$0x75316420] }
  0x23   : > { %v2126_v9 = vrot.slane %v2098_v63, %v18736_v10  ;;  %v2127_v11 = vcombine.low %v2105_v62, %v2112_v0  ;;  %v656_v12 = vcombine.high %v18801_v1, %v18801_v1  ;;  %v1150_v13 = vrot.slane %v17144_v58, %v18736_v10  ;;  %v17137_v58 = vld.sshfl [vmem:[%s18729_s21 + $0xc] sm:$0x33 pattern:$0x75316420] }
  0x24   : > { %v18814_v15 = vrot.slane %v687_v5, %v18736_v10  ;;  %v1157_v17 = vrot.slane %v1143_v8, %v18736_v10  ;;  %v1752_v20 = vshrl.u32 %v18791_v57, 16  ;;  %v1757_v21 = vshll.u32 %v18801_v1, 16 }
  0x25   : > { %v2128_v23 = vcombine.low %v2119_v4, %v2126_v9  ;;  %v2135_v26 = vrot.slane %v2127_v11, %v18736_v10  ;;  %v1158_v27 = vcombine.high %v1150_v13, %v1150_v13  ;;  %v1760_v28 = vshrl.u32 %v18801_v1, 16 }
  0x26   : > { %v1159_v29 = vcombine.high %v1157_v17, %v1157_v17  ;;  %v1759_v30 = vsel %vm18764_vm1, %v1752_v20, %v1757_v21  ;;  %v1765_v31 = vshll.u32 %v655_v3, 16  ;;  %v1768_v32 = vshrl.u32 %v655_v3, 16 }
  0x27   : > { %v2142_v33 = vrot.slane %v2128_v23, %v18736_v10  ;;  %v1773_v34 = vshll.u32 %v656_v12, 16  ;;  %v1776_v35 = vshrl.u32 %v656_v12, 16  ;;  %v1781_v36 = vshll.u32 %v1150_v13, 16 }
  0x28   : > { %v1767_v37 = vsel %vm18764_vm1, %v1760_v28, %v1765_v31  ;;  %v1784_v38 = vshrl.u32 %v1150_v13, 16  ;;  %v1789_v39 = vshll.u32 %v1157_v17, 16  ;;  %v1792_v40 = vshrl.u32 %v1157_v17, 16 }
  0x29   : > { %v2143_v41 = vcombine.low %v2135_v26, %v2142_v33  ;;  %v1775_v42 = vsel %vm18764_vm1, %v1768_v32, %v1773_v34  ;;  %v1783_v43 = vsel %vm18764_vm1, %v1776_v35, %v1781_v36  ;;  %v1797_v44 = vshll.u32 %v1158_v27, 16 }
  0x2a   : > { %v1791_v45 = vsel %vm18764_vm1, %v1784_v38, %v1789_v39  ;;  %v1800_v46 = vshrl.u32 %v1158_v27, 16  ;;  %v1805_v47 = vshll.u32 %v1159_v29, 16  ;;  %v1809_v48 = vshrl.u32 %v18807_v7, 16 }
  0x2b   : > { %18129 = vmatmul.mubr.msk.bf16.vlgmr.msra.gmra.mrb[0].mxu0 %vm2698_vm2, %v2143_v41  ;;  %v1799_v49 = vsel %vm18764_vm1, %v1792_v40, %v1797_v44  ;;  %v1814_v50 = vshll.u32 %v18814_v15, 16  ;;  %v2438_v51 = vcombine.low %v1759_v30, %v1767_v37  ;;  %v2439_v52 = vcombine.low %v1775_v42, %v1783_v43 }
  0x2c   : > { %v1807_v54 = vsel %vm18764_vm1, %v1800_v46, %v1805_v47  ;;  %v2440_v55 = vcombine.low %v1791_v45, %v1799_v49  ;;  %18235 = vmatpush3.bf16.msra.mxu0 %v18750_v18  ;;  %18132 = vmatprep.mubr.msk.bf16.mxu0 %vm18669_vm4, %v23251_v2  ;;  %v18845_v56 = vcombine.high %v18746_v16, %v18746_v16  ;;  %v1361_v59 = vshrl.u32 %v18762_v24, 16 }
  0x2d   : > { %v1816_v60 = vsel %vm18764_vm1, %v1809_v48, %v1814_v50  ;;  %v2448_v61 = vrot.slane %v2438_v51, %v18736_v10  ;;  %v2455_v62 = vrot.slane %v2439_v52, %v18736_v10  ;;  %v18855_v18 = vcombine.high %v18762_v24, %v18762_v24  ;;  %18342 = vmatprep.subr.bf16.mxu0 %v23251_v2  ;;  %v17128_v52 = vld.sshfl [vmem:[%s18729_s21 + $0x50] sm:$0x33 pattern:$0x75316420] }
  0x2e   : > { %v2441_v63 = vcombine.low %v1807_v54, %v1816_v60  ;;  %v2462_v0 = vrot.slane %v2440_v55, %v18736_v10  ;;  %v358_v3 = vcombine.high %v17112_v53, %v17112_v53  ;;  %v18860_v4 = vrot.slane %v17112_v53, %v18736_v10 }
  0x2f   : > { %v2470_v5 = vcombine.low %v2448_v61, %v2455_v62  ;;  %v975_v8 = vcombine.high %v17137_v58, %v17137_v58  ;;  %v982_v9 = vrot.slane %v17137_v58, %v18736_v10  ;;  %v1366_v11 = vshll.u32 %v18845_v56, 16 }
  0x30   : > { %v2469_v12 = vrot.slane %v2441_v63, %v18736_v10  ;;  %v18866_v13 = vrot.slane %v358_v3, %v18736_v10  ;;  %v18870_v17 = vcombine.high %v18860_v4, %v18860_v4  ;;  %v1369_v20 = vshrl.u32 %v18845_v56, 16 }
  0x31   : > { %v2478_v21 = vrot.slane %v2470_v5, %v18736_v10  ;;  %v989_v23 = vrot.slane %v975_v8, %v18736_v10  ;;  %v990_v26 = vcombine.high %v982_v9, %v982_v9  ;;  %v1368_v27 = vsel %vm18764_vm1, %v1361_v59, %v1366_v11  ;;  %v17145_v59 = vld.sshfl [vmem:[%s18729_s21 + $0x4c] sm:$0x33 pattern:$0x75316420] }
  0x32   : > { %v2471_v28 = vcombine.low %v2462_v0, %v2469_v12  ;;  %v1374_v29 = vshll.u32 %v18855_v18, 16  ;;  %v1377_v30 = vshrl.u32 %v18855_v18, 16  ;;  %v1382_v31 = vshll.u32 %v982_v9, 16 }
  0x33   : > { %v991_v32 = vcombine.high %v989_v23, %v989_v23  ;;  %v1385_v33 = vshrl.u32 %v982_v9, 16  ;;  %v1390_v34 = vshll.u32 %v989_v23, 16  ;;  %v1393_v35 = vshrl.u32 %v989_v23, 16 }
  0x34   : > { %v2485_v36 = vrot.slane %v2471_v28, %v18736_v10  ;;  %v1376_v37 = vsel %vm18764_vm1, %v1369_v20, %v1374_v29  ;;  %v1384_v38 = vsel %vm18764_vm1, %v1377_v30, %v1382_v31  ;;  %v1398_v39 = vshll.u32 %v990_v26, 16 }
  0x35   : > { %v1392_v40 = vsel %vm18764_vm1, %v1385_v33, %v1390_v34  ;;  %v1401_v41 = vshrl.u32 %v990_v26, 16  ;;  %v1406_v42 = vshll.u32 %v991_v32, 16  ;;  %v1410_v43 = vshrl.u32 %v18860_v4, 16 }
  0x36   : > { %v2486_v44 = vcombine.low %v2478_v21, %v2485_v36  ;;  %v1400_v45 = vsel %vm18764_vm1, %v1393_v35, %v1398_v39  ;;  %v1415_v46 = vshll.u32 %v18866_v13, 16  ;;  %v1418_v47 = vshrl.u32 %v18866_v13, 16 }
  0x37   : > { %v1408_v48 = vsel %vm18764_vm1, %v1401_v41, %v1406_v42  ;;  %v1423_v49 = vshll.u32 %v18870_v17, 16  ;;  %v2144_v50 = vcombine.low %v1368_v27, %v1376_v37  ;;  %v2145_v51 = vcombine.low %v1384_v38, %v1392_v40 }
  0x38   : > { %18157 = vmatmul.mubr.msk.bf16.vlgmr.msra.gmra.mrb[0].mxu1 %vm2698_vm2, %v2486_v44  ;;  %v1417_v53 = vsel %vm18764_vm1, %v1410_v43, %v1415_v46  ;;  %v2146_v54 = vcombine.low %v1400_v45, %v1408_v48  ;;  %v18900_v55 = vcombine.high %v18807_v7, %v18807_v7  ;;  %v18904_v58 = vcombine.high %v18814_v15, %v18814_v15  ;;  %v17114_v43 = vld.sshfl [vmem:[%s18729_s21 + $0x18] sm:$0x33 pattern:$0x75316420] }
  0x39   : > { %18181 = vmatpush3.bf16.msra.mxu1 %v18757_v22  ;;  %18160 = vmatprep.mubr.msk.bf16.mxu1 %vm18669_vm4, %v23251_v2  ;;  %v1425_v60 = vsel %vm18764_vm1, %v1418_v47, %v1423_v49  ;;  %v2154_v61 = vrot.slane %v2144_v50, %v18736_v10  ;;  %v2161_v62 = vrot.slane %v2145_v51, %v18736_v10  ;;  %v1817_v63 = vshrl.u32 %v18814_v15, 16 }
  0x3a   : > { %23277 = vst [vmem:[#allocation4_spill] sm:$0xff] %v18904_v58  ;;  %v2147_v0 = vcombine.low %v1417_v53, %v1425_v60  ;;  %v2168_v3 = vrot.slane %v2146_v54, %v18736_v10  ;;  %v734_v5 = vcombine.high %v17128_v52, %v17128_v52  ;;  %v18917_v8 = vrot.slane %v17128_v52, %v18736_v10  ;;  %v17138_v60 = vld.sshfl [vmem:[%s18729_s21 + $0x14] sm:$0x33 pattern:$0x75316420] }
  0x3b   : > { %18288 = vmatprep.subr.bf16.mxu1 %v23251_v2  ;;  %v2176_v22 = vcombine.low %v2154_v61, %v2161_v62  ;;  %v1167_v9 = vcombine.high %v17145_v59, %v17145_v59  ;;  %v1174_v11 = vrot.slane %v17145_v59, %v18736_v10  ;;  %v1822_v12 = vshll.u32 %v18900_v55, 16 }
  0x3c   : > { %23278 = vst [vmem:[#allocation5_spill] sm:$0xff] %v18917_v8  ;;  %v2175_v20 = vrot.slane %v2147_v0, %v18736_v10  ;;  %v18924_v21 = vrot.slane %v734_v5, %v18736_v10  ;;  %v18928_v23 = vcombine.high %v18917_v8, %v18917_v8  ;;  %v1825_v26 = vshrl.u32 %v18900_v55, 16 }
  0x3d   : > { %v2184_v27 = vrot.slane %v2176_v22, %v18736_v10  ;;  %v1181_v28 = vrot.slane %v1167_v9, %v18736_v10  ;;  %v1182_v29 = vcombine.high %v1174_v11, %v1174_v11  ;;  %v1824_v30 = vsel %vm18764_vm1, %v1817_v63, %v1822_v12 }
  0x3e   : > { %23279 = vst [vmem:[#allocation6_spill] sm:$0xff] %v18924_v21  ;;  %v2177_v31 = vcombine.low %v2168_v3, %v2175_v20  ;;  %v1830_v32 = vshll.u32 %v18904_v58, 16  ;;  %v1833_v33 = vshrl.u32 %v18904_v58, 16  ;;  %v1838_v34 = vshll.u32 %v1174_v11, 16 }
  0x3f   : > { %v1183_v35 = vcombine.high %v1181_v28, %v1181_v28  ;;  %v1841_v36 = vshrl.u32 %v1174_v11, 16  ;;  %v1846_v37 = vshll.u32 %v1181_v28, 16  ;;  %v1849_v38 = vshrl.u32 %v1181_v28, 16 }
  0x40   : > { %v2191_v39 = vrot.slane %v2177_v31, %v18736_v10  ;;  %v1832_v40 = vsel %vm18764_vm1, %v1825_v26, %v1830_v32  ;;  %v1840_v41 = vsel %vm18764_vm1, %v1833_v33, %v1838_v34  ;;  %v1854_v42 = vshll.u32 %v1182_v29, 16 }
  0x41   : > { %v1848_v44 = vsel %vm18764_vm1, %v1841_v36, %v1846_v37  ;;  %v1857_v45 = vshrl.u32 %v1182_v29, 16  ;;  %v1862_v46 = vshll.u32 %v1183_v35, 16  ;;  %v1866_v47 = vshrl.u32 %v18917_v8, 16 }
  0x42   : > { %v2192_v48 = vcombine.low %v2184_v27, %v2191_v39  ;;  %v1856_v49 = vsel %vm18764_vm1, %v1849_v38, %v1854_v42  ;;  %v1871_v50 = vshll.u32 %v18924_v21, 16  ;;  %v1874_v51 = vshrl.u32 %v18924_v21, 16 }
  0x43   : > { %v1864_v52 = vsel %vm18764_vm1, %v1857_v45, %v1862_v46  ;;  %v1879_v53 = vshll.u32 %v18928_v23, 16  ;;  %v2487_v54 = vcombine.low %v1824_v30, %v1832_v40  ;;  %v2488_v59 = vcombine.low %v1840_v41, %v1848_v44 }
  0x44   : > { %18133 = vmatmul.mubr.msk.bf16.gmra.mrb[4].mxu0 %vm2698_vm2, %v2192_v48  ;;  %v1873_v61 = vsel %vm18764_vm1, %v1866_v47, %v1871_v50  ;;  %v2489_v62 = vcombine.low %v1856_v49, %v1864_v52  ;;  %v374_v63 = vcombine.high %v18866_v13, %v18866_v13  ;;  %v405_v0 = vcombine.high %v17114_v43, %v17114_v43 }
  0x45   : > { %v1881_v3 = vsel %vm18764_vm1, %v1874_v51, %v1879_v53  ;;  %v2497_v5 = vrot.slane %v2487_v54, %v18736_v10  ;;  %v2504_v22 = vrot.slane %v2488_v59, %v18736_v10  ;;  %18136 = vmatprep.mubr.msk.bf16.mxu0 %vm18669_vm4, %v23251_v2  ;;  %v18966_v9 = vrot.slane %v17114_v43, %v18736_v10  ;;  %v17130_v54 = vld.sshfl [vmem:[%s18729_s21 + $0x58] sm:$0x33 pattern:$0x75316420] }
  0x46   : > { %v2490_v11 = vcombine.low %v1873_v61, %v1881_v3  ;;  %v2511_v12 = vrot.slane %v2489_v62, %v18736_v10  ;;  %v18970_v20 = vrot.slane %v405_v0, %v18736_v10  ;;  %v999_v26 = vcombine.high %v17138_v60, %v17138_v60 }
  0x47   : > { %v2519_v27 = vcombine.low %v2497_v5, %v2504_v22  ;;  %v18974_v28 = vcombine.high %v18966_v9, %v18966_v9  ;;  %v1006_v29 = vrot.slane %v17138_v60, %v18736_v10  ;;  %v1426_v30 = vshrl.u32 %v18870_v17, 16  ;;  %v17146_v22 = vld.sshfl [vmem:[%s18729_s21 + $0x54] sm:$0x33 pattern:$0x75316420] }
  0x48   : > { %v2518_v31 = vrot.slane %v2490_v11, %v18736_v10  ;;  %v18981_v32 = vcombine.high %v18970_v20, %v18970_v20  ;;  %v1013_v33 = vrot.slane %v999_v26, %v18736_v10  ;;  %v1431_v34 = vshll.u32 %v374_v63, 16 }
  0x49   : > { %v2527_v35 = vrot.slane %v2519_v27, %v18736_v10  ;;  %v1014_v36 = vcombine.high %v1006_v29, %v1006_v29  ;;  %v1434_v37 = vshrl.u32 %v374_v63, 16  ;;  %v1439_v38 = vshll.u32 %v1006_v29, 16 }
  0x4a   : > { %v2520_v39 = vcombine.low %v2511_v12, %v2518_v31  ;;  %v1015_v40 = vcombine.high %v1013_v33, %v1013_v33  ;;  %v1433_v17 = vsel %vm18764_vm1, %v1426_v30, %v1431_v34  ;;  %v1442_v41 = vshrl.u32 %v1006_v29, 16 }
  0x4b   : > { %v1441_v42 = vsel %vm18764_vm1, %v1434_v37, %v1439_v38  ;;  %v1447_v43 = vshll.u32 %v1013_v33, 16  ;;  %v1450_v44 = vshrl.u32 %v1013_v33, 16  ;;  %v1455_v45 = vshll.u32 %v1014_v36, 16 }
  0x4c   : > { %v2534_v46 = vrot.slane %v2520_v39, %v18736_v10  ;;  %v1458_v47 = vshrl.u32 %v1014_v36, 16  ;;  %v1463_v48 = vshll.u32 %v1015_v40, 16  ;;  %v1467_v49 = vshrl.u32 %v18966_v9, 16 }
  0x4d   : > { %v1449_v50 = vsel %vm18764_vm1, %v1442_v41, %v1447_v43  ;;  %v1457_v51 = vsel %vm18764_vm1, %v1450_v44, %v1455_v45  ;;  %v1472_v52 = vshll.u32 %v18970_v20, 16  ;;  %v1475_v53 = vshrl.u32 %v18970_v20, 16 }
  0x4e   : > { %v2535_v59 = vcombine.low %v2527_v35, %v2534_v46  ;;  %v1465_v60 = vsel %vm18764_vm1, %v1458_v47, %v1463_v48  ;;  %v1480_v61 = vshll.u32 %v18974_v28, 16  ;;  %v1483_v62 = vshrl.u32 %v18974_v28, 16 }
  0x4f   : > { %v1474_v63 = vsel %vm18764_vm1, %v1467_v49, %v1472_v52  ;;  %v1488_v0 = vshll.u32 %v18981_v32, 16  ;;  %v2193_v3 = vcombine.low %v1433_v17, %v1441_v42  ;;  %v2194_v5 = vcombine.low %v1449_v50, %v1457_v51 }
  0x50   : > { %18161 = vmatmul.mubr.msk.bf16.gmra.mrb[4].mxu1 %vm2698_vm2, %v2535_v59  ;;  %v1482_v11 = vsel %vm18764_vm1, %v1475_v53, %v1480_v61  ;;  %v2195_v12 = vcombine.low %v1465_v60, %v1474_v63  ;;  %v750_v26 = vcombine.high %v18924_v21, %v18924_v21  ;;  %v781_v27 = vcombine.high %v17130_v54, %v17130_v54 }
  0x51   : > { %18164 = vmatprep.mubr.msk.bf16.mxu1 %vm18669_vm4, %v23251_v2  ;;  %v1490_v29 = vsel %vm18764_vm1, %v1483_v62, %v1488_v0  ;;  %v2203_v30 = vrot.slane %v2193_v3, %v18736_v10  ;;  %v2210_v31 = vrot.slane %v2194_v5, %v18736_v10  ;;  %v19018_v33 = vrot.slane %v17130_v54, %v18736_v10 }
  0x52   : > { %v2196_v34 = vcombine.low %v1482_v11, %v1490_v29  ;;  %v2217_v35 = vrot.slane %v2195_v12, %v18736_v10  ;;  %v19022_v36 = vrot.slane %v781_v27, %v18736_v10  ;;  %v1191_v37 = vcombine.high %v17146_v22, %v17146_v22  ;;  %v17116_v11 = vld.sshfl [vmem:[%s18729_s21 + $0x20] sm:$0x33 pattern:$0x75316420] }
  0x53   : > { %23280 = vst [vmem:[#allocation7_spill] sm:$0xff] %v19018_v33  ;;  %v2225_v38 = vcombine.low %v2203_v30, %v2210_v31  ;;  %v19026_v39 = vcombine.high %v19018_v33, %v19018_v33  ;;  %v1198_v40 = vrot.slane %v17146_v22, %v18736_v10  ;;  %v1882_v17 = vshrl.u32 %v18928_v23, 16  ;;  %v17139_v30 = vld.sshfl [vmem:[%s18729_s21 + $0x1c] sm:$0x33 pattern:$0x75316420] }
  0x54   : > { %23281 = vst [vmem:[#allocation8_spill] sm:$0xff] %v19022_v36  ;;  %v2224_v41 = vrot.slane %v2196_v34, %v18736_v10  ;;  %v19033_v42 = vcombine.high %v19022_v36, %v19022_v36  ;;  %v1205_v43 = vrot.slane %v1191_v37, %v18736_v10  ;;  %v1887_v44 = vshll.u32 %v750_v26, 16 }
  0x55   : > { %23282 = vst [vmem:[#allocation9_spill] sm:$0xff] %v19026_v39  ;;  %v2233_v45 = vrot.slane %v2225_v38, %v18736_v10  ;;  %v1206_v46 = vcombine.high %v1198_v40, %v1198_v40  ;;  %v1890_v47 = vshrl.u32 %v750_v26, 16  ;;  %v1895_v48 = vshll.u32 %v1198_v40, 16 }
  0x56   : > { %23283 = vst [vmem:[#allocation10_spill] sm:$0xff] %v19033_v42  ;;  %v2226_v49 = vcombine.low %v2217_v35, %v2224_v41  ;;  %v1207_v50 = vcombine.high %v1205_v43, %v1205_v43  ;;  %v1889_v23 = vsel %vm18764_vm1, %v1882_v17, %v1887_v44  ;;  %v1898_v51 = vshrl.u32 %v1198_v40, 16 }
  0x57   : > { %v1897_v52 = vsel %vm18764_vm1, %v1890_v47, %v1895_v48  ;;  %v1903_v53 = vshll.u32 %v1205_v43, 16  ;;  %v1906_v54 = vshrl.u32 %v1205_v43, 16  ;;  %v1911_v59 = vshll.u32 %v1206_v46, 16 }
  0x58   : > { %v2240_v60 = vrot.slane %v2226_v49, %v18736_v10  ;;  %v1914_v61 = vshrl.u32 %v1206_v46, 16  ;;  %v1919_v62 = vshll.u32 %v1207_v50, 16  ;;  %v1923_v63 = vshrl.u32 %v19018_v33, 16 }
  0x59   : > { %v1905_v0 = vsel %vm18764_vm1, %v1898_v51, %v1903_v53  ;;  %v1913_v3 = vsel %vm18764_vm1, %v1906_v54, %v1911_v59  ;;  %v1928_v5 = vshll.u32 %v19022_v36, 16  ;;  %v1931_v22 = vshrl.u32 %v19022_v36, 16  ;;  %v19065_v43 = vld.sshfl [vmem:[%s18729_s21 + $0x24] sm:$0x33 pattern:$0x75316420] }
  0x5a   : > { %v2241_v12 = vcombine.low %v2233_v45, %v2240_v60  ;;  %v1921_v26 = vsel %vm18764_vm1, %v1914_v61, %v1919_v62  ;;  %v1936_v27 = vshll.u32 %v19026_v39, 16  ;;  %v1939_v29 = vshrl.u32 %v19026_v39, 16 }
  0x5b   : > { %v1930_v31 = vsel %vm18764_vm1, %v1923_v63, %v1928_v5  ;;  %v1944_v34 = vshll.u32 %v19033_v42, 16  ;;  %v2536_v35 = vcombine.low %v1889_v23, %v1897_v52  ;;  %v2537_v37 = vcombine.low %v1905_v0, %v1913_v3 }
  0x5c   : > { %18137 = vmatmul.mubr.msk.bf16.gmra.mrb[8].mxu0 %vm2698_vm2, %v2241_v12  ;;  %v1938_v38 = vsel %vm18764_vm1, %v1931_v22, %v1936_v27  ;;  %v2538_v40 = vcombine.low %v1921_v26, %v1930_v31  ;;  %v452_v17 = vcombine.high %v17116_v11, %v17116_v11  ;;  %v19062_v41 = vrot.slane %v17116_v11, %v18736_v10 }
  0x5d   : > { %v1946_v44 = vsel %vm18764_vm1, %v1939_v29, %v1944_v34  ;;  %v2546_v45 = vrot.slane %v2536_v35, %v18736_v10  ;;  %v2553_v46 = vrot.slane %v2537_v37, %v18736_v10  ;;  %18140 = vmatprep.mubr.msk.bf16.mxu0 %vm18669_vm4, %v23251_v2  ;;  %v1023_v47 = vcombine.high %v17139_v30, %v17139_v30 }
  0x5e   : > { %v2539_v48 = vcombine.low %v1938_v38, %v1946_v44  ;;  %v2560_v49 = vrot.slane %v2538_v40, %v18736_v10  ;;  %v19075_v50 = vrot.slane %v452_v17, %v18736_v10  ;;  %v467_v23 = vcombine.high %v19062_v41, %v19062_v41 }
  0x5f   : > { %v2568_v51 = vcombine.low %v2546_v45, %v2553_v46  ;;  %v1030_v52 = vrot.slane %v17139_v30, %v18736_v10  ;;  %v1037_v53 = vrot.slane %v1023_v47, %v18736_v10  ;;  %v19083_v54 = vrot.slane %v19065_v43, %v18736_v10  ;;  %v17132_v46 = vld.sshfl [vmem:[%s18729_s21 + $0x60] sm:$0x33 pattern:$0x75316420] }
  0x60   : > { %v2567_v59 = vrot.slane %v2539_v48, %v18736_v10  ;;  %v468_v60 = vcombine.high %v19075_v50, %v19075_v50  ;;  %v1491_v61 = vshrl.u32 %v18981_v32, 16  ;;  %v1524_v62 = vshrl.u32 %v19062_v41, 16 }
  0x61   : > { %v2576_v63 = vrot.slane %v2568_v51, %v18736_v10  ;;  %v1038_v0 = vcombine.high %v1030_v52, %v1030_v52  ;;  %v1039_v3 = vcombine.high %v1037_v53, %v1037_v53  ;;  %v1496_v5 = vshll.u32 %v1030_v52, 16 }
  0x62   : > { %v2569_v22 = vcombine.low %v2560_v49, %v2567_v59  ;;  %v1499_v11 = vshrl.u32 %v1030_v52, 16  ;;  %v1504_v12 = vshll.u32 %v1037_v53, 16  ;;  %v1507_v26 = vshrl.u32 %v1037_v53, 16 }
  0x63   : > { %v1498_v27 = vsel %vm18764_vm1, %v1491_v61, %v1496_v5  ;;  %v1512_v29 = vshll.u32 %v1038_v0, 16  ;;  %v1515_v30 = vshrl.u32 %v1038_v0, 16  ;;  %v1520_v31 = vshll.u32 %v1039_v3, 16 }
  0x64   : > { %v2583_v34 = vrot.slane %v2569_v22, %v18736_v10  ;;  %v1506_v35 = vsel %vm18764_vm1, %v1499_v11, %v1504_v12  ;;  %v1529_v37 = vshll.u32 %v19075_v50, 16  ;;  %v1532_v38 = vshrl.u32 %v19075_v50, 16  ;;  %v17147_v52 = vld.sshfl [vmem:[%s18729_s21 + $0x5c] sm:$0x33 pattern:$0x75316420] }
  0x65   : > { %v1514_v40 = vsel %vm18764_vm1, %v1507_v26, %v1512_v29  ;;  %v1522_v17 = vsel %vm18764_vm1, %v1515_v30, %v1520_v31  ;;  %v1537_v44 = vshll.u32 %v467_v23, 16  ;;  %v1540_v45 = vshrl.u32 %v467_v23, 16 }
  0x66   : > { %v2584_v47 = vcombine.low %v2576_v63, %v2583_v34  ;;  %v1531_v48 = vsel %vm18764_vm1, %v1524_v62, %v1529_v37  ;;  %v1545_v49 = vshll.u32 %v468_v60, 16  ;;  %v1548_v51 = vshrl.u32 %v468_v60, 16  ;;  %v19116_v62 = vld.sshfl [vmem:[%s18729_s21 + $0x64] sm:$0x33 pattern:$0x75316420] }
  0x67   : > { %v1539_v53 = vsel %vm18764_vm1, %v1532_v38, %v1537_v44  ;;  %v1553_v59 = vshll.u32 %v19083_v54, 16  ;;  %v2242_v61 = vcombine.low %v1498_v27, %v1506_v35  ;;  %v2243_v0 = vcombine.low %v1514_v40, %v1522_v17 }
  0x68   : > { %18165 = vmatmul.mubr.msk.bf16.gmra.mrb[8].mxu1 %vm2698_vm2, %v2584_v47  ;;  %v1547_v23 = vsel %vm18764_vm1, %v1540_v45, %v1545_v49  ;;  %v2244_v3 = vcombine.low %v1531_v48, %v1539_v53  ;;  %v828_v63 = vcombine.high %v17132_v46, %v17132_v46  ;;  %v19113_v5 = vrot.slane %v17132_v46, %v18736_v10 }
  0x69   : > { %18168 = vmatprep.mubr.msk.bf16.mxu1 %vm18669_vm4, %v23251_v2  ;;  %v1555_v60 = vsel %vm18764_vm1, %v1548_v51, %v1553_v59  ;;  %v2252_v22 = vrot.slane %v2242_v61, %v18736_v10  ;;  %v2259_v11 = vrot.slane %v2243_v0, %v18736_v10  ;;  %v1215_v12 = vcombine.high %v17147_v52, %v17147_v52 }
  0x6a   : > { %23284 = vst [vmem:[#allocation11_spill] sm:$0xff] %v19113_v5  ;;  %v2245_v26 = vcombine.low %v1547_v23, %v1555_v60  ;;  %v2266_v27 = vrot.slane %v2244_v3, %v18736_v10  ;;  %v19126_v29 = vrot.slane %v828_v63, %v18736_v10  ;;  %v843_v30 = vcombine.high %v19113_v5, %v19113_v5 }
  0x6b   : > { %v2274_v31 = vcombine.low %v2252_v22, %v2259_v11  ;;  %v1222_v34 = vrot.slane %v17147_v52, %v18736_v10  ;;  %v1229_v35 = vrot.slane %v1215_v12, %v18736_v10  ;;  %v19134_v37 = vrot.slane %v19116_v62, %v18736_v10 }
  0x6c   : > { %23285 = vst [vmem:[#allocation12_spill] sm:$0xff] %v19126_v29  ;;  %v2273_v38 = vrot.slane %v2245_v26, %v18736_v10  ;;  %v844_v40 = vcombine.high %v19126_v29, %v19126_v29  ;;  %v1947_v17 = vshrl.u32 %v19033_v42, 16  ;;  %v1980_v44 = vshrl.u32 %v19113_v5, 16 }
  0x6d   : > { %v2282_v45 = vrot.slane %v2274_v31, %v18736_v10  ;;  %v1230_v46 = vcombine.high %v1222_v34, %v1222_v34  ;;  %v1231_v47 = vcombine.high %v1229_v35, %v1229_v35  ;;  %v1952_v48 = vshll.u32 %v1222_v34, 16  ;;  %v17118_v31 = vld.sshfl [vmem:[%s18729_s21 + $0x28] sm:$0x33 pattern:$0x75316420] }
  0x6e   : > { %v2275_v49 = vcombine.low %v2266_v27, %v2273_v38  ;;  %v1955_v51 = vshrl.u32 %v1222_v34, 16  ;;  %v1960_v52 = vshll.u32 %v1229_v35, 16  ;;  %v1963_v53 = vshrl.u32 %v1229_v35, 16 }
  0x6f   : > { %v1954_v59 = vsel %vm18764_vm1, %v1947_v17, %v1952_v48  ;;  %v1968_v61 = vshll.u32 %v1230_v46, 16  ;;  %v1971_v0 = vshrl.u32 %v1230_v46, 16  ;;  %v1976_v23 = vshll.u32 %v1231_v47, 16 }
  0x70   : > { %v2289_v3 = vrot.slane %v2275_v49, %v18736_v10  ;;  %v1962_v63 = vsel %vm18764_vm1, %v1955_v51, %v1960_v52  ;;  %v1985_v60 = vshll.u32 %v19126_v29, 16  ;;  %v1988_v22 = vshrl.u32 %v19126_v29, 16 }
  0x71   : > { %v1970_v11 = vsel %vm18764_vm1, %v1963_v53, %v1968_v61  ;;  %v1978_v12 = vsel %vm18764_vm1, %v1971_v0, %v1976_v23  ;;  %v1993_v26 = vshll.u32 %v843_v30, 16  ;;  %v1996_v27 = vshrl.u32 %v843_v30, 16 }
  0x72   : > { %v2290_v34 = vcombine.low %v2282_v45, %v2289_v3  ;;  %v1987_v35 = vsel %vm18764_vm1, %v1980_v44, %v1985_v60  ;;  %v2001_v38 = vshll.u32 %v844_v40, 16  ;;  %v2004_v17 = vshrl.u32 %v844_v40, 16  ;;  %v17141_v44 = vld.sshfl [vmem:[%s18729_s21 + $0x2c] sm:$0x33 pattern:$0x75316420] }
  0x73   : > { %v1995_v46 = vsel %vm18764_vm1, %v1988_v22, %v1993_v26  ;;  %v2009_v47 = vshll.u32 %v19134_v37, 16  ;;  %v2585_v48 = vcombine.low %v1954_v59, %v1962_v63  ;;  %v2586_v49 = vcombine.low %v1970_v11, %v1978_v12 }
  0x74   : > { %18141 = vmatmul.mubr.msk.bf16.gmra.mrb[12].mxu0 %vm2698_vm2, %v2290_v34  ;;  %v2003_v51 = vsel %vm18764_vm1, %v1996_v27, %v2001_v38  ;;  %v2587_v30 = vcombine.low %v1987_v35, %v1995_v46  ;;  %v499_v52 = vcombine.high %v17118_v31, %v17118_v31  ;;  %v19163_v45 = vrot.slane %v17118_v31, %v18736_v10 }
  0x75   : > { %v2011_v40 = vsel %vm18764_vm1, %v2004_v17, %v2009_v47  ;;  %v2595_v53 = vrot.slane %v2585_v48, %v18736_v10  ;;  %v2602_v61 = vrot.slane %v2586_v49, %v18736_v10  ;;  %18144 = vmatprep.mubr.msk.bf16.mxu0 %vm18669_vm4, %v23251_v2  ;;  %v1047_v59 = vcombine.high %v19065_v43, %v19065_v43 }
  0x76   : > { %v2588_v0 = vcombine.low %v2003_v51, %v2011_v40  ;;  %v2609_v23 = vrot.slane %v2587_v30, %v18736_v10  ;;  %v19176_v3 = vrot.slane %v499_v52, %v18736_v10  ;;  %v19180_v63 = vcombine.high %v19163_v45, %v19163_v45 }
  0x77   : > { %v2617_v60 = vcombine.low %v2595_v53, %v2602_v61  ;;  %v1061_v22 = vrot.slane %v1047_v59, %v18736_v10  ;;  %v1062_v11 = vcombine.high %v19083_v54, %v19083_v54  ;;  %v1071_v12 = vcombine.high %v17141_v44, %v17141_v44 }
  0x78   : > { %v2616_v26 = vrot.slane %v2588_v0, %v18736_v10  ;;  %v19188_v43 = vcombine.high %v19176_v3, %v19176_v3  ;;  %v19191_v27 = vrot.slane %v17141_v44, %v18736_v10  ;;  %v1556_v31 = vshrl.u32 %v19083_v54, 16 }
  0x79   : > { %v2625_v34 = vrot.slane %v2617_v60, %v18736_v10  ;;  %v1063_v35 = vcombine.high %v1061_v22, %v1061_v22  ;;  %v19196_v38 = vrot.slane %v1071_v12, %v18736_v10  ;;  %v1561_v17 = vshll.u32 %v1061_v22, 16 }
  0x7a   : > { %v2618_v46 = vcombine.low %v2609_v23, %v2616_v26  ;;  %v1564_v47 = vshrl.u32 %v1061_v22, 16  ;;  %v1569_v48 = vshll.u32 %v1062_v11, 16  ;;  %v1572_v49 = vshrl.u32 %v1062_v11, 16 }
  0x7b   : > { %v1563_v51 = vsel %vm18764_vm1, %v1556_v31, %v1561_v17  ;;  %v1577_v30 = vshll.u32 %v1063_v35, 16  ;;  %v1581_v52 = vshrl.u32 %v19163_v45, 16  ;;  %v1586_v54 = vshll.u32 %v19176_v3, 16 }
  0x7c   : > { %v2632_v44 = vrot.slane %v2618_v46, %v18736_v10  ;;  %v1571_v40 = vsel %vm18764_vm1, %v1564_v47, %v1569_v48  ;;  %v1589_v53 = vshrl.u32 %v19176_v3, 16  ;;  %v1594_v61 = vshll.u32 %v19180_v63, 16  ;;  %v17134_v22 = vld.sshfl [vmem:[%s18729_s21 + $0x68] sm:$0x33 pattern:$0x75316420] }
  0x7d   : > { %v1579_v59 = vsel %vm18764_vm1, %v1572_v49, %v1577_v30  ;;  %v1588_v0 = vsel %vm18764_vm1, %v1581_v52, %v1586_v54  ;;  %v1597_v23 = vshrl.u32 %v19180_v63, 16  ;;  %v1602_v60 = vshll.u32 %v19188_v43, 16  ;;  %v17149_v52 = vld.sshfl [vmem:[%s18729_s21 + $0x6c] sm:$0x33 pattern:$0x75316420] }
  0x7e   : > { %v2633_v11 = vcombine.low %v2625_v34, %v2632_v44  ;;  %v1596_v12 = vsel %vm18764_vm1, %v1589_v53, %v1594_v61  ;;  %v1605_v26 = vshrl.u32 %v19188_v43, 16  ;;  %v1610_v31 = vshll.u32 %v19191_v27, 16 }
  0x7f   : > { %v1604_v35 = vsel %vm18764_vm1, %v1597_v23, %v1602_v60  ;;  %v1613_v17 = vshrl.u32 %v19191_v27, 16  ;;  %v1618_v46 = vshll.u32 %v19196_v38, 16  ;;  %v2291_v47 = vcombine.low %v1563_v51, %v1571_v40 }
  0x80   : > { %18169 = vmatmul.mubr.msk.bf16.gmra.mrb[12].mxu1 %vm2698_vm2, %v2633_v11  ;;  %v1612_v34 = vsel %vm18764_vm1, %v1605_v26, %v1610_v31  ;;  %v2292_v48 = vcombine.low %v1579_v59, %v1588_v0  ;;  %v2293_v49 = vcombine.low %v1596_v12, %v1604_v35  ;;  %v875_v30 = vcombine.high %v17134_v22, %v17134_v22 }
  0x81   : > { %18172 = vmatprep.mubr.msk.bf16.mxu1 %vm18669_vm4, %v23251_v2  ;;  %v1620_v54 = vsel %vm18764_vm1, %v1613_v17, %v1618_v46  ;;  %v2301_v44 = vrot.slane %v2291_v47, %v18736_v10  ;;  %v19232_v53 = vrot.slane %v17134_v22, %v18736_v10  ;;  %v1239_v51 = vcombine.high %v19116_v62, %v19116_v62  ;;  %v17142_v2 = vld.sshfl [vmem:[%s18729_s21 + $0x34] sm:$0x33 pattern:$0x75316420] }
  0x82   : > { %v2294_v40 = vcombine.low %v1612_v34, %v1620_v54  ;;  %v2308_v61 = vrot.slane %v2292_v48, %v18736_v10  ;;  %v2315_v59 = vrot.slane %v2293_v49, %v18736_v10  ;;  %v19239_v0 = vrot.slane %v875_v30, %v18736_v10 }
  0x83   : > { %23286 = vst [vmem:[#allocation13_spill] sm:$0xff] %v19232_v53  ;;  %v19243_v23 = vcombine.high %v19232_v53, %v19232_v53  ;;  %v1253_v60 = vrot.slane %v1239_v51, %v18736_v10  ;;  %v1254_v22 = vcombine.high %v19134_v37, %v19134_v37  ;;  %v1263_v11 = vcombine.high %v17149_v52, %v17149_v52 }
  0x84   : > { %23287 = vst [vmem:[#allocation14_spill] sm:$0xff] %v19239_v0  ;;  %v2322_v62 = vrot.slane %v2294_v40, %v18736_v10  ;;  %v2323_v12 = vcombine.low %v2301_v44, %v2308_v61  ;;  %v19251_v26 = vcombine.high %v19239_v0, %v19239_v0  ;;  %v19254_v31 = vrot.slane %v17149_v52, %v18736_v10 }
  0x85   : > { %23288 = vst [vmem:[#allocation15_spill] sm:$0xff] %v19243_v23  ;;  %v1255_v35 = vcombine.high %v1253_v60, %v1253_v60  ;;  %v19257_v17 = vrot.slane %v1263_v11, %v18736_v10  ;;  %v2012_v46 = vshrl.u32 %v19134_v37, 16  ;;  %v2017_v47 = vshll.u32 %v1253_v60, 16 }
  0x86   : > { %23289 = vst [vmem:[#allocation16_spill] sm:$0xff] %v19251_v26  ;;  %v2324_v34 = vcombine.low %v2315_v59, %v2322_v62  ;;  %v2331_v48 = vrot.slane %v2323_v12, %v18736_v10  ;;  %v2020_v49 = vshrl.u32 %v1253_v60, 16  ;;  %v2025_v30 = vshll.u32 %v1254_v22, 16 }
  0x87   : > { %v2019_v54 = vsel %vm18764_vm1, %v2012_v46, %v2017_v47  ;;  %v2028_v44 = vshrl.u32 %v1254_v22, 16  ;;  %v2033_v51 = vshll.u32 %v1255_v35, 16  ;;  %v2037_v52 = vshrl.u32 %v19232_v53, 16 }
  0x88   : > { %v2338_v40 = vrot.slane %v2324_v34, %v18736_v10  ;;  %v2027_v61 = vsel %vm18764_vm1, %v2020_v49, %v2025_v30  ;;  %v2042_v37 = vshll.u32 %v19239_v0, 16  ;;  %v2045_v59 = vshrl.u32 %v19239_v0, 16  ;;  %v17120_v34 = vld.sshfl [vmem:[%s18729_s21 + $0x30] sm:$0x33 pattern:$0x75316420] }
  0x89   : > { %v2035_v60 = vsel %vm18764_vm1, %v2028_v44, %v2033_v51  ;;  %v2050_v11 = vshll.u32 %v19243_v23, 16  ;;  %v2053_v62 = vshrl.u32 %v19243_v23, 16  ;;  %v2058_v22 = vshll.u32 %v19251_v26, 16 }
  0x8a   : > { %v2339_v12 = vcombine.low %v2331_v48, %v2338_v40  ;;  %v2044_v35 = vsel %vm18764_vm1, %v2037_v52, %v2042_v37  ;;  %v2061_v46 = vshrl.u32 %v19251_v26, 16  ;;  %v2066_v47 = vshll.u32 %v19254_v31, 16 }
  0x8b   : > { %v2052_v49 = vsel %vm18764_vm1, %v2045_v59, %v2050_v11  ;;  %v2060_v30 = vsel %vm18764_vm1, %v2053_v62, %v2058_v22  ;;  %v2069_v44 = vshrl.u32 %v19254_v31, 16  ;;  %v2074_v51 = vshll.u32 %v19257_v17, 16 }
  0x8c   : > { %18145 = vmatmul.mubr.msk.bf16.gmra.mrb[16].mxu0 %vm2698_vm2, %v2339_v12  ;;  %v2068_v48 = vsel %vm18764_vm1, %v2061_v46, %v2066_v47  ;;  %v2634_v52 = vcombine.low %v2019_v54, %v2027_v61  ;;  %v2635_v40 = vcombine.low %v2035_v60, %v2044_v35  ;;  %v2636_v37 = vcombine.low %v2052_v49, %v2060_v30 }
  0x8d   : > { %v2076_v6 = vsel %vm18764_vm1, %v2069_v44, %v2074_v51  ;;  %v23290_v59 = vmov 0.0   ;;  %v546_v11 = vcombine.high %v17120_v34, %v17120_v34  ;;  %v19294_v62 = vrot.slane %v17120_v34, %v18736_v10 }
  0x8e   : > { %18148 = vmatprep.mubr.msk.bf16.mxu0 %vm18669_vm4, %v23290_v59  ;;  %v1086_v22 = vcombine.high %v19191_v27, %v19191_v27  ;;  %v2637_v12 = vcombine.low %v2068_v48, %v2076_v6  ;;  %v2644_v46 = vrot.slane %v2634_v52, %v18736_v10  ;;  %v2651_v54 = vrot.slane %v2635_v40, %v18736_v10 }
  0x8f   : > { %v2658_v61 = vrot.slane %v2636_v37, %v18736_v10  ;;  %v19302_v60 = vrot.slane %v546_v11, %v18736_v10  ;;  %v561_v35 = vcombine.high %v19294_v62, %v19294_v62  ;;  %v1087_v47 = vcombine.high %v19196_v38, %v19196_v38 }
  0x90   : > { %v1095_v34 = vcombine.high %v17142_v2, %v17142_v2  ;;  %v2665_v49 = vrot.slane %v2637_v12, %v18736_v10  ;;  %v2666_v30 = vcombine.low %v2644_v46, %v2651_v54  ;;  %v19310_v6 = vrot.slane %v17142_v2, %v18736_v10 }
  0x91   : > { %v1621_v44 = vshrl.u32 %v19196_v38, 16  ;;  %v562_v51 = vcombine.high %v19302_v60, %v19302_v60  ;;  %v1626_v52 = vshll.u32 %v1086_v22, 16  ;;  %v1629_v40 = vshrl.u32 %v1086_v22, 16 }
  0x92   : > { %v19316_v48 = vrot.slane %v1095_v34, %v18736_v10  ;;  %v2667_v37 = vcombine.low %v2658_v61, %v2665_v49  ;;  %v2674_v11 = vrot.slane %v2666_v30, %v18736_v10  ;;  %v19321_v12 = vcombine.high %v19310_v6, %v19310_v6 }
  0x93   : > { %v1634_v46 = vshll.u32 %v1087_v47, 16  ;;  %v1628_v2 = vsel %vm18764_vm1, %v1621_v44, %v1626_v52  ;;  %v1638_v54 = vshrl.u32 %v19294_v62, 16  ;;  %v1643_v53 = vshll.u32 %v19302_v60, 16 }
  0x94   : > { %v1646_v34 = vshrl.u32 %v19302_v60, 16  ;;  %v2681_v26 = vrot.slane %v2667_v37, %v18736_v10  ;;  %v1651_v61 = vshll.u32 %v561_v35, 16  ;;  %v1654_v49 = vshrl.u32 %v561_v35, 16 }
  0x95   : > { %v1636_v22 = vsel %vm18764_vm1, %v1629_v40, %v1634_v46  ;;  %v1645_v30 = vsel %vm18764_vm1, %v1638_v54, %v1643_v53  ;;  %v1659_v47 = vshll.u32 %v562_v51, 16  ;;  %v1662_v0 = vshrl.u32 %v562_v51, 16 }
  0x96   : > { %v1667_v44 = vshll.u32 %v19310_v6, 16  ;;  %v2682_v52 = vcombine.low %v2674_v11, %v2681_v26  ;;  %v1653_v23 = vsel %vm18764_vm1, %v1646_v34, %v1651_v61  ;;  %v1670_v42 = vshrl.u32 %v19310_v6, 16  ;;  %v17122_v34 = vld.sshfl [vmem:[%s18729_s21 + $0x38] sm:$0x33 pattern:$0x75316420] }
  0x97   : > { %v1675_v37 = vshll.u32 %v19316_v48, 16  ;;  %v1661_v40 = vsel %vm18764_vm1, %v1654_v49, %v1659_v47  ;;  %v1678_v53 = vshrl.u32 %v19316_v48, 16  ;;  %v1683_v51 = vshll.u32 %v19321_v12, 16 }
  0x98   : > { %v1669_v35 = vsel %vm18764_vm1, %v1662_v0, %v1667_v44  ;;  %18173 = vmatmul.mubr.msk.bf16.gmra.mrb[16].mxu1 %vm2698_vm2, %v2682_v52  ;;  %v2340_v11 = vcombine.low %v1628_v2, %v1636_v22  ;;  %v2341_v46 = vcombine.low %v1645_v30, %v1653_v23  ;;  %v1278_v61 = vcombine.high %v19254_v31, %v19254_v31  ;;  %v17143_v22 = vld.sshfl [vmem:[%s18729_s21 + $0x3c] sm:$0x33 pattern:$0x75316420] }
  0x99   : > { %v1677_v26 = vsel %vm18764_vm1, %v1670_v42, %v1675_v37  ;;  %v2342_v54 = vcombine.low %v1661_v40, %v1669_v35  ;;  %18176 = vmatprep.mubr.msk.bf16.mxu1 %vm18669_vm4, %v23290_v59  ;;  %v1685_v0 = vsel %vm18764_vm1, %v1678_v53, %v1683_v51  ;;  %v1279_v49 = vcombine.high %v19257_v17, %v19257_v17 }
  0x9a   : > { %v2077_v47 = vshrl.u32 %v19257_v17, 16  ;;  %v2343_v44 = vcombine.low %v1677_v26, %v1685_v0  ;;  %v2350_v42 = vrot.slane %v2340_v11, %v18736_v10  ;;  %v2357_v23 = vrot.slane %v2341_v46, %v18736_v10 }
  0x9b   : > { %v2364_v2 = vrot.slane %v2342_v54, %v18736_v10  ;;  %v2082_v30 = vshll.u32 %v1278_v61, 16  ;;  %v2085_v52 = vshrl.u32 %v1278_v61, 16  ;;  %v2090_v37 = vshll.u32 %v1279_v49, 16 }
  0x9c   : > { %v593_v40 = vcombine.high %v17122_v34, %v17122_v34  ;;  %v2371_v35 = vrot.slane %v2343_v44, %v18736_v10  ;;  %v2372_v31 = vcombine.low %v2350_v42, %v2357_v23  ;;  %v19363_v53 = vrot.slane %v17122_v34, %v18736_v10 }
  0x9d   : > { %v19367_v17 = vcombine.high %v19316_v48, %v19316_v48  ;;  %v2084_v51 = vsel %vm18764_vm1, %v2077_v47, %v2082_v30  ;;  %v2092_v26 = vsel %vm18764_vm1, %v2085_v52, %v2090_v37  ;;  %v1119_v46 = vcombine.high %v17143_v22, %v17143_v22 }
  0x9e   : > { %v19374_v11 = vrot.slane %v593_v40, %v18736_v10  ;;  %v2373_v54 = vcombine.low %v2364_v2, %v2371_v35  ;;  %v2380_v0 = vrot.slane %v2372_v31, %v18736_v10  ;;  %v2683_v61 = vcombine.low %v2084_v51, %v2092_v26 }
  0x9f   : > { %v19379_v34 = vcombine.high %v19363_v53, %v19363_v53  ;;  %v19386_v47 = vrot.slane %v17143_v22, %v18736_v10  ;;  %v19389_v44 = vrot.slane %v1119_v46, %v18736_v10  ;;  %v1686_v42 = vshrl.u32 %v19321_v12, 16 }
  0xa0   : > { %v19383_v49 = vcombine.high %v19374_v11, %v19374_v11  ;;  %v2387_v23 = vrot.slane %v2373_v54, %v18736_v10  ;;  %v2690_v2 = vrot.slane %v2683_v61, %v18736_v10  ;;  %v1691_v30 = vshll.u32 %v19367_v17, 16  ;;  %v17109_v54 = vld.sshfl [vmem:[%s18729_s21 + $0x4] sm:$0x13 pattern:$0x75316420] }
  0xa1   : > { %v1695_v52 = vshrl.u32 %v19363_v53, 16  ;;  %v1134_v37 = vcombine.high %v19386_v47, %v19386_v47  ;;  %v1135_v22 = vcombine.high %v19389_v44, %v19389_v44  ;;  %v1700_v40 = vshll.u32 %v19374_v11, 16 }
  0xa2   : > { %v1703_v35 = vshrl.u32 %v19374_v11, 16  ;;  %v2388_v31 = vcombine.low %v2380_v0, %v2387_v23  ;;  %v2697_v51 = vrot.slane %v2690_v2, %v18736_v10  ;;  %v1693_v26 = vsel %vm18764_vm1, %v1686_v42, %v1691_v30 }
  0xa3   : > { %v1708_v46 = vshll.u32 %v19379_v34, 16  ;;  %v1702_v61 = vsel %vm18764_vm1, %v1695_v52, %v1700_v40  ;;  %v1711_v5 = vshrl.u32 %v19379_v34, 16  ;;  %v1716_v29 = vshll.u32 %v19383_v49, 16 }
  0xa4   : > { %v1719_v33 = vshrl.u32 %v19383_v49, 16  ;;  %18149 = vmatmul.mubr.msk.bf16.gmra.mrb[20].mxu0 %vm2698_vm2, %v2388_v31  ;;  %18177 = vmatmul.mubr.msk.bf16.gmra.mrb[20].mxu1 %vm2698_vm2, %v2697_v51  ;;  %v1724_v42 = vshll.u32 %v19386_v47, 16  ;;  %v1727_v23 = vshrl.u32 %v19386_v47, 16  ;;  %v1732_v2 = vshll.u32 %v19389_v44, 16 }
  0xa5   : > { %v1710_v0 = vsel %vm18764_vm1, %v1703_v35, %v1708_v46  ;;  %18152 = vmatprep.mubr.msk.bf16.mxu0 %vm18669_vm4, %v23290_v59  ;;  %18182 = vmatprep.mubr.msk.bf16.mxu1 %vm18669_vm4, %v23290_v59  ;;  %v1718_v30 = vsel %vm18764_vm1, %v1711_v5, %v1716_v29  ;;  %v1735_v52 = vshrl.u32 %v19389_v44, 16  ;;  %v1740_v40 = vshll.u32 %v1134_v37, 16  ;;  %v17394_v5 = vld [vmem:[%s23248_s1 + $0x6] sm:$0x3] }
  0xa6   : > { %v1743_v35 = vshrl.u32 %v1134_v37, 16  ;;  %v1726_v31 = vsel %vm18764_vm1, %v1719_v33, %v1724_v42  ;;  %v1734_v51 = vsel %vm18764_vm1, %v1727_v23, %v1732_v2  ;;  %v1748_v46 = vshll.u32 %v1135_v22, 16 }
  0xa7   : > { %v2389_v36 = vcombine.low %v1693_v26, %v1702_v61  ;;  %v1742_v39 = vsel %vm18764_vm1, %v1735_v52, %v1740_v40  ;;  %v2390_v58 = vcombine.low %v1710_v0, %v1718_v30  ;;  %v2391_v8 = vcombine.low %v1726_v31, %v1734_v51  ;;  %v17111_v26 = vld.sshfl [vmem:[%s18729_s21 + $0xc] sm:$0x13 pattern:$0x75316420] }
  0xa8   : > { %v288_v21 = vcombine.high %v17109_v54, %v17109_v54  ;;  %v1750_v29 = vsel %vm18764_vm1, %v1743_v35, %v1748_v46  ;;  %v295_v37 = vrot.slane %v17109_v54, %v18736_v10  ;;  %v2878_v22 = vcombine.low %v18743_v14, %v18753_v19 }
  0xa9   : > { %v2399_v33 = vrot.slane %v2389_v36, %v18736_v10  ;;  %v2392_v61 = vcombine.low %v1742_v39, %v1750_v29  ;;  %v2406_v0 = vrot.slane %v2390_v58, %v18736_v10  ;;  %v2413_v42 = vrot.slane %v2391_v8, %v18736_v10 }
  0xaa   : > { %v302_v23 = vrot.slane %v288_v21, %v18736_v10  ;;  %v303_v2 = vcombine.high %v295_v37, %v295_v37  ;;  %v17262_v30 = vcombine.high %v18743_v14, %v18753_v19  ;;  %v2888_v36 = vrot.slane %v2878_v22, %v18736_v10  ;;  %v17282_v14 = vld.sshfl [vmem:[%s18729_s21] sm:$0x32 pattern:$0x75316420] }
  0xab   : > { %v6558_v54 = vsel %vm2738_vm0, %v17394_v5, 0  ;;  %v2420_v52 = vrot.slane %v2392_v61, %v18736_v10  ;;  %v2421_v40 = vcombine.low %v2399_v33, %v2406_v0  ;;  %v335_v39 = vcombine.high %v17111_v26, %v17111_v26 }
  0xac   : > { %v2880_v35 = vcombine.low %v295_v37, %v302_v23  ;;  %v2881_v31 = vcombine.low %v303_v2, %v18746_v16  ;;  %v2895_v58 = vrot.slane %v17262_v30, %v18736_v10  ;;  %v342_v8 = vrot.slane %v17111_v26, %v18736_v10  ;;  %v17283_v26 = vld.sshfl [vmem:[%s18729_s21 + $0x4] sm:$0x33 pattern:$0x75316420] }
  0xad   : > { %v2927_v21 = vcombine.low %v18762_v24, %v18845_v56  ;;  %v2422_v19 = vcombine.low %v2413_v42, %v2420_v52  ;;  %v2429_v51 = vrot.slane %v2421_v40, %v18736_v10  ;;  %v349_v5 = vrot.slane %v335_v39, %v18736_v10  ;;  %v19469_v30 = vld.sshfl [vmem:[%s18729_s21 + $0x8] sm:$0x32 pattern:$0x75316420] }
  0xae   : > { %v2902_v46 = vrot.slane %v2880_v35, %v18736_v10  ;;  %v2909_v29 = vrot.slane %v2881_v31, %v18736_v10  ;;  %v2910_v16 = vcombine.low %v2888_v36, %v2895_v58  ;;  %v350_v33 = vcombine.high %v342_v8, %v342_v8 }
  0xaf   : > { %v2928_v37 = vcombine.low %v18855_v18, %v342_v8  ;;  %v2436_v22 = vrot.slane %v2422_v19, %v18736_v10  ;;  %v2930_v24 = vcombine.low %v18860_v4, %v18866_v13  ;;  %v2937_v56 = vrot.slane %v2927_v21, %v18736_v10 }
  0xb0   : > { %v3722_v61 = vcombine.high %v17282_v14, %v17282_v14  ;;  %v2911_v0 = vcombine.low %v2902_v46, %v2909_v29  ;;  %v2918_v42 = vrot.slane %v2910_v16, %v18736_v10  ;;  %v2929_v23 = vcombine.low %v349_v5, %v350_v33  ;;  %v17113_v46 = vld.sshfl [vmem:[%s18729_s21 + $0x14] sm:$0x13 pattern:$0x75316420] }
  0xb1   : > { %v2944_v2 = vrot.slane %v2928_v37, %v18736_v10  ;;  %v2437_v36 = vcombine.low %v2429_v51, %v2436_v22  ;;  %v2958_v18 = vrot.slane %v2930_v24, %v18736_v10  ;;  %v3729_v52 = vrot.slane %v17282_v14, %v18736_v10  ;;  %v17569_v14 = vld [vmem:[%s23248_s1 + $0x8] sm:$0x3]  ;;  %v17639_v37 = vld [vmem:[%s23248_s1 + $0xa] sm:$0x3] }
  0xb2   : > { %v3736_v40 = vrot.slane %v3722_v61, %v18736_v10  ;;  %v2925_v35 = vrot.slane %v2911_v0, %v18736_v10  ;;  %v2951_v39 = vrot.slane %v2929_v23, %v18736_v10  ;;  %v3746_v58 = vcombine.high %v17283_v26, %v17283_v26 }
  0xb3   : > { %v2959_v31 = vcombine.low %v2937_v56, %v2944_v2  ;;  %18153 = vmatmul.mubr.msk.bf16.gmra.mrb[24].mxu0 %vm2698_vm2, %v2437_v36  ;;  %v3737_v8 = vcombine.high %v3729_v52, %v3729_v52  ;;  %v3753_v19 = vrot.slane %v17283_v26, %v18736_v10  ;;  %v3770_v51 = vcombine.high %v19469_v30, %v19469_v30 }
  0xb4   : > { %v3738_v21 = vcombine.high %v3736_v40, %v3736_v40  ;;  %v2926_v5 = vcombine.low %v2918_v42, %v2925_v35  ;;  %18236 = vmatprep.mubr.msk.bf16.mxu0 %vm18669_vm4, %v23290_v59  ;;  %v2960_v29 = vcombine.low %v2951_v39, %v2958_v18  ;;  %v3760_v33 = vrot.slane %v3746_v58, %v18736_v10 }
  0xb5   : > { %v2967_v16 = vrot.slane %v2959_v31, %v18736_v10  ;;  %v3761_v22 = vcombine.high %v3753_v19, %v3753_v19  ;;  %v3784_v24 = vrot.slane %v3770_v51, %v18736_v10  ;;  %v4389_v56 = vcombine.low %v3736_v40, %v3737_v8 }
  0xb6   : > { %v4390_v26 = vcombine.low %v3738_v21, %v3753_v19  ;;  %18183 = vmatmul.mubr.msk.bf16.vlgmr.msra.gmra.mrb[24].mxu1 %vm2698_vm2, %v2926_v5  ;;  %v2974_v61 = vrot.slane %v2960_v29, %v18736_v10  ;;  %v3762_v0 = vcombine.high %v3760_v33, %v3760_v33  ;;  %v8892_v42 = vsel %vm2738_vm0, %v17569_v14, 0 }
  0xb7   : > { %v382_v23 = vcombine.high %v17113_v46, %v17113_v46  ;;  %18289 = vmatpush3.bf16.msra.mxu1 %v6558_v54  ;;  %18186 = vmatprep.mubr.msk.bf16.mxu1 %vm18669_vm4, %v23290_v59  ;;  %v4391_v2 = vcombine.low %v3760_v33, %v3761_v22  ;;  %v4399_v36 = vrot.slane %v4389_v56, %v18736_v10  ;;  %v19500_v52 = vsel %vm2738_vm0, %v17639_v37, 0  ;;  %v17285_v54 = vld.sshfl [vmem:[%s18729_s21 + $0xc] sm:$0x33 pattern:$0x75316420] }
  0xb8   : > { %v4406_v18 = vrot.slane %v4390_v26, %v18736_v10  ;;  %v2975_v40 = vcombine.low %v2967_v16, %v2974_v61  ;;  %v4392_v35 = vcombine.low %v3762_v0, %v3784_v24  ;;  %v389_v39 = vrot.slane %v17113_v46, %v18736_v10  ;;  %18396 = vmatprep.subr.bf16.mxu1 %v23290_v59  ;;  %v17286_v46 = vld.sshfl [vmem:[%s18729_s21 + $0x10] sm:$0x32 pattern:$0x75316420] }
  0xb9   : > { %v396_v31 = vrot.slane %v382_v23, %v18736_v10  ;;  %v4413_v58 = vrot.slane %v4391_v2, %v18736_v10  ;;  %v17263_v21 = vcombine.high %v18860_v4, %v18866_v13  ;;  %v2979_v19 = vcombine.low %v18970_v20, %v18974_v28  ;;  %v17115_v56 = vld.sshfl [vmem:[%s18729_s21 + $0x1c] sm:$0x13 pattern:$0x75316420] }
  0xba   : > { %v4421_v8 = vcombine.low %v4399_v36, %v4406_v18  ;;  %v4420_v51 = vrot.slane %v4392_v35, %v18736_v10  ;;  %v397_v14 = vcombine.high %v389_v39, %v389_v39  ;;  %v3777_v29 = vrot.slane %v19469_v30, %v18736_v10 }
  0xbb   : > { %v2977_v5 = vcombine.low %v389_v39, %v396_v31  ;;  %v2986_v33 = vrot.slane %v17263_v21, %v18736_v10  ;;  %v3007_v37 = vrot.slane %v2979_v19, %v18736_v10  ;;  %v3794_v22 = vcombine.high %v17285_v54, %v17285_v54 }
  0xbc   : > { %v4429_v16 = vrot.slane %v4421_v8, %v18736_v10  ;;  %v4422_v4 = vcombine.low %v4413_v58, %v4420_v51  ;;  %v2978_v13 = vcombine.low %v397_v14, %v18966_v9  ;;  %v3801_v28 = vrot.slane %v17285_v54, %v18736_v10  ;;  %v17723_v14 = vld [vmem:[%s23248_s1 + $0xc] sm:$0x3] }
  0xbd   : > { %v2993_v20 = vrot.slane %v2977_v5, %v18736_v10  ;;  %v3808_v26 = vrot.slane %v3794_v22, %v18736_v10  ;;  %v3818_v61 = vcombine.high %v17286_v46, %v17286_v46  ;;  %v3825_v30 = vrot.slane %v17286_v46, %v18736_v10 }
  0xbe   : > { %v17311_v0 = vcombine.high %v3777_v29, %v3784_v24  ;;  %18187 = vmatmul.mubr.msk.bf16.gmra.mrb[28].mxu1 %vm2698_vm2, %v2975_v40  ;;  %v4436_v23 = vrot.slane %v4422_v4, %v18736_v10  ;;  %v3000_v2 = vrot.slane %v2978_v13, %v18736_v10  ;;  %v429_v18 = vcombine.high %v17115_v56, %v17115_v56 }
  0xbf   : > { %v3008_v36 = vcombine.low %v2986_v33, %v2993_v20  ;;  %18190 = vmatprep.mubr.msk.bf16.mxu1 %vm18669_vm4, %v23290_v59  ;;  %v3832_v9 = vrot.slane %v3818_v61, %v18736_v10  ;;  %v3833_v35 = vcombine.high %v3825_v30, %v3825_v30  ;;  %v4439_v39 = vcombine.low %v3801_v28, %v3808_v26 }
  0xc0   : > { %v17312_v31 = vcombine.high %v3801_v28, %v3808_v26  ;;  %v4437_v54 = vcombine.low %v4429_v16, %v4436_v23  ;;  %v3009_v58 = vcombine.low %v3000_v2, %v3007_v37  ;;  %v4448_v40 = vrot.slane %v17311_v0, %v18736_v10 }
  0xc1   : > { %v3016_v24 = vrot.slane %v3008_v36, %v18736_v10  ;;  %v4441_v8 = vcombine.low %v3832_v9, %v3833_v35  ;;  %v4455_v21 = vrot.slane %v4439_v39, %v18736_v10  ;;  %v436_v51 = vrot.slane %v17115_v56, %v18736_v10  ;;  %v17287_v56 = vld.sshfl [vmem:[%s18729_s21 + $0x14] sm:$0x33 pattern:$0x75316420] }
  0xc2   : > { %v4462_v19 = vrot.slane %v17312_v31, %v18736_v10  ;;  %18237 = vmatmul.mubr.msk.bf16.vlgmr.msra.gmra.mrb[28].mxu0 %vm2698_vm2, %v4437_v54  ;;  %v3023_v5 = vrot.slane %v3009_v58, %v18736_v10  ;;  %v443_v46 = vrot.slane %v429_v18, %v18736_v10  ;;  %v3027_v29 = vcombine.low %v19062_v41, %v19075_v50  ;;  %v17117_v36 = vld.sshfl [vmem:[%s18729_s21 + $0x24] sm:$0x13 pattern:$0x75316420] }
  0xc3   : > { %v17264_v16 = vcombine.high %v19062_v41, %v19075_v50  ;;  %18343 = vmatpush3.bf16.msra.mxu0 %v8892_v42  ;;  %18240 = vmatprep.mubr.msk.bf16.mxu0 %vm18669_vm4, %v23290_v59  ;;  %v4469_v33 = vrot.slane %v4441_v8, %v18736_v10  ;;  %v4470_v37 = vcombine.low %v4448_v40, %v4455_v21  ;;  %v19550_v4 = vsel %vm2738_vm0, %v17723_v14, 0  ;;  %v17288_v50 = vld.sshfl [vmem:[%s18729_s21 + $0x18] sm:$0x32 pattern:$0x75316420] }
  0xc4   : > { %v444_v22 = vcombine.high %v436_v51, %v436_v51  ;;  %v3024_v13 = vcombine.low %v3016_v24, %v3023_v5  ;;  %v3025_v20 = vcombine.low %v18981_v32, %v436_v51  ;;  %v3049_v28 = vrot.slane %v3027_v29, %v18736_v10  ;;  %18450 = vmatprep.subr.bf16.mxu0 %v23290_v59  ;;  %v17119_v40 = vld.sshfl [vmem:[%s18729_s21 + $0x2c] sm:$0x13 pattern:$0x75316420] }
  0xc5   : > { %v3056_v41 = vrot.slane %v17264_v16, %v18736_v10  ;;  %v4471_v42 = vcombine.low %v4462_v19, %v4469_v33  ;;  %v4478_v26 = vrot.slane %v4470_v37, %v18736_v10  ;;  %v3834_v30 = vcombine.high %v3832_v9, %v3832_v9 }
  0xc6   : > { %v3026_v61 = vcombine.low %v443_v46, %v444_v22  ;;  %18191 = vmatmul.mubr.msk.bf16.gmra.mrb[32].mxu1 %vm2698_vm2, %v3024_v13  ;;  %v3035_v0 = vrot.slane %v3025_v20, %v18736_v10  ;;  %v3842_v2 = vcombine.high %v17287_v56, %v17287_v56  ;;  %v3849_v32 = vrot.slane %v17287_v56, %v18736_v10 }
  0xc7   : > { %v3058_v23 = vcombine.low %v3049_v28, %v3056_v41  ;;  %v4485_v18 = vrot.slane %v4471_v42, %v18736_v10  ;;  %18194 = vmatprep.mubr.msk.bf16.mxu1 %vm18669_vm4, %v23290_v59  ;;  %v3866_v39 = vcombine.high %v17288_v50, %v17288_v50  ;;  %v3873_v9 = vrot.slane %v17288_v50, %v18736_v10  ;;  %v17289_v41 = vld.sshfl [vmem:[%s18729_s21 + $0x1c] sm:$0x33 pattern:$0x75316420] }
  0xc8   : > { %v3042_v35 = vrot.slane %v3026_v61, %v18736_v10  ;;  %v3856_v54 = vrot.slane %v3842_v2, %v18736_v10  ;;  %v3857_v58 = vcombine.high %v3849_v32, %v3849_v32  ;;  %v4487_v24 = vcombine.low %v3834_v30, %v3849_v32  ;;  %v17290_v30 = vld.sshfl [vmem:[%s18729_s21 + $0x20] sm:$0x32 pattern:$0x75316420] }
  0xc9   : > { %v3072_v31 = vrot.slane %v3058_v23, %v18736_v10  ;;  %v4486_v8 = vcombine.low %v4478_v26, %v4485_v18  ;;  %v3880_v19 = vrot.slane %v3866_v39, %v18736_v10  ;;  %v476_v51 = vcombine.high %v17117_v36, %v17117_v36 }
  0xca   : > { %v3057_v21 = vcombine.low %v3035_v0, %v3042_v35  ;;  %v3858_v14 = vcombine.high %v3856_v54, %v3856_v54  ;;  %v4488_v5 = vcombine.low %v3856_v54, %v3857_v58  ;;  %v4497_v46 = vrot.slane %v4487_v24, %v18736_v10 }
  0xcb   : > { %v483_v29 = vrot.slane %v17117_v36, %v18736_v10  ;;  %18241 = vmatmul.mubr.msk.bf16.gmra.mrb[32].mxu0 %vm2698_vm2, %v4486_v8  ;;  %v17313_v33 = vcombine.high %v3873_v9, %v3880_v19  ;;  %v490_v37 = vrot.slane %v476_v51, %v18736_v10  ;;  %v530_v22 = vrot.slane %v17119_v40, %v18736_v10  ;;  %v17291_v36 = vld.sshfl [vmem:[%s18729_s21 + $0x24] sm:$0x33 pattern:$0x75316420] }
  0xcc   : > { %v3065_v16 = vrot.slane %v3057_v21, %v18736_v10  ;;  %18244 = vmatprep.mubr.msk.bf16.mxu0 %vm18669_vm4, %v23290_v59  ;;  %v4489_v56 = vcombine.low %v3858_v14, %v3880_v19  ;;  %v4504_v13 = vrot.slane %v4488_v5, %v18736_v10  ;;  %v3076_v28 = vcombine.low %v19176_v3, %v19180_v63 }
  0xcd   : > { %v491_v20 = vcombine.high %v483_v29, %v483_v29  ;;  %v4518_v42 = vrot.slane %v17313_v33, %v18736_v10  ;;  %v3074_v26 = vcombine.low %v483_v29, %v490_v37  ;;  %v3077_v61 = vcombine.low %v19188_v43, %v530_v22 }
  0xce   : > { %v3073_v50 = vcombine.low %v3065_v16, %v3072_v31  ;;  %v4511_v0 = vrot.slane %v4489_v56, %v18736_v10  ;;  %v4519_v23 = vcombine.low %v4497_v46, %v4504_v13  ;;  %v3098_v32 = vrot.slane %v3076_v28, %v18736_v10  ;;  %v17121_v16 = vld.sshfl [vmem:[%s18729_s21 + $0x34] sm:$0x13 pattern:$0x75316420] }
  0xcf   : > { %v3075_v2 = vcombine.low %v491_v20, %v19163_v45  ;;  %v3084_v3 = vrot.slane %v3074_v26, %v18736_v10  ;;  %v3105_v63 = vrot.slane %v3077_v61, %v18736_v10  ;;  %v3890_v18 = vcombine.high %v17289_v41, %v17289_v41 }
  0xd0   : > { %18195 = vmatmul.mubr.msk.bf16.gmra.mrb[36].mxu1 %vm2698_vm2, %v3073_v50  ;;  %v3897_v35 = vrot.slane %v17289_v41, %v18736_v10  ;;  %v4520_v39 = vcombine.low %v4511_v0, %v4518_v42  ;;  %v4527_v43 = vrot.slane %v4519_v23, %v18736_v10  ;;  %v3914_v9 = vcombine.high %v17290_v30, %v17290_v30 }
  0xd1   : > { %18198 = vmatprep.mubr.msk.bf16.mxu1 %vm18669_vm4, %v23290_v59  ;;  %v3091_v45 = vrot.slane %v3075_v2, %v18736_v10  ;;  %v3107_v31 = vcombine.low %v3098_v32, %v3105_v63  ;;  %v3904_v54 = vrot.slane %v3890_v18, %v18736_v10  ;;  %v3921_v58 = vrot.slane %v17290_v30, %v18736_v10  ;;  %v17292_v63 = vld.sshfl [vmem:[%s18729_s21 + $0x28] sm:$0x32 pattern:$0x75316420] }
  0xd2   : > { %v3945_v24 = vrot.slane %v17291_v36, %v18736_v10  ;;  %v4534_v8 = vrot.slane %v4520_v39, %v18736_v10  ;;  %v3928_v19 = vrot.slane %v3914_v9, %v18736_v10  ;;  %v523_v51 = vcombine.high %v17119_v40, %v17119_v40 }
  0xd3   : > { %v3106_v21 = vcombine.low %v3084_v3, %v3091_v45  ;;  %v3121_v14 = vrot.slane %v3107_v31, %v18736_v10  ;;  %v3929_v5 = vcombine.high %v3921_v58, %v3921_v58  ;;  %v4536_v46 = vcombine.low %v3897_v35, %v3904_v54 }
  0xd4   : > { %v17314_v29 = vcombine.high %v3897_v35, %v3904_v54  ;;  %v4535_v33 = vcombine.low %v4527_v43, %v4534_v8  ;;  %v3930_v56 = vcombine.high %v3928_v19, %v3928_v19  ;;  %v537_v13 = vrot.slane %v523_v51, %v18736_v10 }
  0xd5   : > { %v3114_v37 = vrot.slane %v3106_v21, %v18736_v10  ;;  %v4538_v20 = vcombine.low %v3928_v19, %v3929_v5  ;;  %v4546_v28 = vrot.slane %v4536_v46, %v18736_v10  ;;  %v538_v50 = vcombine.high %v530_v22, %v530_v22  ;;  %v17123_v21 = vld.sshfl [vmem:[%s18729_s21 + $0x3c] sm:$0x13 pattern:$0x75316420] }
  0xd6   : > { %v4553_v41 = vrot.slane %v17314_v29, %v18736_v10  ;;  %18245 = vmatmul.mubr.msk.bf16.gmra.mrb[36].mxu0 %vm2698_vm2, %v4535_v33  ;;  %v4539_v42 = vcombine.low %v3930_v56, %v3945_v24  ;;  %v570_v26 = vcombine.high %v17121_v16, %v17121_v16  ;;  %v577_v61 = vrot.slane %v17121_v16, %v18736_v10  ;;  %v17294_v33 = vld.sshfl [vmem:[%s18729_s21 + $0x30] sm:$0x32 pattern:$0x75316420] }
  0xd7   : > { %v3122_v40 = vcombine.low %v3114_v37, %v3121_v14  ;;  %18248 = vmatprep.mubr.msk.bf16.mxu0 %vm18669_vm4, %v23290_v59  ;;  %v4560_v30 = vrot.slane %v4538_v20, %v18736_v10  ;;  %v3123_v23 = vcombine.low %v537_v13, %v538_v50  ;;  %v3124_v2 = vcombine.low %v19294_v62, %v19302_v60 }
  0xd8   : > { %v4568_v0 = vcombine.low %v4546_v28, %v4553_v41  ;;  %v4567_v22 = vrot.slane %v4539_v42, %v18736_v10  ;;  %v584_v32 = vrot.slane %v570_v26, %v18736_v10  ;;  %v17265_v3 = vcombine.high %v19294_v62, %v19302_v60 }
  0xd9   : > { %18199 = vmatmul.mubr.msk.bf16.gmra.mrb[40].mxu1 %vm2698_vm2, %v3122_v40  ;;  %v3938_v18 = vcombine.high %v17291_v36, %v17291_v36  ;;  %v3133_v39 = vrot.slane %v3123_v23, %v18736_v10  ;;  %v3140_v43 = vrot.slane %v3124_v2, %v18736_v10  ;;  %v3953_v45 = vcombine.high %v3945_v24, %v3945_v24 }
  0xda   : > { %v4576_v35 = vrot.slane %v4568_v0, %v18736_v10  ;;  %18202 = vmatprep.mubr.msk.bf16.mxu1 %vm18669_vm4, %v23290_v59  ;;  %v4569_v9 = vcombine.low %v4560_v30, %v4567_v22  ;;  %v3126_v31 = vcombine.low %v577_v61, %v584_v32  ;;  %v3147_v54 = vrot.slane %v17265_v3, %v18736_v10 }
  0xdb   : > { %v3952_v62 = vrot.slane %v3938_v18, %v18736_v10  ;;  %v3155_v60 = vcombine.low %v3133_v39, %v3140_v43  ;;  %v3962_v58 = vcombine.high %v17292_v63, %v17292_v63  ;;  %v3969_v36 = vrot.slane %v17292_v63, %v18736_v10 }
  0xdc   : > { %v4588_v8 = vcombine.low %v19191_v27, %v19196_v38  ;;  %v4583_v19 = vrot.slane %v4569_v9, %v18736_v10  ;;  %v3154_v51 = vrot.slane %v3126_v31, %v18736_v10  ;;  %v585_v16 = vcombine.high %v577_v61, %v577_v61  ;;  %v17125_v9 = vld.sshfl [vmem:[%s18729_s21 + $0x44] sm:$0x13 pattern:$0x75316420] }
  0xdd   : > { %v3954_v24 = vcombine.high %v3952_v62, %v3952_v62  ;;  %v4585_v14 = vcombine.low %v3952_v62, %v3953_v45  ;;  %v3163_v5 = vrot.slane %v3155_v60, %v18736_v10  ;;  %v3976_v46 = vrot.slane %v3962_v58, %v18736_v10 }
  0xde   : > { %v4616_v29 = vrot.slane %v4588_v8, %v18736_v10  ;;  %v4584_v37 = vcombine.low %v4576_v35, %v4583_v19  ;;  %v3156_v56 = vcombine.low %v3147_v54, %v3154_v51  ;;  %v617_v20 = vcombine.high %v17123_v21, %v17123_v21 }
  0xdf   : > { %v4595_v13 = vrot.slane %v4585_v14, %v18736_v10  ;;  %v4586_v28 = vcombine.low %v3954_v24, %v3976_v46  ;;  %v17315_v41 = vcombine.high %v3969_v36, %v3976_v46  ;;  %v624_v50 = vrot.slane %v17123_v21, %v18736_v10 }
  0xe0   : > { %v3172_v40 = vcombine.low %v585_v16, %v19363_v53  ;;  %18249 = vmatmul.mubr.msk.bf16.gmra.mrb[40].mxu0 %vm2698_vm2, %v4584_v37  ;;  %v3170_v42 = vrot.slane %v3156_v56, %v18736_v10  ;;  %v631_v26 = vrot.slane %v617_v20, %v18736_v10  ;;  %v3173_v61 = vcombine.low %v19374_v11, %v19379_v34 }
  0xe1   : > { %v4010_v30 = vcombine.high %v17294_v33, %v17294_v33  ;;  %18252 = vmatprep.mubr.msk.bf16.mxu0 %vm18669_vm4, %v23290_v59  ;;  %v4602_v0 = vrot.slane %v4586_v28, %v18736_v10  ;;  %v4609_v23 = vrot.slane %v17315_v41, %v18736_v10  ;;  %v632_v2 = vcombine.high %v624_v50, %v624_v50 }
  0xe2   : > { %v3174_v53 = vcombine.low %v19383_v49, %v624_v50  ;;  %v3171_v22 = vcombine.low %v3163_v5, %v3170_v42  ;;  %v3182_v32 = vrot.slane %v3172_v40, %v18736_v10  ;;  %v3189_v3 = vrot.slane %v3173_v61, %v18736_v10 }
  0xe3   : > { %v4017_v63 = vrot.slane %v17294_v33, %v18736_v10  ;;  %v4617_v11 = vcombine.low %v4595_v13, %v4602_v0  ;;  %v4618_v34 = vcombine.low %v4609_v23, %v4616_v29  ;;  %v3175_v18 = vcombine.low %v631_v26, %v632_v2  ;;  %v17127_v26 = vld.sshfl [vmem:[%s18729_s21 + $0x4c] sm:$0x13 pattern:$0x75316420] }
  0xe4   : > { %v3196_v35 = vrot.slane %v3174_v53, %v18736_v10  ;;  %18203 = vmatmul.mubr.msk.bf16.gmra.mrb[44].mxu1 %vm2698_vm2, %v3171_v22  ;;  %v3204_v39 = vcombine.low %v3182_v32, %v3189_v3  ;;  %v4024_v43 = vrot.slane %v4010_v30, %v18736_v10  ;;  %v17316_v49 = vcombine.high %v19191_v27, %v19196_v38  ;;  %v17296_v27 = vld.sshfl [vmem:[%s18729_s21 + $0x38] sm:$0x32 pattern:$0x75316420] }
  0xe5   : > { %v4025_v45 = vcombine.high %v4017_v63, %v4017_v63  ;;  %v4625_v31 = vrot.slane %v4617_v11, %v18736_v10  ;;  %v4632_v54 = vrot.slane %v4618_v34, %v18736_v10  ;;  %18206 = vmatprep.mubr.msk.bf16.mxu1 %vm18669_vm4, %v23290_v59  ;;  %v3203_v62 = vrot.slane %v3175_v18, %v18736_v10  ;;  %v17298_v34 = vld.sshfl [vmem:[%s18729_s21 + $0x40] sm:$0x32 pattern:$0x75316420] }
  0xe6   : > { %v4637_v60 = vcombine.low %v19316_v48, %v19321_v12  ;;  %v3212_v58 = vrot.slane %v3204_v39, %v18736_v10  ;;  %v4026_v36 = vcombine.high %v4024_v43, %v4024_v43  ;;  %v4644_v21 = vrot.slane %v17316_v49, %v18736_v10 }
  0xe7   : > { %v4635_v8 = vcombine.low %v4024_v43, %v4025_v45  ;;  %v4633_v38 = vcombine.low %v4625_v31, %v4632_v54  ;;  %v3205_v19 = vcombine.low %v3196_v35, %v3203_v62  ;;  %v664_v24 = vcombine.high %v17125_v9, %v17125_v9  ;;  %v23291_v31 = vld [vmem:[#allocation6_spill] sm:$0xff]  ;;  %v23292_v54 = vld [vmem:[#allocation5_spill] sm:$0xff] }
  0xe8   : > { %v4665_v51 = vrot.slane %v4637_v60, %v18736_v10  ;;  %v4636_v14 = vcombine.low %v4026_v36, %v19310_v6  ;;  %v671_v46 = vrot.slane %v17125_v9, %v18736_v10  ;;  %v3221_v48 = vcombine.low %v18791_v57, %v18801_v1  ;;  %v17299_v60 = vld.sshfl [vmem:[%s18729_s21 + $0x44] sm:$0x33 pattern:$0x75316420] }
  0xe9   : > { %v4651_v5 = vrot.slane %v4635_v8, %v18736_v10  ;;  %18253 = vmatmul.mubr.msk.bf16.gmra.mrb[44].mxu0 %vm2698_vm2, %v4633_v38  ;;  %v3219_v12 = vrot.slane %v3205_v19, %v18736_v10  ;;  %v678_v29 = vrot.slane %v664_v24, %v18736_v10  ;;  %v17266_v16 = vcombine.high %v18791_v57, %v18801_v1 }
  0xea   : > { %v4058_v33 = vcombine.high %v17296_v27, %v17296_v27  ;;  %18256 = vmatprep.mubr.msk.bf16.mxu0 %vm18669_vm4, %v23290_v59  ;;  %v4658_v6 = vrot.slane %v4636_v14, %v18736_v10  ;;  %v679_v56 = vcombine.high %v671_v46, %v671_v46  ;;  %v3231_v13 = vrot.slane %v3221_v48, %v18736_v10 }
  0xeb   : > { %v4666_v37 = vcombine.low %v4644_v21, %v4651_v5  ;;  %v3220_v20 = vcombine.low %v3212_v58, %v3219_v12  ;;  %v3223_v28 = vcombine.low %v671_v46, %v678_v29  ;;  %v3238_v41 = vrot.slane %v17266_v16, %v18736_v10  ;;  %v23293_v21 = vld [vmem:[#allocation4_spill] sm:$0xff] }
  0xec   : > { %v4065_v50 = vrot.slane %v17296_v27, %v18736_v10  ;;  %v4667_v40 = vcombine.low %v4658_v6, %v4665_v51  ;;  %v3224_v57 = vcombine.low %v679_v56, %v18807_v7  ;;  %v4072_v1 = vrot.slane %v4058_v33, %v18736_v10  ;;  %v17129_v12 = vld.sshfl [vmem:[%s18729_s21 + $0x54] sm:$0x13 pattern:$0x75316420] }
  0xed   : > { %v4674_v42 = vrot.slane %v4666_v37, %v18736_v10  ;;  %18207 = vmatmul.mubr.msk.bf16.gmra.mrb[48].mxu1 %vm2698_vm2, %v3220_v20  ;;  %v3245_v61 = vrot.slane %v3223_v28, %v18736_v10  ;;  %v3253_v30 = vcombine.low %v3231_v13, %v3238_v41  ;;  %v4685_v0 = vcombine.low %v19386_v47, %v19389_v44 }
  0xee   : > { %v17318_v23 = vcombine.high %v19386_v47, %v19389_v44  ;;  %v4681_v2 = vrot.slane %v4667_v40, %v18736_v10  ;;  %18210 = vmatprep.mubr.msk.bf16.mxu1 %vm18669_vm4, %v23290_v59  ;;  %v3252_v7 = vrot.slane %v3224_v57, %v18736_v10  ;;  %v4683_v53 = vcombine.low %v19367_v17, %v4072_v1 }
  0xef   : > { %v17317_v22 = vcombine.high %v4065_v50, %v4072_v1  ;;  %v3261_v32 = vrot.slane %v3253_v30, %v18736_v10  ;;  %v4707_v3 = vrot.slane %v4685_v0, %v18736_v10  ;;  %v711_v11 = vcombine.high %v17127_v26, %v17127_v26 }
  0xf0   : > { %v4714_v63 = vrot.slane %v17318_v23, %v18736_v10  ;;  %v4682_v47 = vcombine.low %v4674_v42, %v4681_v2  ;;  %v3254_v44 = vcombine.low %v3245_v61, %v3252_v7  ;;  %v4693_v18 = vrot.slane %v4683_v53, %v18736_v10 }
  0xf1   : > { %v4700_v35 = vrot.slane %v17317_v22, %v18736_v10  ;;  %v718_v17 = vrot.slane %v17127_v26, %v18736_v10  ;;  %v725_v43 = vrot.slane %v711_v11, %v18736_v10  ;;  %v3270_v45 = vcombine.low %v18814_v15, %v18900_v55  ;;  %v19724_v55 = vld.sshfl [vmem:[%s18729_s21 + $0x48] sm:$0x32 pattern:$0x75316420]  ;;  %v23294_v11 = vld [vmem:[#allocation9_spill] sm:$0xff] }
  0xf2   : > { %v4716_v39 = vcombine.low %v4707_v3, %v4714_v63  ;;  %18257 = vmatmul.mubr.msk.bf16.gmra.mrb[48].mxu0 %vm2698_vm2, %v4682_v47  ;;  %v3268_v49 = vrot.slane %v3254_v44, %v18736_v10  ;;  %v3273_v62 = vcombine.low %v23292_v54, %v23291_v31  ;;  %v4106_v58 = vcombine.high %v17298_v34, %v17298_v34  ;;  %v17301_v44 = vld.sshfl [vmem:[%s18729_s21 + $0x4c] sm:$0x33 pattern:$0x75316420] }
  0xf3   : > { %v4715_v9 = vcombine.low %v4693_v18, %v4700_v35  ;;  %18260 = vmatprep.mubr.msk.bf16.mxu0 %vm18669_vm4, %v23290_v59  ;;  %v726_v8 = vcombine.high %v718_v17, %v718_v17  ;;  %v3271_v27 = vcombine.low %v23293_v21, %v718_v17  ;;  %v3280_v15 = vrot.slane %v3270_v45, %v18736_v10  ;;  %v23296_v45 = vld [vmem:[#allocation7_spill] sm:$0xff] }
  0xf4   : > { %v4730_v36 = vrot.slane %v4716_v39, %v18736_v10  ;;  %v3269_v38 = vcombine.low %v3261_v32, %v3268_v49  ;;  %v3301_v51 = vrot.slane %v3273_v62, %v18736_v10  ;;  %v4113_v24 = vrot.slane %v17298_v34, %v18736_v10  ;;  %v23295_v34 = vld [vmem:[#allocation8_spill] sm:$0xff]  ;;  %v17131_v62 = vld.sshfl [vmem:[%s18729_s21 + $0x5c] sm:$0x13 pattern:$0x75316420] }
  0xf5   : > { %v4723_v19 = vrot.slane %v4715_v9, %v18736_v10  ;;  %v3272_v14 = vcombine.low %v725_v43, %v726_v8  ;;  %v3287_v5 = vrot.slane %v3271_v27, %v18736_v10  ;;  %v4120_v46 = vrot.slane %v4106_v58, %v18736_v10  ;;  %v17302_v43 = vld.sshfl [vmem:[%s18729_s21 + $0x50] sm:$0x32 pattern:$0x75316420] }
  0xf6   : > { %v4130_v48 = vcombine.high %v17299_v60, %v17299_v60  ;;  %18211 = vmatmul.mubr.msk.bf16.gmra.mrb[52].mxu1 %vm2698_vm2, %v3269_v38  ;;  %v4121_v16 = vcombine.high %v4113_v24, %v4113_v24  ;;  %v4137_v33 = vrot.slane %v17299_v60, %v18736_v10  ;;  %v4154_v6 = vcombine.high %v19724_v55, %v19724_v55 }
  0xf7   : > { %v4731_v29 = vcombine.low %v4723_v19, %v4730_v36  ;;  %18214 = vmatprep.mubr.msk.bf16.mxu1 %vm18669_vm4, %v23290_v59  ;;  %v3294_v37 = vrot.slane %v3272_v14, %v18736_v10  ;;  %v3302_v56 = vcombine.low %v3280_v15, %v3287_v5  ;;  %v4122_v13 = vcombine.high %v4120_v46, %v4120_v46 }
  0xf8   : > { %v4144_v20 = vrot.slane %v4130_v48, %v18736_v10  ;;  %v4145_v28 = vcombine.high %v4137_v33, %v4137_v33  ;;  %v4168_v41 = vrot.slane %v4154_v6, %v18736_v10  ;;  %v4732_v50 = vcombine.low %v4120_v46, %v4121_v16 }
  0xf9   : > { %v758_v40 = vcombine.high %v17129_v12, %v17129_v12  ;;  %v3303_v42 = vcombine.low %v3294_v37, %v3301_v51  ;;  %v3310_v57 = vrot.slane %v3302_v56, %v18736_v10  ;;  %v4733_v26 = vcombine.low %v4122_v13, %v4137_v33 }
  0xfa   : > { %v4146_v1 = vcombine.high %v4144_v20, %v4144_v20  ;;  %18261 = vmatmul.mubr.msk.bf16.gmra.mrb[52].mxu0 %vm2698_vm2, %v4731_v29  ;;  %v4734_v61 = vcombine.low %v4144_v20, %v4145_v28  ;;  %v4742_v30 = vrot.slane %v4732_v50, %v18736_v10  ;;  %v765_v0 = vrot.slane %v17129_v12, %v18736_v10  ;;  %v23298_v50 = vld [vmem:[#allocation11_spill] sm:$0xff] }
  0xfb   : > { %v772_v23 = vrot.slane %v758_v40, %v18736_v10  ;;  %18264 = vmatprep.mubr.msk.bf16.mxu0 %vm18669_vm4, %v23290_v59  ;;  %v3317_v2 = vrot.slane %v3303_v42, %v18736_v10  ;;  %v4749_v53 = vrot.slane %v4733_v26, %v18736_v10  ;;  %v17267_v22 = vcombine.high %v23292_v54, %v23291_v31 }
  0xfc   : > { %v4735_v7 = vcombine.low %v4146_v1, %v4168_v41  ;;  %v4756_v32 = vrot.slane %v4734_v61, %v18736_v10  ;;  %v773_v3 = vcombine.high %v765_v0, %v765_v0  ;;  %v3322_v47 = vcombine.low %v23295_v34, %v23294_v11 }
  0xfd   : > { %v3320_v63 = vcombine.low %v765_v0, %v772_v23  ;;  %v3318_v18 = vcombine.low %v3310_v57, %v3317_v2  ;;  %v4764_v39 = vcombine.low %v4742_v30, %v4749_v53  ;;  %v3329_v17 = vrot.slane %v17267_v22, %v18736_v10  ;;  %v17303_v57 = vld.sshfl [vmem:[%s18729_s21 + $0x54] sm:$0x33 pattern:$0x75316420]  ;;  %v23299_v30 = vld [vmem:[#allocation10_spill] sm:$0xff] }
  0xfe   : > { %v4763_v35 = vrot.slane %v4735_v7, %v18736_v10  ;;  %v3321_v49 = vcombine.low %v773_v3, %v23296_v45  ;;  %v3350_v31 = vrot.slane %v3322_v47, %v18736_v10  ;;  %v4161_v54 = vrot.slane %v19724_v55, %v18736_v10  ;;  %v17304_v23 = vld.sshfl [vmem:[%s18729_s21 + $0x58] sm:$0x32 pattern:$0x75316420] }
  0xff   : > { %v3336_v9 = vrot.slane %v3320_v63, %v18736_v10  ;;  %18215 = vmatmul.mubr.msk.bf16.gmra.mrb[56].mxu1 %vm2698_vm2, %v3318_v18  ;;  %v4772_v58 = vrot.slane %v4764_v39, %v18736_v10  ;;  %v4178_v36 = vcombine.high %v17301_v44, %v17301_v44  ;;  %v4185_v8 = vrot.slane %v17301_v44, %v18736_v10 }
 0x100   : > { %v4765_v60 = vcombine.low %v4756_v32, %v4763_v35  ;;  %18218 = vmatprep.mubr.msk.bf16.mxu1 %vm18669_vm4, %v23290_v59  ;;  %v3343_v21 = vrot.slane %v3321_v49, %v18736_v10  ;;  %v4202_v15 = vcombine.high %v17302_v43, %v17302_v43  ;;  %v4209_v38 = vrot.slane %v17302_v43, %v18736_v10  ;;  %v17133_v35 = vld.sshfl [vmem:[%s18729_s21 + $0x64] sm:$0x13 pattern:$0x75316420] }
 0x101   : > { %v3351_v27 = vcombine.low %v3329_v17, %v3336_v9  ;;  %v4192_v19 = vrot.slane %v4178_v36, %v18736_v10  ;;  %v17319_v51 = vcombine.high %v4161_v54, %v4168_v41  ;;  %v805_v24 = vcombine.high %v17131_v62, %v17131_v62  ;;  %v23297_v41 = vld [vmem:[#allocation12_spill] sm:$0xff] }
 0x102   : > { %v4779_v55 = vrot.slane %v4765_v60, %v18736_v10  ;;  %v3352_v14 = vcombine.low %v3343_v21, %v3350_v31  ;;  %v4216_v46 = vrot.slane %v4202_v15, %v18736_v10  ;;  %v4217_v48 = vcombine.high %v4209_v38, %v4209_v38 }
 0x103   : > { %v3359_v5 = vrot.slane %v3351_v27, %v18736_v10  ;;  %v4782_v29 = vcombine.low %v4185_v8, %v4192_v19  ;;  %v17320_v16 = vcombine.high %v4185_v8, %v4192_v19  ;;  %v4791_v33 = vrot.slane %v17319_v51, %v18736_v10 }
 0x104   : > { %v4780_v12 = vcombine.low %v4772_v58, %v4779_v55  ;;  %v3366_v6 = vrot.slane %v3352_v14, %v18736_v10  ;;  %v4784_v37 = vcombine.low %v4216_v46, %v4217_v48  ;;  %v812_v56 = vrot.slane %v17131_v62, %v18736_v10  ;;  %v17135_v62 = vld.sshfl [vmem:[%s18729_s21 + $0x6c] sm:$0x13 pattern:$0x75316420] }
 0x105   : > { %v819_v13 = vrot.slane %v805_v24, %v18736_v10  ;;  %v4798_v20 = vrot.slane %v4782_v29, %v18736_v10  ;;  %v4805_v28 = vrot.slane %v17320_v16, %v18736_v10  ;;  %v3370_v40 = vcombine.low %v23298_v50, %v23297_v41  ;;  %v17305_v14 = vld.sshfl [vmem:[%s18729_s21 + $0x5c] sm:$0x33 pattern:$0x75316420]  ;;  %v23301_v29 = vld [vmem:[#allocation14_spill] sm:$0xff] }
 0x106   : > { %18265 = vmatmul.mubr.msk.bf16.gmra.mrb[56].mxu0 %vm2698_vm2, %v4780_v12  ;;  %v17268_v42 = vcombine.high %v23298_v50, %v23297_v41  ;;  %v3367_v1 = vcombine.low %v3359_v5, %v3366_v6  ;;  %v4812_v26 = vrot.slane %v4784_v37, %v18736_v10  ;;  %v820_v61 = vcombine.high %v812_v56, %v812_v56  ;;  %v23300_v12 = vld [vmem:[#allocation15_spill] sm:$0xff]  ;;  %v23303_v41 = vld [vmem:[#allocation13_spill] sm:$0xff] }
 0x107   : > { %18268 = vmatprep.mubr.msk.bf16.mxu0 %vm18669_vm4, %v23290_v59  ;;  %v3368_v0 = vcombine.low %v23299_v30, %v812_v56  ;;  %v4813_v2 = vcombine.low %v4791_v33, %v4798_v20  ;;  %v3392_v7 = vrot.slane %v3370_v40, %v18736_v10  ;;  %v4218_v22 = vcombine.high %v4216_v46, %v4216_v46  ;;  %v23302_v56 = vld [vmem:[#allocation16_spill] sm:$0xff]  ;;  %v17306_v20 = vld.sshfl [vmem:[%s18729_s21 + $0x60] sm:$0x32 pattern:$0x75316420] }
 0x108   : > { %v3399_v53 = vrot.slane %v17268_v42, %v18736_v10  ;;  %18219 = vmatmul.mubr.msk.bf16.gmra.mrb[60].mxu1 %vm2698_vm2, %v3367_v1  ;;  %v4814_v32 = vcombine.low %v4805_v28, %v4812_v26  ;;  %v3369_v3 = vcombine.low %v819_v13, %v820_v61  ;;  %v4226_v11 = vcombine.high %v17303_v57, %v17303_v57  ;;  %v17307_v42 = vld.sshfl [vmem:[%s18729_s21 + $0x64] sm:$0x33 pattern:$0x75316420] }
 0x109   : > { %v3378_v63 = vrot.slane %v3368_v0, %v18736_v10  ;;  %v4821_v34 = vrot.slane %v4813_v2, %v18736_v10  ;;  %18222 = vmatprep.mubr.msk.bf16.mxu1 %vm18669_vm4, %v23290_v59  ;;  %v4233_v44 = vrot.slane %v17303_v57, %v18736_v10  ;;  %v4250_v18 = vcombine.high %v17304_v23, %v17304_v23 }
 0x10a   : > { %v3401_v47 = vcombine.low %v3392_v7, %v3399_v53  ;;  %v4828_v39 = vrot.slane %v4814_v32, %v18736_v10  ;;  %v3385_v17 = vrot.slane %v3369_v3, %v18736_v10  ;;  %v4240_v43 = vrot.slane %v4226_v11, %v18736_v10 }
 0x10b   : > { %v4257_v45 = vrot.slane %v17304_v23, %v18736_v10  ;;  %v4241_v9 = vcombine.high %v4233_v44, %v4233_v44  ;;  %v4264_v31 = vrot.slane %v4250_v18, %v18736_v10  ;;  %v4830_v54 = vcombine.low %v4218_v22, %v4233_v44 }
 0x10c   : > { %v3415_v49 = vrot.slane %v3401_v47, %v18736_v10  ;;  %v4829_v60 = vcombine.low %v4821_v34, %v4828_v39  ;;  %v3400_v58 = vcombine.low %v3378_v63, %v3385_v17  ;;  %v4242_v36 = vcombine.high %v4240_v43, %v4240_v43 }
 0x10d   : > { %v852_v8 = vcombine.high %v17133_v35, %v17133_v35  ;;  %v4831_v21 = vcombine.low %v4240_v43, %v4241_v9  ;;  %v17321_v27 = vcombine.high %v4257_v45, %v4264_v31  ;;  %v4840_v15 = vrot.slane %v4830_v54, %v18736_v10  ;;  %v17308_v9 = vld.sshfl [vmem:[%s18729_s21 + $0x68] sm:$0x32 pattern:$0x75316420] }
 0x10e   : > { %v859_v38 = vrot.slane %v17133_v35, %v18736_v10  ;;  %18269 = vmatmul.mubr.msk.bf16.gmra.mrb[60].mxu0 %vm2698_vm2, %v4829_v60  ;;  %v3408_v55 = vrot.slane %v3400_v58, %v18736_v10  ;;  %v4832_v19 = vcombine.low %v4242_v36, %v4264_v31  ;;  %v906_v24 = vrot.slane %v17135_v62, %v18736_v10  ;;  %v17309_v58 = vld.sshfl [vmem:[%s18729_s21 + $0x6c] sm:$0x33 pattern:$0x75316420] }
 0x10f   : > { %v866_v51 = vrot.slane %v852_v8, %v18736_v10  ;;  %18272 = vmatprep.mubr.msk.bf16.mxu0 %vm18669_vm4, %v23290_v59  ;;  %v4847_v5 = vrot.slane %v4831_v21, %v18736_v10  ;;  %v4861_v46 = vrot.slane %v17321_v27, %v18736_v10  ;;  %v3419_v16 = vcombine.low %v23301_v29, %v23300_v12 }
 0x110   : > { %v867_v48 = vcombine.high %v859_v38, %v859_v38  ;;  %v3416_v33 = vcombine.low %v3408_v55, %v3415_v49  ;;  %v4854_v6 = vrot.slane %v4832_v19, %v18736_v10  ;;  %v3420_v13 = vcombine.low %v23302_v56, %v906_v24  ;;  %v17367_v56 = vld.sshfl [vmem:[%s18729_s21 + $0xc] sm:$0x13 pattern:$0x75316420] }
 0x111   : > { %v3417_v37 = vcombine.low %v859_v38, %v866_v51  ;;  %v4862_v28 = vcombine.low %v4840_v15, %v4847_v5  ;;  %v3441_v40 = vrot.slane %v3419_v16, %v18736_v10  ;;  %v4274_v57 = vcombine.high %v17305_v14, %v17305_v14  ;;  %v17366_v51 = vld.sshfl [vmem:[%s18729_s21 + $0x8] sm:$0x33 pattern:$0x75316420] }
 0x112   : > { %v3418_v50 = vcombine.low %v867_v48, %v23303_v41  ;;  %18223 = vmatmul.mubr.msk.bf16.gmra.mrb[64].mxu1 %vm2698_vm2, %v3416_v33  ;;  %v4863_v1 = vcombine.low %v4854_v6, %v4861_v46  ;;  %v3448_v61 = vrot.slane %v3420_v13, %v18736_v10  ;;  %v4281_v30 = vrot.slane %v17305_v14, %v18736_v10 }
 0x113   : > { %v3427_v26 = vrot.slane %v3417_v37, %v18736_v10  ;;  %v4870_v0 = vrot.slane %v4862_v28, %v18736_v10  ;;  %18226 = vmatprep.mubr.msk.bf16.mxu1 %vm18669_vm4, %v23290_v59  ;;  %v4288_v2 = vrot.slane %v4274_v57, %v18736_v10  ;;  %v4298_v7 = vcombine.high %v17306_v20, %v17306_v20 }
 0x114   : > { %v3434_v23 = vrot.slane %v3418_v50, %v18736_v10  ;;  %v4877_v53 = vrot.slane %v4863_v1, %v18736_v10  ;;  %v3450_v22 = vcombine.low %v3441_v40, %v3448_v61  ;;  %v4305_v32 = vrot.slane %v17306_v20, %v18736_v10 }
 0x115   : > { %v4329_v3 = vrot.slane %v17307_v42, %v18736_v10  ;;  %v4312_v11 = vrot.slane %v4298_v7, %v18736_v10  ;;  %v4879_v34 = vcombine.low %v4281_v30, %v4288_v2  ;;  %v17322_v47 = vcombine.high %v4281_v30, %v4288_v2 }
 0x116   : > { %v3449_v63 = vcombine.low %v3427_v26, %v3434_v23  ;;  %v4878_v44 = vcombine.low %v4870_v0, %v4877_v53  ;;  %v3464_v18 = vrot.slane %v3450_v22, %v18736_v10  ;;  %v4313_v35 = vcombine.high %v4305_v32, %v4305_v32  ;;  %v17368_v26 = vld.sshfl [vmem:[%s18729_s21 + $0x10] sm:$0x33 pattern:$0x75316420] }
 0x117   : > { %v899_v39 = vcombine.high %v17135_v62, %v17135_v62  ;;  %v4314_v43 = vcombine.high %v4312_v11, %v4312_v11  ;;  %v4889_v45 = vrot.slane %v4879_v34, %v18736_v10  ;;  %v4896_v49 = vrot.slane %v17322_v47, %v18736_v10  ;;  %v17369_v34 = vld.sshfl [vmem:[%s18729_s21 + $0x14] sm:$0x13 pattern:$0x75316420] }
 0x118   : > { %v3457_v17 = vrot.slane %v3449_v63, %v18736_v10  ;;  %18273 = vmatmul.mubr.msk.bf16.gmra.mrb[64].mxu0 %vm2698_vm2, %v4878_v44  ;;  %v4881_v31 = vcombine.low %v4312_v11, %v4313_v35  ;;  %v914_v60 = vcombine.high %v906_v24, %v906_v24  ;;  %v4322_v36 = vcombine.high %v17307_v42, %v17307_v42 }
 0x119   : > { %v913_v54 = vrot.slane %v899_v39, %v18736_v10  ;;  %18276 = vmatprep.mubr.msk.bf16.mxu0 %vm18669_vm4, %v23290_v59  ;;  %v4882_v8 = vcombine.low %v4314_v43, %v4329_v3  ;;  %v4911_v21 = vcombine.low %v4889_v45, %v4896_v49  ;;  %v4337_v27 = vcombine.high %v4329_v3, %v4329_v3  ;;  %v19894_v39 = vpop.f32.mrb[0].mxu0 }
 0x11a   : > { %v3465_v62 = vcombine.low %v3457_v17, %v3464_v18  ;;  %v4903_v15 = vrot.slane %v4881_v31, %v18736_v10  ;;  %v4336_v55 = vrot.slane %v4322_v36, %v18736_v10  ;;  %v4346_v19 = vcombine.high %v17308_v9, %v17308_v9  ;;  %v19896_v17 = vpop.f32.mrb[0].mxu1  ;;  %v18130_v31 = vpop.f32.mrb[1].mxu0 }
 0x11b   : > { %v3466_v38 = vcombine.low %v913_v54, %v914_v60  ;;  %v4910_v24 = vrot.slane %v4882_v8, %v18736_v10  ;;  %v4919_v14 = vrot.slane %v4911_v21, %v18736_v10  ;;  %v4353_v5 = vrot.slane %v17308_v9, %v18736_v10  ;;  %23304 = vst [vmem:[#allocation6_spill] sm:$0xff] %v19896_v17  ;;  %v18158_v54 = vpop.f32.mrb[1].mxu1  ;;  %v19910_v21 = vpop.f32.mrb[2].mxu0 }
 0x11c   : > { %18227 = vmatmul.mubr.msk.bf16.gmra.mrb[68].mxu1 %vm2698_vm2, %v3465_v62  ;;  %v4370_v46 = vcombine.high %v17309_v58, %v17309_v58  ;;  %v4338_v12 = vcombine.high %v4336_v55, %v4336_v55  ;;  %v4360_v29 = vrot.slane %v4346_v19, %v18736_v10  ;;  %v4377_v16 = vrot.slane %v17309_v58, %v18736_v10  ;;  %v17370_v62 = vld.sshfl [vmem:[%s18729_s21 + $0x18] sm:$0x33 pattern:$0x75316420] }
 0x11d   : > { %18230 = vmatprep.mubr.msk.bf16.mxu1 %vm18669_vm4, %v23290_v59  ;;  %v3473_v48 = vrot.slane %v3466_v38, %v18736_v10  ;;  %v4912_v33 = vcombine.low %v4903_v15, %v4910_v24  ;;  %v4928_v37 = vcombine.low %v4336_v55, %v4337_v27  ;;  %v5262_v13 = vcombine.high %v17366_v51, %v17366_v51  ;;  %v19912_v27 = vpop.f32.mrb[2].mxu1 }
 0x11e   : > { %v4384_v6 = vrot.slane %v4370_v46, %v18736_v10  ;;  %v4929_v28 = vcombine.low %v4338_v12, %v4360_v29  ;;  %v17323_v41 = vcombine.high %v4353_v5, %v4360_v29  ;;  %v19867_v50 = vrot.slane %v17366_v51, %v18736_v10  ;;  %23305 = vst [vmem:[#allocation5_spill] sm:$0xff] %v19912_v27  ;;  %v18131_v51 = vpop.f32.mrb[3].mxu0  ;;  %v18159_v24 = vpop.f32.mrb[3].mxu1 }
 0x11f   : > { %v3480_v20 = vrot.slane %v3473_v48, %v18736_v10  ;;  %v4926_v40 = vrot.slane %v4912_v33, %v18736_v10  ;;  %v4938_v57 = vrot.slane %v4928_v37, %v18736_v10  ;;  %v19875_v0 = vrot.slane %v5262_v13, %v18736_v10  ;;  %v17372_v51 = vld.sshfl [vmem:[%s18729_s21 + $0x20] sm:$0x33 pattern:$0x75316420] }
 0x120   : > { %v4931_v42 = vcombine.low %v4377_v16, %v4384_v6  ;;  %v17324_v1 = vcombine.high %v4377_v16, %v4384_v6  ;;  %v4945_v61 = vrot.slane %v4929_v28, %v18736_v10  ;;  %v4952_v30 = vrot.slane %v17323_v41, %v18736_v10 }
 0x121   : > { %v5286_v23 = vcombine.high %v17367_v56, %v17367_v56  ;;  %v4927_v2 = vcombine.low %v4919_v14, %v4926_v40  ;;  %v5293_v22 = vrot.slane %v17367_v56, %v18736_v10  ;;  %v19884_v63 = vrot.slane %v17368_v26, %v18736_v10 }
 0x122   : > { %v4959_v7 = vrot.slane %v4931_v42, %v18736_v10  ;;  %v19879_v53 = vrot.slane %v17324_v1, %v18736_v10  ;;  %v4960_v32 = vcombine.low %v4938_v57, %v4945_v61  ;;  %v5915_v11 = vcombine.low %v19867_v50, %v19875_v0 }
 0x123   : > { %v5300_v3 = vrot.slane %v5286_v23, %v18736_v10  ;;  %18277 = vmatmul.mubr.msk.bf16.gmra.mrb[68].mxu0 %vm2698_vm2, %v4927_v2  ;;  %v5301_v18 = vcombine.high %v5293_v22, %v5293_v22  ;;  %v7450_v35 = vshrl.u32 %v19867_v50, 16  ;;  %v17395_v45 = vcombine.high %v19867_v50, %v19875_v0 }
 0x124   : > { %18231 = vmatmul.mubr.msk.bf16.gmra.mrb[72].mxu1 %vm2698_vm2, %v3480_v20  ;;  %v4961_v47 = vcombine.low %v4952_v30, %v4959_v7  ;;  %v4991_v44 = vrot.slane %v19879_v53, %v18736_v10  ;;  %18280 = vmatprep.mubr.msk.bf16.mxu0 %vm18669_vm4, %v23290_v59  ;;  %v4968_v43 = vrot.slane %v4960_v32, %v18736_v10  ;;  %v7455_v9 = vshll.u32 %v19875_v0, 16  ;;  %v17444_v20 = vld.sshfl [vmem:[%s18729_s21 + $0xc] sm:$0x33 pattern:$0x75316420] }
 0x125   : > { %18290 = vmatprep.mubr.msk.bf16.mxu1 %vm18669_vm4, %v23290_v59  ;;  %v5917_v49 = vcombine.low %v5293_v22, %v5300_v3  ;;  %v5918_v58 = vcombine.low %v5301_v18, %v19884_v63  ;;  %v5925_v36 = vrot.slane %v5915_v11, %v18736_v10  ;;  %v5309_v8 = vcombine.high %v17368_v26, %v17368_v26 }
 0x126   : > { %v4975_v60 = vrot.slane %v4961_v47, %v18736_v10  ;;  %v5932_v15 = vrot.slane %v17395_v45, %v18736_v10  ;;  %v19918_v55 = vcombine.high %v19884_v63, %v19884_v63  ;;  %v5333_v19 = vcombine.high %v17369_v34, %v17369_v34 }
 0x127   : > { %v5939_v38 = vrot.slane %v5917_v49, %v18736_v10  ;;  %v5946_v5 = vrot.slane %v5918_v58, %v18736_v10  ;;  %v19922_v46 = vrot.slane %v5309_v8, %v18736_v10  ;;  %v5340_v48 = vrot.slane %v17369_v34, %v18736_v10  ;;  %v17371_v8 = vld.sshfl [vmem:[%s18729_s21 + $0x1c] sm:$0x13 pattern:$0x75316420] }
 0x128   : > { %v4976_v14 = vcombine.low %v4968_v43, %v4975_v60  ;;  %v5947_v12 = vcombine.low %v5925_v36, %v5932_v15  ;;  %v5347_v29 = vrot.slane %v5333_v19, %v18736_v10  ;;  %v5356_v16 = vcombine.high %v17370_v62, %v17370_v62 }
 0x129   : > { %v19927_v33 = vrot.slane %v17370_v62, %v18736_v10  ;;  %v5948_v6 = vcombine.low %v5939_v38, %v5946_v5  ;;  %v19931_v37 = vcombine.high %v19922_v46, %v19922_v46  ;;  %v5348_v56 = vcombine.high %v5340_v48, %v5340_v48 }
 0x12a   : > { %v5964_v13 = vcombine.low %v19922_v46, %v19918_v55  ;;  %v5955_v28 = vrot.slane %v5947_v12, %v18736_v10  ;;  %v19938_v41 = vrot.slane %v5356_v16, %v18736_v10  ;;  %v6799_v40 = vcombine.high %v19867_v50, %v19867_v50 }
 0x12b   : > { %v6800_v42 = vcombine.high %v19875_v0, %v19875_v0  ;;  %18281 = vmatmul.mubr.msk.bf16.gmra.mrb[72].mxu0 %vm2698_vm2, %v4976_v14  ;;  %v5962_v57 = vrot.slane %v5948_v6, %v18736_v10  ;;  %v5965_v1 = vcombine.low %v19931_v37, %v5340_v48  ;;  %v5966_v26 = vcombine.low %v5347_v29, %v5348_v56  ;;  %v19987_v6 = vpop.f32.mrb[4].mxu0 }
 0x12c   : > { %v5974_v61 = vrot.slane %v5964_v13, %v18736_v10  ;;  %18284 = vmatprep.mubr.msk.bf16.mxu0 %vm18669_vm4, %v23290_v59  ;;  %v5967_v30 = vcombine.low %v19927_v33, %v19938_v41  ;;  %v6808_v23 = vcombine.high %v17444_v20, %v17444_v20  ;;  %v6815_v50 = vrot.slane %v17444_v20, %v18736_v10 }
 0x12d   : > { %v7457_v2 = vsel %vm18764_vm1, %v7450_v35, %v7455_v9  ;;  %v5963_v7 = vcombine.low %v5955_v28, %v5962_v57  ;;  %v5981_v22 = vrot.slane %v5965_v1, %v18736_v10  ;;  %v5988_v32 = vrot.slane %v5966_v26, %v18736_v10  ;;  %v18134_v28 = vpop.f32.mrb[5].mxu0 }
 0x12e   : > { %v7458_v3 = vshrl.u32 %v19875_v0, 16  ;;  %v5995_v11 = vrot.slane %v5967_v30, %v18736_v10  ;;  %v6822_v34 = vrot.slane %v6808_v23, %v18736_v10  ;;  %v6823_v47 = vcombine.high %v6815_v50, %v6815_v50  ;;  %v19998_v30 = vpop.f32.mrb[6].mxu0 }
 0x12f   : > { %v7463_v18 = vshll.u32 %v6799_v40, 16  ;;  %18291 = vmatmul.mubr.msk.bf16.vlgmr.msra.gmra.mrb[76].mxu1 %vm2698_vm2, %v5963_v7  ;;  %v5996_v43 = vcombine.low %v5974_v61, %v5981_v22  ;;  %v7466_v45 = vshrl.u32 %v6799_v40, 16  ;;  %v7471_v49 = vshll.u32 %v6800_v42, 16 }
 0x130   : > { %v7474_v35 = vshrl.u32 %v6800_v42, 16  ;;  %18397 = vmatpush3.bf16.msra.mxu1 %v19500_v52  ;;  %18294 = vmatprep.mubr.msk.bf16.mxu1 %vm18669_vm4, %v23290_v59  ;;  %v5997_v0 = vcombine.low %v5988_v32, %v5995_v11  ;;  %v6824_v9 = vcombine.high %v6822_v34, %v6822_v34  ;;  %v7479_v54 = vshll.u32 %v6815_v50, 16  ;;  %v17446_v61 = vld.sshfl [vmem:[%s18729_s21 + $0x14] sm:$0x33 pattern:$0x75316420] }
 0x131   : > { %v7465_v31 = vsel %vm18764_vm1, %v7458_v3, %v7463_v18  ;;  %v6004_v60 = vrot.slane %v5996_v43, %v18736_v10  ;;  %v7473_v58 = vsel %vm18764_vm1, %v7466_v45, %v7471_v49  ;;  %v7482_v36 = vshrl.u32 %v6815_v50, 16  ;;  %18504 = vmatprep.subr.bf16.mxu1 %v23290_v59  ;;  %v18135_v32 = vpop.f32.mrb[7].mxu0 }
 0x132   : > { %v7487_v62 = vshll.u32 %v6822_v34, 16  ;;  %v6011_v52 = vrot.slane %v5997_v0, %v18736_v10  ;;  %v7481_v15 = vsel %vm18764_vm1, %v7474_v35, %v7479_v54  ;;  %v7490_v38 = vshrl.u32 %v6822_v34, 16 }
 0x133   : > { %v7495_v19 = vshll.u32 %v6823_v47, 16  ;;  %18285 = vmatmul.mubr.msk.bf16.gmra.mrb[76].mxu0 %vm2698_vm2, %v4991_v44  ;;  %v7498_v14 = vshrl.u32 %v6823_v47, 16  ;;  %v7503_v5 = vshll.u32 %v6824_v9, 16  ;;  %v7507_v48 = vshrl.u32 %v19884_v63, 16  ;;  %v19989_v44 = vpop.f32.mrb[4].mxu1 }
 0x134   : > { %v7489_v24 = vsel %vm18764_vm1, %v7482_v36, %v7487_v62  ;;  %18344 = vmatprep.mubr.msk.bf16.mxu0 %vm18669_vm4, %v23290_v59  ;;  %v6012_v12 = vcombine.low %v6004_v60, %v6011_v52  ;;  %v7512_v16 = vshll.u32 %v19922_v46, 16  ;;  %v8249_v53 = vcombine.low %v7457_v2, %v7465_v31  ;;  %23306 = vst [vmem:[#allocation4_spill] sm:$0xff] %v19989_v44  ;;  %v18162_v40 = vpop.f32.mrb[5].mxu1 }
 0x135   : > { %v7497_v29 = vsel %vm18764_vm1, %v7490_v38, %v7495_v19  ;;  %v7505_v56 = vsel %vm18764_vm1, %v7498_v14, %v7503_v5  ;;  %v8250_v13 = vcombine.low %v7473_v58, %v7481_v15  ;;  %v5380_v20 = vcombine.high %v17371_v8, %v17371_v8  ;;  %v20000_v23 = vpop.f32.mrb[6].mxu1 }
 0x136   : > { %v8251_v63 = vcombine.low %v7489_v24, %v7497_v29  ;;  %v7514_v42 = vsel %vm18764_vm1, %v7507_v48, %v7512_v16  ;;  %v8259_v57 = vrot.slane %v8249_v53, %v18736_v10  ;;  %v5387_v1 = vrot.slane %v17371_v8, %v18736_v10  ;;  %23307 = vst [vmem:[#allocation9_spill] sm:$0xff] %v20000_v23  ;;  %v18163_v3 = vpop.f32.mrb[7].mxu1 }
 0x137   : > { %v5403_v26 = vcombine.high %v17372_v51, %v17372_v51  ;;  %18295 = vmatmul.mubr.msk.bf16.gmra.mrb[80].mxu1 %vm2698_vm2, %v6012_v12  ;;  %v8252_v50 = vcombine.low %v7505_v56, %v7514_v42  ;;  %v8266_v2 = vrot.slane %v8250_v13, %v18736_v10  ;;  %v5394_v22 = vrot.slane %v5380_v20, %v18736_v10 }
 0x138   : > { %v8273_v7 = vrot.slane %v8251_v63, %v18736_v10  ;;  %18298 = vmatprep.mubr.msk.bf16.mxu1 %vm18669_vm4, %v23290_v59  ;;  %v5395_v11 = vcombine.high %v5387_v1, %v5387_v1  ;;  %v20009_v34 = vrot.slane %v17372_v51, %v18736_v10  ;;  %v17396_v18 = vcombine.high %v19927_v33, %v19938_v41 }
 0x139   : > { %v20012_v47 = vrot.slane %v5403_v26, %v18736_v10  ;;  %v8280_v43 = vrot.slane %v8252_v50, %v18736_v10  ;;  %v8281_v45 = vcombine.low %v8259_v57, %v8266_v2  ;;  %v6014_v49 = vcombine.low %v5387_v1, %v5394_v22  ;;  %v17373_v1 = vld.sshfl [vmem:[%s18729_s21 + $0x24] sm:$0x13 pattern:$0x75316420] }
 0x13a   : > { %v6856_v35 = vcombine.high %v17446_v61, %v17446_v61  ;;  %v20019_v0 = vcombine.high %v20009_v34, %v20009_v34  ;;  %v6015_v9 = vcombine.low %v5395_v11, %v20009_v34  ;;  %v6023_v31 = vrot.slane %v17396_v18, %v18736_v10 }
 0x13b   : > { %v6863_v54 = vrot.slane %v17446_v61, %v18736_v10  ;;  %v8282_v60 = vcombine.low %v8273_v7, %v8280_v43  ;;  %v8289_v58 = vrot.slane %v8281_v45, %v18736_v10  ;;  %v6030_v36 = vrot.slane %v6014_v49, %v18736_v10  ;;  %v20066_v43 = vpop.f32.mrb[8].mxu0  ;;  %v20068_v45 = vpop.f32.mrb[8].mxu1 }
 0x13c   : > { %v6870_v62 = vrot.slane %v6856_v35, %v18736_v10  ;;  %v6016_v8 = vcombine.low %v20012_v47, %v20019_v0  ;;  %v6037_v52 = vrot.slane %v6015_v9, %v18736_v10  ;;  %v20032_v38 = vcombine.high %v19927_v33, %v19927_v33  ;;  %23308 = vst [vmem:[#allocation8_spill] sm:$0xff] %v20068_v45 }
 0x13d   : > { %v6871_v15 = vcombine.high %v6863_v54, %v6863_v54  ;;  %v8296_v19 = vrot.slane %v8282_v60, %v18736_v10  ;;  %v6045_v51 = vcombine.low %v6023_v31, %v6030_v36  ;;  %v7515_v14 = vshrl.u32 %v19922_v46, 16  ;;  %v18166_v60 = vpop.f32.mrb[9].mxu1 }
 0x13e   : > { %v6872_v24 = vcombine.high %v6870_v62, %v6870_v62  ;;  %v6044_v5 = vrot.slane %v6016_v8, %v18736_v10  ;;  %v7520_v48 = vshll.u32 %v19918_v55, 16  ;;  %v7523_v12 = vshrl.u32 %v19918_v55, 16 }
 0x13f   : > { %v7528_v29 = vshll.u32 %v19931_v37, 16  ;;  %v8297_v16 = vcombine.low %v8289_v58, %v8296_v19  ;;  %v6053_v53 = vrot.slane %v6045_v51, %v18736_v10  ;;  %v7531_v56 = vshrl.u32 %v19931_v37, 16 }
 0x140   : > { %v7536_v13 = vshll.u32 %v6863_v54, 16  ;;  %v6046_v63 = vcombine.low %v6037_v52, %v6044_v5  ;;  %v7522_v20 = vsel %vm18764_vm1, %v7515_v14, %v7520_v48  ;;  %v7539_v28 = vshrl.u32 %v6863_v54, 16  ;;  %v18138_v54 = vpop.f32.mrb[9].mxu0 }
 0x141   : > { %v7530_v46 = vsel %vm18764_vm1, %v7523_v12, %v7528_v29  ;;  %18345 = vmatmul.mubr.msk.bf16.vlgmr.msra.gmra.mrb[80].mxu0 %vm2698_vm2, %v8297_v16  ;;  %v7544_v40 = vshll.u32 %v6870_v62, 16  ;;  %v7547_v42 = vshrl.u32 %v6870_v62, 16  ;;  %v7552_v57 = vshll.u32 %v6871_v15, 16  ;;  %v20081_v52 = vpop.f32.mrb[10].mxu0 }
 0x142   : > { %v7538_v55 = vsel %vm18764_vm1, %v7531_v56, %v7536_v13  ;;  %18451 = vmatpush3.bf16.msra.mxu0 %v19550_v4  ;;  %18348 = vmatprep.mubr.msk.bf16.mxu0 %vm18669_vm4, %v23290_v59  ;;  %v6060_v37 = vrot.slane %v6046_v63, %v18736_v10  ;;  %v7555_v26 = vshrl.u32 %v6871_v15, 16  ;;  %v7560_v61 = vshll.u32 %v6872_v24, 16  ;;  %v17374_v4 = vld.sshfl [vmem:[%s18729_s21 + $0x28] sm:$0x33 pattern:$0x75316420] }
 0x143   : > { %v7564_v50 = vshrl.u32 %v19927_v33, 16  ;;  %v7546_v2 = vsel %vm18764_vm1, %v7539_v28, %v7544_v40  ;;  %v7554_v7 = vsel %vm18764_vm1, %v7547_v42, %v7552_v57  ;;  %v7569_v22 = vshll.u32 %v19938_v41, 16  ;;  %18558 = vmatprep.subr.bf16.mxu0 %v23290_v59  ;;  %v20083_v15 = vpop.f32.mrb[10].mxu1  ;;  %v18139_v48 = vpop.f32.mrb[11].mxu0 }
 0x144   : > { %v7572_v32 = vshrl.u32 %v19938_v41, 16  ;;  %v6061_v3 = vcombine.low %v6053_v53, %v6060_v37  ;;  %v7562_v11 = vsel %vm18764_vm1, %v7555_v26, %v7560_v61  ;;  %v7577_v18 = vshll.u32 %v20032_v38, 16  ;;  %23309 = vst [vmem:[#allocation7_spill] sm:$0xff] %v20083_v15  ;;  %v18167_v12 = vpop.f32.mrb[11].mxu1 }
 0x145   : > { %v8298_v33 = vcombine.low %v7522_v20, %v7530_v46  ;;  %v7571_v49 = vsel %vm18764_vm1, %v7564_v50, %v7569_v22  ;;  %v8299_v35 = vcombine.low %v7538_v55, %v7546_v2  ;;  %v8300_v9 = vcombine.low %v7554_v7, %v7562_v11  ;;  %v17448_v5 = vld.sshfl [vmem:[%s18729_s21 + $0x1c] sm:$0x33 pattern:$0x75316420] }
 0x146   : > { %v20074_v31 = vcombine.high %v20012_v47, %v20012_v47  ;;  %18299 = vmatmul.mubr.msk.bf16.gmra.mrb[84].mxu1 %vm2698_vm2, %v6061_v3  ;;  %v7579_v58 = vsel %vm18764_vm1, %v7572_v32, %v7577_v18  ;;  %v5427_v62 = vcombine.high %v17373_v1, %v17373_v1  ;;  %v5434_v8 = vrot.slane %v17373_v1, %v18736_v10 }
 0x147   : > { %v8308_v36 = vrot.slane %v8298_v33, %v18736_v10  ;;  %v8301_v19 = vcombine.low %v7571_v49, %v7579_v58  ;;  %v8315_v51 = vrot.slane %v8299_v35, %v18736_v10  ;;  %v8322_v24 = vrot.slane %v8300_v9, %v18736_v10  ;;  %18302 = vmatprep.mubr.msk.bf16.mxu1 %vm18669_vm4, %v23290_v59 }
 0x148   : > { %v5450_v14 = vcombine.high %v17374_v4, %v17374_v4  ;;  %v5441_v29 = vrot.slane %v5427_v62, %v18736_v10  ;;  %v5442_v16 = vcombine.high %v5434_v8, %v5434_v8  ;;  %v20092_v53 = vrot.slane %v17374_v4, %v18736_v10  ;;  %v17375_v62 = vld.sshfl [vmem:[%s18729_s21 + $0x2c] sm:$0x13 pattern:$0x75316420] }
 0x149   : > { %v6062_v56 = vcombine.low %v20074_v31, %v5434_v8  ;;  %v8329_v13 = vrot.slane %v8301_v19, %v18736_v10  ;;  %v8330_v63 = vcombine.low %v8308_v36, %v8315_v51  ;;  %v6896_v46 = vcombine.high %v19938_v41, %v19938_v41 }
 0x14a   : > { %v20097_v20 = vrot.slane %v5450_v14, %v18736_v10  ;;  %v6063_v28 = vcombine.low %v5441_v29, %v5442_v16  ;;  %v6904_v40 = vcombine.high %v17448_v5, %v17448_v5  ;;  %v6911_v42 = vrot.slane %v17448_v5, %v18736_v10 }
 0x14b   : > { %v6072_v55 = vrot.slane %v6062_v56, %v18736_v10  ;;  %v8331_v57 = vcombine.low %v8322_v24, %v8329_v13  ;;  %v8338_v1 = vrot.slane %v8330_v63, %v18736_v10  ;;  %v7580_v2 = vshrl.u32 %v20032_v38, 16  ;;  %v17376_v63 = vld.sshfl [vmem:[%s18729_s21 + $0x30] sm:$0x33 pattern:$0x75316420] }
 0x14c   : > { %v6064_v37 = vcombine.low %v20092_v53, %v20097_v20  ;;  %v17397_v26 = vcombine.high %v20092_v53, %v20097_v20  ;;  %v6079_v61 = vrot.slane %v6063_v28, %v18736_v10  ;;  %v6918_v50 = vrot.slane %v6904_v40, %v18736_v10 }
 0x14d   : > { %v6919_v41 = vcombine.high %v6911_v42, %v6911_v42  ;;  %v8345_v7 = vrot.slane %v8331_v57, %v18736_v10  ;;  %v7585_v4 = vshll.u32 %v6896_v46, 16  ;;  %v7588_v18 = vshrl.u32 %v6896_v46, 16 }
 0x14e   : > { %v6086_v22 = vrot.slane %v6064_v37, %v18736_v10  ;;  %v6093_v32 = vrot.slane %v17397_v26, %v18736_v10  ;;  %v6094_v3 = vcombine.low %v6072_v55, %v6079_v61  ;;  %v6920_v11 = vcombine.high %v6918_v50, %v6918_v50  ;;  %v20147_v37 = vld.sshfl [vmem:[%s18729_s21 + $0x34] sm:$0x13 pattern:$0x75316420] }
 0x14f   : > { %v7593_v33 = vshll.u32 %v6911_v42, 16  ;;  %v8346_v49 = vcombine.low %v8338_v1, %v8345_v7  ;;  %v7587_v9 = vsel %vm18764_vm1, %v7580_v2, %v7585_v4  ;;  %v7596_v54 = vshrl.u32 %v6911_v42, 16 }
 0x150   : > { %v6095_v35 = vcombine.low %v6086_v22, %v6093_v32  ;;  %v6102_v38 = vrot.slane %v6094_v3, %v18736_v10  ;;  %v7601_v58 = vshll.u32 %v6918_v50, 16  ;;  %v7604_v36 = vshrl.u32 %v6918_v50, 16  ;;  %v17450_v22 = vld.sshfl [vmem:[%s18729_s21 + $0x24] sm:$0x33 pattern:$0x75316420] }
 0x151   : > { %v7595_v60 = vsel %vm18764_vm1, %v7588_v18, %v7593_v33  ;;  %18349 = vmatmul.mubr.msk.bf16.gmra.mrb[84].mxu0 %vm2698_vm2, %v8346_v49  ;;  %v7609_v19 = vshll.u32 %v6919_v41, 16  ;;  %v7612_v51 = vshrl.u32 %v6919_v41, 16  ;;  %v7617_v24 = vshll.u32 %v6920_v11, 16 }
 0x152   : > { %v6109_v8 = vrot.slane %v6095_v35, %v18736_v10  ;;  %18352 = vmatprep.mubr.msk.bf16.mxu0 %vm18669_vm4, %v23290_v59  ;;  %v7603_v14 = vsel %vm18764_vm1, %v7596_v54, %v7601_v58  ;;  %v7621_v5 = vshrl.u32 %v20009_v34, 16  ;;  %v7626_v48 = vshll.u32 %v20012_v47, 16 }
 0x153   : > { %v7629_v12 = vshrl.u32 %v20012_v47, 16  ;;  %v7611_v16 = vsel %vm18764_vm1, %v7604_v36, %v7609_v19  ;;  %v7619_v56 = vsel %vm18764_vm1, %v7612_v51, %v7617_v24  ;;  %v7634_v13 = vshll.u32 %v20019_v0, 16  ;;  %v20139_v47 = vpop.f32.mrb[12].mxu0  ;;  %v20141_v40 = vpop.f32.mrb[12].mxu1 }
 0x154   : > { %v6110_v29 = vcombine.low %v6102_v38, %v6109_v8  ;;  %v7628_v46 = vsel %vm18764_vm1, %v7621_v5, %v7626_v48  ;;  %v7637_v34 = vshrl.u32 %v20019_v0, 16  ;;  %v7642_v28 = vshll.u32 %v20074_v31, 16  ;;  %23310 = vst [vmem:[#allocation12_spill] sm:$0xff] %v20141_v40  ;;  %v18142_v61 = vpop.f32.mrb[13].mxu0  ;;  %v18170_v0 = vpop.f32.mrb[13].mxu1 }
 0x155   : > { %v8347_v55 = vcombine.low %v7587_v9, %v7595_v60  ;;  %v7636_v42 = vsel %vm18764_vm1, %v7629_v12, %v7634_v13  ;;  %v8348_v57 = vcombine.low %v7603_v14, %v7611_v16  ;;  %v8349_v1 = vcombine.low %v7619_v56, %v7628_v46  ;;  %v20156_v32 = vpop.f32.mrb[14].mxu0  ;;  %v20158_v4 = vpop.f32.mrb[14].mxu1 }
 0x156   : > { %18303 = vmatmul.mubr.msk.bf16.gmra.mrb[88].mxu1 %vm2698_vm2, %v6110_v29  ;;  %v5474_v26 = vcombine.high %v17375_v62, %v17375_v62  ;;  %v7644_v50 = vsel %vm18764_vm1, %v7637_v34, %v7642_v28  ;;  %v5481_v2 = vrot.slane %v17375_v62, %v18736_v10  ;;  %v5497_v7 = vcombine.high %v17376_v63, %v17376_v63  ;;  %v18143_v49 = vpop.f32.mrb[15].mxu0  ;;  %v18171_v35 = vpop.f32.mrb[15].mxu1  ;;  %v20187_v29 = vld.sshfl [vmem:[%s18729_s21 + $0x2c] sm:$0x33 pattern:$0x75316420] }
 0x157   : > { %v8357_v41 = vrot.slane %v8347_v55, %v18736_v10  ;;  %18306 = vmatprep.mubr.msk.bf16.mxu1 %vm18669_vm4, %v23290_v59  ;;  %23311 = vst [vmem:[#allocation11_spill] sm:$0xff] %v20158_v4  ;;  %v8350_v3 = vcombine.low %v7636_v42, %v7644_v50  ;;  %v8364_v11 = vrot.slane %v8348_v57, %v18736_v10  ;;  %v7645_v50 = vshrl.u32 %v20074_v31, 16 }
 0x158   : > { %v8371_v18 = vrot.slane %v8349_v1, %v18736_v10  ;;  %v5488_v33 = vrot.slane %v5474_v26, %v18736_v10  ;;  %v5489_v9 = vcombine.high %v5481_v2, %v5481_v2  ;;  %v20164_v54 = vrot.slane %v17376_v63, %v18736_v10 }
 0x159   : > { %v20167_v38 = vrot.slane %v5497_v7, %v18736_v10  ;;  %v20171_v60 = vrot.slane %v20147_v37, %v18736_v10  ;;  %v8378_v58 = vrot.slane %v8350_v3, %v18736_v10  ;;  %v8379_v36 = vcombine.low %v8357_v41, %v8364_v11 }
 0x15a   : > { %v6111_v62 = vcombine.low %v5481_v2, %v5488_v33  ;;  %v6952_v8 = vcombine.high %v17450_v22, %v17450_v22  ;;  %v20176_v19 = vcombine.high %v20164_v54, %v20164_v54  ;;  %v6112_v24 = vcombine.low %v5489_v9, %v20164_v54 }
 0x15b   : > { %v20180_v51 = vcombine.high %v20167_v38, %v20167_v38  ;;  %v6959_v14 = vrot.slane %v17450_v22, %v18736_v10  ;;  %v8380_v5 = vcombine.low %v8371_v18, %v8378_v58  ;;  %v8387_v48 = vrot.slane %v8379_v36, %v18736_v10 }
 0x15c   : > { %v6121_v12 = vrot.slane %v6111_v62, %v18736_v10  ;;  %v6966_v16 = vrot.slane %v6952_v8, %v18736_v10  ;;  %v6113_v56 = vcombine.low %v20167_v38, %v20176_v19  ;;  %v6128_v63 = vrot.slane %v6112_v24, %v18736_v10 }
 0x15d   : > { %v6114_v13 = vcombine.low %v20180_v51, %v20171_v60  ;;  %v6967_v46 = vcombine.high %v6959_v14, %v6959_v14  ;;  %v8394_v34 = vrot.slane %v8380_v5, %v18736_v10  ;;  %v6991_v55 = vcombine.high %v20092_v53, %v20092_v53 }
 0x15e   : > { %v6968_v28 = vcombine.high %v6966_v16, %v6966_v16  ;;  %v6992_v42 = vcombine.high %v20097_v20, %v20097_v20  ;;  %v6135_v57 = vrot.slane %v6113_v56, %v18736_v10  ;;  %v6143_v26 = vcombine.low %v6121_v12, %v6128_v63  ;;  %v17378_v56 = vld.sshfl [vmem:[%s18729_s21 + $0x38] sm:$0x33 pattern:$0x75316420] }
 0x15f   : > { %v6142_v1 = vrot.slane %v6114_v13, %v18736_v10  ;;  %v20204_v61 = vrot.slane %v20187_v29, %v18736_v10  ;;  %v8395_v0 = vcombine.low %v8387_v48, %v8394_v34  ;;  %v7650_v41 = vshll.u32 %v6959_v14, 16  ;;  %v20229_v34 = vpop.f32.mrb[16].mxu0 }
 0x160   : > { %v7653_v2 = vshrl.u32 %v6959_v14, 16  ;;  %v6151_v22 = vrot.slane %v6143_v26, %v18736_v10  ;;  %v7658_v3 = vshll.u32 %v6966_v16, 16  ;;  %v7661_v11 = vshrl.u32 %v6966_v16, 16  ;;  %v18146_v26 = vpop.f32.mrb[17].mxu0 }
 0x161   : > { %v6144_v7 = vcombine.low %v6135_v57, %v6142_v1  ;;  %18353 = vmatmul.mubr.msk.bf16.gmra.mrb[88].mxu0 %vm2698_vm2, %v8395_v0  ;;  %v7652_v18 = vsel %vm18764_vm1, %v7645_v50, %v7650_v41  ;;  %v7666_v33 = vshll.u32 %v6967_v46, 16  ;;  %v7669_v49 = vshrl.u32 %v6967_v46, 16  ;;  %v17379_v1 = vld.sshfl [vmem:[%s18729_s21 + $0x3c] sm:$0x13 pattern:$0x75316420] }
 0x162   : > { %v7674_v35 = vshll.u32 %v6968_v28, 16  ;;  %18356 = vmatprep.mubr.msk.bf16.mxu0 %vm18669_vm4, %v23290_v59  ;;  %v7660_v9 = vsel %vm18764_vm1, %v7653_v2, %v7658_v3  ;;  %v7678_v58 = vshrl.u32 %v20092_v53, 16  ;;  %v7683_v36 = vshll.u32 %v20097_v20, 16  ;;  %v20244_v2 = vpop.f32.mrb[18].mxu0 }
 0x163   : > { %v6158_v31 = vrot.slane %v6144_v7, %v18736_v10  ;;  %v7668_v62 = vsel %vm18764_vm1, %v7661_v11, %v7666_v33  ;;  %v7686_v24 = vshrl.u32 %v20097_v20, 16  ;;  %v7691_v14 = vshll.u32 %v6991_v55, 16  ;;  %v18147_v11 = vpop.f32.mrb[19].mxu0 }
 0x164   : > { %v7676_v8 = vsel %vm18764_vm1, %v7669_v49, %v7674_v35  ;;  %v7685_v48 = vsel %vm18764_vm1, %v7678_v58, %v7683_v36  ;;  %v7694_v12 = vshrl.u32 %v6991_v55, 16  ;;  %v7699_v16 = vshll.u32 %v6992_v42, 16  ;;  %v17454_v58 = vld.sshfl [vmem:[%s18729_s21 + $0x34] sm:$0x33 pattern:$0x75316420] }
 0x165   : > { %v6159_v5 = vcombine.low %v6151_v22, %v6158_v31  ;;  %v7693_v53 = vsel %vm18764_vm1, %v7686_v24, %v7691_v14  ;;  %v7702_v13 = vshrl.u32 %v6992_v42, 16  ;;  %v7707_v63 = vshll.u32 %v20204_v61, 16 }
 0x166   : > { %v8396_v46 = vcombine.low %v7652_v18, %v7660_v9  ;;  %v7701_v20 = vsel %vm18764_vm1, %v7694_v12, %v7699_v16  ;;  %v8397_v28 = vcombine.low %v7668_v62, %v7676_v8  ;;  %v8398_v57 = vcombine.low %v7685_v48, %v7693_v53 }
 0x167   : > { %18307 = vmatmul.mubr.msk.bf16.gmra.mrb[92].mxu1 %vm2698_vm2, %v6159_v5  ;;  %v5521_v55 = vcombine.high %v20147_v37, %v20147_v37  ;;  %v7709_v42 = vsel %vm18764_vm1, %v7702_v13, %v7707_v63  ;;  %v5536_v50 = vcombine.high %v20171_v60, %v20171_v60  ;;  %v5544_v41 = vcombine.high %v17378_v56, %v17378_v56 }
 0x168   : > { %v8406_v0 = vrot.slane %v8396_v46, %v18736_v10  ;;  %18310 = vmatprep.mubr.msk.bf16.mxu1 %vm18669_vm4, %v23290_v59  ;;  %v8399_v7 = vcombine.low %v7701_v20, %v7709_v42  ;;  %v8413_v22 = vrot.slane %v8397_v28, %v18736_v10  ;;  %v8420_v37 = vrot.slane %v8398_v57, %v18736_v10 }
 0x169   : > { %v5535_v3 = vrot.slane %v5521_v55, %v18736_v10  ;;  %v20250_v18 = vrot.slane %v17378_v56, %v18736_v10  ;;  %v20253_v33 = vrot.slane %v5544_v41, %v18736_v10  ;;  %v5568_v49 = vcombine.high %v17379_v1, %v17379_v1 }
 0x16a   : > { %v20256_v60 = vrot.slane %v17379_v1, %v18736_v10  ;;  %v8427_v35 = vrot.slane %v8399_v7, %v18736_v10  ;;  %v8428_v31 = vcombine.low %v8406_v0, %v8413_v22  ;;  %v7000_v36 = vcombine.high %v20187_v29, %v20187_v29 }
 0x16b   : > { %v6160_v9 = vcombine.low %v5535_v3, %v5536_v50  ;;  %v5582_v62 = vrot.slane %v5568_v49, %v18736_v10  ;;  %v6161_v8 = vcombine.low %v20250_v18, %v20253_v33  ;;  %v17398_v24 = vcombine.high %v20250_v18, %v20253_v33  ;;  %v20269_v5 = vpop.f32.mrb[16].mxu1 }
 0x16c   : > { %v7015_v14 = vcombine.high %v20204_v61, %v20204_v61  ;;  %23312 = vst [vmem:[#allocation10_spill] sm:$0xff] %v20269_v5  ;;  %v8429_v48 = vcombine.low %v8420_v37, %v8427_v35  ;;  %v8436_v12 = vrot.slane %v8428_v31, %v18736_v10  ;;  %v7014_v29 = vrot.slane %v7000_v36, %v18736_v10  ;;  %v18174_v56 = vpop.f32.mrb[17].mxu1 }
 0x16d   : > { %v6170_v16 = vrot.slane %v6160_v9, %v18736_v10  ;;  %v6163_v53 = vcombine.low %v20256_v60, %v5582_v62  ;;  %v6177_v13 = vrot.slane %v6161_v8, %v18736_v10  ;;  %v6184_v63 = vrot.slane %v17398_v24, %v18736_v10  ;;  %v20277_v20 = vpop.f32.mrb[18].mxu1 }
 0x16e   : > { %v7048_v46 = vcombine.high %v17454_v58, %v17454_v58  ;;  %23313 = vst [vmem:[#allocation15_spill] sm:$0xff] %v20277_v20  ;;  %v8443_v28 = vrot.slane %v8429_v48, %v18736_v10  ;;  %v7016_v57 = vcombine.high %v7014_v29, %v7014_v29  ;;  %v20281_v1 = vrot.slane %v17454_v58, %v18736_v10  ;;  %v18175_v26 = vpop.f32.mrb[19].mxu1  ;;  %v17380_v48 = vld.sshfl [vmem:[%s18729_s21 + $0x40] sm:$0x33 pattern:$0x75316420] }
 0x16f   : > { %v7710_v55 = vshrl.u32 %v20204_v61, 16  ;;  %v6191_v42 = vrot.slane %v6163_v53, %v18736_v10  ;;  %v6192_v0 = vcombine.low %v6170_v16, %v6177_v13  ;;  %v7715_v41 = vshll.u32 %v7014_v29, 16 }
 0x170   : > { %v20286_v50 = vrot.slane %v7048_v46, %v18736_v10  ;;  %v8444_v7 = vcombine.low %v8436_v12, %v8443_v28  ;;  %v7718_v22 = vshrl.u32 %v7014_v29, 16  ;;  %v7723_v37 = vshll.u32 %v7015_v14, 16 }
 0x171   : > { %v7726_v3 = vshrl.u32 %v7015_v14, 16  ;;  %v6193_v11 = vcombine.low %v6184_v63, %v6191_v42  ;;  %v6200_v49 = vrot.slane %v6192_v0, %v18736_v10  ;;  %v7717_v35 = vsel %vm18764_vm1, %v7710_v55, %v7715_v41 }
 0x172   : > { %v7731_v61 = vshll.u32 %v7016_v57, 16  ;;  %18357 = vmatmul.mubr.msk.bf16.gmra.mrb[92].mxu0 %vm2698_vm2, %v8444_v7  ;;  %v7725_v31 = vsel %vm18764_vm1, %v7718_v22, %v7723_v37  ;;  %v7735_v9 = vshrl.u32 %v20164_v54, 16  ;;  %v7740_v58 = vshll.u32 %v20167_v38, 16 }
 0x173   : > { %v7743_v36 = vshrl.u32 %v20167_v38, 16  ;;  %18360 = vmatprep.mubr.msk.bf16.mxu0 %vm18669_vm4, %v23290_v59  ;;  %v6207_v62 = vrot.slane %v6193_v11, %v18736_v10  ;;  %v7748_v24 = vshll.u32 %v20176_v19, 16  ;;  %v7751_v14 = vshrl.u32 %v20176_v19, 16 }
 0x174   : > { %v7733_v8 = vsel %vm18764_vm1, %v7726_v3, %v7731_v61  ;;  %v7742_v54 = vsel %vm18764_vm1, %v7735_v9, %v7740_v58  ;;  %v7756_v12 = vshll.u32 %v20180_v51, 16  ;;  %v7759_v38 = vshrl.u32 %v20180_v51, 16  ;;  %v17381_v57 = vld.sshfl [vmem:[%s18729_s21 + $0x44] sm:$0x13 pattern:$0x75316420] }
 0x175   : > { %v7764_v16 = vshll.u32 %v20281_v1, 16  ;;  %v6208_v29 = vcombine.low %v6200_v49, %v6207_v62  ;;  %v7750_v56 = vsel %vm18764_vm1, %v7743_v36, %v7748_v24  ;;  %v7767_v53 = vshrl.u32 %v20281_v1, 16 }
 0x176   : > { %v7772_v13 = vshll.u32 %v20286_v50, 16  ;;  %v7758_v19 = vsel %vm18764_vm1, %v7751_v14, %v7756_v12  ;;  %v8445_v46 = vcombine.low %v7717_v35, %v7725_v31  ;;  %v8446_v28 = vcombine.low %v7733_v8, %v7742_v54 }
 0x177   : > { %v7766_v63 = vsel %vm18764_vm1, %v7759_v38, %v7764_v16  ;;  %18311 = vmatmul.mubr.msk.bf16.gmra.mrb[96].mxu1 %vm2698_vm2, %v6208_v29  ;;  %v8447_v55 = vcombine.low %v7750_v56, %v7758_v19  ;;  %v5583_v26 = vcombine.high %v20256_v60, %v20256_v60  ;;  %v5591_v42 = vcombine.high %v17380_v48, %v17380_v48  ;;  %v20324_v0 = vpop.f32.mrb[20].mxu0  ;;  %v20326_v41 = vpop.f32.mrb[20].mxu1  ;;  %v17456_v16 = vld.sshfl [vmem:[%s18729_s21 + $0x3c] sm:$0x33 pattern:$0x75316420] }
 0x178   : > { %v7774_v51 = vsel %vm18764_vm1, %v7767_v53, %v7772_v13  ;;  %23314 = vst [vmem:[#allocation14_spill] sm:$0xff] %v20324_v0  ;;  %23315 = vst [vmem:[#allocation16_spill] sm:$0xff] %v20326_v41  ;;  %v8455_v22 = vrot.slane %v8445_v46, %v18736_v10  ;;  %v8462_v37 = vrot.slane %v8446_v28, %v18736_v10  ;;  %18314 = vmatprep.mubr.msk.bf16.mxu1 %vm18669_vm4, %v23290_v59  ;;  %v18150_v11 = vpop.f32.mrb[21].mxu0  ;;  %v18178_v49 = vpop.f32.mrb[21].mxu1 }
 0x179   : > { %v8448_v7 = vcombine.low %v7766_v63, %v7774_v51  ;;  %v20333_v3 = vrot.slane %v17380_v48, %v18736_v10  ;;  %v8469_v60 = vrot.slane %v8447_v55, %v18736_v10  ;;  %v20337_v35 = vrot.slane %v5591_v42, %v18736_v10  ;;  %v20340_v9 = vpop.f32.mrb[22].mxu0  ;;  %v2875_v58 = vpop.f32.mrb[22].mxu1 }
 0x17a   : > { %v5615_v61 = vcombine.high %v17381_v57, %v17381_v57  ;;  %v5622_v31 = vrot.slane %v17381_v57, %v18736_v10  ;;  %23316 = vst [vmem:[#allocation13_spill] sm:$0xff] %v20340_v9  ;;  %v8477_v62 = vcombine.low %v8455_v22, %v8462_v37  ;;  %v18151_v14 = vpop.f32.mrb[23].mxu0  ;;  %v18179_v48 = vpop.f32.mrb[23].mxu1  ;;  %v7063_v29 = vcombine.high %v20281_v1, %v20281_v1 }
 0x17b   : > { %v8476_v36 = vrot.slane %v8448_v7, %v18736_v10  ;;  %v20345_v8 = vcombine.high %v20333_v3, %v20333_v3  ;;  %v6209_v24 = vcombine.low %v5583_v26, %v20333_v3  ;;  %v20350_v54 = vcombine.high %v20337_v35, %v20337_v35 }
 0x17c   : > { %v5629_v12 = vrot.slane %v5615_v61, %v18736_v10  ;;  %v5630_v38 = vcombine.high %v5622_v31, %v5622_v31  ;;  %v8485_v53 = vrot.slane %v8477_v62, %v18736_v10  ;;  %v7064_v28 = vcombine.high %v20286_v50, %v20286_v50 }
 0x17d   : > { %v8478_v56 = vcombine.low %v8469_v60, %v8476_v36  ;;  %v6210_v13 = vcombine.low %v20337_v35, %v20345_v8  ;;  %v6219_v19 = vrot.slane %v6209_v24, %v18736_v10  ;;  %v6211_v63 = vcombine.low %v20350_v54, %v5622_v31 }
 0x17e   : > { %v6212_v46 = vcombine.low %v5629_v12, %v5630_v38  ;;  %v7087_v57 = vcombine.high %v20250_v18, %v20250_v18  ;;  %v7088_v55 = vcombine.high %v20253_v33, %v20253_v33  ;;  %v7096_v26 = vcombine.high %v17456_v16, %v17456_v16 }
 0x17f   : > { %v8492_v51 = vrot.slane %v8478_v56, %v18736_v10  ;;  %v6226_v1 = vrot.slane %v6210_v13, %v18736_v10  ;;  %v6233_v42 = vrot.slane %v6211_v63, %v18736_v10  ;;  %v7103_v22 = vrot.slane %v17456_v16, %v18736_v10  ;;  %v17382_v56 = vld.sshfl [vmem:[%s18729_s21 + $0x48] sm:$0x33 pattern:$0x75316420] }
 0x180   : > { %v6240_v7 = vrot.slane %v6212_v46, %v18736_v10  ;;  %v7775_v37 = vshrl.u32 %v20286_v50, 16  ;;  %v20374_v60 = vrot.slane %v7096_v26, %v18736_v10  ;;  %v7780_v61 = vshll.u32 %v7063_v29, 16 }
 0x181   : > { %v8493_v11 = vcombine.low %v8485_v53, %v8492_v51  ;;  %v6241_v49 = vcombine.low %v6219_v19, %v6226_v1  ;;  %v20376_v58 = vcombine.high %v7103_v22, %v7103_v22  ;;  %v7783_v36 = vshrl.u32 %v7063_v29, 16  ;;  %v17383_v1 = vld.sshfl [vmem:[%s18729_s21 + $0x4c] sm:$0x13 pattern:$0x75316420] }
 0x182   : > { %v6242_v31 = vcombine.low %v6233_v42, %v6240_v7  ;;  %v7788_v62 = vshll.u32 %v7064_v28, 16  ;;  %v7782_v14 = vsel %vm18764_vm1, %v7775_v37, %v7780_v61  ;;  %v7792_v50 = vshrl.u32 %v20250_v18, 16 }
 0x183   : > { %18361 = vmatmul.mubr.msk.bf16.gmra.mrb[96].mxu0 %vm2698_vm2, %v8493_v11  ;;  %v6249_v24 = vrot.slane %v6241_v49, %v18736_v10  ;;  %v7797_v48 = vshll.u32 %v20253_v33, 16  ;;  %v7800_v16 = vshrl.u32 %v20253_v33, 16  ;;  %v7805_v29 = vshll.u32 %v7087_v57, 16 }
 0x184   : > { %18364 = vmatprep.mubr.msk.bf16.mxu0 %vm18669_vm4, %v23290_v59  ;;  %v6256_v12 = vrot.slane %v6242_v31, %v18736_v10  ;;  %v7790_v38 = vsel %vm18764_vm1, %v7783_v36, %v7788_v62  ;;  %v7808_v13 = vshrl.u32 %v7087_v57, 16  ;;  %v7813_v18 = vshll.u32 %v7088_v55, 16  ;;  %v20407_v11 = vld.sshfl [vmem:[%s18729_s21 + $0x50] sm:$0x33 pattern:$0x75316420] }
 0x185   : > { %v7799_v53 = vsel %vm18764_vm1, %v7792_v50, %v7797_v48  ;;  %v7816_v19 = vshrl.u32 %v7088_v55, 16  ;;  %v7807_v46 = vsel %vm18764_vm1, %v7800_v16, %v7805_v29  ;;  %v7821_v28 = vshll.u32 %v7103_v22, 16  ;;  %v17458_v16 = vld.sshfl [vmem:[%s18729_s21 + $0x44] sm:$0x33 pattern:$0x75316420] }
 0x186   : > { %v6257_v63 = vcombine.low %v6249_v24, %v6256_v12  ;;  %v7824_v51 = vshrl.u32 %v7103_v22, 16  ;;  %v7815_v26 = vsel %vm18764_vm1, %v7808_v13, %v7813_v18  ;;  %v7829_v33 = vshll.u32 %v20374_v60, 16  ;;  %v20401_v57 = vpop.f32.mrb[24].mxu0 }
 0x187   : > { %v7832_v42 = vshrl.u32 %v20374_v60, 16  ;;  %v7837_v7 = vshll.u32 %v20376_v58, 16  ;;  %23317 = vst [vmem:[#allocation17_spill] sm:$0xff] %v20401_v57  ;;  %v7823_v55 = vsel %vm18764_vm1, %v7816_v19, %v7821_v28  ;;  %v8494_v37 = vcombine.low %v7782_v14, %v7790_v38  ;;  %v18154_v61 = vpop.f32.mrb[25].mxu0 }
 0x188   : > { %18315 = vmatmul.mubr.msk.bf16.gmra.mrb[100].mxu1 %vm2698_vm2, %v6257_v63  ;;  %v8495_v22 = vcombine.low %v7799_v53, %v7807_v46  ;;  %v5638_v49 = vcombine.high %v17382_v56, %v17382_v56  ;;  %v7831_v31 = vsel %vm18764_vm1, %v7824_v51, %v7829_v33  ;;  %v8496_v62 = vcombine.low %v7815_v26, %v7823_v55  ;;  %v20418_v50 = vpop.f32.mrb[26].mxu0 }
 0x189   : > { %v7839_v36 = vsel %vm18764_vm1, %v7832_v42, %v7837_v7  ;;  %18318 = vmatprep.mubr.msk.bf16.mxu1 %vm18669_vm4, %v23290_v59  ;;  %v20416_v24 = vrot.slane %v17382_v56, %v18736_v10  ;;  %23318 = vst [vmem:[#allocation18_spill] sm:$0xff] %v20418_v50  ;;  %v8504_v48 = vrot.slane %v8494_v37, %v18736_v10  ;;  %v20426_v29 = vpop.f32.mrb[24].mxu1  ;;  %v18155_v53 = vpop.f32.mrb[27].mxu0 }
 0x18a   : > { %v8497_v14 = vcombine.low %v7831_v31, %v7839_v36  ;;  %v8511_v12 = vrot.slane %v8495_v22, %v18736_v10  ;;  %v20423_v38 = vrot.slane %v5638_v49, %v18736_v10  ;;  %v8518_v13 = vrot.slane %v8496_v62, %v18736_v10  ;;  %v18184_v63 = vpop.f32.mrb[25].mxu1 }
 0x18b   : > { %v5662_v18 = vcombine.high %v17383_v1, %v17383_v1  ;;  %v5669_v56 = vrot.slane %v17383_v1, %v18736_v10  ;;  %v20432_v19 = vrot.slane %v20407_v11, %v18736_v10  ;;  %v20439_v33 = vpop.f32.mrb[26].mxu1  ;;  %v7112_v1 = vcombine.high %v20374_v60, %v20374_v60 }
 0x18c   : > { %v8525_v46 = vrot.slane %v8497_v14, %v18736_v10  ;;  %v8526_v28 = vcombine.low %v8504_v48, %v8511_v12  ;;  %v6258_v51 = vcombine.low %v20416_v24, %v20423_v38  ;;  %v17399_v26 = vcombine.high %v20416_v24, %v20423_v38  ;;  %v18185_v37 = vpop.f32.mrb[27].mxu1 }
 0x18d   : > { %v5676_v42 = vrot.slane %v5662_v18, %v18736_v10  ;;  %v5677_v7 = vcombine.high %v5669_v56, %v5669_v56  ;;  %v7144_v55 = vcombine.high %v17458_v16, %v17458_v16  ;;  %v7151_v14 = vrot.slane %v17458_v16, %v18736_v10 }
 0x18e   : > { %v8527_v22 = vcombine.low %v8518_v13, %v8525_v46  ;;  %v8534_v49 = vrot.slane %v8526_v28, %v18736_v10  ;;  %v6268_v61 = vrot.slane %v6258_v51, %v18736_v10  ;;  %v6275_v31 = vrot.slane %v17399_v26, %v18736_v10 }
 0x18f   : > { %v6260_v36 = vcombine.low %v5669_v56, %v5676_v42  ;;  %v6261_v62 = vcombine.low %v5677_v7, %v20432_v19  ;;  %v7158_v48 = vrot.slane %v7144_v55, %v18736_v10  ;;  %v7840_v60 = vshrl.u32 %v20376_v58, 16 }
 0x190   : > { %v8541_v12 = vrot.slane %v8527_v22, %v18736_v10  ;;  %v6290_v53 = vcombine.low %v6268_v61, %v6275_v31  ;;  %v7845_v18 = vshll.u32 %v7112_v1, 16  ;;  %v7159_v46 = vcombine.high %v7151_v14, %v7151_v14 }
 0x191   : > { %v6282_v13 = vrot.slane %v6260_v36, %v18736_v10  ;;  %v6289_v63 = vrot.slane %v6261_v62, %v18736_v10  ;;  %v7160_v28 = vcombine.high %v7158_v48, %v7158_v48  ;;  %v7849_v26 = vshrl.u32 %v20333_v3, 16  ;;  %v20458_v42 = vpop.f32.mrb[28].mxu1 }
 0x192   : > { %v8542_v51 = vcombine.low %v8534_v49, %v8541_v12  ;;  %v6298_v56 = vrot.slane %v6290_v53, %v18736_v10  ;;  %v7847_v16 = vsel %vm18764_vm1, %v7840_v60, %v7845_v18  ;;  %v7854_v58 = vshll.u32 %v20337_v35, 16  ;;  %v18188_v37 = vpop.f32.mrb[29].mxu1 }
 0x193   : > { %v6291_v7 = vcombine.low %v6282_v13, %v6289_v63  ;;  %v7857_v1 = vshrl.u32 %v20337_v35, 16  ;;  %v7862_v55 = vshll.u32 %v20345_v8, 16  ;;  %v7865_v22 = vshrl.u32 %v20345_v8, 16  ;;  %v20467_v31 = vpop.f32.mrb[30].mxu1 }
 0x194   : > { %18365 = vmatmul.mubr.msk.bf16.gmra.mrb[100].mxu0 %vm2698_vm2, %v8542_v51  ;;  %v7870_v49 = vshll.u32 %v20350_v54, 16  ;;  %v7873_v61 = vshrl.u32 %v20350_v54, 16  ;;  %v7878_v3 = vshll.u32 %v7151_v14, 16  ;;  %v7856_v36 = vsel %vm18764_vm1, %v7849_v26, %v7854_v58  ;;  %v18189_v8 = vpop.f32.mrb[31].mxu1 }
 0x195   : > { %18368 = vmatprep.mubr.msk.bf16.mxu0 %vm18669_vm4, %v23290_v59  ;;  %v6305_v35 = vrot.slane %v6291_v7, %v18736_v10  ;;  %v7864_v62 = vsel %vm18764_vm1, %v7857_v1, %v7862_v55  ;;  %v7881_v12 = vshrl.u32 %v7151_v14, 16  ;;  %v7886_v60 = vshll.u32 %v7158_v48, 16  ;;  %v17385_v13 = vld.sshfl [vmem:[%s18729_s21 + $0x54] sm:$0x13 pattern:$0x75316420] }
 0x196   : > { %v7872_v54 = vsel %vm18764_vm1, %v7865_v22, %v7870_v49  ;;  %v7880_v53 = vsel %vm18764_vm1, %v7873_v61, %v7878_v3  ;;  %v7889_v18 = vshrl.u32 %v7158_v48, 16  ;;  %v20481_v63 = vpop.f32.mrb[28].mxu0  ;;  %v7894_v7 = vshll.u32 %v7159_v46, 16 }
 0x197   : > { %v6306_v51 = vcombine.low %v6298_v56, %v6305_v35  ;;  %v7897_v26 = vshrl.u32 %v7159_v46, 16  ;;  %v7902_v58 = vshll.u32 %v7160_v28, 16  ;;  %v18238_v37 = vpop.f32.mrb[29].mxu0  ;;  %v7888_v14 = vsel %vm18764_vm1, %v7881_v12, %v7886_v60 }
 0x198   : > { %v8543_v1 = vcombine.low %v7847_v16, %v7856_v36  ;;  %v8544_v55 = vcombine.low %v7864_v62, %v7872_v54  ;;  %v17386_v8 = vld.sshfl [vmem:[%s18729_s21 + $0x58] sm:$0x33 pattern:$0x75316420]  ;;  %v5685_v22 = vcombine.high %v20407_v11, %v20407_v11  ;;  %v20488_v49 = vpop.f32.mrb[30].mxu0  ;;  %v7896_v48 = vsel %vm18764_vm1, %v7889_v18, %v7894_v7 }
 0x199   : > { %18319 = vmatmul.mubr.msk.bf16.gmra.mrb[104].mxu1 %vm2698_vm2, %v6306_v51  ;;  %v7904_v46 = vsel %vm18764_vm1, %v7897_v26, %v7902_v58  ;;  %v8545_v28 = vcombine.low %v7880_v53, %v7888_v14  ;;  %v20497_v56 = vcombine.high %v20432_v19, %v20432_v19  ;;  %v18239_v16 = vpop.f32.mrb[31].mxu0  ;;  %v20506_v36 = vpop.f32.mrb[32].mxu1  ;;  %v5709_v12 = vcombine.high %v17385_v13, %v17385_v13 }
 0x19a   : > { %v8546_v61 = vcombine.low %v7896_v48, %v7904_v46  ;;  %v8553_v3 = vrot.slane %v8543_v1, %v18736_v10  ;;  %v8560_v11 = vrot.slane %v8544_v55, %v18736_v10  ;;  %18322 = vmatprep.mubr.msk.bf16.mxu1 %vm18669_vm4, %v23290_v59  ;;  %v20504_v35 = vrot.slane %v5685_v22, %v18736_v10  ;;  %v18192_v60 = vpop.f32.mrb[33].mxu1  ;;  %v17460_v55 = vld.sshfl [vmem:[%s18729_s21 + $0x4c] sm:$0x33 pattern:$0x75316420] }
 0x19b   : > { %v8567_v62 = vrot.slane %v8545_v28, %v18736_v10  ;;  %v5716_v54 = vrot.slane %v17385_v13, %v18736_v10  ;;  %v5732_v53 = vcombine.high %v17386_v8, %v17386_v8  ;;  %v20516_v26 = vrot.slane %v17386_v8, %v18736_v10  ;;  %v20518_v58 = vpop.f32.mrb[34].mxu1 }
 0x19c   : > { %v8574_v18 = vrot.slane %v8546_v61, %v18736_v10  ;;  %v8575_v51 = vcombine.low %v8553_v3, %v8560_v11  ;;  %v20513_v7 = vcombine.high %v20504_v35, %v20504_v35  ;;  %v5723_v37 = vrot.slane %v5709_v12, %v18736_v10  ;;  %v18193_v22 = vpop.f32.mrb[35].mxu1 }
 0x19d   : > { %v5724_v14 = vcombine.high %v5716_v54, %v5716_v54  ;;  %v20522_v1 = vrot.slane %v5732_v53, %v18736_v10  ;;  %v6307_v13 = vcombine.low %v20504_v35, %v20497_v56  ;;  %v7183_v8 = vcombine.high %v20416_v24, %v20416_v24 }
 0x19e   : > { %v8576_v48 = vcombine.low %v8567_v62, %v8574_v18  ;;  %v8583_v46 = vrot.slane %v8575_v51, %v18736_v10  ;;  %v6308_v28 = vcombine.low %v20513_v7, %v5716_v54  ;;  %v7184_v11 = vcombine.high %v20423_v38, %v20423_v38  ;;  %v20536_v12 = vpop.f32.mrb[32].mxu0 }
 0x19f   : > { %v6309_v16 = vcombine.low %v5723_v37, %v5724_v14  ;;  %v6310_v61 = vcombine.low %v20516_v26, %v20522_v1  ;;  %v6317_v3 = vrot.slane %v6307_v13, %v18736_v10  ;;  %v7192_v60 = vcombine.high %v17460_v55, %v17460_v55  ;;  %v18242_v18 = vpop.f32.mrb[33].mxu0 }
 0x1a0   : > { %v8590_v62 = vrot.slane %v8576_v48, %v18736_v10  ;;  %v6324_v53 = vrot.slane %v6308_v28, %v18736_v10  ;;  %v7199_v54 = vrot.slane %v17460_v55, %v18736_v10  ;;  %v7906_v14 = vshrl.u32 %v20416_v24, 16  ;;  %v20545_v22 = vpop.f32.mrb[34].mxu0 }
 0x1a1   : > { %v6331_v51 = vrot.slane %v6309_v16, %v18736_v10  ;;  %v6338_v37 = vrot.slane %v6310_v61, %v18736_v10  ;;  %v7911_v13 = vshll.u32 %v20423_v38, 16  ;;  %v7206_v48 = vrot.slane %v7192_v60, %v18736_v10  ;;  %v18243_v5 = vpop.f32.mrb[35].mxu0 }
 0x1a2   : > { %v8591_v41 = vcombine.low %v8583_v46, %v8590_v62  ;;  %v6339_v20 = vcombine.low %v6317_v3, %v6324_v53  ;;  %v7207_v28 = vcombine.high %v7199_v54, %v7199_v54  ;;  %v7914_v16 = vshrl.u32 %v20423_v38, 16  ;;  %v17387_v62 = vld.sshfl [vmem:[%s18729_s21 + $0x5c] sm:$0x13 pattern:$0x75316420] }
 0x1a3   : > { %v6340_v4 = vcombine.low %v6331_v51, %v6338_v37  ;;  %v7913_v55 = vsel %vm18764_vm1, %v7906_v14, %v7911_v13  ;;  %v7919_v61 = vshll.u32 %v7183_v8, 16  ;;  %v20551_v18 = vpop.f32.mrb[36].mxu1  ;;  %v7208_v40 = vcombine.high %v7206_v48, %v7206_v48 }
 0x1a4   : > { %18369 = vmatmul.mubr.msk.bf16.gmra.mrb[104].mxu0 %vm2698_vm2, %v8591_v41  ;;  %v6347_v24 = vrot.slane %v6339_v20, %v18736_v10  ;;  %v7922_v46 = vshrl.u32 %v7183_v8, 16  ;;  %v7927_v3 = vshll.u32 %v7184_v11, 16  ;;  %v18196_v53 = vpop.f32.mrb[37].mxu1  ;;  %v7930_v60 = vshrl.u32 %v7184_v11, 16 }
 0x1a5   : > { %18372 = vmatprep.mubr.msk.bf16.mxu0 %vm18669_vm4, %v23290_v59  ;;  %v6354_v5 = vrot.slane %v6340_v4, %v18736_v10  ;;  %v7921_v38 = vsel %vm18764_vm1, %v7914_v16, %v7919_v61  ;;  %v7935_v51 = vshll.u32 %v7199_v54, 16  ;;  %v20561_v37 = vpop.f32.mrb[38].mxu1  ;;  %v7938_v41 = vshrl.u32 %v7199_v54, 16 }
 0x1a6   : > { %v7929_v20 = vsel %vm18764_vm1, %v7922_v46, %v7927_v3  ;;  %v7943_v8 = vshll.u32 %v7206_v48, 16  ;;  %v7946_v14 = vshrl.u32 %v7206_v48, 16  ;;  %v18197_v13 = vpop.f32.mrb[39].mxu1  ;;  %v7951_v4 = vshll.u32 %v7207_v28, 16 }
 0x1a7   : > { %v6355_v53 = vcombine.low %v6347_v24, %v6354_v5  ;;  %v7937_v15 = vsel %vm18764_vm1, %v7930_v60, %v7935_v51  ;;  %v7954_v45 = vshrl.u32 %v7207_v28, 16  ;;  %v7959_v16 = vshll.u32 %v7208_v40, 16  ;;  %v17388_v46 = vld.sshfl [vmem:[%s18729_s21 + $0x60] sm:$0x33 pattern:$0x75316420] }
 0x1a8   : > { %v7945_v11 = vsel %vm18764_vm1, %v7938_v41, %v7943_v8  ;;  %v7963_v61 = vshrl.u32 %v20432_v19, 16  ;;  %v7968_v23 = vshll.u32 %v20504_v35, 16  ;;  %v7953_v54 = vsel %vm18764_vm1, %v7946_v14, %v7951_v4 }
 0x1a9   : > { %18323 = vmatmul.mubr.msk.bf16.gmra.mrb[108].mxu1 %vm2698_vm2, %v6355_v53  ;;  %v8592_v48 = vcombine.low %v7913_v55, %v7921_v38  ;;  %v8593_v24 = vcombine.low %v7929_v20, %v7937_v15  ;;  %v5756_v3 = vcombine.high %v17387_v62, %v17387_v62  ;;  %v7961_v28 = vsel %vm18764_vm1, %v7954_v45, %v7959_v16  ;;  %v20582_v60 = vpop.f32.mrb[36].mxu0  ;;  %v17462_v20 = vld.sshfl [vmem:[%s18729_s21 + $0x54] sm:$0x33 pattern:$0x75316420] }
 0x1aa   : > { %v7970_v40 = vsel %vm18764_vm1, %v7963_v61, %v7968_v23  ;;  %v8594_v5 = vcombine.low %v7945_v11, %v7953_v54  ;;  %18326 = vmatprep.mubr.msk.bf16.mxu1 %vm18669_vm4, %v23290_v59  ;;  %v5763_v19 = vrot.slane %v17387_v62, %v18736_v10  ;;  %v18246_v45 = vpop.f32.mrb[37].mxu0  ;;  %v5779_v8 = vcombine.high %v17388_v46, %v17388_v46 }
 0x1ab   : > { %v8595_v51 = vcombine.low %v7961_v28, %v7970_v40  ;;  %v8602_v55 = vrot.slane %v8592_v48, %v18736_v10  ;;  %v8609_v15 = vrot.slane %v8593_v24, %v18736_v10  ;;  %v5770_v38 = vrot.slane %v5756_v3, %v18736_v10  ;;  %v20592_v13 = vpop.f32.mrb[38].mxu0 }
 0x1ac   : > { %v8616_v41 = vrot.slane %v8594_v5, %v18736_v10  ;;  %v5771_v23 = vcombine.high %v5763_v19, %v5763_v19  ;;  %v20590_v14 = vrot.slane %v17388_v46, %v18736_v10  ;;  %v20594_v62 = vpop.f32.mrb[40].mxu1  ;;  %v17400_v11 = vcombine.high %v20516_v26, %v20522_v1  ;;  %v18247_v61 = vpop.f32.mrb[39].mxu0 }
 0x1ad   : > { %v8623_v53 = vrot.slane %v8595_v51, %v18736_v10  ;;  %v8624_v4 = vcombine.low %v8602_v55, %v8609_v15  ;;  %v6357_v16 = vcombine.low %v5763_v19, %v5770_v38  ;;  %v18200_v54 = vpop.f32.mrb[41].mxu1  ;;  %v20600_v48 = vrot.slane %v5779_v8, %v18736_v10 }
 0x1ae   : > { %v20604_v24 = vcombine.high %v20590_v14, %v20590_v14  ;;  %v6358_v46 = vcombine.low %v5771_v23, %v20590_v14  ;;  %v7240_v3 = vcombine.high %v17462_v20, %v17462_v20  ;;  %v20607_v28 = vpop.f32.mrb[42].mxu1  ;;  %v6366_v51 = vrot.slane %v17400_v11, %v18736_v10 }
 0x1af   : > { %v8625_v40 = vcombine.low %v8616_v41, %v8623_v53  ;;  %v8632_v5 = vrot.slane %v8624_v4, %v18736_v10  ;;  %v6373_v19 = vrot.slane %v6357_v16, %v18736_v10  ;;  %v18201_v55 = vpop.f32.mrb[43].mxu1  ;;  %v7247_v45 = vrot.slane %v17462_v20, %v18736_v10 }
 0x1b0   : > { %v6359_v15 = vcombine.low %v20600_v48, %v20604_v24  ;;  %v6380_v38 = vrot.slane %v6358_v46, %v18736_v10  ;;  %v7254_v23 = vrot.slane %v7240_v3, %v18736_v10  ;;  %v20620_v41 = vcombine.high %v20516_v26, %v20516_v26 }
 0x1b1   : > { %v8639_v8 = vrot.slane %v8625_v40, %v18736_v10  ;;  %v6388_v61 = vcombine.low %v6366_v51, %v6373_v19  ;;  %v7971_v53 = vshrl.u32 %v20504_v35, 16  ;;  %v7255_v11 = vcombine.high %v7247_v45, %v7247_v45 }
 0x1b2   : > { %v6387_v4 = vrot.slane %v6359_v15, %v18736_v10  ;;  %v7256_v16 = vcombine.high %v7254_v23, %v7254_v23  ;;  %v7976_v54 = vshll.u32 %v20497_v56, 16  ;;  %v7979_v3 = vshrl.u32 %v20497_v56, 16  ;;  %v17389_v56 = vld.sshfl [vmem:[%s18729_s21 + $0x64] sm:$0x13 pattern:$0x75316420] }
 0x1b3   : > { %v8640_v46 = vcombine.low %v8632_v5, %v8639_v8  ;;  %v6396_v20 = vrot.slane %v6388_v61, %v18736_v10  ;;  %v7984_v40 = vshll.u32 %v20513_v7, 16  ;;  %v7987_v35 = vshrl.u32 %v20513_v7, 16  ;;  %v20631_v15 = vpop.f32.mrb[40].mxu0 }
 0x1b4   : > { %v6389_v51 = vcombine.low %v6380_v38, %v6387_v4  ;;  %v7978_v19 = vsel %vm18764_vm1, %v7971_v53, %v7976_v54  ;;  %v7992_v55 = vshll.u32 %v7247_v45, 16  ;;  %v7995_v8 = vshrl.u32 %v7247_v45, 16  ;;  %v18250_v27 = vpop.f32.mrb[41].mxu0 }
 0x1b5   : > { %18373 = vmatmul.mubr.msk.bf16.gmra.mrb[108].mxu0 %vm2698_vm2, %v8640_v46  ;;  %v7986_v5 = vsel %vm18764_vm1, %v7979_v3, %v7984_v40  ;;  %v8000_v61 = vshll.u32 %v7254_v23, 16  ;;  %v8003_v44 = vshrl.u32 %v7254_v23, 16  ;;  %v8008_v53 = vshll.u32 %v7255_v11, 16  ;;  %v20642_v54 = vpop.f32.mrb[42].mxu0 }
 0x1b6   : > { %18376 = vmatprep.mubr.msk.bf16.mxu0 %vm18669_vm4, %v23290_v59  ;;  %v6403_v38 = vrot.slane %v6389_v51, %v18736_v10  ;;  %v7994_v7 = vsel %vm18764_vm1, %v7987_v35, %v7992_v55  ;;  %v8011_v4 = vshrl.u32 %v7255_v11, 16  ;;  %v8016_v46 = vshll.u32 %v7256_v16, 16  ;;  %v18251_v3 = vpop.f32.mrb[43].mxu0 }
 0x1b7   : > { %v8002_v45 = vsel %vm18764_vm1, %v7995_v8, %v8000_v61  ;;  %v8020_v23 = vshrl.u32 %v20516_v26, 16  ;;  %v8025_v27 = vshll.u32 %v20522_v1, 16  ;;  %v8010_v51 = vsel %vm18764_vm1, %v8003_v44, %v8008_v53  ;;  %v20652_v55 = vpop.f32.mrb[44].mxu1 }
 0x1b8   : > { %v6404_v40 = vcombine.low %v6396_v20, %v6403_v38  ;;  %v8028_v35 = vshrl.u32 %v20522_v1, 16  ;;  %v8033_v11 = vshll.u32 %v20620_v41, 16  ;;  %23319 = vst [vmem:[#allocation19_spill] sm:$0xff] %v20652_v55  ;;  %v8018_v17 = vsel %vm18764_vm1, %v8011_v4, %v8016_v46  ;;  %v18204_v20 = vpop.f32.mrb[45].mxu1 }
 0x1b9   : > { %v8027_v16 = vsel %vm18764_vm1, %v8020_v23, %v8025_v27  ;;  %v8641_v26 = vcombine.low %v7978_v19, %v7986_v5  ;;  %v8642_v8 = vcombine.low %v7994_v7, %v8002_v45  ;;  %v17390_v61 = vld.sshfl [vmem:[%s18729_s21 + $0x68] sm:$0x33 pattern:$0x75316420]  ;;  %v8643_v38 = vcombine.low %v8010_v51, %v8018_v17  ;;  %v20666_v4 = vpop.f32.mrb[46].mxu1 }
 0x1ba   : > { %18327 = vmatmul.mubr.msk.bf16.gmra.mrb[112].mxu1 %vm2698_vm2, %v6404_v40  ;;  %v8035_v44 = vsel %vm18764_vm1, %v8028_v35, %v8033_v11  ;;  %v20664_v53 = vcombine.high %v20600_v48, %v20600_v48  ;;  %v5803_v3 = vcombine.high %v17389_v56, %v17389_v56  ;;  %23320 = vst [vmem:[#allocation20_spill] sm:$0xff] %v20666_v4  ;;  %v17464_v7 = vld.sshfl [vmem:[%s18729_s21 + $0x5c] sm:$0x33 pattern:$0x75316420]  ;;  %v18205_v45 = vpop.f32.mrb[47].mxu1 }
 0x1bb   : > { %v8644_v46 = vcombine.low %v8027_v16, %v8035_v44  ;;  %v8651_v23 = vrot.slane %v8641_v26, %v18736_v10  ;;  %v8658_v19 = vrot.slane %v8642_v8, %v18736_v10  ;;  %18330 = vmatprep.mubr.msk.bf16.mxu1 %vm18669_vm4, %v23290_v59  ;;  %v5810_v5 = vrot.slane %v17389_v56, %v18736_v10 }
 0x1bc   : > { %v8665_v17 = vrot.slane %v8643_v38, %v18736_v10  ;;  %v5817_v27 = vrot.slane %v5803_v3, %v18736_v10  ;;  %v5826_v40 = vcombine.high %v17390_v61, %v17390_v61  ;;  %v20677_v51 = vrot.slane %v17390_v61, %v18736_v10  ;;  %v20681_v8 = vpop.f32.mrb[44].mxu0 }
 0x1bd   : > { %v8672_v35 = vrot.slane %v8644_v46, %v18736_v10  ;;  %v8673_v11 = vcombine.low %v8651_v23, %v8658_v19  ;;  %v5818_v16 = vcombine.high %v5810_v5, %v5810_v5  ;;  %v6405_v26 = vcombine.low %v20664_v53, %v5810_v5  ;;  %23321 = vst [vmem:[#allocation21_spill] sm:$0xff] %v20681_v8  ;;  %v18254_v3 = vpop.f32.mrb[45].mxu0 }
 0x1be   : > { %v20684_v56 = vrot.slane %v5826_v40, %v18736_v10  ;;  %v7280_v20 = vcombine.high %v20522_v1, %v20522_v1  ;;  %v7288_v44 = vcombine.high %v17464_v7, %v17464_v7  ;;  %v7295_v38 = vrot.slane %v17464_v7, %v18736_v10  ;;  %v20691_v19 = vpop.f32.mrb[46].mxu0 }
 0x1bf   : > { %v8674_v61 = vcombine.low %v8665_v17, %v8672_v35  ;;  %v8681_v45 = vrot.slane %v8673_v11, %v18736_v10  ;;  %v6406_v46 = vcombine.low %v5817_v27, %v5818_v16  ;;  %v6415_v23 = vrot.slane %v6405_v26, %v18736_v10  ;;  %23322 = vst [vmem:[#allocation22_spill] sm:$0xff] %v20691_v19  ;;  %v18255_v57 = vpop.f32.mrb[47].mxu0 }
 0x1c0   : > { %v6407_v5 = vcombine.low %v20677_v51, %v20684_v56  ;;  %v17401_v40 = vcombine.high %v20677_v51, %v20684_v56  ;;  %v7302_v1 = vrot.slane %v7288_v44, %v18736_v10  ;;  %v7303_v50 = vcombine.high %v7295_v38, %v7295_v38  ;;  %v20703_v19 = vpop.f32.mrb[48].mxu1 }
 0x1c1   : > { %v8688_v7 = vrot.slane %v8674_v61, %v18736_v10  ;;  %v6422_v17 = vrot.slane %v6406_v46, %v18736_v10  ;;  %v8036_v27 = vshrl.u32 %v20620_v41, 16  ;;  %v8041_v35 = vshll.u32 %v7280_v20, 16  ;;  %23323 = vst [vmem:[#allocation23_spill] sm:$0xff] %v20703_v19  ;;  %v18208_v9 = vpop.f32.mrb[49].mxu1 }
 0x1c2   : > { %v6429_v11 = vrot.slane %v6407_v5, %v18736_v10  ;;  %v6436_v16 = vrot.slane %v17401_v40, %v18736_v10  ;;  %v7304_v26 = vcombine.high %v7302_v1, %v7302_v1  ;;  %v8044_v3 = vshrl.u32 %v7280_v20, 16  ;;  %v20707_v5 = vpop.f32.mrb[50].mxu1 }
 0x1c3   : > { %v8689_v4 = vcombine.low %v8681_v45, %v8688_v7  ;;  %v6437_v44 = vcombine.low %v6415_v23, %v6422_v17  ;;  %v8043_v57 = vsel %vm18764_vm1, %v8036_v27, %v8041_v35  ;;  %v8049_v61 = vshll.u32 %v7295_v38, 16  ;;  %23324 = vst [vmem:[#allocation24_spill] sm:$0xff] %v20707_v5  ;;  %v17391_v7 = vld.sshfl [vmem:[%s18729_s21 + $0x6c] sm:$0x13 pattern:$0x75316420] }
 0x1c4   : > { %v6438_v46 = vcombine.low %v6429_v11, %v6436_v16  ;;  %v8052_v8 = vshrl.u32 %v7295_v38, 16  ;;  %v8057_v41 = vshll.u32 %v7302_v1, 16  ;;  %v8060_v55 = vshrl.u32 %v7302_v1, 16  ;;  %v18209_v17 = vpop.f32.mrb[51].mxu1 }
 0x1c5   : > { %18377 = vmatmul.mubr.msk.bf16.gmra.mrb[112].mxu0 %vm2698_vm2, %v8689_v4  ;;  %v6445_v20 = vrot.slane %v6437_v44, %v18736_v10  ;;  %v8051_v45 = vsel %vm18764_vm1, %v8044_v3, %v8049_v61  ;;  %v8065_v23 = vshll.u32 %v7303_v50, 16  ;;  %v8068_v40 = vshrl.u32 %v7303_v50, 16  ;;  %v17392_v27 = vld.sshfl [vmem:[%s18729_s21 + $0x70] sm:$0x33 pattern:$0x75316420] }
 0x1c6   : > { %18380 = vmatprep.mubr.msk.bf16.mxu0 %vm18669_vm4, %v23290_v59  ;;  %v6452_v9 = vrot.slane %v6438_v46, %v18736_v10  ;;  %v8059_v38 = vsel %vm18764_vm1, %v8052_v8, %v8057_v41  ;;  %v8073_v1 = vshll.u32 %v7304_v26, 16  ;;  %v8077_v4 = vshrl.u32 %v20590_v14, 16  ;;  %v20721_v35 = vpop.f32.mrb[48].mxu0 }
 0x1c7   : > { %23325 = vst [vmem:[#allocation25_spill] sm:$0xff] %v20721_v35  ;;  %v8067_v11 = vsel %vm18764_vm1, %v8060_v55, %v8065_v23  ;;  %v8082_v50 = vshll.u32 %v20600_v48, 16  ;;  %v8085_v16 = vshrl.u32 %v20600_v48, 16  ;;  %v8090_v3 = vshll.u32 %v20604_v24, 16  ;;  %v18258_v44 = vpop.f32.mrb[49].mxu0 }
 0x1c8   : > { %v6453_v61 = vcombine.low %v6445_v20, %v6452_v9  ;;  %v8075_v8 = vsel %vm18764_vm1, %v8068_v40, %v8073_v1  ;;  %v8093_v14 = vshrl.u32 %v20604_v24, 16  ;;  %v8098_v26 = vshll.u32 %v20664_v53, 16  ;;  %v20732_v46 = vpop.f32.mrb[50].mxu0 }
 0x1c9   : > { %23326 = vst [vmem:[#allocation26_spill] sm:$0xff] %v20732_v46  ;;  %v8084_v55 = vsel %vm18764_vm1, %v8077_v4, %v8082_v50  ;;  %v8092_v48 = vsel %vm18764_vm1, %v8085_v16, %v8090_v3  ;;  %v8690_v41 = vcombine.low %v8043_v57, %v8051_v45  ;;  %v8691_v23 = vcombine.low %v8059_v38, %v8067_v11  ;;  %v18259_v17 = vpop.f32.mrb[51].mxu0  ;;  %v20742_v40 = vld.sshfl [vmem:[%s18729_s21 + $0x74] sm:$0x13 pattern:$0x75316420] }
 0x1ca   : > { %18331 = vmatmul.mubr.msk.bf16.gmra.mrb[116].mxu1 %vm2698_vm2, %v6453_v61  ;;  %v8100_v20 = vsel %vm18764_vm1, %v8093_v14, %v8098_v26  ;;  %v8692_v24 = vcombine.low %v8075_v8, %v8084_v55  ;;  %v5850_v9 = vcombine.high %v17391_v7, %v17391_v7  ;;  %v5857_v1 = vrot.slane %v17391_v7, %v18736_v10  ;;  %v17466_v45 = vld.sshfl [vmem:[%s18729_s21 + $0x64] sm:$0x33 pattern:$0x75316420] }
 0x1cb   : > { %v8693_v44 = vcombine.low %v8092_v48, %v8100_v20  ;;  %v8700_v4 = vrot.slane %v8690_v41, %v18736_v10  ;;  %v8707_v50 = vrot.slane %v8691_v23, %v18736_v10  ;;  %18334 = vmatprep.mubr.msk.bf16.mxu1 %vm18669_vm4, %v23290_v59  ;;  %v5873_v57 = vcombine.high %v17392_v27, %v17392_v27 }
 0x1cc   : > { %v8714_v38 = vrot.slane %v8692_v24, %v18736_v10  ;;  %v5864_v11 = vrot.slane %v5850_v9, %v18736_v10  ;;  %v5865_v16 = vcombine.high %v5857_v1, %v5857_v1  ;;  %v20753_v3 = vrot.slane %v17392_v27, %v18736_v10 }
 0x1cd   : > { %v8721_v7 = vrot.slane %v8693_v44, %v18736_v10  ;;  %v8722_v61 = vcombine.low %v8700_v4, %v8707_v50  ;;  %v20757_v8 = vrot.slane %v5873_v57, %v18736_v10  ;;  %v20761_v14 = vrot.slane %v20742_v40, %v18736_v10  ;;  %v20782_v50 = vpop.f32.mrb[52].mxu1  ;;  %v20784_v57 = vpop.f32.mrb[52].mxu0 }
 0x1ce   : > { %v20765_v26 = vcombine.high %v20753_v3, %v20753_v3  ;;  %v6454_v55 = vcombine.low %v5857_v1, %v5864_v11  ;;  %v6455_v48 = vcombine.low %v5865_v16, %v20753_v3  ;;  %v7336_v27 = vcombine.high %v17466_v45, %v17466_v45  ;;  %v20779_v1 = vld.sshfl [vmem:[%s18729_s21 + $0x6c] sm:$0x33 pattern:$0x75316420]  ;;  %23327 = vst [vmem:[#allocation27_spill] sm:$0xff] %v20782_v50 }
 0x1cf   : > { %v8723_v41 = vcombine.low %v8714_v38, %v8721_v7  ;;  %v8730_v23 = vrot.slane %v8722_v61, %v18736_v10  ;;  %v20771_v17 = vcombine.high %v20757_v8, %v20757_v8  ;;  %v7343_v20 = vrot.slane %v17466_v45, %v18736_v10  ;;  %23328 = vst [vmem:[#allocation28_spill] sm:$0xff] %v20784_v57  ;;  %v18212_v7 = vpop.f32.mrb[53].mxu1  ;;  %v18262_v61 = vpop.f32.mrb[53].mxu0 }
 0x1d0   : > { %v6456_v24 = vcombine.low %v20757_v8, %v20765_v26  ;;  %v6464_v9 = vrot.slane %v6454_v55, %v18736_v10  ;;  %v6471_v44 = vrot.slane %v6455_v48, %v18736_v10  ;;  %v7350_v4 = vrot.slane %v7336_v27, %v18736_v10  ;;  %v20794_v50 = vpop.f32.mrb[54].mxu1  ;;  %v20796_v57 = vpop.f32.mrb[54].mxu0 }
 0x1d1   : > { %v8737_v38 = vrot.slane %v8723_v41, %v18736_v10  ;;  %v6457_v45 = vcombine.low %v20771_v17, %v20761_v14  ;;  %v7351_v11 = vcombine.high %v7343_v20, %v7343_v20  ;;  %v7375_v16 = vcombine.high %v20677_v51, %v20677_v51  ;;  %23329 = vst [vmem:[#allocation29_spill] sm:$0xff] %v20794_v50  ;;  %v18263_v61 = vpop.f32.mrb[55].mxu0 }
 0x1d2   : > { %v6478_v55 = vrot.slane %v6456_v24, %v18736_v10  ;;  %v6486_v48 = vcombine.low %v6464_v9, %v6471_v44  ;;  %v7352_v46 = vcombine.high %v7350_v4, %v7350_v4  ;;  %v7376_v27 = vcombine.high %v20684_v56, %v20684_v56  ;;  %23330 = vst [vmem:[#allocation30_spill] sm:$0xff] %v20796_v57  ;;  %v18213_v24 = vpop.f32.mrb[55].mxu1 }
 0x1d3   : > { %v8738_v41 = vcombine.low %v8730_v23, %v8737_v38  ;;  %v6485_v5 = vrot.slane %v6457_v45, %v18736_v10  ;;  %v20801_v35 = vrot.slane %v20779_v1, %v18736_v10  ;;  %v8101_v7 = vshrl.u32 %v20664_v53, 16 }
 0x1d4   : > { %v6494_v9 = vrot.slane %v6486_v48, %v18736_v10  ;;  %v8106_v44 = vshll.u32 %v7343_v20, 16  ;;  %v8109_v19 = vshrl.u32 %v7343_v20, 16  ;;  %v8114_v0 = vshll.u32 %v7350_v4, 16 }
 0x1d5   : > { %18381 = vmatmul.mubr.msk.bf16.gmra.mrb[116].mxu0 %vm2698_vm2, %v8738_v41  ;;  %v6487_v50 = vcombine.low %v6478_v55, %v6485_v5  ;;  %v8117_v57 = vshrl.u32 %v7350_v4, 16  ;;  %v8122_v23 = vshll.u32 %v7351_v11, 16  ;;  %v8125_v38 = vshrl.u32 %v7351_v11, 16 }
 0x1d6   : > { %18384 = vmatprep.mubr.msk.bf16.mxu0 %vm18669_vm4, %v23290_v59  ;;  %v8108_v45 = vsel %vm18764_vm1, %v8101_v7, %v8106_v44  ;;  %v8116_v53 = vsel %vm18764_vm1, %v8109_v19, %v8114_v0  ;;  %v8130_v61 = vshll.u32 %v7352_v46, 16  ;;  %v8134_v48 = vshrl.u32 %v20677_v51, 16 }
 0x1d7   : > { %v6501_v20 = vrot.slane %v6487_v50, %v18736_v10  ;;  %v8124_v5 = vsel %vm18764_vm1, %v8117_v57, %v8122_v23  ;;  %v8139_v4 = vshll.u32 %v20684_v56, 16  ;;  %v8142_v11 = vshrl.u32 %v20684_v56, 16  ;;  %v17470_v23 = vld.sshfl [vmem:[%s18729_s21 + $0x74] sm:$0x33 pattern:$0x75316420] }
 0x1d8   : > { %v8132_v55 = vsel %vm18764_vm1, %v8125_v38, %v8130_v61  ;;  %v8147_v41 = vshll.u32 %v7375_v16, 16  ;;  %v8150_v7 = vshrl.u32 %v7375_v16, 16  ;;  %v8155_v24 = vshll.u32 %v7376_v27, 16  ;;  %v20835_v61 = vpop.f32.mrb[56].mxu1 }
 0x1d9   : > { %v6502_v0 = vcombine.low %v6494_v9, %v6501_v20  ;;  %v8141_v51 = vsel %vm18764_vm1, %v8134_v48, %v8139_v4  ;;  %v8158_v19 = vshrl.u32 %v7376_v27, 16  ;;  %v8163_v46 = vshll.u32 %v20801_v35, 16  ;;  %v20837_v48 = vpop.f32.mrb[56].mxu0  ;;  %v18216_v4 = vpop.f32.mrb[57].mxu1 }
 0x1da   : > { %v8149_v50 = vsel %vm18764_vm1, %v8142_v11, %v8147_v41  ;;  %v8157_v57 = vsel %vm18764_vm1, %v8150_v7, %v8155_v24  ;;  %v8739_v56 = vcombine.low %v8108_v45, %v8116_v53  ;;  %v8740_v44 = vcombine.low %v8124_v5, %v8132_v55  ;;  %v20849_v7 = vpop.f32.mrb[58].mxu1 }
 0x1db   : > { %18335 = vmatmul.mubr.msk.bf16.gmra.mrb[120].mxu1 %vm2698_vm2, %v6502_v0  ;;  %v8165_v16 = vsel %vm18764_vm1, %v8158_v19, %v8163_v46  ;;  %v8741_v9 = vcombine.low %v8141_v51, %v8149_v50  ;;  %v5897_v27 = vcombine.high %v20742_v40, %v20742_v40  ;;  %v5912_v38 = vcombine.high %v20761_v14, %v20761_v14  ;;  %v18266_v40 = vpop.f32.mrb[57].mxu0  ;;  %v18217_v50 = vpop.f32.mrb[59].mxu1 }
 0x1dc   : > { %v8742_v20 = vcombine.low %v8157_v57, %v8165_v16  ;;  %v8749_v45 = vrot.slane %v8739_v56, %v18736_v10  ;;  %v8756_v53 = vrot.slane %v8740_v44, %v18736_v10  ;;  %18338 = vmatprep.mubr.msk.bf16.mxu1 %vm18669_vm4, %v23290_v59  ;;  %v7384_v5 = vcombine.high %v20779_v1, %v20779_v1  ;;  %v20851_v24 = vpop.f32.mrb[58].mxu0 }
 0x1dd   : > { %v8763_v11 = vrot.slane %v8741_v9, %v18736_v10  ;;  %v5911_v14 = vrot.slane %v5897_v27, %v18736_v10  ;;  %v7399_v55 = vcombine.high %v20801_v35, %v20801_v35  ;;  %v7432_v41 = vcombine.high %v17470_v23, %v17470_v23  ;;  %v18267_v46 = vpop.f32.mrb[59].mxu0 }
 0x1de   : > { %v8770_v0 = vrot.slane %v8742_v20, %v18736_v10  ;;  %v8771_v51 = vcombine.low %v8749_v45, %v8756_v53  ;;  %v7398_v19 = vrot.slane %v7384_v5, %v18736_v10  ;;  %v7439_v1 = vrot.slane %v17470_v23, %v18736_v10 }
 0x1df   : > { %v6503_v57 = vcombine.low %v5911_v14, %v5912_v38  ;;  %v7446_v56 = vrot.slane %v7432_v41, %v18736_v10  ;;  %v8166_v44 = vshrl.u32 %v20801_v35, 16  ;;  %v8179_v16 = vshll.u32 %v7399_v55, 16 }
 0x1e0   : > { %v8772_v9 = vcombine.low %v8763_v11, %v8770_v0  ;;  %v8779_v27 = vrot.slane %v8771_v51, %v18736_v10  ;;  %v7400_v4 = vcombine.high %v7398_v19, %v7398_v19  ;;  %v8171_v40 = vshll.u32 %v7398_v19, 16 }
 0x1e1   : > { %v6510_v20 = vrot.slane %v6503_v57, %v18736_v10  ;;  %v8174_v45 = vshrl.u32 %v7398_v19, 16  ;;  %v8182_v53 = vshrl.u32 %v7399_v55, 16  ;;  %v8191_v5 = vshrl.u32 %v20753_v3, 16 }
 0x1e2   : > { %v8786_v23 = vrot.slane %v8772_v9, %v18736_v10  ;;  %v8173_v38 = vsel %vm18764_vm1, %v8166_v44, %v8171_v40  ;;  %v8187_v14 = vshll.u32 %v7400_v4, 16  ;;  %v8196_v35 = vshll.u32 %v20757_v8, 16 }
 0x1e3   : > { %v6517_v11 = vrot.slane %v6510_v20, %v18736_v10  ;;  %v8181_v41 = vsel %vm18764_vm1, %v8174_v45, %v8179_v16  ;;  %v8199_v0 = vshrl.u32 %v20757_v8, 16  ;;  %v8204_v51 = vshll.u32 %v20765_v26, 16  ;;  %v17611_v45 = vld.sshfl [vmem:[%s18729_s21 + $0x8] sm:$0x32 pattern:$0x75316420] }
 0x1e4   : > { %v8787_v55 = vcombine.low %v8779_v27, %v8786_v23  ;;  %v8189_v3 = vsel %vm18764_vm1, %v8182_v53, %v8187_v14  ;;  %v8198_v19 = vsel %vm18764_vm1, %v8191_v5, %v8196_v35  ;;  %v8207_v46 = vshrl.u32 %v20765_v26, 16  ;;  %v17612_v14 = vld.sshfl [vmem:[%s18729_s21 + $0xc] sm:$0x33 pattern:$0x75316420] }
 0x1e5   : > { %18339 = vmatmul.mubr.msk.bf16.gmra.mrb[124].mxu1 %vm2698_vm2, %v6517_v11  ;;  %v8206_v50 = vsel %vm18764_vm1, %v8199_v0, %v8204_v51  ;;  %v8212_v57 = vshll.u32 %v20771_v17, 16  ;;  %v8215_v8 = vshrl.u32 %v20771_v17, 16  ;;  %v8220_v44 = vshll.u32 %v7439_v1, 16  ;;  %v20895_v51 = vpop.f32.mrb[60].mxu1 }
 0x1e6   : > { %18385 = vmatmul.mubr.msk.bf16.gmra.mrb[120].mxu0 %vm2698_vm2, %v8787_v55  ;;  %v8223_v16 = vshrl.u32 %v7439_v1, 16  ;;  %v8228_v9 = vshll.u32 %v7446_v56, 16  ;;  %v8788_v27 = vcombine.low %v8173_v38, %v8181_v41  ;;  %v8789_v4 = vcombine.low %v8189_v3, %v8198_v19  ;;  %18398 = vmatprep.mubr.msk.bf16.mxu1 %vm18669_vm4, %v23290_v59  ;;  %v20897_v55 = vpop.f32.mrb[60].mxu0 }
 0x1e7   : > { %18388 = vmatprep.mubr.msk.bf16.mxu0 %vm18669_vm4, %v23290_v59  ;;  %v8214_v26 = vsel %vm18764_vm1, %v8207_v46, %v8212_v57  ;;  %v8222_v17 = vsel %vm18764_vm1, %v8215_v8, %v8220_v44  ;;  %v7447_v40 = vcombine.high %v7439_v1, %v7439_v1  ;;  %v7448_v20 = vcombine.high %v7446_v56, %v7446_v56  ;;  %v18270_v57 = vpop.f32.mrb[61].mxu0 }
 0x1e8   : > { %v8230_v53 = vsel %vm18764_vm1, %v8223_v16, %v8228_v9  ;;  %v8790_v5 = vcombine.low %v8206_v50, %v8214_v26  ;;  %v8798_v23 = vrot.slane %v8788_v27, %v18736_v10  ;;  %v8805_v38 = vrot.slane %v8789_v4, %v18736_v10  ;;  %v18220_v50 = vpop.f32.mrb[61].mxu1  ;;  %v17613_v16 = vld.sshfl [vmem:[%s18729_s21 + $0x10] sm:$0x32 pattern:$0x75316420]  ;;  %v20907_v4 = vpop.f32.mrb[62].mxu0 }
 0x1e9   : > { %v8791_v35 = vcombine.low %v8222_v17, %v8230_v53  ;;  %v8231_v11 = vshrl.u32 %v7446_v56, 16  ;;  %v8236_v41 = vshll.u32 %v7447_v40, 16  ;;  %v8239_v0 = vshrl.u32 %v7447_v40, 16  ;;  %v20905_v27 = vpop.f32.mrb[62].mxu1  ;;  %v18271_v53 = vpop.f32.mrb[63].mxu0 }
 0x1ea   : > { %v8812_v1 = vrot.slane %v8790_v5, %v18736_v10  ;;  %v8820_v3 = vcombine.low %v8798_v23, %v8805_v38  ;;  %v8244_v19 = vshll.u32 %v7448_v20, 16  ;;  %v9118_v46 = vcombine.high %v17611_v45, %v17611_v45  ;;  %v18221_v5 = vpop.f32.mrb[63].mxu1  ;;  %v17614_v57 = vld.sshfl [vmem:[%s18729_s21 + $0x14] sm:$0x33 pattern:$0x75316420] }
 0x1eb   : > { %v8819_v8 = vrot.slane %v8791_v35, %v18736_v10  ;;  %v8238_v44 = vsel %vm18764_vm1, %v8231_v11, %v8236_v41  ;;  %v9125_v56 = vrot.slane %v17611_v45, %v18736_v10  ;;  %v9142_v9 = vcombine.high %v17612_v14, %v17612_v14 }
 0x1ec   : > { %v8828_v26 = vrot.slane %v8820_v3, %v18736_v10  ;;  %v8246_v17 = vsel %vm18764_vm1, %v8239_v0, %v8244_v19  ;;  %v9132_v40 = vrot.slane %v9118_v46, %v18736_v10  ;;  %v9149_v20 = vrot.slane %v17612_v14, %v18736_v10  ;;  %v17898_v14 = vld [vmem:[%s23248_s1 + $0xe] sm:$0x3] }
 0x1ed   : > { %v8821_v23 = vcombine.low %v8812_v1, %v8819_v8  ;;  %v8837_v38 = vcombine.low %v8238_v44, %v8246_v17  ;;  %v9133_v45 = vcombine.high %v9125_v56, %v9125_v56  ;;  %v9156_v35 = vrot.slane %v9142_v9, %v18736_v10 }
 0x1ee   : > { %v9134_v11 = vcombine.high %v9132_v40, %v9132_v40  ;;  %v9157_v41 = vcombine.high %v9149_v20, %v9149_v20  ;;  %v9166_v50 = vcombine.high %v17613_v16, %v17613_v16  ;;  %v20917_v3 = vadd.f32 %v20426_v29, %v19894_v39  ;;  %v17615_v29 = vld.sshfl [vmem:[%s18729_s21 + $0x18] sm:$0x32 pattern:$0x75316420] }
 0x1ef   : > { %v8835_v0 = vrot.slane %v8821_v23, %v18736_v10  ;;  %v20924_v1 = vrot.slane %v8837_v38, %v18736_v10  ;;  %v9158_v19 = vcombine.high %v9156_v35, %v9156_v35  ;;  %v9785_v46 = vcombine.low %v9132_v40, %v9133_v45  ;;  %v17695_v40 = vld.sshfl [vmem:[%s18729_s21 + $0x10] sm:$0x33 pattern:$0x75316420] }
 0x1f0   : > { %v9180_v8 = vrot.slane %v9166_v50, %v18736_v10  ;;  %v9786_v44 = vcombine.low %v9134_v11, %v9149_v20  ;;  %v9787_v56 = vcombine.low %v9156_v35, %v9157_v41  ;;  %v20930_v39 = vadd.f32 %v20439_v33, %v19910_v21 }
 0x1f1   : > { %v8836_v9 = vcombine.low %v8828_v26, %v8835_v0  ;;  %v8851_v17 = vrot.slane %v20924_v1, %v18736_v10  ;;  %v9795_v53 = vrot.slane %v9785_v46, %v18736_v10  ;;  %v14288_v5 = vsel %vm2738_vm0, %v17898_v14, 0  ;;  %v17696_v14 = vld.sshfl [vmem:[%s18729_s21 + $0x14] sm:$0x13 pattern:$0x75316420]  ;;  %v20948_v1 = vpop.f32.mrb[64].mxu1 }
 0x1f2   : > { %v9788_v23 = vcombine.low %v9158_v19, %v9180_v8  ;;  %v9802_v38 = vrot.slane %v9786_v44, %v18736_v10  ;;  %v9809_v20 = vrot.slane %v9787_v56, %v18736_v10  ;;  %v9173_v45 = vrot.slane %v17613_v16, %v18736_v10  ;;  %23331 = vst [vmem:[#allocation31_spill] sm:$0xff] %v20948_v1  ;;  %v20950_v16 = vpop.f32.mrb[64].mxu0  ;;  %v20957_v44 = vld.sshfl [vmem:[%s18729_s21 + $0x18] sm:$0x33 pattern:$0x75316420] }
 0x1f3   : > { %18389 = vmatmul.mubr.msk.bf16.gmra.mrb[124].mxu0 %vm2698_vm2, %v8836_v9  ;;  %v9190_v21 = vcombine.high %v17614_v57, %v17614_v57  ;;  %v9197_v33 = vrot.slane %v17614_v57, %v18736_v10  ;;  %v9214_v26 = vcombine.high %v17615_v29, %v17615_v29  ;;  %v9221_v35 = vrot.slane %v17615_v29, %v18736_v10  ;;  %v18224_v29 = vpop.f32.mrb[65].mxu1  ;;  %v18274_v9 = vpop.f32.mrb[65].mxu0 }
 0x1f4   : > { %18392 = vmatprep.mubr.msk.bf16.mxu0 %vm18669_vm4, %v23290_v59  ;;  %v9816_v11 = vrot.slane %v9788_v23, %v18736_v10  ;;  %v9817_v41 = vcombine.low %v9795_v53, %v9802_v38  ;;  %v17640_v50 = vcombine.high %v9173_v45, %v9180_v8  ;;  %v10658_v0 = vcombine.high %v17695_v40, %v17695_v40  ;;  %v20963_v45 = vpop.f32.mrb[66].mxu1 }
 0x1f5   : > { %23332 = vst [vmem:[#allocation32_spill] sm:$0xff] %v20950_v16  ;;  %v9204_v19 = vrot.slane %v9190_v21, %v18736_v10  ;;  %v20954_v46 = vrot.slane %v9214_v26, %v18736_v10  ;;  %v9229_v57 = vcombine.high %v9221_v35, %v9221_v35  ;;  %v10665_v56 = vrot.slane %v17695_v40, %v18736_v10  ;;  %v20965_v21 = vpop.f32.mrb[66].mxu0  ;;  %v18225_v40 = vpop.f32.mrb[67].mxu1 }
 0x1f6   : > { %v9818_v53 = vcombine.low %v9809_v20, %v9816_v11  ;;  %v9825_v8 = vrot.slane %v9817_v41, %v18736_v10  ;;  %v9844_v23 = vrot.slane %v17640_v50, %v18736_v10  ;;  %v10672_v38 = vrot.slane %v10658_v0, %v18736_v10  ;;  %v18275_v1 = vpop.f32.mrb[67].mxu0 }
 0x1f7   : > { %v9835_v26 = vcombine.low %v9197_v33, %v9204_v19  ;;  %v17641_v25 = vcombine.high %v9197_v33, %v9204_v19  ;;  %v9837_v35 = vcombine.low %v20954_v46, %v9229_v57  ;;  %v10682_v16 = vcombine.high %v17696_v14, %v17696_v14 }
 0x1f8   : > { %v9832_v29 = vrot.slane %v9818_v53, %v18736_v10  ;;  %v10689_v20 = vrot.slane %v17696_v14, %v18736_v10  ;;  %v20972_v11 = vrot.slane %v20957_v44, %v18736_v10  ;;  %v11311_v41 = vcombine.low %v10665_v56, %v10672_v38  ;;  %v17968_v14 = vld [vmem:[%s23248_s1 + $0x10] sm:$0x3] }
 0x1f9   : > { %v9851_v50 = vrot.slane %v9835_v26, %v18736_v10  ;;  %v9858_v0 = vrot.slane %v17641_v25, %v18736_v10  ;;  %v9865_v33 = vrot.slane %v9837_v35, %v18736_v10  ;;  %v10696_v19 = vrot.slane %v10682_v16, %v18736_v10 }
 0x1fa   : > { %v9833_v1 = vcombine.low %v9825_v8, %v9832_v29  ;;  %v10697_v57 = vcombine.high %v10689_v20, %v10689_v20  ;;  %v17724_v9 = vcombine.high %v10665_v56, %v10672_v38  ;;  %v11321_v53 = vrot.slane %v11311_v41, %v18736_v10  ;;  %v17616_v38 = vld.sshfl [vmem:[%s18729_s21 + $0x1c] sm:$0x33 pattern:$0x75316420] }
 0x1fb   : > { %18393 = vmatmul.mubr.msk.bf16.gmra.mrb[128].mxu0 %vm2698_vm2, %v8851_v17  ;;  %v9866_v26 = vcombine.low %v9844_v23, %v9851_v50  ;;  %v9867_v40 = vcombine.low %v9858_v0, %v9865_v33  ;;  %v11313_v25 = vcombine.low %v10689_v20, %v10696_v19  ;;  %v20990_v8 = vadd.f32 %v20458_v42, %v19987_v6  ;;  %v17617_v20 = vld.sshfl [vmem:[%s18729_s21 + $0x20] sm:$0x32 pattern:$0x75316420] }
 0x1fc   : > { %18399 = vmatmul.mubr.msk.bf16.vlgmr.msra.gmra.mrb[128].mxu1 %vm2698_vm2, %v9833_v1  ;;  %18452 = vmatprep.mubr.msk.bf16.mxu0 %vm18669_vm4, %v23290_v59  ;;  %v11314_v16 = vcombine.low %v10697_v57, %v20972_v11  ;;  %v11328_v56 = vrot.slane %v17724_v9, %v18736_v10  ;;  %v15824_v29 = vsel %vm2738_vm0, %v17968_v14, 0  ;;  %v21003_v6 = vadd.f32 %v20481_v63, %v20917_v3  ;;  %v21015_v1 = vpop.f32.mrb[68].mxu1  ;;  %v21017_v57 = vpop.f32.mrb[68].mxu0 }
 0x1fd   : > { %18505 = vmatpush3.bf16.msra.mxu1 %v14288_v5  ;;  %18402 = vmatprep.mubr.msk.bf16.mxu1 %vm18669_vm4, %v23290_v59  ;;  %v9874_v17 = vrot.slane %v9866_v26, %v18736_v10  ;;  %v9881_v23 = vrot.slane %v9867_v40, %v18736_v10  ;;  %v11335_v35 = vrot.slane %v11313_v25, %v18736_v10  ;;  %v18278_v14 = vpop.f32.mrb[69].mxu0 }
 0x1fe   : > { %v11342_v41 = vrot.slane %v11314_v16, %v18736_v10  ;;  %v11343_v50 = vcombine.low %v11321_v53, %v11328_v56  ;;  %v21007_v42 = vadd.f32 %v20467_v31, %v19998_v30  ;;  %v21011_v0 = vadd.f32 %v20488_v49, %v20930_v39  ;;  %v17698_v31 = vld.sshfl [vmem:[%s18729_s21 + $0x1c] sm:$0x13 pattern:$0x75316420]  ;;  %v18228_v53 = vpop.f32.mrb[69].mxu1  ;;  %v21030_v25 = vpop.f32.mrb[70].mxu0 }
 0x1ff   : > { %v9882_v5 = vcombine.low %v9874_v17, %v9881_v23  ;;  %v9230_v33 = vcombine.high %v20954_v46, %v20954_v46  ;;  %v9238_v19 = vcombine.high %v17616_v38, %v17616_v38  ;;  %v9245_v3 = vrot.slane %v17616_v38, %v18736_v10  ;;  %v21028_v40 = vpop.f32.mrb[70].mxu1  ;;  %v18279_v23 = vpop.f32.mrb[71].mxu0 }
 0x200   : > { %v11344_v9 = vcombine.low %v11335_v35, %v11342_v41  ;;  %v11351_v63 = vrot.slane %v11343_v50, %v18736_v10  ;;  %v9262_v30 = vcombine.high %v17617_v20, %v17617_v20  ;;  %v9269_v39 = vrot.slane %v17617_v20, %v18736_v10  ;;  %v18229_v35 = vpop.f32.mrb[71].mxu1  ;;  %v17699_v20 = vld.sshfl [vmem:[%s18729_s21 + $0x20] sm:$0x33 pattern:$0x75316420] }
 0x201   : > { %v9252_v49 = vrot.slane %v9238_v19, %v18736_v10  ;;  %v10705_v46 = vcombine.high %v20957_v44, %v20957_v44  ;;  %v10720_v26 = vcombine.high %v20972_v11, %v20972_v11  ;;  %v9253_v56 = vcombine.high %v9245_v3, %v9245_v3 }
 0x202   : > { %v11358_v16 = vrot.slane %v11344_v9, %v18736_v10  ;;  %v9276_v38 = vrot.slane %v9262_v30, %v18736_v10  ;;  %v9883_v17 = vcombine.low %v9230_v33, %v9245_v3  ;;  %v10729_v44 = vcombine.high %v17698_v31, %v17698_v31 }
 0x203   : > { %v9254_v41 = vcombine.high %v9252_v49, %v9252_v49  ;;  %v10719_v50 = vrot.slane %v10705_v46, %v18736_v10  ;;  %v10736_v19 = vrot.slane %v17698_v31, %v18736_v10  ;;  %v9884_v53 = vcombine.low %v9252_v49, %v9253_v56 }
 0x204   : > { %18403 = vmatmul.mubr.msk.bf16.gmra.mrb[132].mxu1 %vm2698_vm2, %v9882_v5  ;;  %v11359_v11 = vcombine.low %v11351_v63, %v11358_v16  ;;  %v17642_v14 = vcombine.high %v9269_v39, %v9276_v38  ;;  %v9893_v9 = vrot.slane %v9883_v17, %v18736_v10  ;;  %v10743_v30 = vrot.slane %v10729_v44, %v18736_v10 }
 0x205   : > { %18406 = vmatprep.mubr.msk.bf16.mxu1 %vm18669_vm4, %v23290_v59  ;;  %v9885_v33 = vcombine.low %v9254_v41, %v9276_v38  ;;  %v10721_v3 = vcombine.high %v10719_v50, %v10719_v50  ;;  %v10744_v23 = vcombine.high %v10736_v19, %v10736_v19  ;;  %v9900_v31 = vrot.slane %v9884_v53, %v18736_v10  ;;  %v17618_v41 = vld.sshfl [vmem:[%s18729_s21 + $0x24] sm:$0x33 pattern:$0x75316420] }
 0x206   : > { %18453 = vmatmul.mubr.msk.bf16.vlgmr.msra.gmra.mrb[132].mxu0 %vm2698_vm2, %v11359_v11  ;;  %v9914_v5 = vrot.slane %v17642_v14, %v18736_v10  ;;  %v10752_v63 = vcombine.high %v17699_v20, %v17699_v20  ;;  %v21046_v49 = vrot.slane %v17699_v20, %v18736_v10  ;;  %v11360_v46 = vcombine.low %v10719_v50, %v10720_v26  ;;  %v17619_v50 = vld.sshfl [vmem:[%s18729_s21 + $0x28] sm:$0x32 pattern:$0x75316420]  ;;  %v21068_v11 = vpop.f32.mrb[72].mxu0 }
 0x207   : > { %18559 = vmatpush3.bf16.msra.mxu0 %v15824_v29  ;;  %18456 = vmatprep.mubr.msk.bf16.mxu0 %vm18669_vm4, %v23290_v59  ;;  %v9907_v39 = vrot.slane %v9885_v33, %v18736_v10  ;;  %v11361_v16 = vcombine.low %v10721_v3, %v10736_v19  ;;  %v9915_v56 = vcombine.low %v9893_v9, %v9900_v31  ;;  %v21066_v19 = vpop.f32.mrb[72].mxu1  ;;  %v21079_v9 = vld.sshfl [vmem:[%s18729_s21 + $0x2c] sm:$0x33 pattern:$0x75316420] }
 0x208   : > { %v21052_v38 = vrot.slane %v10752_v63, %v18736_v10  ;;  %v11362_v17 = vcombine.low %v10743_v30, %v10744_v23  ;;  %v21056_v35 = vadd.f32 %v20506_v36, %v20066_v43  ;;  %v11370_v29 = vrot.slane %v11360_v46, %v18736_v10  ;;  %v17700_v31 = vld.sshfl [vmem:[%s18729_s21 + $0x24] sm:$0x13 pattern:$0x75316420] }
 0x209   : > { %v9916_v20 = vcombine.low %v9907_v39, %v9914_v5  ;;  %v11377_v44 = vrot.slane %v11361_v16, %v18736_v10  ;;  %v21063_v26 = vadd.f32 %v20536_v12, %v20990_v8  ;;  %v9923_v53 = vrot.slane %v9915_v56, %v18736_v10  ;;  %v18282_v12 = vpop.f32.mrb[73].mxu0  ;;  %v18232_v8 = vpop.f32.mrb[73].mxu1  ;;  %v17701_v16 = vld.sshfl [vmem:[%s18729_s21 + $0x28] sm:$0x33 pattern:$0x75316420] }
 0x20a   : > { %v11363_v43 = vcombine.low %v21046_v49, %v21052_v38  ;;  %v11384_v36 = vrot.slane %v11362_v17, %v18736_v10  ;;  %v21076_v14 = vadd.f32 %v20518_v58, %v20081_v52  ;;  %v21084_v30 = vadd.f32 %v20545_v22, %v21007_v42  ;;  %v21087_v5 = vpop.f32.mrb[74].mxu0  ;;  %v3656_v63 = vpop.f32.mrb[74].mxu1 }
 0x20b   : > { %v9930_v33 = vrot.slane %v9916_v20, %v18736_v10  ;;  %v11392_v3 = vcombine.low %v11370_v29, %v11377_v44  ;;  %v9286_v23 = vcombine.high %v17618_v41, %v17618_v41  ;;  %v9293_v52 = vrot.slane %v17618_v41, %v18736_v10  ;;  %v18283_v56 = vpop.f32.mrb[75].mxu0  ;;  %v18233_v17 = vpop.f32.mrb[75].mxu1 }
 0x20c   : > { %v11391_v39 = vrot.slane %v11363_v43, %v18736_v10  ;;  %v9310_v58 = vcombine.high %v17619_v50, %v17619_v50  ;;  %v9317_v46 = vrot.slane %v17619_v50, %v18736_v10  ;;  %v21097_v42 = vrot.slane %v21079_v9, %v18736_v10 }
 0x20d   : > { %v9931_v20 = vcombine.low %v9923_v53, %v9930_v33  ;;  %v11400_v29 = vrot.slane %v11392_v3, %v18736_v10  ;;  %v9300_v22 = vrot.slane %v9286_v23, %v18736_v10  ;;  %v10776_v41 = vcombine.high %v17700_v31, %v17700_v31 }
 0x20e   : > { %v11393_v44 = vcombine.low %v11384_v36, %v11391_v39  ;;  %v9324_v43 = vrot.slane %v9310_v58, %v18736_v10  ;;  %v9325_v12 = vcombine.high %v9317_v46, %v9317_v46  ;;  %v10783_v63 = vrot.slane %v17700_v31, %v18736_v10 }
 0x20f   : > { %18407 = vmatmul.mubr.msk.bf16.gmra.mrb[136].mxu1 %vm2698_vm2, %v9931_v20  ;;  %v9932_v50 = vcombine.low %v9293_v52, %v9300_v22  ;;  %v17643_v8 = vcombine.high %v9293_v52, %v9300_v22  ;;  %v10799_v53 = vcombine.high %v17701_v16, %v17701_v16  ;;  %v10790_v36 = vrot.slane %v10776_v41, %v18736_v10 }
 0x210   : > { %v11407_v33 = vrot.slane %v11393_v44, %v18736_v10  ;;  %18410 = vmatprep.mubr.msk.bf16.mxu1 %vm18669_vm4, %v23290_v59  ;;  %v9326_v3 = vcombine.high %v9324_v43, %v9324_v43  ;;  %v9934_v23 = vcombine.low %v9324_v43, %v9325_v12  ;;  %v10791_v46 = vcombine.high %v10783_v63, %v10783_v63 }
 0x211   : > { %v9942_v39 = vrot.slane %v9932_v50, %v18736_v10  ;;  %v9949_v58 = vrot.slane %v17643_v8, %v18736_v10  ;;  %v10806_v52 = vrot.slane %v17701_v16, %v18736_v10  ;;  %v21112_v20 = vrot.slane %v10799_v53, %v18736_v10  ;;  %v17621_v8 = vld.sshfl [vmem:[%s18729_s21 + $0x30] sm:$0x32 pattern:$0x75316420] }
 0x212   : > { %v11408_v56 = vcombine.low %v11400_v29, %v11407_v33  ;;  %v9935_v31 = vcombine.low %v9326_v3, %v21097_v42  ;;  %v9956_v17 = vrot.slane %v9934_v23, %v18736_v10  ;;  %v17725_v43 = vcombine.high %v21046_v49, %v21052_v38  ;;  %v17622_v33 = vld.sshfl [vmem:[%s18729_s21 + $0x34] sm:$0x33 pattern:$0x75316420] }
 0x213   : > { %v9964_v22 = vcombine.low %v9942_v39, %v9949_v58  ;;  %v10814_v44 = vcombine.high %v10806_v52, %v10806_v52  ;;  %v11410_v12 = vcombine.low %v10783_v63, %v10790_v36  ;;  %v11411_v16 = vcombine.low %v10791_v46, %v10806_v52  ;;  %v21148_v58 = vpop.f32.mrb[76].mxu0  ;;  %v21150_v46 = vpop.f32.mrb[76].mxu1  ;;  %v17702_v52 = vld.sshfl [vmem:[%s18729_s21 + $0x2c] sm:$0x13 pattern:$0x75316420] }
 0x214   : > { %18457 = vmatmul.mubr.msk.bf16.gmra.mrb[136].mxu0 %vm2698_vm2, %v11408_v56  ;;  %v9963_v41 = vrot.slane %v9935_v31, %v18736_v10  ;;  %v21120_v29 = vadd.f32 %v20551_v18, %v20139_v47  ;;  %v21124_v50 = vadd.f32 %v20582_v60, %v21056_v35  ;;  %v11419_v63 = vrot.slane %v17725_v43, %v18736_v10  ;;  %v18286_v56 = vpop.f32.mrb[77].mxu0  ;;  %v18292_v31 = vpop.f32.mrb[77].mxu1 }
 0x215   : > { %18460 = vmatprep.mubr.msk.bf16.mxu0 %vm18669_vm4, %v23290_v59  ;;  %v9972_v49 = vrot.slane %v9964_v22, %v18736_v10  ;;  %v11412_v38 = vcombine.low %v21112_v20, %v10814_v44  ;;  %v11426_v53 = vrot.slane %v11410_v12, %v18736_v10  ;;  %v11433_v18 = vrot.slane %v11411_v16, %v18736_v10  ;;  %v17703_v44 = vld.sshfl [vmem:[%s18729_s21 + $0x30] sm:$0x33 pattern:$0x75316420]  ;;  %v5167_v43 = vpop.f32.mrb[78].mxu0  ;;  %v21161_v12 = vpop.f32.mrb[78].mxu1 }
 0x216   : > { %v9965_v47 = vcombine.low %v9956_v17, %v9963_v41  ;;  %v21137_v60 = vadd.f32 %v20561_v37, %v20156_v32  ;;  %v21141_v35 = vadd.f32 %v20592_v13, %v21076_v14  ;;  %v9334_v36 = vcombine.high %v21079_v9, %v21079_v9 }
 0x217   : > { %v11440_v3 = vrot.slane %v11412_v38, %v18736_v10  ;;  %v11441_v23 = vcombine.low %v11419_v63, %v11426_v53  ;;  %v9349_v39 = vcombine.high %v21097_v42, %v21097_v42  ;;  %v9358_v37 = vcombine.high %v17621_v8, %v17621_v8  ;;  %v18287_v63 = vpop.f32.mrb[79].mxu0  ;;  %v18293_v53 = vpop.f32.mrb[79].mxu1 }
 0x218   : > { %v9979_v32 = vrot.slane %v9965_v47, %v18736_v10  ;;  %v9365_v13 = vrot.slane %v17621_v8, %v18736_v10  ;;  %v9382_v14 = vcombine.high %v17622_v33, %v17622_v33  ;;  %v9348_v9 = vrot.slane %v9334_v36, %v18736_v10 }
 0x219   : > { %v11442_v17 = vcombine.low %v11433_v18, %v11440_v3  ;;  %v11449_v22 = vrot.slane %v11441_v23, %v18736_v10  ;;  %v21158_v42 = vrot.slane %v17622_v33, %v18736_v10  ;;  %v9372_v16 = vrot.slane %v9358_v37, %v18736_v10 }
 0x21a   : > { %v9980_v41 = vcombine.low %v9972_v49, %v9979_v32  ;;  %v21165_v8 = vrot.slane %v9382_v14, %v18736_v10  ;;  %v10815_v38 = vcombine.high %v21112_v20, %v21112_v20  ;;  %v9350_v18 = vcombine.high %v9348_v9, %v9348_v9 }
 0x21b   : > { %v11456_v47 = vrot.slane %v11442_v17, %v18736_v10  ;;  %v9981_v33 = vcombine.low %v9348_v9, %v9349_v39  ;;  %v10823_v3 = vcombine.high %v17702_v52, %v17702_v52  ;;  %v17644_v23 = vcombine.high %v9365_v13, %v9372_v16 }
 0x21c   : > { %18411 = vmatmul.mubr.msk.bf16.gmra.mrb[140].mxu1 %vm2698_vm2, %v9980_v41  ;;  %v9984_v49 = vcombine.low %v21158_v42, %v21165_v8  ;;  %v10830_v36 = vrot.slane %v17702_v52, %v18736_v10  ;;  %v10846_v32 = vcombine.high %v17703_v44, %v17703_v44  ;;  %v9982_v20 = vcombine.low %v9350_v18, %v9372_v16  ;;  %v17623_v41 = vld.sshfl [vmem:[%s18729_s21 + $0x38] sm:$0x32 pattern:$0x75316420] }
 0x21d   : > { %v11457_v37 = vcombine.low %v11449_v22, %v11456_v47  ;;  %18414 = vmatprep.mubr.msk.bf16.mxu1 %vm18669_vm4, %v23290_v59  ;;  %v9991_v14 = vrot.slane %v9981_v33, %v18736_v10  ;;  %v10837_v39 = vrot.slane %v10823_v3, %v18736_v10  ;;  %v10005_v56 = vrot.slane %v17644_v23, %v18736_v10 }
 0x21e   : > { %v10012_v13 = vrot.slane %v9984_v49, %v18736_v10  ;;  %v10838_v31 = vcombine.high %v10830_v36, %v10830_v36  ;;  %v10853_v17 = vrot.slane %v17703_v44, %v18736_v10  ;;  %v9998_v52 = vrot.slane %v9982_v20, %v18736_v10 }
 0x21f   : > { %18461 = vmatmul.mubr.msk.bf16.gmra.mrb[140].mxu0 %vm2698_vm2, %v11457_v37  ;;  %v10860_v22 = vrot.slane %v10846_v32, %v18736_v10  ;;  %v11458_v9 = vcombine.low %v10815_v38, %v10830_v36  ;;  %v21186_v43 = vadd.f32 %v20594_v62, %v20229_v34  ;;  %v21193_v44 = vadd.f32 %v20631_v15, %v21120_v29  ;;  %v17624_v62 = vld.sshfl [vmem:[%s18729_s21 + $0x3c] sm:$0x33 pattern:$0x75316420] }
 0x220   : > { %18464 = vmatprep.mubr.msk.bf16.mxu0 %vm18669_vm4, %v23290_v59  ;;  %v10014_v16 = vcombine.low %v10005_v56, %v10012_v13  ;;  %v11459_v63 = vcombine.low %v10837_v39, %v10838_v31  ;;  %v21197_v53 = vadd.f32 %v20607_v28, %v20244_v2  ;;  %v10013_v47 = vcombine.low %v9991_v14, %v9998_v52  ;;  %v17704_v14 = vld.sshfl [vmem:[%s18729_s21 + $0x34] sm:$0x13 pattern:$0x75316420] }
 0x221   : > { %23333 = vst [vmem:[#allocation33_spill] sm:$0xff] %v21193_v44  ;;  %v11460_v38 = vcombine.low %v10853_v17, %v10860_v22  ;;  %v17726_v18 = vcombine.high %v10853_v17, %v10860_v22  ;;  %v11468_v34 = vrot.slane %v11458_v9, %v18736_v10  ;;  %v21205_v15 = vadd.f32 %v20642_v54, %v21137_v60  ;;  %v17705_v13 = vld.sshfl [vmem:[%s18729_s21 + $0x38] sm:$0x33 pattern:$0x75316420]  ;;  %v23354_v44 = vld [vmem:[#allocation28_spill] sm:$0xff] }
 0x222   : > { %v10028_v33 = vrot.slane %v10014_v16, %v18736_v10  ;;  %v11475_v3 = vrot.slane %v11459_v63, %v18736_v10  ;;  %v9406_v29 = vcombine.high %v17623_v41, %v17623_v41  ;;  %v10021_v2 = vrot.slane %v10013_v47, %v18736_v10  ;;  %v21228_v47 = vld.sshfl [vmem:[%s18729_s21 + $0x3c] sm:$0x13 pattern:$0x75316420] }
 0x223   : > { %23334 = vst [vmem:[#allocation34_spill] sm:$0xff] %v21205_v15  ;;  %v11482_v28 = vrot.slane %v11460_v38, %v18736_v10  ;;  %v11489_v23 = vrot.slane %v17726_v18, %v18736_v10  ;;  %v9413_v49 = vrot.slane %v17623_v41, %v18736_v10  ;;  %v9430_v37 = vcombine.high %v17624_v62, %v17624_v62 }
 0x224   : > { %v11490_v36 = vcombine.low %v11468_v34, %v11475_v3  ;;  %v9420_v32 = vrot.slane %v9406_v29, %v18736_v10  ;;  %v9437_v20 = vrot.slane %v17624_v62, %v18736_v10  ;;  %v10029_v39 = vcombine.low %v10021_v2, %v10028_v33  ;;  %v21231_v34 = vpop.f32.mrb[80].mxu1  ;;  %v21233_v62 = vpop.f32.mrb[80].mxu0 }
 0x225   : > { %v11491_v56 = vcombine.low %v11482_v28, %v11489_v23  ;;  %v9421_v54 = vcombine.high %v9413_v49, %v9413_v49  ;;  %v17645_v60 = vcombine.high %v21158_v42, %v21165_v8  ;;  %v21219_v52 = vrot.slane %v9430_v37, %v18736_v10  ;;  %v18296_v28 = vpop.f32.mrb[81].mxu1  ;;  %v18346_v23 = vpop.f32.mrb[81].mxu0 }
 0x226   : > { %v11498_v31 = vrot.slane %v11490_v36, %v18736_v10  ;;  %v9422_v17 = vcombine.high %v9420_v32, %v9420_v32  ;;  %v9445_v22 = vcombine.high %v9437_v20, %v9437_v20  ;;  %18415 = vmatmul.mubr.msk.bf16.gmra.mrb[144].mxu1 %vm2698_vm2, %v10029_v39  ;;  %v10870_v63 = vcombine.high %v17704_v14, %v17704_v14  ;;  %v23339_v23 = vld [vmem:[#allocation13_spill] sm:$0xff] }
 0x227   : > { %v11505_v9 = vrot.slane %v11491_v56, %v18736_v10  ;;  %v10031_v41 = vcombine.low %v9420_v32, %v9421_v54  ;;  %v10040_v16 = vrot.slane %v17645_v60, %v18736_v10  ;;  %18418 = vmatprep.mubr.msk.bf16.mxu1 %vm18669_vm4, %v23290_v59  ;;  %v10877_v38 = vrot.slane %v17704_v14, %v18736_v10  ;;  %v21243_v14 = vpop.f32.mrb[82].mxu0 }
 0x228   : > { %v10032_v42 = vcombine.low %v9422_v17, %v9437_v20  ;;  %v10033_v8 = vcombine.low %v21219_v52, %v9445_v22  ;;  %v10893_v18 = vcombine.high %v17705_v13, %v17705_v13  ;;  %v10884_v29 = vrot.slane %v10870_v63, %v18736_v10  ;;  %v21241_v20 = vpop.f32.mrb[82].mxu1  ;;  %v23336_v63 = vld [vmem:[#allocation19_spill] sm:$0xff] }
 0x229   : > { %v11506_v33 = vcombine.low %v11498_v31, %v11505_v9  ;;  %v10047_v3 = vrot.slane %v10031_v41, %v18736_v10  ;;  %v10900_v2 = vrot.slane %v17705_v13, %v18736_v10  ;;  %v10885_v32 = vcombine.high %v10877_v38, %v10877_v38  ;;  %v18347_v13 = vpop.f32.mrb[83].mxu0  ;;  %v18297_v31 = vpop.f32.mrb[83].mxu1  ;;  %v23335_v41 = vld [vmem:[#allocation14_spill] sm:$0xff] }
 0x22a   : > { %v10054_v49 = vrot.slane %v10032_v42, %v18736_v10  ;;  %v10061_v36 = vrot.slane %v10033_v8, %v18736_v10  ;;  %v10907_v37 = vrot.slane %v10893_v18, %v18736_v10  ;;  %v10924_v54 = vrot.slane %v21228_v47, %v18736_v10  ;;  %v17625_v8 = vld.sshfl [vmem:[%s18729_s21 + $0x40] sm:$0x32 pattern:$0x75316420] }
 0x22b   : > { %18465 = vmatmul.mubr.msk.bf16.gmra.mrb[144].mxu0 %vm2698_vm2, %v11506_v33  ;;  %v10062_v39 = vcombine.low %v10040_v16, %v10047_v3  ;;  %v10908_v56 = vcombine.high %v10900_v2, %v10900_v2  ;;  %v11507_v60 = vcombine.low %v10877_v38, %v10884_v29  ;;  %v11508_v9 = vcombine.low %v10885_v32, %v10900_v2  ;;  %v23337_v38 = vld [vmem:[#allocation21_spill] sm:$0xff]  ;;  %v17626_v32 = vld.sshfl [vmem:[%s18729_s21 + $0x44] sm:$0x33 pattern:$0x75316420] }
 0x22c   : > { %18468 = vmatprep.mubr.msk.bf16.mxu0 %vm18669_vm4, %v23290_v59  ;;  %v10063_v17 = vcombine.low %v10054_v49, %v10061_v36  ;;  %v10909_v22 = vcombine.high %v10907_v37, %v10907_v37  ;;  %v3598_v42 = vadd.f32 %v23336_v63, %v23335_v41  ;;  %v21257_v3 = vadd.f32 %v23337_v38, %v21186_v43  ;;  %v23340_v49 = vld [vmem:[#allocation20_spill] sm:$0xff]  ;;  %v17708_v38 = vld.sshfl [vmem:[%s18729_s21 + $0x44] sm:$0x13 pattern:$0x75316420] }
 0x22d   : > { %v10070_v16 = vrot.slane %v10062_v39, %v18736_v10  ;;  %v11509_v18 = vcombine.low %v10907_v37, %v10908_v56  ;;  %v11517_v33 = vrot.slane %v11507_v60, %v18736_v10  ;;  %v11524_v2 = vrot.slane %v11508_v9, %v18736_v10  ;;  %v23341_v37 = vld [vmem:[#allocation22_spill] sm:$0xff] }
 0x22e   : > { %23338 = vst [vmem:[#allocation14_spill] sm:$0xff] %v21257_v3  ;;  %v10077_v29 = vrot.slane %v10063_v17, %v18736_v10  ;;  %v11510_v28 = vcombine.low %v10909_v22, %v10924_v54  ;;  %v3601_v36 = vadd.f32 %v23340_v49, %v23339_v23  ;;  %v21267_v39 = vadd.f32 %v23341_v37, %v21197_v53  ;;  %v17707_v60 = vld.sshfl [vmem:[%s18729_s21 + $0x40] sm:$0x33 pattern:$0x75316420] }
 0x22f   : > { %v11531_v13 = vrot.slane %v11509_v18, %v18736_v10  ;;  %v9446_v43 = vcombine.high %v21219_v52, %v21219_v52  ;;  %v9454_v56 = vcombine.high %v17625_v8, %v17625_v8  ;;  %v11539_v22 = vcombine.low %v11517_v33, %v11524_v2 }
 0x230   : > { %23342 = vst [vmem:[#allocation19_spill] sm:$0xff] %v21267_v39  ;;  %v10078_v31 = vcombine.low %v10070_v16, %v10077_v29  ;;  %v11538_v17 = vrot.slane %v11510_v28, %v18736_v10  ;;  %v9461_v9 = vrot.slane %v17625_v8, %v18736_v10  ;;  %v9478_v63 = vcombine.high %v17626_v32, %v17626_v32 }
 0x231   : > { %v9468_v41 = vrot.slane %v9454_v56, %v18736_v10  ;;  %v9485_v18 = vrot.slane %v17626_v32, %v18736_v10  ;;  %v10917_v53 = vcombine.high %v21228_v47, %v21228_v47  ;;  %v11547_v23 = vrot.slane %v11539_v22, %v18736_v10 }
 0x232   : > { %18419 = vmatmul.mubr.msk.bf16.gmra.mrb[148].mxu1 %vm2698_vm2, %v10078_v31  ;;  %v11540_v52 = vcombine.low %v11531_v13, %v11538_v17  ;;  %v10932_v16 = vcombine.high %v10924_v54, %v10924_v54  ;;  %v10940_v29 = vcombine.high %v17707_v60, %v17707_v60  ;;  %v9492_v8 = vrot.slane %v9478_v63, %v18736_v10 }
 0x233   : > { %18422 = vmatprep.mubr.msk.bf16.mxu1 %vm18669_vm4, %v23290_v59  ;;  %v10079_v33 = vcombine.low %v9446_v43, %v9468_v41  ;;  %v17646_v28 = vcombine.high %v9461_v9, %v9468_v41  ;;  %v10931_v2 = vrot.slane %v10917_v53, %v18736_v10  ;;  %v10947_v47 = vrot.slane %v17707_v60, %v18736_v10 }
 0x234   : > { %v11554_v49 = vrot.slane %v11540_v52, %v18736_v10  ;;  %v10954_v32 = vrot.slane %v10940_v29, %v18736_v10  ;;  %v10964_v13 = vcombine.high %v17708_v38, %v17708_v38  ;;  %v10081_v37 = vcombine.low %v9485_v18, %v9492_v8 }
 0x235   : > { %v17647_v54 = vcombine.high %v9485_v18, %v9492_v8  ;;  %v10089_v56 = vrot.slane %v10079_v33, %v18736_v10  ;;  %v10096_v31 = vrot.slane %v17646_v28, %v18736_v10  ;;  %v21291_v43 = vrot.slane %v17708_v38, %v18736_v10  ;;  %v17627_v18 = vld.sshfl [vmem:[%s18729_s21 + $0x48] sm:$0x32 pattern:$0x75316420]  ;;  %v23343_v38 = vld [vmem:[#allocation17_spill] sm:$0xff] }
 0x236   : > { %v11555_v17 = vcombine.low %v11547_v23, %v11554_v49  ;;  %v10978_v22 = vrot.slane %v10964_v13, %v18736_v10  ;;  %v11556_v9 = vcombine.low %v10931_v2, %v10932_v16  ;;  %v10103_v41 = vrot.slane %v10081_v37, %v18736_v10  ;;  %v23344_v8 = vld [vmem:[#allocation23_spill] sm:$0xff]  ;;  %v23345_v13 = vld [vmem:[#allocation25_spill] sm:$0xff] }
 0x237   : > { %v10110_v60 = vrot.slane %v17647_v54, %v18736_v10  ;;  %v10111_v63 = vcombine.low %v10089_v56, %v10096_v31  ;;  %v11557_v53 = vcombine.low %v10947_v47, %v10954_v32  ;;  %v17727_v52 = vcombine.high %v10947_v47, %v10954_v32  ;;  %v17628_v16 = vld.sshfl [vmem:[%s18729_s21 + $0x4c] sm:$0x33 pattern:$0x75316420]  ;;  %v21315_v32 = vpop.f32.mrb[84].mxu1  ;;  %v21317_v54 = vpop.f32.mrb[84].mxu0 }
 0x238   : > { %18469 = vmatmul.mubr.msk.bf16.gmra.mrb[148].mxu0 %vm2698_vm2, %v11555_v17  ;;  %v11559_v29 = vcombine.low %v21291_v43, %v10978_v22  ;;  %v11566_v23 = vrot.slane %v11556_v9, %v18736_v10  ;;  %v21302_v33 = vadd.f32 %v23344_v8, %v23343_v38  ;;  %v21310_v37 = vadd.f32 %v23345_v13, %v3598_v42  ;;  %v21313_v47 = vld.sshfl [vmem:[%s18729_s21 + $0x50] sm:$0x32 pattern:$0x75316420]  ;;  %v23347_v17 = vld [vmem:[#allocation18_spill] sm:$0xff]  ;;  %v18300_v42 = vpop.f32.mrb[85].mxu1 }
 0x239   : > { %18472 = vmatprep.mubr.msk.bf16.mxu0 %vm18669_vm4, %v23290_v59  ;;  %v10112_v28 = vcombine.low %v10103_v41, %v10110_v60  ;;  %v10119_v2 = vrot.slane %v10111_v63, %v18736_v10  ;;  %v11573_v49 = vrot.slane %v11557_v53, %v18736_v10  ;;  %v11580_v56 = vrot.slane %v17727_v52, %v18736_v10  ;;  %v23348_v22 = vld [vmem:[#allocation24_spill] sm:$0xff]  ;;  %v23349_v41 = vld [vmem:[#allocation26_spill] sm:$0xff]  ;;  %v18350_v63 = vpop.f32.mrb[85].mxu0 }
 0x23a   : > { %23346 = vst [vmem:[#allocation21_spill] sm:$0xff] %v21310_v37  ;;  %v11587_v31 = vrot.slane %v11559_v29, %v18736_v10  ;;  %v21323_v9 = vadd.f32 %v23348_v22, %v23347_v17  ;;  %v21326_v60 = vadd.f32 %v23349_v41, %v3601_v36  ;;  %v9502_v8 = vcombine.high %v17627_v18, %v17627_v18  ;;  %v21330_v37 = vpop.f32.mrb[86].mxu1  ;;  %v21332_v52 = vpop.f32.mrb[86].mxu0 }
 0x23b   : > { %v10126_v53 = vrot.slane %v10112_v28, %v18736_v10  ;;  %v11588_v38 = vcombine.low %v11566_v23, %v11573_v49  ;;  %v9509_v13 = vrot.slane %v17627_v18, %v18736_v10  ;;  %23351 = vst [vmem:[#allocation20_spill] sm:$0xff] %v21332_v52  ;;  %v9526_v39 = vcombine.high %v17628_v16, %v17628_v16  ;;  %v17709_v22 = vld.sshfl [vmem:[%s18729_s21 + $0x48] sm:$0x33 pattern:$0x75316420]  ;;  %v18351_v41 = vpop.f32.mrb[87].mxu0 }
 0x23c   : > { %23350 = vst [vmem:[#allocation13_spill] sm:$0xff] %v21326_v60  ;;  %v11589_v29 = vcombine.low %v11580_v56, %v11587_v31  ;;  %v9533_v17 = vrot.slane %v17628_v16, %v18736_v10  ;;  %v9550_v36 = vcombine.high %v21313_v47, %v21313_v47  ;;  %v18301_v42 = vpop.f32.mrb[87].mxu1  ;;  %v9516_v18 = vrot.slane %v9502_v8, %v18736_v10  ;;  %v17710_v16 = vld.sshfl [vmem:[%s18729_s21 + $0x4c] sm:$0x13 pattern:$0x75316420] }
 0x23d   : > { %v10127_v28 = vcombine.low %v10119_v2, %v10126_v53  ;;  %v11596_v23 = vrot.slane %v11588_v38, %v18736_v10  ;;  %v9517_v49 = vcombine.high %v9509_v13, %v9509_v13  ;;  %v9540_v60 = vrot.slane %v9526_v39, %v18736_v10  ;;  %v17630_v52 = vld.sshfl [vmem:[%s18729_s21 + $0x54] sm:$0x33 pattern:$0x75316420] }
 0x23e   : > { %v11603_v63 = vrot.slane %v11589_v29, %v18736_v10  ;;  %v9541_v56 = vcombine.high %v9533_v17, %v9533_v17  ;;  %v9564_v31 = vrot.slane %v9550_v36, %v18736_v10  ;;  %v9518_v3 = vcombine.high %v9516_v18, %v9516_v18 }
 0x23f   : > { %18423 = vmatmul.mubr.msk.bf16.gmra.mrb[152].mxu1 %vm2698_vm2, %v10127_v28  ;;  %v10128_v15 = vcombine.low %v9516_v18, %v9517_v49  ;;  %v10979_v2 = vcombine.high %v21291_v43, %v21291_v43  ;;  %v10987_v53 = vcombine.high %v17709_v22, %v17709_v22  ;;  %v9542_v8 = vcombine.high %v9540_v60, %v9540_v60 }
 0x240   : > { %v11604_v38 = vcombine.low %v11596_v23, %v11603_v63  ;;  %18426 = vmatprep.mubr.msk.bf16.mxu1 %vm18669_vm4, %v23290_v59  ;;  %v10130_v13 = vcombine.low %v9540_v60, %v9541_v56  ;;  %v10994_v39 = vrot.slane %v17709_v22, %v18736_v10  ;;  %v10129_v29 = vcombine.low %v9518_v3, %v9533_v17  ;;  %v23352_v56 = vld [vmem:[#allocation6_spill] sm:$0xff] }
 0x241   : > { %v10138_v36 = vrot.slane %v10128_v15, %v18736_v10  ;;  %v11001_v41 = vrot.slane %v10987_v53, %v18736_v10  ;;  %v11011_v42 = vcombine.high %v17710_v16, %v17710_v16  ;;  %v10131_v28 = vcombine.low %v9542_v8, %v9564_v31  ;;  %v23353_v53 = vld [vmem:[#allocation27_spill] sm:$0xff] }
 0x242   : > { %18473 = vmatmul.mubr.msk.bf16.gmra.mrb[152].mxu0 %vm2698_vm2, %v11604_v38  ;;  %v10152_v43 = vrot.slane %v10130_v13, %v18736_v10  ;;  %v11002_v23 = vcombine.high %v10994_v39, %v10994_v39  ;;  %v11018_v18 = vrot.slane %v17710_v16, %v18736_v10  ;;  %v10145_v60 = vrot.slane %v10129_v29, %v18736_v10 }
 0x243   : > { %18476 = vmatprep.mubr.msk.bf16.mxu0 %vm18669_vm4, %v23290_v59  ;;  %v11003_v3 = vcombine.high %v11001_v41, %v11001_v41  ;;  %v11025_v15 = vrot.slane %v11011_v42, %v18736_v10  ;;  %v11605_v17 = vcombine.low %v10979_v2, %v10994_v39  ;;  %v10159_v22 = vrot.slane %v10131_v28, %v18736_v10  ;;  %v23356_v28 = vld [vmem:[#allocation5_spill] sm:$0xff] }
 0x244   : > { %v11026_v49 = vcombine.high %v11018_v18, %v11018_v18  ;;  %v11606_v63 = vcombine.low %v11001_v41, %v11002_v23  ;;  %v21362_v38 = vadd.f32 %v23353_v53, %v23352_v56  ;;  %v10160_v8 = vcombine.low %v10138_v36, %v10145_v60  ;;  %v23357_v41 = vld [vmem:[#allocation29_spill] sm:$0xff]  ;;  %v23358_v60 = vld [vmem:[#allocation30_spill] sm:$0xff] }
 0x245   : > { %v11607_v16 = vcombine.low %v11003_v3, %v11018_v18  ;;  %v11615_v13 = vrot.slane %v11605_v17, %v18736_v10  ;;  %v21367_v29 = vadd.f32 %v23354_v44, %v21302_v33  ;;  %v10161_v42 = vcombine.low %v10152_v43, %v10159_v22  ;;  %v17631_v56 = vld.sshfl [vmem:[%s18729_s21 + $0x58] sm:$0x32 pattern:$0x75316420] }
 0x246   : > { %v11608_v2 = vcombine.low %v11025_v15, %v11026_v49  ;;  %v11622_v39 = vrot.slane %v11606_v63, %v18736_v10  ;;  %v21373_v23 = vadd.f32 %v23357_v41, %v23356_v28  ;;  %v10168_v36 = vrot.slane %v10160_v8, %v18736_v10  ;;  %v17711_v22 = vld.sshfl [vmem:[%s18729_s21 + $0x50] sm:$0x33 pattern:$0x75316420] }
 0x247   : > { %23355 = vst [vmem:[#allocation22_spill] sm:$0xff] %v21367_v29  ;;  %v11629_v18 = vrot.slane %v11607_v16, %v18736_v10  ;;  %v21380_v3 = vadd.f32 %v23358_v60, %v21323_v9  ;;  %v9557_v44 = vrot.slane %v21313_v47, %v18736_v10  ;;  %v10175_v33 = vrot.slane %v10161_v42, %v18736_v10  ;;  %v17712_v41 = vld.sshfl [vmem:[%s18729_s21 + $0x54] sm:$0x13 pattern:$0x75316420]  ;;  %v21392_v42 = vpop.f32.mrb[88].mxu1 }
 0x248   : > { %v11636_v43 = vrot.slane %v11608_v2, %v18736_v10  ;;  %v11637_v15 = vcombine.low %v11615_v13, %v11622_v39  ;;  %v9574_v17 = vcombine.high %v17630_v52, %v17630_v52  ;;  %v9581_v49 = vrot.slane %v17630_v52, %v18736_v10  ;;  %v21394_v2 = vpop.f32.mrb[88].mxu0  ;;  %v21401_v60 = vld.sshfl [vmem:[%s18729_s21 + $0x58] sm:$0x33 pattern:$0x75316420] }
 0x249   : > { %23359 = vst [vmem:[#allocation17_spill] sm:$0xff] %v21380_v3  ;;  %v9598_v63 = vcombine.high %v17631_v56, %v17631_v56  ;;  %v9605_v53 = vrot.slane %v17631_v56, %v18736_v10  ;;  %v17648_v8 = vcombine.high %v9557_v44, %v9564_v31  ;;  %v10176_v16 = vcombine.low %v10168_v36, %v10175_v33  ;;  %v18304_v56 = vpop.f32.mrb[89].mxu1  ;;  %v18354_v36 = vpop.f32.mrb[89].mxu0 }
 0x24a   : > { %v11638_v9 = vcombine.low %v11629_v18, %v11636_v43  ;;  %v11645_v28 = vrot.slane %v11637_v15, %v18736_v10  ;;  %v9588_v47 = vrot.slane %v9574_v17, %v18736_v10  ;;  %v11034_v31 = vcombine.high %v17711_v22, %v17711_v22  ;;  %v21406_v15 = vpop.f32.mrb[90].mxu1  ;;  %v21408_v17 = vpop.f32.mrb[90].mxu0 }
 0x24b   : > { %v21397_v13 = vrot.slane %v9598_v63, %v18736_v10  ;;  %v9613_v39 = vcombine.high %v9605_v53, %v9605_v53  ;;  %v10187_v52 = vrot.slane %v17648_v8, %v18736_v10  ;;  %18427 = vmatmul.mubr.msk.bf16.gmra.mrb[156].mxu1 %vm2698_vm2, %v10176_v16  ;;  %v11041_v43 = vrot.slane %v17711_v22, %v18736_v10  ;;  %v18305_v56 = vpop.f32.mrb[91].mxu1 }
 0x24c   : > { %v11652_v18 = vrot.slane %v11638_v9, %v18736_v10  ;;  %v10178_v44 = vcombine.low %v9581_v49, %v9588_v47  ;;  %v17649_v33 = vcombine.high %v9581_v49, %v9588_v47  ;;  %23360 = vst [vmem:[#allocation23_spill] sm:$0xff] %v21408_v17  ;;  %18430 = vmatprep.mubr.msk.bf16.mxu1 %vm18669_vm4, %v23290_v59  ;;  %v18355_v9 = vpop.f32.mrb[91].mxu0  ;;  %v23361_v56 = vld [vmem:[#allocation4_spill] sm:$0xff] }
 0x24d   : > { %v10180_v63 = vcombine.low %v21397_v13, %v9613_v39  ;;  %v11048_v53 = vrot.slane %v11034_v31, %v18736_v10  ;;  %v11058_v8 = vcombine.high %v17712_v41, %v17712_v41  ;;  %v11065_v16 = vrot.slane %v17712_v41, %v18736_v10 }
 0x24e   : > { %v11653_v49 = vcombine.low %v11645_v28, %v11652_v18  ;;  %v10194_v22 = vrot.slane %v10178_v44, %v18736_v10  ;;  %v10201_v47 = vrot.slane %v17649_v33, %v18736_v10  ;;  %v11088_v36 = vrot.slane %v21401_v60, %v18736_v10  ;;  %v17632_v44 = vld.sshfl [vmem:[%s18729_s21 + $0x5c] sm:$0x33 pattern:$0x75316420] }
 0x24f   : > { %v10208_v3 = vrot.slane %v10180_v63, %v18736_v10  ;;  %v11072_v39 = vrot.slane %v11058_v8, %v18736_v10  ;;  %v11073_v31 = vcombine.high %v11065_v16, %v11065_v16  ;;  %v11654_v29 = vcombine.low %v11041_v43, %v11048_v53 }
 0x250   : > { %18477 = vmatmul.mubr.msk.bf16.gmra.mrb[156].mxu0 %vm2698_vm2, %v11653_v49  ;;  %v10209_v41 = vcombine.low %v10187_v52, %v10194_v22  ;;  %v17728_v9 = vcombine.high %v11041_v43, %v11048_v53  ;;  %v21424_v28 = vadd.f32 %v20835_v61, %v23361_v56  ;;  %v21428_v18 = vadd.f32 %v20837_v48, %v21362_v38  ;;  %v17633_v49 = vld.sshfl [vmem:[%s18729_s21 + $0x60] sm:$0x32 pattern:$0x75316420]  ;;  %v23363_v43 = vld [vmem:[#allocation9_spill] sm:$0xff] }
 0x251   : > { %18480 = vmatprep.mubr.msk.bf16.mxu0 %vm18669_vm4, %v23290_v59  ;;  %v10210_v33 = vcombine.low %v10201_v47, %v10208_v3  ;;  %v11656_v63 = vcombine.low %v11065_v16, %v11072_v39  ;;  %v11657_v8 = vcombine.low %v11073_v31, %v11088_v36  ;;  %v11664_v17 = vrot.slane %v11654_v29, %v18736_v10 }
 0x252   : > { %23362 = vst [vmem:[#allocation25_spill] sm:$0xff] %v21428_v18  ;;  %v10217_v52 = vrot.slane %v10209_v41, %v18736_v10  ;;  %v11671_v61 = vrot.slane %v17728_v9, %v18736_v10  ;;  %v21439_v53 = vadd.f32 %v20849_v7, %v23363_v43  ;;  %v21443_v48 = vadd.f32 %v20851_v24, %v21373_v23  ;;  %v17714_v24 = vld.sshfl [vmem:[%s18729_s21 + $0x5c] sm:$0x13 pattern:$0x75316420] }
 0x253   : > { %v10224_v38 = vrot.slane %v10210_v33, %v18736_v10  ;;  %v11678_v3 = vrot.slane %v11656_v63, %v18736_v10  ;;  %v11685_v29 = vrot.slane %v11657_v8, %v18736_v10  ;;  %v9614_v16 = vcombine.high %v21397_v13, %v21397_v13  ;;  %v17715_v43 = vld.sshfl [vmem:[%s18729_s21 + $0x60] sm:$0x33 pattern:$0x75316420] }
 0x254   : > { %23364 = vst [vmem:[#allocation18_spill] sm:$0xff] %v21443_v48  ;;  %v11686_v22 = vcombine.low %v11664_v17, %v11671_v61  ;;  %v9622_v47 = vcombine.high %v17632_v44, %v17632_v44  ;;  %v9629_v39 = vrot.slane %v17632_v44, %v18736_v10  ;;  %v9646_v31 = vcombine.high %v17633_v49, %v17633_v49 }
 0x255   : > { %v10225_v7 = vcombine.low %v10217_v52, %v10224_v38  ;;  %v11687_v41 = vcombine.low %v11678_v3, %v11685_v29  ;;  %v9653_v9 = vrot.slane %v17633_v49, %v18736_v10  ;;  %v11081_v23 = vcombine.high %v21401_v60, %v21401_v60 }
 0x256   : > { %v11694_v56 = vrot.slane %v11686_v22, %v18736_v10  ;;  %v9636_v33 = vrot.slane %v9622_v47, %v18736_v10  ;;  %v9637_v63 = vcombine.high %v9629_v39, %v9629_v39  ;;  %v9660_v13 = vrot.slane %v9646_v31, %v18736_v10 }
 0x257   : > { %18431 = vmatmul.mubr.msk.bf16.gmra.mrb[160].mxu1 %vm2698_vm2, %v10225_v7  ;;  %v11701_v17 = vrot.slane %v11687_v41, %v18736_v10  ;;  %v10226_v44 = vcombine.low %v9614_v16, %v9629_v39  ;;  %v11095_v8 = vrot.slane %v11081_v23, %v18736_v10  ;;  %v11096_v49 = vcombine.high %v11088_v36, %v11088_v36 }
 0x258   : > { %18434 = vmatprep.mubr.msk.bf16.mxu1 %vm18669_vm4, %v23290_v59  ;;  %v9638_v52 = vcombine.high %v9636_v33, %v9636_v33  ;;  %v10227_v60 = vcombine.low %v9636_v33, %v9637_v63  ;;  %v17650_v61 = vcombine.high %v9653_v9, %v9660_v13  ;;  %v11105_v38 = vcombine.high %v17714_v24, %v17714_v24  ;;  %v23365_v63 = vld [vmem:[#allocation8_spill] sm:$0xff] }
 0x259   : > { %v11702_v3 = vcombine.low %v11694_v56, %v11701_v17  ;;  %v10236_v29 = vrot.slane %v10226_v44, %v18736_v10  ;;  %v11097_v22 = vcombine.high %v11095_v8, %v11095_v8  ;;  %v11112_v47 = vrot.slane %v17714_v24, %v18736_v10  ;;  %v17634_v17 = vld.sshfl [vmem:[%s18729_s21 + $0x64] sm:$0x33 pattern:$0x75316420] }
 0x25a   : > { %v10228_v31 = vcombine.low %v9638_v52, %v9660_v13  ;;  %v10243_v16 = vrot.slane %v10227_v60, %v18736_v10  ;;  %v10257_v36 = vrot.slane %v17650_v61, %v18736_v10  ;;  %v11119_v39 = vrot.slane %v11105_v38, %v18736_v10  ;;  %v21490_v61 = vpop.f32.mrb[92].mxu1 }
 0x25b   : > { %18481 = vmatmul.mubr.msk.bf16.gmra.mrb[160].mxu0 %vm2698_vm2, %v11702_v3  ;;  %v11120_v7 = vcombine.high %v11112_v47, %v11112_v47  ;;  %v11128_v41 = vcombine.high %v17715_v43, %v17715_v43  ;;  %v21471_v9 = vrot.slane %v17715_v43, %v18736_v10  ;;  %v11703_v23 = vcombine.low %v11095_v8, %v11096_v49  ;;  %v17635_v49 = vld.sshfl [vmem:[%s18729_s21 + $0x68] sm:$0x32 pattern:$0x75316420]  ;;  %v21492_v43 = vpop.f32.mrb[92].mxu0 }
 0x25c   : > { %18484 = vmatprep.mubr.msk.bf16.mxu0 %vm18669_vm4, %v23290_v59  ;;  %v10250_v24 = vrot.slane %v10228_v31, %v18736_v10  ;;  %v10258_v56 = vcombine.low %v10236_v29, %v10243_v16  ;;  %v11704_v33 = vcombine.low %v11097_v22, %v11112_v47  ;;  %v21478_v13 = vadd.f32 %v20895_v51, %v23365_v63  ;;  %v23367_v29 = vld [vmem:[#allocation7_spill] sm:$0xff]  ;;  %v18308_v31 = vpop.f32.mrb[93].mxu1  ;;  %v18358_v16 = vpop.f32.mrb[93].mxu0 }
 0x25d   : > { %v21482_v44 = vrot.slane %v11128_v41, %v18736_v10  ;;  %v11705_v52 = vcombine.low %v11119_v39, %v11120_v7  ;;  %v11713_v60 = vrot.slane %v11703_v23, %v18736_v10  ;;  %v21487_v8 = vadd.f32 %v20897_v55, %v21424_v28  ;;  %v21501_v47 = vld.sshfl [vmem:[%s18729_s21 + $0x6c] sm:$0x33 pattern:$0x75316420]  ;;  %v21511_v41 = vpop.f32.mrb[94].mxu1 }
 0x25e   : > { %v10259_v38 = vcombine.low %v10250_v24, %v10257_v36  ;;  %v10266_v51 = vrot.slane %v10258_v56, %v18736_v10  ;;  %v11720_v3 = vrot.slane %v11704_v33, %v18736_v10  ;;  %v21498_v22 = vadd.f32 %v20905_v27, %v23367_v29  ;;  %v17716_v7 = vld.sshfl [vmem:[%s18729_s21 + $0x64] sm:$0x13 pattern:$0x75316420]  ;;  %v21513_v27 = vpop.f32.mrb[94].mxu0  ;;  %v18309_v29 = vpop.f32.mrb[95].mxu1 }
 0x25f   : > { %23366 = vst [vmem:[#allocation24_spill] sm:$0xff] %v21487_v8  ;;  %v11706_v55 = vcombine.low %v21471_v9, %v21482_v44  ;;  %v11727_v28 = vrot.slane %v11705_v52, %v18736_v10  ;;  %v21508_v36 = vadd.f32 %v20907_v4, %v21439_v53  ;;  %v9670_v39 = vcombine.high %v17634_v17, %v17634_v17  ;;  %v18359_v63 = vpop.f32.mrb[95].mxu0  ;;  %v17717_v16 = vld.sshfl [vmem:[%s18729_s21 + $0x68] sm:$0x33 pattern:$0x75316420] }
 0x260   : > { %v10273_v23 = vrot.slane %v10259_v38, %v18736_v10  ;;  %v11735_v24 = vcombine.low %v11713_v60, %v11720_v3  ;;  %v9677_v56 = vrot.slane %v17634_v17, %v18736_v10  ;;  %v9694_v33 = vcombine.high %v17635_v49, %v17635_v49 }
 0x261   : > { %23368 = vst [vmem:[#allocation26_spill] sm:$0xff] %v21508_v36  ;;  %v11734_v52 = vrot.slane %v11706_v55, %v18736_v10  ;;  %v9684_v31 = vrot.slane %v9670_v39, %v18736_v10  ;;  %v9701_v4 = vrot.slane %v17635_v49, %v18736_v10  ;;  %v21522_v53 = vrot.slane %v21501_v47, %v18736_v10 }
 0x262   : > { %v10274_v36 = vcombine.low %v10266_v51, %v10273_v23  ;;  %v11743_v38 = vrot.slane %v11735_v24, %v18736_v10  ;;  %v9708_v60 = vrot.slane %v9694_v33, %v18736_v10  ;;  %v11152_v17 = vcombine.high %v17716_v7, %v17716_v7 }
 0x263   : > { %v11736_v3 = vcombine.low %v11727_v28, %v11734_v52  ;;  %v9709_v63 = vcombine.high %v9701_v4, %v9701_v4  ;;  %v10275_v29 = vcombine.low %v9677_v56, %v9684_v31  ;;  %v17651_v8 = vcombine.high %v9677_v56, %v9684_v31 }
 0x264   : > { %18435 = vmatmul.mubr.msk.bf16.gmra.mrb[164].mxu1 %vm2698_vm2, %v10274_v36  ;;  %v9710_v55 = vcombine.high %v9708_v60, %v9708_v60  ;;  %v11159_v49 = vrot.slane %v17716_v7, %v18736_v10  ;;  %v11166_v39 = vrot.slane %v11152_v17, %v18736_v10  ;;  %v11175_v48 = vcombine.high %v17717_v16, %v17717_v16 }
 0x265   : > { %v11750_v18 = vrot.slane %v11736_v3, %v18736_v10  ;;  %18438 = vmatprep.mubr.msk.bf16.mxu1 %vm18669_vm4, %v23290_v59  ;;  %v10277_v51 = vcombine.low %v9708_v60, %v9709_v63  ;;  %v10285_v23 = vrot.slane %v10275_v29, %v18736_v10  ;;  %v10292_v28 = vrot.slane %v17651_v8, %v18736_v10  ;;  %v23369_v63 = vld [vmem:[#allocation12_spill] sm:$0xff] }
 0x266   : > { %v10278_v24 = vcombine.low %v9710_v55, %v21522_v53  ;;  %v11167_v56 = vcombine.high %v11159_v49, %v11159_v49  ;;  %v11182_v36 = vrot.slane %v17717_v16, %v18736_v10  ;;  %v21538_v7 = vrot.slane %v11175_v48, %v18736_v10  ;;  %v23371_v29 = vld [vmem:[#allocation32_spill] sm:$0xff] }
 0x267   : > { %v11751_v33 = vcombine.low %v11743_v38, %v11750_v18  ;;  %v10299_v52 = vrot.slane %v10277_v51, %v18736_v10  ;;  %v10307_v31 = vcombine.low %v10285_v23, %v10292_v28  ;;  %v17729_v4 = vcombine.high %v21471_v9, %v21482_v44  ;;  %v23370_v18 = vld [vmem:[#allocation31_spill] sm:$0xff]  ;;  %v17637_v9 = vld.sshfl [vmem:[%s18729_s21 + $0x70] sm:$0x32 pattern:$0x75316420] }
 0x268   : > { %v10306_v60 = vrot.slane %v10278_v24, %v18736_v10  ;;  %v11190_v8 = vcombine.high %v11182_v36, %v11182_v36  ;;  %v11753_v17 = vcombine.low %v11159_v49, %v11166_v39  ;;  %v11754_v3 = vcombine.low %v11167_v56, %v11182_v36  ;;  %v17638_v23 = vld.sshfl [vmem:[%s18729_s21 + $0x74] sm:$0x33 pattern:$0x75316420]  ;;  %v23373_v28 = vld [vmem:[#allocation11_spill] sm:$0xff] }
 0x269   : > { %18485 = vmatmul.mubr.msk.bf16.gmra.mrb[164].mxu0 %vm2698_vm2, %v11751_v33  ;;  %v10315_v16 = vrot.slane %v10307_v31, %v18736_v10  ;;  %v11762_v48 = vrot.slane %v17729_v4, %v18736_v10  ;;  %v3638_v38 = vadd.f32 %v23370_v18, %v23369_v63  ;;  %v21551_v55 = vadd.f32 %v23371_v29, %v21478_v13 }
 0x26a   : > { %18488 = vmatprep.mubr.msk.bf16.mxu0 %vm18669_vm4, %v23290_v59  ;;  %v10308_v44 = vcombine.low %v10299_v52, %v10306_v60  ;;  %v11755_v49 = vcombine.low %v21538_v7, %v11190_v8  ;;  %v11769_v39 = vrot.slane %v11753_v17, %v18736_v10  ;;  %v11776_v51 = vrot.slane %v11754_v3, %v18736_v10  ;;  %v21572_v60 = vpop.f32.mrb[96].mxu1 }
 0x26b   : > { %23372 = vst [vmem:[#allocation6_spill] sm:$0xff] %v21551_v55  ;;  %v3641_v24 = vadd.f32 %v20963_v45, %v23373_v28  ;;  %v21564_v13 = vadd.f32 %v20965_v21, %v21498_v22  ;;  %v9718_v56 = vcombine.high %v21501_v47, %v21501_v47  ;;  %v9733_v36 = vcombine.high %v21522_v53, %v21522_v53  ;;  %v21574_v45 = vpop.f32.mrb[96].mxu0  ;;  %v17718_v53 = vld.sshfl [vmem:[%s18729_s21 + $0x6c] sm:$0x13 pattern:$0x75316420] }
 0x26c   : > { %v10322_v33 = vrot.slane %v10308_v44, %v18736_v10  ;;  %v11783_v52 = vrot.slane %v11755_v49, %v18736_v10  ;;  %v11784_v31 = vcombine.low %v11762_v48, %v11769_v39  ;;  %v9742_v4 = vcombine.high %v17637_v9, %v17637_v9  ;;  %v18312_v17 = vpop.f32.mrb[97].mxu1  ;;  %v18362_v3 = vpop.f32.mrb[97].mxu0  ;;  %v17719_v44 = vld.sshfl [vmem:[%s18729_s21 + $0x70] sm:$0x33 pattern:$0x75316420] }
 0x26d   : > { %23374 = vst [vmem:[#allocation27_spill] sm:$0xff] %v21564_v13  ;;  %v9732_v21 = vrot.slane %v9718_v56, %v18736_v10  ;;  %v9749_v22 = vrot.slane %v17637_v9, %v18736_v10  ;;  %v9766_v8 = vcombine.high %v17638_v23, %v17638_v23  ;;  %v21579_v47 = vrot.slane %v17638_v23, %v18736_v10  ;;  %v21585_v49 = vpop.f32.mrb[98].mxu1  ;;  %v21587_v39 = vpop.f32.mrb[98].mxu0 }
 0x26e   : > { %v10323_v63 = vcombine.low %v10315_v16, %v10322_v33  ;;  %v11785_v18 = vcombine.low %v11776_v51, %v11783_v52  ;;  %v11792_v48 = vrot.slane %v11784_v31, %v18736_v10  ;;  %v9756_v29 = vrot.slane %v9742_v4, %v18736_v10  ;;  %v18363_v17 = vpop.f32.mrb[99].mxu0  ;;  %v18313_v3 = vpop.f32.mrb[99].mxu1 }
 0x26f   : > { %v9734_v28 = vcombine.high %v9732_v21, %v9732_v21  ;;  %v9780_v9 = vrot.slane %v9766_v8, %v18736_v10  ;;  %v10324_v56 = vcombine.low %v9732_v21, %v9733_v36  ;;  %v11191_v23 = vcombine.high %v21538_v7, %v21538_v7 }
 0x270   : > { %18439 = vmatmul.mubr.msk.bf16.gmra.mrb[168].mxu1 %vm2698_vm2, %v10323_v63  ;;  %v11799_v16 = vrot.slane %v11785_v18, %v18736_v10  ;;  %v17652_v51 = vcombine.high %v9749_v22, %v9756_v29  ;;  %v11199_v33 = vcombine.high %v17718_v53, %v17718_v53  ;;  %v11206_v52 = vrot.slane %v17718_v53, %v18736_v10 }
 0x271   : > { %18442 = vmatprep.mubr.msk.bf16.mxu1 %vm18669_vm4, %v23290_v59  ;;  %v10325_v31 = vcombine.low %v9734_v28, %v9756_v29  ;;  %v10327_v4 = vcombine.low %v21579_v47, %v9780_v9  ;;  %v10334_v36 = vrot.slane %v10324_v56, %v18736_v10  ;;  %v11222_v21 = vcombine.high %v17719_v44, %v17719_v44 }
 0x272   : > { %v11800_v7 = vcombine.low %v11792_v48, %v11799_v16  ;;  %v10348_v8 = vrot.slane %v17652_v51, %v18736_v10  ;;  %v11213_v63 = vrot.slane %v11199_v33, %v18736_v10  ;;  %v11214_v18 = vcombine.high %v11206_v52, %v11206_v52  ;;  %v23375_v48 = vld [vmem:[#allocation10_spill] sm:$0xff] }
 0x273   : > { %v10341_v22 = vrot.slane %v10325_v31, %v18736_v10  ;;  %v10355_v53 = vrot.slane %v10327_v4, %v18736_v10  ;;  %v11229_v17 = vrot.slane %v17719_v44, %v18736_v10  ;;  %v11236_v29 = vrot.slane %v11222_v21, %v18736_v10  ;;  %v17720_v4 = vld.sshfl [vmem:[%s18729_s21 + $0x74] sm:$0x13 pattern:$0x75316420] }
 0x274   : > { %18489 = vmatmul.mubr.msk.bf16.gmra.mrb[168].mxu0 %vm2698_vm2, %v11800_v7  ;;  %v11801_v28 = vcombine.low %v11191_v23, %v11206_v52  ;;  %v11802_v56 = vcombine.low %v11213_v63, %v11214_v18  ;;  %v3646_v3 = vadd.f32 %v21015_v1, %v23375_v48  ;;  %v21609_v16 = vadd.f32 %v21017_v57, %v3638_v38  ;;  %v23377_v52 = vld [vmem:[#allocation15_spill] sm:$0xff]  ;;  %v17721_v57 = vld.sshfl [vmem:[%s18729_s21 + $0x78] sm:$0x33 pattern:$0x75316420] }
 0x275   : > { %18492 = vmatprep.mubr.msk.bf16.mxu0 %vm18669_vm4, %v23290_v59  ;;  %v10356_v51 = vcombine.low %v10334_v36, %v10341_v22  ;;  %v10357_v33 = vcombine.low %v10348_v8, %v10355_v53  ;;  %v11803_v44 = vcombine.low %v11229_v17, %v11236_v29  ;;  %v17730_v31 = vcombine.high %v11229_v17, %v11236_v29  ;;  %v17722_v53 = vld.sshfl [vmem:[%s18729_s21 + $0x7c] sm:$0x13 pattern:$0x75316420] }
 0x276   : > { %23376 = vst [vmem:[#allocation28_spill] sm:$0xff] %v21609_v16  ;;  %v11811_v21 = vrot.slane %v11801_v28, %v18736_v10  ;;  %v11818_v23 = vrot.slane %v11802_v56, %v18736_v10  ;;  %v3649_v7 = vadd.f32 %v21028_v40, %v23377_v52  ;;  %v21619_v1 = vadd.f32 %v21030_v25, %v3641_v24  ;;  %v23379_v52 = vld [vmem:[#allocation16_spill] sm:$0xff] }
 0x277   : > { %v10364_v38 = vrot.slane %v10356_v51, %v18736_v10  ;;  %v10371_v36 = vrot.slane %v10357_v33, %v18736_v10  ;;  %v11825_v8 = vrot.slane %v11803_v44, %v18736_v10  ;;  %v11832_v63 = vrot.slane %v17730_v31, %v18736_v10 }
 0x278   : > { %23378 = vst [vmem:[#allocation5_spill] sm:$0xff] %v21619_v1  ;;  %v11833_v18 = vcombine.low %v11811_v21, %v11818_v23  ;;  %v17653_v22 = vcombine.high %v21579_v47, %v9780_v9  ;;  %v11246_v17 = vcombine.high %v17720_v4, %v17720_v4  ;;  %v11253_v29 = vrot.slane %v17720_v4, %v18736_v10 }
 0x279   : > { %v10372_v40 = vcombine.low %v10364_v38, %v10371_v36  ;;  %v11834_v28 = vcombine.low %v11825_v8, %v11832_v63  ;;  %v11269_v25 = vcombine.high %v17721_v57, %v17721_v57  ;;  %v11276_v24 = vrot.slane %v17721_v57, %v18736_v10  ;;  %v17772_v38 = vld.sshfl [vmem:[%s18729_s21 + $0x10] sm:$0x33 pattern:$0x75316420] }
 0x27a   : > { %v11841_v56 = vrot.slane %v11833_v18, %v18736_v10  ;;  %v10380_v48 = vrot.slane %v17653_v22, %v18736_v10  ;;  %v11260_v51 = vrot.slane %v11246_v17, %v18736_v10  ;;  %v11261_v33 = vcombine.high %v11253_v29, %v11253_v29  ;;  %v17773_v22 = vld.sshfl [vmem:[%s18729_s21 + $0x14] sm:$0x33 pattern:$0x75316420] }
 0x27b   : > { %18443 = vmatmul.mubr.msk.bf16.gmra.mrb[172].mxu1 %vm2698_vm2, %v10372_v40  ;;  %v11848_v47 = vrot.slane %v11834_v28, %v18736_v10  ;;  %v11283_v9 = vrot.slane %v11269_v25, %v18736_v10  ;;  %v11284_v44 = vcombine.high %v11276_v24, %v11276_v24  ;;  %v11300_v31 = vrot.slane %v17722_v53, %v18736_v10  ;;  %v17774_v25 = vld.sshfl [vmem:[%s18729_s21 + $0x18] sm:$0x33 pattern:$0x75316420] }
 0x27c   : > { %18446 = vmatprep.mubr.msk.bf16.mxu1 %vm18669_vm4, %v23290_v59  ;;  %v10387_v4 = vrot.slane %v10380_v48, %v18736_v10  ;;  %v11850_v21 = vcombine.low %v11253_v29, %v11260_v51  ;;  %v11851_v23 = vcombine.low %v11261_v33, %v11276_v24  ;;  %v21642_v57 = vadd.f32 %v21066_v19, %v23379_v52  ;;  %v21657_v51 = vpop.f32.mrb[100].mxu1 }
 0x27d   : > { %v11849_v36 = vcombine.low %v11841_v56, %v11848_v47  ;;  %v11285_v8 = vcombine.high %v11283_v9, %v11283_v9  ;;  %v11852_v63 = vcombine.low %v11283_v9, %v11284_v44  ;;  %v21646_v18 = vadd.f32 %v21068_v11, %v3646_v3  ;;  %v21659_v11 = vpop.f32.mrb[100].mxu0  ;;  %v18316_v33 = vpop.f32.mrb[101].mxu1 }
 0x27e   : > { %v11860_v17 = vrot.slane %v11850_v21, %v18736_v10  ;;  %v11867_v40 = vrot.slane %v11851_v23, %v18736_v10  ;;  %v21652_v28 = vadd.f32 %v21087_v5, %v3649_v7  ;;  %v11293_v29 = vcombine.high %v17722_v53, %v17722_v53  ;;  %v18366_v47 = vpop.f32.mrb[101].mxu0  ;;  %v21670_v23 = vpop.f32.mrb[102].mxu1 }
 0x27f   : > { %23380 = vst [vmem:[#allocation29_spill] sm:$0xff] %v21646_v18  ;;  %18493 = vmatmul.mubr.msk.bf16.gmra.mrb[172].mxu0 %vm2698_vm2, %v11849_v36  ;;  %v11853_v19 = vcombine.low %v11285_v8, %v11300_v31  ;;  %v11874_v24 = vrot.slane %v11852_v63, %v18736_v10  ;;  %v11308_v56 = vcombine.high %v11300_v31, %v11300_v31  ;;  %v21672_v52 = vpop.f32.mrb[102].mxu0 }
 0x280   : > { %23381 = vst [vmem:[#allocation30_spill] sm:$0xff] %v21652_v28  ;;  %v12180_v48 = vcombine.high %v17772_v38, %v17772_v38  ;;  %18496 = vmatprep.mubr.msk.bf16.mxu0 %vm18669_vm4, %v23290_v59  ;;  %v11882_v3 = vcombine.low %v11860_v17, %v11867_v40  ;;  %v11307_v5 = vrot.slane %v11293_v29, %v18736_v10  ;;  %v18367_v17 = vpop.f32.mrb[103].mxu0  ;;  %v18317_v40 = vpop.f32.mrb[103].mxu1 }
 0x281   : > { %v12187_v7 = vrot.slane %v17772_v38, %v18736_v10  ;;  %v12204_v53 = vcombine.high %v17773_v22, %v17773_v22  ;;  %v11881_v9 = vrot.slane %v11853_v19, %v18736_v10  ;;  %v21668_v31 = vrot.slane %v17773_v22, %v18736_v10 }
 0x282   : > { %v12194_v44 = vrot.slane %v12180_v48, %v18736_v10  ;;  %v12228_v21 = vcombine.high %v17774_v25, %v17774_v25  ;;  %v11890_v36 = vrot.slane %v11882_v3, %v18736_v10  ;;  %v11899_v8 = vcombine.low %v11307_v5, %v11308_v56 }
 0x283   : > { %v12195_v63 = vcombine.high %v12187_v7, %v12187_v7  ;;  %v21676_v38 = vrot.slane %v12204_v53, %v18736_v10  ;;  %18447 = vmatmul.mubr.msk.bf16.gmra.mrb[176].mxu1 %vm2698_vm2, %v10387_v4  ;;  %v11883_v29 = vcombine.low %v11874_v24, %v11881_v9  ;;  %v21681_v22 = vcombine.high %v21668_v31, %v21668_v31 }
 0x284   : > { %v12196_v19 = vcombine.high %v12194_v44, %v12194_v44  ;;  %v12235_v48 = vrot.slane %v17774_v25, %v18736_v10  ;;  %18506 = vmatprep.mubr.msk.bf16.mxu1 %vm18669_vm4, %v23290_v59  ;;  %v11906_v56 = vrot.slane %v11899_v8, %v18736_v10  ;;  %v21692_v5 = vrot.slane %v12228_v21, %v18736_v10 }
 0x285   : > { %v21689_v3 = vcombine.high %v21676_v38, %v21676_v38  ;;  %v12846_v4 = vshrl.u32 %v12187_v7, 16  ;;  %v11897_v24 = vrot.slane %v11883_v29, %v18736_v10  ;;  %v12851_v53 = vshll.u32 %v12194_v44, 16 }
 0x286   : > { %v12854_v33 = vshrl.u32 %v12194_v44, 16  ;;  %v12859_v47 = vshll.u32 %v12195_v63, 16  ;;  %v11913_v25 = vrot.slane %v11906_v56, %v18736_v10  ;;  %v12862_v9 = vshrl.u32 %v12195_v63, 16 }
 0x287   : > { %v12867_v17 = vshll.u32 %v12196_v19, 16  ;;  %v12870_v40 = vshrl.u32 %v12196_v19, 16  ;;  %v11898_v28 = vcombine.low %v11890_v36, %v11897_v24  ;;  %v12853_v18 = vsel %vm18764_vm1, %v12846_v4, %v12851_v53 }
 0x288   : > { %v12861_v1 = vsel %vm18764_vm1, %v12854_v33, %v12859_v47  ;;  %v12875_v21 = vshll.u32 %v21668_v31, 16  ;;  %v12878_v44 = vshrl.u32 %v21668_v31, 16  ;;  %v12883_v29 = vshll.u32 %v21676_v38, 16 }
 0x289   : > { %v12869_v7 = vsel %vm18764_vm1, %v12862_v9, %v12867_v17  ;;  %v12886_v63 = vshrl.u32 %v21676_v38, 16  ;;  %18497 = vmatmul.mubr.msk.bf16.gmra.mrb[176].mxu0 %vm2698_vm2, %v11898_v28  ;;  %v12891_v19 = vshll.u32 %v21681_v22, 16  ;;  %v12894_v56 = vshrl.u32 %v21681_v22, 16 }
 0x28a   : > { %v12877_v36 = vsel %vm18764_vm1, %v12870_v40, %v12875_v21  ;;  %v12899_v4 = vshll.u32 %v21689_v3, 16  ;;  %18500 = vmatprep.mubr.msk.bf16.mxu0 %vm18669_vm4, %v23290_v59  ;;  %v12885_v24 = vsel %vm18764_vm1, %v12878_v44, %v12883_v29  ;;  %v12903_v53 = vshrl.u32 %v12235_v48, 16  ;;  %v17775_v21 = vld.sshfl [vmem:[%s18729_s21 + $0x1c] sm:$0x33 pattern:$0x75316420] }
 0x28b   : > { %v12908_v33 = vshll.u32 %v21692_v5, 16  ;;  %v13645_v28 = vcombine.low %v12853_v18, %v12861_v1  ;;  %v12893_v47 = vsel %vm18764_vm1, %v12886_v63, %v12891_v19  ;;  %v13646_v17 = vcombine.low %v12869_v7, %v12877_v36  ;;  %v17776_v18 = vld.sshfl [vmem:[%s18729_s21 + $0x20] sm:$0x33 pattern:$0x75316420] }
 0x28c   : > { %v12901_v9 = vsel %vm18764_vm1, %v12894_v56, %v12899_v4  ;;  %v21723_v40 = vadd.f32 %v21148_v58, %v21642_v57  ;;  %v13647_v44 = vcombine.low %v12885_v24, %v12893_v47  ;;  %v21731_v1 = vadd.f32 %v21150_v46, %v21003_v6 }
 0x28d   : > { %v12910_v16 = vsel %vm18764_vm1, %v12903_v53, %v12908_v33  ;;  %v13655_v29 = vrot.slane %v13645_v28, %v18736_v10  ;;  %v13662_v19 = vrot.slane %v13646_v17, %v18736_v10  ;;  %v21737_v7 = vadd.f32 %v21161_v12, %v21011_v0  ;;  %v21747_v53 = vpop.f32.mrb[104].mxu1  ;;  %v21749_v0 = vpop.f32.mrb[104].mxu0 }
 0x28e   : > { %23383 = vst [vmem:[#allocation4_spill] sm:$0xff] %v21723_v40  ;;  %v13648_v63 = vcombine.low %v12901_v9, %v12910_v16  ;;  %v12243_v58 = vcombine.high %v12235_v48, %v12235_v48  ;;  %v13669_v57 = vrot.slane %v13647_v44, %v18736_v10  ;;  %v12244_v36 = vcombine.high %v21692_v5, %v21692_v5  ;;  %v18320_v47 = vpop.f32.mrb[105].mxu1  ;;  %v18370_v9 = vpop.f32.mrb[105].mxu0 }
 0x28f   : > { %v12252_v56 = vcombine.high %v17775_v21, %v17775_v21  ;;  %v21743_v4 = vrot.slane %v17775_v21, %v18736_v10  ;;  %v13677_v46 = vcombine.low %v13655_v29, %v13662_v19  ;;  %v12276_v16 = vcombine.high %v17776_v18, %v17776_v18 }
 0x290   : > { %v13676_v6 = vrot.slane %v13648_v63, %v18736_v10  ;;  %v12283_v24 = vrot.slane %v17776_v18, %v18736_v10  ;;  %v12911_v33 = vshrl.u32 %v21692_v5, 16  ;;  %v12916_v28 = vshll.u32 %v12243_v58, 16  ;;  %v21764_v18 = vpop.f32.mrb[106].mxu1  ;;  %v21766_v63 = vpop.f32.mrb[106].mxu0 }
 0x291   : > { %v21752_v12 = vrot.slane %v12252_v56, %v18736_v10  ;;  %v12267_v48 = vcombine.high %v21743_v4, %v21743_v4  ;;  %18501 = vmatmul.mubr.msk.bf16.gmra.mrb[180].mxu0 %vm2698_vm2, %v11913_v25  ;;  %v13685_v21 = vrot.slane %v13677_v46, %v18736_v10  ;;  %v21760_v44 = vrot.slane %v12276_v16, %v18736_v10  ;;  %v18371_v56 = vpop.f32.mrb[107].mxu0 }
 0x292   : > { %v13678_v17 = vcombine.low %v13669_v57, %v13676_v6  ;;  %v21762_v29 = vcombine.high %v12283_v24, %v12283_v24  ;;  %23384 = vst [vmem:[#allocation9_spill] sm:$0xff] %v21764_v18  ;;  %23385 = vst [vmem:[#allocation8_spill] sm:$0xff] %v21766_v63  ;;  %18560 = vmatprep.mubr.msk.bf16.mxu0 %vm18669_vm4, %v23290_v59  ;;  %v12918_v25 = vsel %vm18764_vm1, %v12911_v33, %v12916_v28  ;;  %v18321_v6 = vpop.f32.mrb[107].mxu1 }
 0x293   : > { %v12268_v5 = vcombine.high %v21752_v12, %v21752_v12  ;;  %v12919_v19 = vshrl.u32 %v12243_v58, 16  ;;  %v12924_v57 = vshll.u32 %v12244_v36, 16  ;;  %v12927_v16 = vshrl.u32 %v12244_v36, 16 }
 0x294   : > { %v13692_v46 = vrot.slane %v13678_v17, %v18736_v10  ;;  %v12932_v47 = vshll.u32 %v21743_v4, 16  ;;  %v12935_v9 = vshrl.u32 %v21743_v4, 16  ;;  %v12940_v13 = vshll.u32 %v21752_v12, 16 }
 0x295   : > { %v12926_v40 = vsel %vm18764_vm1, %v12919_v19, %v12924_v57  ;;  %v12943_v33 = vshrl.u32 %v21752_v12, 16  ;;  %v12948_v58 = vshll.u32 %v12267_v48, 16  ;;  %v12951_v6 = vshrl.u32 %v12267_v48, 16 }
 0x296   : > { %v13693_v28 = vcombine.low %v13685_v21, %v13692_v46  ;;  %v12934_v56 = vsel %vm18764_vm1, %v12927_v16, %v12932_v47  ;;  %v12956_v17 = vshll.u32 %v12268_v5, 16  ;;  %v17940_v36 = vld.sshfl [vmem:[%s18729_s21 + $0x10] sm:$0x32 pattern:$0x75316420]  ;;  %v12942_v55 = vsel %vm18764_vm1, %v12935_v9, %v12940_v13 }
 0x297   : > { %v12950_v63 = vsel %vm18764_vm1, %v12943_v33, %v12948_v58  ;;  %v12960_v18 = vshrl.u32 %v12283_v24, 16  ;;  %v12965_v19 = vshll.u32 %v21760_v44, 16  ;;  %v21790_v57 = vld.sshfl [vmem:[%s18729_s21 + $0x18] sm:$0x32 pattern:$0x75316420]  ;;  %v13694_v46 = vcombine.low %v12918_v25, %v12926_v40 }
 0x298   : > { %18507 = vmatmul.mubr.msk.bf16.vlgmr.msra.gmra.mrb[180].mxu1 %vm2698_vm2, %v13693_v28  ;;  %v12958_v21 = vsel %vm18764_vm1, %v12951_v6, %v12956_v17  ;;  %v12968_v48 = vshrl.u32 %v21760_v44, 16  ;;  %v12973_v5 = vshll.u32 %v21762_v29, 16  ;;  %v13695_v24 = vcombine.low %v12934_v56, %v12942_v55 }
 0x299   : > { %18510 = vmatprep.mubr.msk.bf16.mxu1 %vm18669_vm4, %v23290_v59  ;;  %v12967_v13 = vsel %vm18764_vm1, %v12960_v18, %v12965_v19  ;;  %v13696_v16 = vcombine.low %v12950_v63, %v12958_v21  ;;  %v14514_v47 = vcombine.high %v17940_v36, %v17940_v36  ;;  %v13704_v33 = vrot.slane %v13694_v46, %v18736_v10 }
 0x29a   : > { %v12975_v9 = vsel %vm18764_vm1, %v12968_v48, %v12973_v5  ;;  %v14521_v58 = vrot.slane %v17940_v36, %v18736_v10  ;;  %v14562_v40 = vcombine.high %v21790_v57, %v21790_v57  ;;  %v13711_v28 = vrot.slane %v13695_v24, %v18736_v10  ;;  %v17777_v5 = vld.sshfl [vmem:[%s18729_s21 + $0x24] sm:$0x33 pattern:$0x75316420] }
 0x29b   : > { %v13697_v25 = vcombine.low %v12967_v13, %v12975_v9  ;;  %v13718_v18 = vrot.slane %v13696_v16, %v18736_v10  ;;  %v14528_v55 = vrot.slane %v14514_v47, %v18736_v10  ;;  %v15183_v6 = vcombine.low %v21676_v38, %v21681_v22 }
 0x29c   : > { %v14529_v63 = vcombine.high %v14521_v58, %v14521_v58  ;;  %v21811_v56 = vrot.slane %v14562_v40, %v18736_v10  ;;  %v21817_v17 = vadd.f32 %v21231_v34, %v21063_v26  ;;  %v13726_v19 = vcombine.low %v13704_v33, %v13711_v28  ;;  %v17778_v26 = vld.sshfl [vmem:[%s18729_s21 + $0x28] sm:$0x33 pattern:$0x75316420] }
 0x29d   : > { %v13725_v36 = vrot.slane %v13697_v25, %v18736_v10  ;;  %v14530_v21 = vcombine.high %v14528_v55, %v14528_v55  ;;  %v21822_v48 = vadd.f32 %v21233_v62, %v21731_v1  ;;  %v15205_v24 = vrot.slane %v15183_v6, %v18736_v10 }
 0x29e   : > { %v15181_v46 = vcombine.low %v14528_v55, %v14529_v63  ;;  %v15184_v13 = vcombine.low %v21689_v3, %v21811_v56  ;;  %v21830_v38 = vadd.f32 %v21241_v20, %v21084_v30  ;;  %v13734_v22 = vrot.slane %v13726_v19, %v18736_v10  ;;  %v21863_v19 = vpop.f32.mrb[108].mxu1 }
 0x29f   : > { %23386 = vst [vmem:[#allocation7_spill] sm:$0xff] %v21822_v48  ;;  %v13727_v34 = vcombine.low %v13718_v18, %v13725_v36  ;;  %v15182_v16 = vcombine.low %v14530_v21, %v21668_v31  ;;  %v21837_v62 = vadd.f32 %v21243_v14, %v21737_v7  ;;  %v12292_v47 = vcombine.high %v21760_v44, %v21760_v44  ;;  %v21865_v21 = vpop.f32.mrb[108].mxu0  ;;  %v17946_v48 = vld.sshfl [vmem:[%s18729_s21 + $0x28] sm:$0x32 pattern:$0x75316420] }
 0x2a0   : > { %v15191_v1 = vrot.slane %v15181_v46, %v18736_v10  ;;  %v15212_v3 = vrot.slane %v15184_v13, %v18736_v10  ;;  %v12300_v9 = vcombine.high %v17777_v5, %v17777_v5  ;;  %v21846_v33 = vrot.slane %v17777_v5, %v18736_v10 }
 0x2a1   : > { %23387 = vst [vmem:[#allocation12_spill] sm:$0xff] %v21837_v62  ;;  %v13741_v30 = vrot.slane %v13727_v34, %v18736_v10  ;;  %v15198_v20 = vrot.slane %v15182_v16, %v18736_v10  ;;  %v12324_v31 = vcombine.high %v17778_v26, %v17778_v26  ;;  %v12331_v7 = vrot.slane %v17778_v26, %v18736_v10  ;;  %v18374_v26 = vpop.f32.mrb[109].mxu0 }
 0x2a2   : > { %v15214_v58 = vcombine.low %v15205_v24, %v15212_v3  ;;  %v21849_v14 = vrot.slane %v12300_v9, %v18736_v10  ;;  %v12976_v40 = vshrl.u32 %v21762_v29, 16  ;;  %v21855_v44 = vcombine.high %v21846_v33, %v21846_v33  ;;  %v18324_v24 = vpop.f32.mrb[109].mxu1  ;;  %v21881_v9 = vpop.f32.mrb[110].mxu0 }
 0x2a3   : > { %v13742_v25 = vcombine.low %v13734_v22, %v13741_v30  ;;  %v15213_v28 = vcombine.low %v15191_v1, %v15198_v20  ;;  %v12338_v18 = vrot.slane %v12324_v31, %v18736_v10  ;;  %v12339_v6 = vcombine.high %v12331_v7, %v12331_v7  ;;  %v21879_v3 = vpop.f32.mrb[110].mxu1 }
 0x2a4   : > { %v15228_v55 = vrot.slane %v15214_v58, %v18736_v10  ;;  %v21861_v63 = vcombine.high %v21849_v14, %v21849_v14  ;;  %v12981_v36 = vshll.u32 %v12292_v47, 16  ;;  %v12984_v46 = vshrl.u32 %v12292_v47, 16  ;;  %v17944_v58 = vld.sshfl [vmem:[%s18729_s21 + $0x20] sm:$0x32 pattern:$0x75316420] }
 0x2a5   : > { %18511 = vmatmul.mubr.msk.bf16.gmra.mrb[184].mxu1 %vm2698_vm2, %v13742_v25  ;;  %v15221_v29 = vrot.slane %v15213_v28, %v18736_v10  ;;  %v21869_v5 = vcombine.high %v12338_v18, %v12338_v18  ;;  %v12989_v13 = vshll.u32 %v21846_v33, 16  ;;  %v12992_v22 = vshrl.u32 %v21846_v33, 16  ;;  %v18325_v25 = vpop.f32.mrb[111].mxu1 }
 0x2a6   : > { %18514 = vmatprep.mubr.msk.bf16.mxu1 %vm18669_vm4, %v23290_v59  ;;  %v12983_v34 = vsel %vm18764_vm1, %v12976_v40, %v12981_v36  ;;  %v12997_v16 = vshll.u32 %v21849_v14, 16  ;;  %v13000_v1 = vshrl.u32 %v21849_v14, 16  ;;  %v13005_v20 = vshll.u32 %v21855_v44, 16  ;;  %v18375_v40 = vpop.f32.mrb[111].mxu0 }
 0x2a7   : > { %v15229_v47 = vcombine.low %v15221_v29, %v15228_v55  ;;  %v12991_v30 = vsel %vm18764_vm1, %v12984_v46, %v12989_v13  ;;  %v13008_v31 = vshrl.u32 %v21855_v44, 16  ;;  %v13013_v36 = vshll.u32 %v21861_v63, 16 }
 0x2a8   : > { %v12999_v28 = vsel %vm18764_vm1, %v12992_v22, %v12997_v16  ;;  %v13017_v24 = vshrl.u32 %v12331_v7, 16  ;;  %v13022_v26 = vshll.u32 %v12338_v18, 16  ;;  %v13007_v55 = vsel %vm18764_vm1, %v13000_v1, %v13005_v20 }
 0x2a9   : > { %18561 = vmatmul.mubr.msk.bf16.vlgmr.msra.gmra.mrb[184].mxu0 %vm2698_vm2, %v15229_v47  ;;  %v13025_v29 = vshrl.u32 %v12338_v18, 16  ;;  %v13030_v46 = vshll.u32 %v12339_v6, 16  ;;  %v13033_v13 = vshrl.u32 %v12339_v6, 16  ;;  %v13015_v40 = vsel %vm18764_vm1, %v13008_v31, %v13013_v36 }
 0x2aa   : > { %18564 = vmatprep.mubr.msk.bf16.mxu0 %vm18669_vm4, %v23290_v59  ;;  %v13024_v22 = vsel %vm18764_vm1, %v13017_v24, %v13022_v26  ;;  %v13038_v7 = vshll.u32 %v21869_v5, 16  ;;  %v13743_v16 = vcombine.low %v12983_v34, %v12991_v30  ;;  %v13744_v1 = vcombine.low %v12999_v28, %v13007_v55 }
 0x2ab   : > { %v13032_v47 = vsel %vm18764_vm1, %v13025_v29, %v13030_v46  ;;  %v13745_v18 = vcombine.low %v13015_v40, %v13024_v22  ;;  %v14569_v6 = vrot.slane %v21790_v57, %v18736_v10  ;;  %v14610_v25 = vcombine.high %v17944_v58, %v17944_v58  ;;  %v17779_v46 = vld.sshfl [vmem:[%s18729_s21 + $0x2c] sm:$0x33 pattern:$0x75316420] }
 0x2ac   : > { %v13040_v20 = vsel %vm18764_vm1, %v13033_v13, %v13038_v7  ;;  %v13753_v31 = vrot.slane %v13743_v16, %v18736_v10  ;;  %v14617_v36 = vrot.slane %v17944_v58, %v18736_v10  ;;  %v13760_v34 = vrot.slane %v13744_v1, %v18736_v10 }
 0x2ad   : > { %v13746_v24 = vcombine.low %v13032_v47, %v13040_v20  ;;  %v13767_v30 = vrot.slane %v13745_v18, %v18736_v10  ;;  %v17969_v28 = vcombine.high %v14569_v6, %v21811_v56  ;;  %v21913_v26 = vrot.slane %v14610_v25, %v18736_v10  ;;  %v17780_v56 = vld.sshfl [vmem:[%s18729_s21 + $0x30] sm:$0x33 pattern:$0x75316420] }
 0x2ae   : > { %v14625_v57 = vcombine.high %v14617_v36, %v14617_v36  ;;  %v15231_v55 = vcombine.low %v21743_v4, %v21752_v12  ;;  %v17970_v29 = vcombine.high %v21743_v4, %v21752_v12  ;;  %v13775_v13 = vcombine.low %v13753_v31, %v13760_v34  ;;  %v21935_v12 = vld.sshfl [vmem:[%s18729_s21 + $0x34] sm:$0x33 pattern:$0x75316420] }
 0x2af   : > { %v13774_v58 = vrot.slane %v13746_v24, %v18736_v10  ;;  %v15240_v40 = vrot.slane %v17969_v28, %v18736_v10  ;;  %v21924_v22 = vadd.f32 %v21315_v32, %v21124_v50  ;;  %v21932_v4 = vadd.f32 %v21317_v54, %v21817_v17  ;;  %v23389_v32 = vld [vmem:[#allocation20_spill] sm:$0xff] }
 0x2b0   : > { %v15233_v7 = vcombine.low %v21913_v26, %v14625_v57  ;;  %v15247_v16 = vrot.slane %v15231_v55, %v18736_v10  ;;  %v15254_v47 = vrot.slane %v17970_v29, %v18736_v10  ;;  %v13783_v18 = vrot.slane %v13775_v13, %v18736_v10 }
 0x2b1   : > { %23388 = vst [vmem:[#allocation31_spill] sm:$0xff] %v21932_v4  ;;  %v13776_v1 = vcombine.low %v13767_v30, %v13774_v58  ;;  %v21940_v50 = vadd.f32 %v21330_v37, %v21141_v35  ;;  %v21944_v6 = vadd.f32 %v23389_v32, %v21830_v38  ;;  %v12348_v25 = vcombine.high %v17779_v46, %v17779_v46  ;;  %v21966_v58 = vpop.f32.mrb[112].mxu0 }
 0x2b2   : > { %v15261_v20 = vrot.slane %v15233_v7, %v18736_v10  ;;  %v15262_v31 = vcombine.low %v15240_v40, %v15247_v16  ;;  %v21948_v54 = vrot.slane %v17779_v46, %v18736_v10  ;;  %v12372_v36 = vcombine.high %v17780_v56, %v17780_v56  ;;  %v21964_v46 = vpop.f32.mrb[112].mxu1 }
 0x2b3   : > { %23390 = vst [vmem:[#allocation32_spill] sm:$0xff] %v21944_v6  ;;  %v13790_v17 = vrot.slane %v13776_v1, %v18736_v10  ;;  %v12379_v24 = vrot.slane %v17780_v56, %v18736_v10  ;;  %v21954_v35 = vrot.slane %v21935_v12, %v18736_v10  ;;  %v21958_v34 = vrot.slane %v12348_v25, %v18736_v10  ;;  %v18328_v16 = vpop.f32.mrb[113].mxu1 }
 0x2b4   : > { %v15263_v37 = vcombine.low %v15254_v47, %v15261_v20  ;;  %v15270_v38 = vrot.slane %v15262_v31, %v18736_v10  ;;  %v12363_v30 = vcombine.high %v21948_v54, %v21948_v54  ;;  %v12386_v57 = vrot.slane %v12372_v36, %v18736_v10  ;;  %v18378_v47 = vpop.f32.mrb[113].mxu0  ;;  %v21976_v20 = vpop.f32.mrb[114].mxu1 }
 0x2b5   : > { %v13791_v28 = vcombine.low %v13783_v18, %v13790_v17  ;;  %v12387_v55 = vcombine.high %v12379_v24, %v12379_v24  ;;  %v13041_v29 = vshrl.u32 %v21869_v5, 16  ;;  %v12364_v40 = vcombine.high %v21958_v34, %v21958_v34  ;;  %v21978_v31 = vpop.f32.mrb[114].mxu0  ;;  %v18329_v16 = vpop.f32.mrb[115].mxu1 }
 0x2b6   : > { %v15277_v13 = vrot.slane %v15263_v37, %v18736_v10  ;;  %v13046_v56 = vshll.u32 %v21948_v54, 16  ;;  %v13049_v7 = vshrl.u32 %v21948_v54, 16  ;;  %v12388_v1 = vcombine.high %v12386_v57, %v12386_v57 }
 0x2b7   : > { %18515 = vmatmul.mubr.msk.bf16.gmra.mrb[188].mxu1 %vm2698_vm2, %v13791_v28  ;;  %v13054_v5 = vshll.u32 %v21958_v34, 16  ;;  %v13057_v18 = vshrl.u32 %v21958_v34, 16  ;;  %v13062_v32 = vshll.u32 %v12363_v30, 16  ;;  %v13065_v36 = vshrl.u32 %v12363_v30, 16  ;;  %v18379_v28 = vpop.f32.mrb[115].mxu0 }
 0x2b8   : > { %v15278_v25 = vcombine.low %v15270_v38, %v15277_v13  ;;  %18518 = vmatprep.mubr.msk.bf16.mxu1 %vm18669_vm4, %v23290_v59  ;;  %v13048_v17 = vsel %vm18764_vm1, %v13041_v29, %v13046_v56  ;;  %v13070_v37 = vshll.u32 %v12364_v40, 16  ;;  %v13074_v4 = vshrl.u32 %v12379_v24, 16 }
 0x2b9   : > { %v13056_v47 = vsel %vm18764_vm1, %v13049_v7, %v13054_v5  ;;  %v13064_v6 = vsel %vm18764_vm1, %v13057_v18, %v13062_v32  ;;  %v13079_v62 = vshll.u32 %v12386_v57, 16  ;;  %v13082_v13 = vshrl.u32 %v12386_v57, 16 }
 0x2ba   : > { %18565 = vmatmul.mubr.msk.bf16.gmra.mrb[188].mxu0 %vm2698_vm2, %v15278_v25  ;;  %v13072_v38 = vsel %vm18764_vm1, %v13065_v36, %v13070_v37  ;;  %v13087_v29 = vshll.u32 %v12387_v55, 16  ;;  %v13090_v30 = vshrl.u32 %v12387_v55, 16  ;;  %v13095_v56 = vshll.u32 %v12388_v1, 16 }
 0x2bb   : > { %18568 = vmatprep.mubr.msk.bf16.mxu0 %vm18669_vm4, %v23290_v59  ;;  %v13081_v40 = vsel %vm18764_vm1, %v13074_v4, %v13079_v62  ;;  %v13098_v7 = vshrl.u32 %v12388_v1, 16  ;;  %v13103_v24 = vshll.u32 %v21954_v35, 16  ;;  %v13792_v18 = vcombine.low %v13048_v17, %v13056_v47 }
 0x2bc   : > { %v13089_v5 = vsel %vm18764_vm1, %v13082_v13, %v13087_v29  ;;  %v13793_v32 = vcombine.low %v13064_v6, %v13072_v38  ;;  %v14626_v57 = vcombine.high %v21913_v26, %v21913_v26  ;;  %v13097_v55 = vsel %vm18764_vm1, %v13090_v30, %v13095_v56  ;;  %v23391_v13 = vld [vmem:[#allocation33_spill] sm:$0xff] }
 0x2bd   : > { %v13105_v25 = vsel %vm18764_vm1, %v13098_v7, %v13103_v24  ;;  %v13794_v36 = vcombine.low %v13081_v40, %v13089_v5  ;;  %v14658_v62 = vcombine.high %v17946_v48, %v17946_v48  ;;  %v13802_v1 = vrot.slane %v13792_v18, %v18736_v10  ;;  %v17782_v7 = vld.sshfl [vmem:[%s18729_s21 + $0x38] sm:$0x33 pattern:$0x75316420]  ;;  %v23393_v24 = vld [vmem:[#allocation34_spill] sm:$0xff] }
 0x2be   : > { %v13795_v4 = vcombine.low %v13097_v55, %v13105_v25  ;;  %v13809_v37 = vrot.slane %v13793_v32, %v18736_v10  ;;  %v14665_v17 = vrot.slane %v17946_v48, %v18736_v10  ;;  %v15279_v28 = vcombine.low %v14626_v57, %v21846_v33 }
 0x2bf   : > { %v13816_v6 = vrot.slane %v13794_v36, %v18736_v10  ;;  %v14672_v26 = vrot.slane %v14658_v62, %v18736_v10  ;;  %v15280_v16 = vcombine.low %v21849_v14, %v21855_v44  ;;  %v22016_v29 = vadd.f32 %v21392_v42, %v23391_v13  ;;  %v23394_v42 = vld [vmem:[#allocation23_spill] sm:$0xff] }
 0x2c0   : > { %v13823_v47 = vrot.slane %v13795_v4, %v18736_v10  ;;  %v13824_v38 = vcombine.low %v13802_v1, %v13809_v37  ;;  %v22020_v48 = vadd.f32 %v21394_v2, %v21924_v22  ;;  %v15289_v56 = vrot.slane %v15279_v28, %v18736_v10  ;;  %v17783_v2 = vld.sshfl [vmem:[%s18729_s21 + $0x3c] sm:$0x33 pattern:$0x75316420]  ;;  %v22056_v28 = vpop.f32.mrb[116].mxu0 }
 0x2c1   : > { %v15281_v30 = vcombine.low %v21861_v63, %v14672_v26  ;;  %v17971_v40 = vcombine.high %v14665_v17, %v14672_v26  ;;  %v15296_v33 = vrot.slane %v15280_v16, %v18736_v10  ;;  %v22029_v5 = vadd.f32 %v21406_v15, %v23393_v24  ;;  %v22054_v26 = vpop.f32.mrb[116].mxu1 }
 0x2c2   : > { %23392 = vst [vmem:[#allocation11_spill] sm:$0xff] %v22020_v48  ;;  %v13825_v14 = vcombine.low %v13816_v6, %v13823_v47  ;;  %v13832_v44 = vrot.slane %v13824_v38, %v18736_v10  ;;  %v22033_v18 = vadd.f32 %v23394_v42, %v21940_v50  ;;  %v12396_v57 = vcombine.high %v21935_v12, %v21935_v12 }
 0x2c3   : > { %v15303_v63 = vrot.slane %v15281_v30, %v18736_v10  ;;  %v15310_v22 = vrot.slane %v17971_v40, %v18736_v10  ;;  %v15311_v32 = vcombine.low %v15289_v56, %v15296_v33  ;;  %v22043_v25 = vcombine.high %v21954_v35, %v21954_v35  ;;  %v18332_v30 = vpop.f32.mrb[117].mxu1  ;;  %v18382_v40 = vpop.f32.mrb[117].mxu0 }
 0x2c4   : > { %23395 = vst [vmem:[#allocation10_spill] sm:$0xff] %v22033_v18  ;;  %v13839_v55 = vrot.slane %v13825_v14, %v18736_v10  ;;  %v12420_v15 = vcombine.high %v17782_v7, %v17782_v7  ;;  %v12427_v36 = vrot.slane %v17782_v7, %v18736_v10  ;;  %v22048_v4 = vrot.slane %v12396_v57, %v18736_v10  ;;  %v22073_v24 = vpop.f32.mrb[118].mxu0 }
 0x2c5   : > { %v15312_v50 = vcombine.low %v15303_v63, %v15310_v22  ;;  %v15319_v62 = vrot.slane %v15311_v32, %v18736_v10  ;;  %v12444_v1 = vcombine.high %v17783_v2, %v17783_v2  ;;  %v22052_v6 = vrot.slane %v17783_v2, %v18736_v10  ;;  %v18383_v32 = vpop.f32.mrb[119].mxu0 }
 0x2c6   : > { %v13840_v37 = vcombine.low %v13832_v44, %v13839_v55  ;;  %v12434_v17 = vrot.slane %v12420_v15, %v18736_v10  ;;  %v12435_v12 = vcombine.high %v12427_v36, %v12427_v36  ;;  %v22061_v47 = vcombine.high %v22048_v4, %v22048_v4  ;;  %v22071_v44 = vpop.f32.mrb[118].mxu1 }
 0x2c7   : > { %v15326_v16 = vrot.slane %v15312_v50, %v18736_v10  ;;  %v22064_v38 = vrot.slane %v12444_v1, %v18736_v10  ;;  %v13106_v13 = vshrl.u32 %v21954_v35, 16  ;;  %v13111_v33 = vshll.u32 %v22048_v4, 16  ;;  %v18333_v57 = vpop.f32.mrb[119].mxu1 }
 0x2c8   : > { %18519 = vmatmul.mubr.msk.bf16.gmra.mrb[192].mxu1 %vm2698_vm2, %v13840_v37  ;;  %v12436_v56 = vcombine.high %v12434_v17, %v12434_v17  ;;  %v13114_v7 = vshrl.u32 %v22048_v4, 16  ;;  %v13119_v14 = vshll.u32 %v22043_v25, 16  ;;  %v13122_v2 = vshrl.u32 %v22043_v25, 16 }
 0x2c9   : > { %v15327_v42 = vcombine.low %v15319_v62, %v15326_v16  ;;  %18522 = vmatprep.mubr.msk.bf16.mxu1 %vm18669_vm4, %v23290_v59  ;;  %v13127_v63 = vshll.u32 %v22061_v47, 16  ;;  %v13131_v22 = vshrl.u32 %v12427_v36, 16  ;;  %v13113_v55 = vsel %vm18764_vm1, %v13106_v13, %v13111_v33  ;;  %v17948_v37 = vld.sshfl [vmem:[%s18729_s21 + $0x30] sm:$0x32 pattern:$0x75316420] }
 0x2ca   : > { %v13121_v15 = vsel %vm18764_vm1, %v13114_v7, %v13119_v14  ;;  %v13136_v50 = vshll.u32 %v12434_v17, 16  ;;  %v13139_v1 = vshrl.u32 %v12434_v17, 16  ;;  %v13144_v16 = vshll.u32 %v12435_v12, 16 }
 0x2cb   : > { %18569 = vmatmul.mubr.msk.bf16.gmra.mrb[192].mxu0 %vm2698_vm2, %v15327_v42  ;;  %v13129_v62 = vsel %vm18764_vm1, %v13122_v2, %v13127_v63  ;;  %v13147_v30 = vshrl.u32 %v12435_v12, 16  ;;  %v13152_v40 = vshll.u32 %v12436_v56, 16  ;;  %v13155_v13 = vshrl.u32 %v12436_v56, 16 }
 0x2cc   : > { %18572 = vmatprep.mubr.msk.bf16.mxu0 %vm18669_vm4, %v23290_v59  ;;  %v13138_v36 = vsel %vm18764_vm1, %v13131_v22, %v13136_v50  ;;  %v13160_v33 = vshll.u32 %v22052_v6, 16  ;;  %v13163_v17 = vshrl.u32 %v22052_v6, 16  ;;  %v13146_v7 = vsel %vm18764_vm1, %v13139_v1, %v13144_v16 }
 0x2cd   : > { %v13154_v14 = vsel %vm18764_vm1, %v13147_v30, %v13152_v40  ;;  %v13168_v12 = vshll.u32 %v22064_v38, 16  ;;  %v13841_v42 = vcombine.low %v13113_v55, %v13121_v15  ;;  %v13842_v63 = vcombine.low %v13129_v62, %v13138_v36 }
 0x2ce   : > { %v13162_v2 = vsel %vm18764_vm1, %v13155_v13, %v13160_v33  ;;  %v13843_v32 = vcombine.low %v13146_v7, %v13154_v14  ;;  %v14706_v22 = vcombine.high %v17948_v37, %v17948_v37  ;;  %v14713_v50 = vrot.slane %v17948_v37, %v18736_v10  ;;  %v23396_v13 = vld [vmem:[#allocation14_spill] sm:$0xff] }
 0x2cf   : > { %v13170_v56 = vsel %vm18764_vm1, %v13163_v17, %v13168_v12  ;;  %v13851_v57 = vrot.slane %v13841_v42, %v18736_v10  ;;  %v15328_v1 = vcombine.low %v21948_v54, %v21958_v34  ;;  %v13858_v55 = vrot.slane %v13842_v63, %v18736_v10  ;;  %v17784_v12 = vld.sshfl [vmem:[%s18729_s21 + $0x40] sm:$0x33 pattern:$0x75316420]  ;;  %v23398_v63 = vld [vmem:[#allocation19_spill] sm:$0xff] }
 0x2d0   : > { %v13844_v16 = vcombine.low %v13162_v2, %v13170_v56  ;;  %v13865_v15 = vrot.slane %v13843_v32, %v18736_v10  ;;  %v14720_v62 = vrot.slane %v14706_v22, %v18736_v10  ;;  %v14721_v30 = vcombine.high %v14713_v50, %v14713_v50 }
 0x2d1   : > { %v17972_v40 = vcombine.high %v21948_v54, %v21958_v34  ;;  %v15338_v36 = vrot.slane %v15328_v1, %v18736_v10  ;;  %v22114_v37 = vadd.f32 %v21490_v61, %v23396_v13  ;;  %v13873_v17 = vcombine.low %v13851_v57, %v13858_v55  ;;  %v17785_v34 = vld.sshfl [vmem:[%s18729_s21 + $0x44] sm:$0x33 pattern:$0x75316420] }
 0x2d2   : > { %v13872_v33 = vrot.slane %v13844_v16, %v18736_v10  ;;  %v14722_v7 = vcombine.high %v14720_v62, %v14720_v62  ;;  %v22119_v14 = vadd.f32 %v21492_v43, %v22016_v29  ;;  %v15330_v42 = vcombine.low %v14720_v62, %v14721_v30 }
 0x2d3   : > { %v15345_v2 = vrot.slane %v17972_v40, %v18736_v10  ;;  %v22125_v54 = vadd.f32 %v21511_v41, %v23398_v63  ;;  %v22129_v61 = vadd.f32 %v21513_v27, %v22029_v5  ;;  %v13881_v22 = vrot.slane %v13873_v17, %v18736_v10  ;;  %v22153_v17 = vpop.f32.mrb[120].mxu0 }
 0x2d4   : > { %23397 = vst [vmem:[#allocation15_spill] sm:$0xff] %v22119_v14  ;;  %v13874_v32 = vcombine.low %v13865_v15, %v13872_v33  ;;  %v15331_v56 = vcombine.low %v14722_v7, %v21954_v35  ;;  %v12459_v43 = vcombine.high %v22052_v6, %v22052_v6  ;;  %v15352_v29 = vrot.slane %v15330_v42, %v18736_v10  ;;  %v22151_v33 = vpop.f32.mrb[120].mxu1 }
 0x2d5   : > { %23399 = vst [vmem:[#allocation16_spill] sm:$0xff] %v22129_v61  ;;  %v15360_v57 = vcombine.low %v15338_v36, %v15345_v2  ;;  %v12460_v41 = vcombine.high %v22064_v38, %v22064_v38  ;;  %v12468_v50 = vcombine.high %v17784_v12, %v17784_v12  ;;  %v12475_v5 = vrot.slane %v17784_v12, %v18736_v10  ;;  %v18336_v63 = vpop.f32.mrb[121].mxu1  ;;  %v17950_v61 = vld.sshfl [vmem:[%s18729_s21 + $0x38] sm:$0x32 pattern:$0x75316420] }
 0x2d6   : > { %v13888_v1 = vrot.slane %v13874_v32, %v18736_v10  ;;  %v15359_v27 = vrot.slane %v15331_v56, %v18736_v10  ;;  %v12492_v16 = vcombine.high %v17785_v34, %v17785_v34  ;;  %v22145_v15 = vrot.slane %v17785_v34, %v18736_v10  ;;  %v18386_v34 = vpop.f32.mrb[121].mxu0 }
 0x2d7   : > { %v15368_v55 = vrot.slane %v15360_v57, %v18736_v10  ;;  %v12482_v35 = vrot.slane %v12468_v50, %v18736_v10  ;;  %v13171_v62 = vshrl.u32 %v22064_v38, 16  ;;  %v12483_v36 = vcombine.high %v12475_v5, %v12475_v5  ;;  %v22161_v57 = vpop.f32.mrb[122].mxu1  ;;  %v22163_v50 = vpop.f32.mrb[122].mxu0 }
 0x2d8   : > { %v13889_v30 = vcombine.low %v13881_v22, %v13888_v1  ;;  %v15361_v40 = vcombine.low %v15352_v29, %v15359_v27  ;;  %v22149_v13 = vrot.slane %v12492_v16, %v18736_v10  ;;  %v22157_v12 = vcombine.high %v22145_v15, %v22145_v15  ;;  %v18337_v63 = vpop.f32.mrb[123].mxu1 }
 0x2d9   : > { %v12484_v7 = vcombine.high %v12482_v35, %v12482_v35  ;;  %v13176_v42 = vshll.u32 %v12459_v43, 16  ;;  %v13179_v2 = vshrl.u32 %v12459_v43, 16  ;;  %v13184_v22 = vshll.u32 %v12460_v41, 16 }
 0x2da   : > { %18523 = vmatmul.mubr.msk.bf16.gmra.mrb[196].mxu1 %vm2698_vm2, %v13889_v30  ;;  %v15375_v32 = vrot.slane %v15361_v40, %v18736_v10  ;;  %v13188_v56 = vshrl.u32 %v12475_v5, 16  ;;  %v13193_v29 = vshll.u32 %v12482_v35, 16  ;;  %v13196_v1 = vshrl.u32 %v12482_v35, 16  ;;  %v18387_v30 = vpop.f32.mrb[123].mxu0 }
 0x2db   : > { %18526 = vmatprep.mubr.msk.bf16.mxu1 %vm18669_vm4, %v23290_v59  ;;  %v13178_v43 = vsel %vm18764_vm1, %v13171_v62, %v13176_v42  ;;  %v13201_v27 = vshll.u32 %v12483_v36, 16  ;;  %v13204_v16 = vshrl.u32 %v12483_v36, 16  ;;  %v13186_v41 = vsel %vm18764_vm1, %v13179_v2, %v13184_v22  ;;  %v22193_v30 = vpop.f32.mrb[124].mxu1  ;;  %v22195_v63 = vpop.f32.mrb[124].mxu0 }
 0x2dc   : > { %v15376_v40 = vcombine.low %v15368_v55, %v15375_v32  ;;  %v13195_v5 = vsel %vm18764_vm1, %v13188_v56, %v13193_v29  ;;  %v13209_v34 = vshll.u32 %v12484_v7, 16  ;;  %v13212_v18 = vshrl.u32 %v12484_v7, 16 }
 0x2dd   : > { %v13203_v14 = vsel %vm18764_vm1, %v13196_v1, %v13201_v27  ;;  %v13217_v62 = vshll.u32 %v22145_v15, 16  ;;  %v13220_v35 = vshrl.u32 %v22145_v15, 16  ;;  %v13225_v36 = vshll.u32 %v22149_v13, 16 }
 0x2de   : > { %18573 = vmatmul.mubr.msk.bf16.gmra.mrb[196].mxu0 %vm2698_vm2, %v15376_v40  ;;  %v13211_v55 = vsel %vm18764_vm1, %v13204_v16, %v13209_v34  ;;  %v13228_v42 = vshrl.u32 %v22149_v13, 16  ;;  %v13233_v2 = vshll.u32 %v22157_v12, 16  ;;  %v13890_v32 = vcombine.low %v13178_v43, %v13186_v41  ;;  %v18390_v41 = vpop.f32.mrb[125].mxu0 }
 0x2df   : > { %18576 = vmatprep.mubr.msk.bf16.mxu0 %vm18669_vm4, %v23290_v59  ;;  %v13219_v7 = vsel %vm18764_vm1, %v13212_v18, %v13217_v62  ;;  %v13891_v22 = vcombine.low %v13195_v5, %v13203_v14  ;;  %v14754_v56 = vcombine.high %v17950_v61, %v17950_v61  ;;  %v13227_v29 = vsel %vm18764_vm1, %v13220_v35, %v13225_v36  ;;  %v18340_v5 = vpop.f32.mrb[125].mxu1  ;;  %v23400_v35 = vld [vmem:[#allocation21_spill] sm:$0xff]  ;;  %v22209_v36 = vpop.f32.mrb[126].mxu0 }
 0x2e0   : > { %v13235_v1 = vsel %vm18764_vm1, %v13228_v42, %v13233_v2  ;;  %v13892_v27 = vcombine.low %v13211_v55, %v13219_v7  ;;  %v14761_v16 = vrot.slane %v17950_v61, %v18736_v10  ;;  %v13900_v18 = vrot.slane %v13890_v32, %v18736_v10  ;;  %v6693_v42 = vpop.f32.mrb[126].mxu1 }
 0x2e1   : > { %v13893_v40 = vcombine.low %v13227_v29, %v13235_v1  ;;  %v13907_v14 = vrot.slane %v13891_v22, %v18736_v10  ;;  %v14768_v43 = vrot.slane %v14754_v56, %v18736_v10  ;;  %v15377_v62 = vcombine.low %v22048_v4, %v22043_v25  ;;  %v17786_v56 = vld.sshfl [vmem:[%s18729_s21 + $0x48] sm:$0x33 pattern:$0x75316420]  ;;  %v18391_v29 = vpop.f32.mrb[127].mxu0  ;;  %v18341_v25 = vpop.f32.mrb[127].mxu1 }
 0x2e2   : > { %v13914_v34 = vrot.slane %v13892_v27, %v18736_v10  ;;  %v15380_v61 = vcombine.low %v22052_v6, %v22064_v38  ;;  %v22207_v55 = vadd.f32 %v21572_v60, %v23400_v35  ;;  %v22218_v60 = vadd.f32 %v21574_v45, %v22114_v37  ;;  %v23402_v27 = vld [vmem:[#allocation13_spill] sm:$0xff] }
 0x2e3   : > { %v13921_v2 = vrot.slane %v13893_v40, %v18736_v10  ;;  %v13922_v7 = vcombine.low %v13900_v18, %v13907_v14  ;;  %v15378_v32 = vcombine.low %v22061_v47, %v14768_v43  ;;  %v17973_v22 = vcombine.high %v14761_v16, %v14768_v43  ;;  %v17787_v40 = vld.sshfl [vmem:[%s18729_s21 + $0x4c] sm:$0x33 pattern:$0x75316420] }
 0x2e4   : > { %v15387_v4 = vrot.slane %v15377_v62, %v18736_v10  ;;  %v15408_v1 = vrot.slane %v15380_v61, %v18736_v10  ;;  %23401 = vst [vmem:[#allocation3_spill] sm:$0xff] %v22218_v60  ;;  %v22222_v41 = vadd.f32 %v21585_v49, %v23402_v27  ;;  %v22230_v43 = vadd.f32 %v21587_v39, %v22125_v54  ;;  %v22243_v54 = vpop.f32.mrb[128].mxu0 }
 0x2e5   : > { %v13923_v18 = vcombine.low %v13914_v34, %v13921_v2  ;;  %v13930_v47 = vrot.slane %v13922_v7, %v18736_v10  ;;  %v15394_v16 = vrot.slane %v15378_v32, %v18736_v10  ;;  %v15401_v14 = vrot.slane %v17973_v22, %v18736_v10  ;;  %23404 = vst [vmem:[#allocation33_spill] sm:$0xff] %v22243_v54  ;;  %v22245_v7 = vpop.f32.mrb[128].mxu1  ;;  %v18394_v25 = vpop.f32.mrb[129].mxu0 }
 0x2e6   : > { %23403 = vst [vmem:[#allocation20_spill] sm:$0xff] %v22230_v43  ;;  %v22234_v45 = vcombine.high %v22149_v13, %v22149_v13  ;;  %v12516_v37 = vcombine.high %v17786_v56, %v17786_v56  ;;  %v12523_v49 = vrot.slane %v17786_v56, %v18736_v10  ;;  %v12540_v61 = vcombine.high %v17787_v40, %v17787_v40 }
 0x2e7   : > { %v13937_v5 = vrot.slane %v13923_v18, %v18736_v10  ;;  %v15409_v34 = vcombine.low %v15387_v4, %v15394_v16  ;;  %v15410_v62 = vcombine.low %v15401_v14, %v15408_v1  ;;  %v22240_v2 = vrot.slane %v17787_v40, %v18736_v10  ;;  %23405 = vst [vmem:[#allocation34_spill] sm:$0xff] %v22245_v7  ;;  %v18400_v4 = vpop.f32.mrb[129].mxu1  ;;  %v9027_v16 = vpop.f32.mrb[130].mxu0 }
 0x2e8   : > { %v12530_v35 = vrot.slane %v12516_v37, %v18736_v10  ;;  %v12531_v42 = vcombine.high %v12523_v49, %v12523_v49  ;;  %v13236_v39 = vshrl.u32 %v22157_v12, 16  ;;  %v22250_v29 = vrot.slane %v12540_v61, %v18736_v10  ;;  %v22255_v14 = vpop.f32.mrb[130].mxu1  ;;  %v18395_v61 = vpop.f32.mrb[131].mxu0 }
 0x2e9   : > { %v13938_v32 = vcombine.low %v13930_v47, %v13937_v5  ;;  %v15417_v22 = vrot.slane %v15409_v34, %v18736_v10  ;;  %v15424_v56 = vrot.slane %v15410_v62, %v18736_v10  ;;  %v12555_v27 = vcombine.high %v22240_v2, %v22240_v2  ;;  %23406 = vst [vmem:[#allocation23_spill] sm:$0xff] %v22255_v14  ;;  %v17952_v62 = vld.sshfl [vmem:[%s18729_s21 + $0x40] sm:$0x32 pattern:$0x75316420]  ;;  %v18401_v25 = vpop.f32.mrb[131].mxu1 }
 0x2ea   : > { %v12532_v1 = vcombine.high %v12530_v35, %v12530_v35  ;;  %v13241_v40 = vshll.u32 %v22234_v45, 16  ;;  %v13245_v18 = vshrl.u32 %v12523_v49, 16  ;;  %v12556_v37 = vcombine.high %v22250_v29, %v22250_v29  ;;  %v22265_v60 = vpop.f32.mrb[132].mxu1 }
 0x2eb   : > { %18527 = vmatmul.mubr.msk.bf16.gmra.mrb[200].mxu1 %vm2698_vm2, %v13938_v32  ;;  %v15425_v47 = vcombine.low %v15417_v22, %v15424_v56  ;;  %v13250_v5 = vshll.u32 %v12530_v35, 16  ;;  %v13253_v34 = vshrl.u32 %v12530_v35, 16  ;;  %v13258_v4 = vshll.u32 %v12531_v42, 16  ;;  %23407 = vst [vmem:[#allocation14_spill] sm:$0xff] %v22265_v60  ;;  %v22267_v32 = vpop.f32.mrb[132].mxu0  ;;  %v18404_v25 = vpop.f32.mrb[133].mxu1 }
 0x2ec   : > { %18530 = vmatprep.mubr.msk.bf16.mxu1 %vm18669_vm4, %v23290_v59  ;;  %v13243_v49 = vsel %vm18764_vm1, %v13236_v39, %v13241_v40  ;;  %v13261_v16 = vshrl.u32 %v12531_v42, 16  ;;  %v13266_v43 = vshll.u32 %v12532_v1, 16  ;;  %23408 = vst [vmem:[#allocation19_spill] sm:$0xff] %v22267_v32  ;;  %v13269_v22 = vshrl.u32 %v12532_v1, 16  ;;  %v18454_v48 = vpop.f32.mrb[133].mxu0  ;;  %v22282_v1 = vpop.f32.mrb[134].mxu1 }
 0x2ed   : > { %18577 = vmatmul.mubr.msk.bf16.gmra.mrb[200].mxu0 %vm2698_vm2, %v15425_v47  ;;  %v13252_v35 = vsel %vm18764_vm1, %v13245_v18, %v13250_v5  ;;  %v13274_v56 = vshll.u32 %v22240_v2, 16  ;;  %v13277_v61 = vshrl.u32 %v22240_v2, 16  ;;  %v13260_v42 = vsel %vm18764_vm1, %v13253_v34, %v13258_v4  ;;  %v22284_v47 = vpop.f32.mrb[134].mxu0  ;;  %v18405_v14 = vpop.f32.mrb[135].mxu1 }
 0x2ee   : > { %18580 = vmatprep.mubr.msk.bf16.mxu0 %vm18669_vm4, %v23290_v59  ;;  %v13268_v39 = vsel %vm18764_vm1, %v13261_v16, %v13266_v43  ;;  %v13282_v40 = vshll.u32 %v22250_v29, 16  ;;  %v13285_v18 = vshrl.u32 %v22250_v29, 16  ;;  %23409 = vst [vmem:[#allocation21_spill] sm:$0xff] %v22284_v47  ;;  %v13290_v5 = vshll.u32 %v12555_v27, 16  ;;  %v18455_v60 = vpop.f32.mrb[135].mxu0  ;;  %v22290_v7 = vpop.f32.mrb[136].mxu1 }
 0x2ef   : > { %v13276_v48 = vsel %vm18764_vm1, %v13269_v22, %v13274_v56  ;;  %v13293_v25 = vshrl.u32 %v12555_v27, 16  ;;  %v13298_v32 = vshll.u32 %v12556_v37, 16  ;;  %v13939_v43 = vcombine.low %v13243_v49, %v13252_v35  ;;  %v22292_v54 = vpop.f32.mrb[136].mxu0  ;;  %v18408_v14 = vpop.f32.mrb[137].mxu1 }
 0x2f0   : > { %v13284_v34 = vsel %vm18764_vm1, %v13277_v61, %v13282_v40  ;;  %v13940_v4 = vcombine.low %v13260_v42, %v13268_v39  ;;  %v14802_v16 = vcombine.high %v17952_v62, %v17952_v62  ;;  %v13292_v47 = vsel %vm18764_vm1, %v13285_v18, %v13290_v5  ;;  %v18458_v37 = vpop.f32.mrb[137].mxu0  ;;  %v22302_v42 = vpop.f32.mrb[138].mxu1 }
 0x2f1   : > { %v13300_v22 = vsel %vm18764_vm1, %v13293_v25, %v13298_v32  ;;  %v13941_v27 = vcombine.low %v13276_v48, %v13284_v34  ;;  %v14809_v60 = vrot.slane %v17952_v62, %v18736_v10  ;;  %v13949_v49 = vrot.slane %v13939_v43, %v18736_v10  ;;  %v22304_v39 = vpop.f32.mrb[138].mxu0  ;;  %v18409_v48 = vpop.f32.mrb[139].mxu1  ;;  %v23410_v43 = vld [vmem:[#allocation22_spill] sm:$0xff] }
 0x2f2   : > { %v13942_v56 = vcombine.low %v13292_v47, %v13300_v22  ;;  %v13956_v35 = vrot.slane %v13940_v4, %v18736_v10  ;;  %v14816_v61 = vrot.slane %v14802_v16, %v18736_v10  ;;  %v17974_v62 = vcombine.high %v22052_v6, %v22064_v38  ;;  %v18459_v47 = vpop.f32.mrb[139].mxu0  ;;  %v17788_v16 = vld.sshfl [vmem:[%s18729_s21 + $0x50] sm:$0x33 pattern:$0x75316420]  ;;  %v22317_v22 = vpop.f32.mrb[140].mxu1 }
 0x2f3   : > { %v13963_v40 = vrot.slane %v13941_v27, %v18736_v10  ;;  %v14817_v32 = vcombine.high %v14809_v60, %v14809_v60  ;;  %v15429_v18 = vcombine.low %v22149_v13, %v22157_v12  ;;  %v22314_v4 = vadd.f32 %v21657_v51, %v23410_v43  ;;  %23411 = vst [vmem:[#allocation13_spill] sm:$0xff] %v22317_v22  ;;  %v22319_v27 = vpop.f32.mrb[140].mxu0  ;;  %v17789_v60 = vld.sshfl [vmem:[%s18729_s21 + $0x54] sm:$0x33 pattern:$0x75316420] }
 0x2f4   : > { %v13970_v5 = vrot.slane %v13942_v56, %v18736_v10  ;;  %v13971_v25 = vcombine.low %v13949_v49, %v13956_v35  ;;  %v14818_v34 = vcombine.high %v14816_v61, %v14816_v61  ;;  %23412 = vst [vmem:[#allocation22_spill] sm:$0xff] %v22319_v27  ;;  %v15436_v38 = vrot.slane %v17974_v62, %v18736_v10  ;;  %v18412_v14 = vpop.f32.mrb[141].mxu1  ;;  %v18462_v37 = vpop.f32.mrb[141].mxu0  ;;  %v23414_v35 = vld [vmem:[#allocation17_spill] sm:$0xff] }
 0x2f5   : > { %v15427_v6 = vcombine.low %v14816_v61, %v14817_v32  ;;  %v15457_v13 = vrot.slane %v15429_v18, %v18736_v10  ;;  %v22325_v12 = vadd.f32 %v21659_v11, %v22207_v55  ;;  %v22332_v47 = vadd.f32 %v21670_v23, %v23414_v35  ;;  %v17790_v61 = vld.sshfl [vmem:[%s18729_s21 + $0x58] sm:$0x33 pattern:$0x75316420]  ;;  %v22335_v32 = vpop.f32.mrb[142].mxu1  ;;  %v22337_v62 = vpop.f32.mrb[142].mxu0 }
 0x2f6   : > { %v13972_v56 = vcombine.low %v13963_v40, %v13970_v5  ;;  %v13979_v51 = vrot.slane %v13971_v25, %v18736_v10  ;;  %v15428_v49 = vcombine.low %v14818_v34, %v22145_v15  ;;  %23415 = vst [vmem:[#allocation17_spill] sm:$0xff] %v22335_v32  ;;  %23416 = vst [vmem:[#allocation36_spill] sm:$0xff] %v22337_v62  ;;  %v18463_v48 = vpop.f32.mrb[143].mxu0  ;;  %v18413_v15 = vpop.f32.mrb[143].mxu1 }
 0x2f7   : > { %23413 = vst [vmem:[#allocation35_spill] sm:$0xff] %v22325_v12  ;;  %v15443_v11 = vrot.slane %v15427_v6, %v18736_v10  ;;  %v22342_v55 = vadd.f32 %v21672_v52, %v22222_v41  ;;  %v12564_v40 = vcombine.high %v17788_v16, %v17788_v16  ;;  %v12571_v18 = vrot.slane %v17788_v16, %v18736_v10 }
 0x2f8   : > { %v13986_v5 = vrot.slane %v13972_v56, %v18736_v10  ;;  %v15450_v23 = vrot.slane %v15428_v49, %v18736_v10  ;;  %v12588_v25 = vcombine.high %v17789_v60, %v17789_v60  ;;  %v22348_v34 = vrot.slane %v17789_v60, %v18736_v10 }
 0x2f9   : > { %23417 = vst [vmem:[#allocation37_spill] sm:$0xff] %v22342_v55  ;;  %v15458_v43 = vcombine.low %v15436_v38, %v15443_v11  ;;  %v12578_v6 = vrot.slane %v12564_v40, %v18736_v10  ;;  %v12579_v14 = vcombine.high %v12571_v18, %v12571_v18  ;;  %v12612_v37 = vcombine.high %v17790_v61, %v17790_v61  ;;  %v22365_v11 = vpop.f32.mrb[144].mxu1 }
 0x2fa   : > { %v13987_v52 = vcombine.low %v13979_v51, %v13986_v5  ;;  %v15459_v41 = vcombine.low %v15450_v23, %v15457_v13  ;;  %v22352_v35 = vrot.slane %v12588_v25, %v18736_v10  ;;  %v22356_v16 = vcombine.high %v22348_v34, %v22348_v34  ;;  %23418 = vst [vmem:[#allocation38_spill] sm:$0xff] %v22365_v11  ;;  %v18416_v15 = vpop.f32.mrb[145].mxu1 }
 0x2fb   : > { %v15466_v56 = vrot.slane %v15458_v43, %v18736_v10  ;;  %v12580_v49 = vcombine.high %v12578_v6, %v12578_v6  ;;  %v22360_v60 = vrot.slane %v17790_v61, %v18736_v10  ;;  %v22363_v38 = vrot.slane %v12612_v37, %v18736_v10  ;;  %v17954_v43 = vld.sshfl [vmem:[%s18729_s21 + $0x48] sm:$0x32 pattern:$0x75316420]  ;;  %v22376_v37 = vpop.f32.mrb[146].mxu1 }
 0x2fc   : > { %18531 = vmatmul.mubr.msk.bf16.gmra.mrb[204].mxu1 %vm2698_vm2, %v13987_v52  ;;  %v15473_v13 = vrot.slane %v15459_v41, %v18736_v10  ;;  %v22371_v51 = vcombine.high %v22352_v35, %v22352_v35  ;;  %v13302_v40 = vshrl.u32 %v12571_v18, 16  ;;  %v13307_v48 = vshll.u32 %v12578_v6, 16  ;;  %23419 = vst [vmem:[#allocation39_spill] sm:$0xff] %v22376_v37  ;;  %v18417_v18 = vpop.f32.mrb[147].mxu1 }
 0x2fd   : > { %18534 = vmatprep.mubr.msk.bf16.mxu1 %vm18669_vm4, %v23290_v59  ;;  %v13310_v61 = vshrl.u32 %v12578_v6, 16  ;;  %v13315_v5 = vshll.u32 %v12579_v14, 16  ;;  %v13318_v23 = vshrl.u32 %v12579_v14, 16  ;;  %v13323_v25 = vshll.u32 %v12580_v49, 16 }
 0x2fe   : > { %v15474_v52 = vcombine.low %v15466_v56, %v15473_v13  ;;  %v13309_v41 = vsel %vm18764_vm1, %v13302_v40, %v13307_v48  ;;  %v13326_v55 = vshrl.u32 %v12580_v49, 16  ;;  %v13331_v12 = vshll.u32 %v22348_v34, 16  ;;  %v22387_v62 = vpop.f32.mrb[144].mxu0 }
 0x2ff   : > { %v13317_v15 = vsel %vm18764_vm1, %v13310_v61, %v13315_v5  ;;  %v13325_v6 = vsel %vm18764_vm1, %v13318_v23, %v13323_v25  ;;  %v13334_v14 = vshrl.u32 %v22348_v34, 16  ;;  %v13339_v11 = vshll.u32 %v22352_v35, 16  ;;  %23420 = vst [vmem:[#allocation40_spill] sm:$0xff] %v22387_v62  ;;  %v18466_v48 = vpop.f32.mrb[145].mxu0 }
 0x300   : > { %18581 = vmatmul.mubr.msk.bf16.gmra.mrb[204].mxu0 %vm2698_vm2, %v15474_v52  ;;  %v13333_v56 = vsel %vm18764_vm1, %v13326_v55, %v13331_v12  ;;  %v13342_v49 = vshrl.u32 %v22352_v35, 16  ;;  %v13347_v13 = vshll.u32 %v22356_v16, 16  ;;  %v13350_v40 = vshrl.u32 %v22356_v16, 16  ;;  %v22402_v12 = vpop.f32.mrb[146].mxu0 }
 0x301   : > { %18584 = vmatprep.mubr.msk.bf16.mxu0 %vm18669_vm4, %v23290_v59  ;;  %v13341_v61 = vsel %vm18764_vm1, %v13334_v14, %v13339_v11  ;;  %v13355_v5 = vshll.u32 %v22371_v51, 16  ;;  %v13359_v23 = vshrl.u32 %v22360_v60, 16  ;;  %v13364_v25 = vshll.u32 %v22363_v38, 16  ;;  %23421 = vst [vmem:[#allocation41_spill] sm:$0xff] %v22402_v12  ;;  %v18467_v62 = vpop.f32.mrb[147].mxu0 }
 0x302   : > { %v13349_v55 = vsel %vm18764_vm1, %v13342_v49, %v13347_v13  ;;  %v13988_v52 = vcombine.low %v13309_v41, %v13317_v15  ;;  %v13989_v18 = vcombine.low %v13325_v6, %v13333_v56  ;;  %v14850_v48 = vcombine.high %v17954_v43, %v17954_v43  ;;  %v23422_v56 = vld [vmem:[#allocation25_spill] sm:$0xff] }
 0x303   : > { %v13357_v37 = vsel %vm18764_vm1, %v13350_v40, %v13355_v5  ;;  %v13366_v11 = vsel %vm18764_vm1, %v13359_v23, %v13364_v25  ;;  %v13990_v14 = vcombine.low %v13341_v61, %v13349_v55  ;;  %v14857_v32 = vrot.slane %v17954_v43, %v18736_v10  ;;  %v17791_v55 = vld.sshfl [vmem:[%s18729_s21 + $0x5c] sm:$0x33 pattern:$0x75316420] }
 0x304   : > { %v13991_v27 = vcombine.low %v13357_v37, %v13366_v11  ;;  %v13998_v22 = vrot.slane %v13988_v52, %v18736_v10  ;;  %v14005_v12 = vrot.slane %v13989_v18, %v18736_v10  ;;  %v14864_v41 = vrot.slane %v14850_v48, %v18736_v10  ;;  %v17792_v52 = vld.sshfl [vmem:[%s18729_s21 + $0x60] sm:$0x33 pattern:$0x75316420] }
 0x305   : > { %v14012_v15 = vrot.slane %v13990_v14, %v18736_v10  ;;  %v15477_v62 = vcombine.low %v22240_v2, %v22250_v29  ;;  %v17976_v6 = vcombine.high %v22240_v2, %v22250_v29  ;;  %v22421_v49 = vadd.f32 %v21747_v53, %v23422_v56  ;;  %v22425_v61 = vpop.f32.mrb[148].mxu1  ;;  %v23424_v29 = vld [vmem:[#allocation18_spill] sm:$0xff]  ;;  %v23425_v53 = vld [vmem:[#allocation9_spill] sm:$0xff] }
 0x306   : > { %v14019_v43 = vrot.slane %v13991_v27, %v18736_v10  ;;  %v14020_v37 = vcombine.low %v13998_v22, %v14005_v12  ;;  %v15475_v13 = vcombine.low %v22234_v45, %v14864_v41  ;;  %v17975_v40 = vcombine.high %v14857_v32, %v14864_v41  ;;  %v18420_v27 = vpop.f32.mrb[149].mxu1 }
 0x307   : > { %v15499_v5 = vrot.slane %v15477_v62, %v18736_v10  ;;  %v15506_v23 = vrot.slane %v17976_v6, %v18736_v10  ;;  %v22431_v2 = vadd.f32 %v21749_v0, %v22314_v4  ;;  %v22435_v25 = vadd.f32 %v23425_v53, %v23424_v29  ;;  %v22442_v18 = vpop.f32.mrb[150].mxu1  ;;  %v23426_v0 = vld [vmem:[#allocation8_spill] sm:$0xff] }
 0x308   : > { %v14021_v22 = vcombine.low %v14012_v15, %v14019_v43  ;;  %v14028_v45 = vrot.slane %v14020_v37, %v18736_v10  ;;  %v15485_v32 = vrot.slane %v15475_v13, %v18736_v10  ;;  %v15492_v12 = vrot.slane %v17975_v40, %v18736_v10  ;;  %v18421_v41 = vpop.f32.mrb[151].mxu1 }
 0x309   : > { %23423 = vst [vmem:[#allocation25_spill] sm:$0xff] %v22431_v2  ;;  %v15508_v48 = vcombine.low %v15499_v5, %v15506_v23  ;;  %v22446_v4 = vadd.f32 %v23426_v0, %v22332_v47  ;;  %v12627_v11 = vcombine.high %v22360_v60, %v22360_v60  ;;  %v12628_v14 = vcombine.high %v22363_v38, %v22363_v38 }
 0x30a   : > { %v14035_v15 = vrot.slane %v14021_v22, %v18736_v10  ;;  %v15507_v62 = vcombine.low %v15485_v32, %v15492_v12  ;;  %v12636_v6 = vcombine.high %v17791_v55, %v17791_v55  ;;  %v22454_v56 = vrot.slane %v17791_v55, %v18736_v10 }
 0x30b   : > { %23427 = vst [vmem:[#allocation18_spill] sm:$0xff] %v22446_v4  ;;  %v15522_v43 = vrot.slane %v15508_v48, %v18736_v10  ;;  %v12660_v37 = vcombine.high %v17792_v52, %v17792_v52  ;;  %v12667_v47 = vrot.slane %v17792_v52, %v18736_v10  ;;  %v13367_v13 = vshrl.u32 %v22363_v38, 16  ;;  %v22465_v29 = vpop.f32.mrb[148].mxu0 }
 0x30c   : > { %v14036_v60 = vcombine.low %v14028_v45, %v14035_v15  ;;  %v15515_v40 = vrot.slane %v15507_v62, %v18736_v10  ;;  %v22461_v5 = vrot.slane %v12636_v6, %v18736_v10  ;;  %v12651_v23 = vcombine.high %v22454_v56, %v22454_v56  ;;  %v18470_v38 = vpop.f32.mrb[149].mxu0  ;;  %v17956_v48 = vld.sshfl [vmem:[%s18729_s21 + $0x50] sm:$0x32 pattern:$0x75316420] }
 0x30d   : > { %v22468_v53 = vrot.slane %v12660_v37, %v18736_v10  ;;  %v22470_v55 = vcombine.high %v12667_v47, %v12667_v47  ;;  %v13372_v27 = vshll.u32 %v12627_v11, 16  ;;  %v13375_v22 = vshrl.u32 %v12627_v11, 16  ;;  %v22476_v0 = vpop.f32.mrb[150].mxu0 }
 0x30e   : > { %18535 = vmatmul.mubr.msk.bf16.gmra.mrb[208].mxu1 %vm2698_vm2, %v14036_v60  ;;  %v15523_v45 = vcombine.low %v15515_v40, %v15522_v43  ;;  %v12652_v32 = vcombine.high %v22461_v5, %v22461_v5  ;;  %v13380_v12 = vshll.u32 %v12628_v14, 16  ;;  %v13383_v52 = vshrl.u32 %v12628_v14, 16  ;;  %23428 = vst [vmem:[#allocation9_spill] sm:$0xff] %v22476_v0  ;;  %v18471_v6 = vpop.f32.mrb[151].mxu0 }
 0x30f   : > { %18538 = vmatprep.mubr.msk.bf16.mxu1 %vm18669_vm4, %v23290_v59  ;;  %v13374_v41 = vsel %vm18764_vm1, %v13367_v13, %v13372_v27  ;;  %v13388_v11 = vshll.u32 %v22454_v56, 16  ;;  %v13391_v15 = vshrl.u32 %v22454_v56, 16  ;;  %v13396_v62 = vshll.u32 %v22461_v5, 16 }
 0x310   : > { %18585 = vmatmul.mubr.msk.bf16.gmra.mrb[208].mxu0 %vm2698_vm2, %v15523_v45  ;;  %v13382_v14 = vsel %vm18764_vm1, %v13375_v22, %v13380_v12  ;;  %v13399_v43 = vshrl.u32 %v22461_v5, 16  ;;  %v13404_v37 = vshll.u32 %v12651_v23, 16  ;;  %v13407_v60 = vshrl.u32 %v12651_v23, 16 }
 0x311   : > { %18588 = vmatprep.mubr.msk.bf16.mxu0 %vm18669_vm4, %v23290_v59  ;;  %v13390_v13 = vsel %vm18764_vm1, %v13383_v52, %v13388_v11  ;;  %v13398_v40 = vsel %vm18764_vm1, %v13391_v15, %v13396_v62  ;;  %v13412_v27 = vshll.u32 %v12652_v32, 16  ;;  %v13416_v38 = vshrl.u32 %v12667_v47, 16  ;;  %v22503_v52 = vld.sshfl [vmem:[%s18729_s21 + $0x58] sm:$0x32 pattern:$0x75316420] }
 0x312   : > { %v13406_v45 = vsel %vm18764_vm1, %v13399_v43, %v13404_v37  ;;  %v13421_v22 = vshll.u32 %v22468_v53, 16  ;;  %v13424_v12 = vshrl.u32 %v22468_v53, 16  ;;  %v13429_v23 = vshll.u32 %v22470_v55, 16  ;;  %v22505_v15 = vpop.f32.mrb[152].mxu1 }
 0x313   : > { %v13414_v6 = vsel %vm18764_vm1, %v13407_v60, %v13412_v27  ;;  %v14037_v4 = vcombine.low %v13374_v41, %v13382_v14  ;;  %v14038_v2 = vcombine.low %v13390_v13, %v13398_v40  ;;  %v14898_v11 = vcombine.high %v17956_v48, %v17956_v48  ;;  %v18424_v37 = vpop.f32.mrb[153].mxu1 }
 0x314   : > { %v13423_v47 = vsel %vm18764_vm1, %v13416_v38, %v13421_v22  ;;  %v13431_v32 = vsel %vm18764_vm1, %v13424_v12, %v13429_v23  ;;  %v14039_v62 = vcombine.low %v13406_v45, %v13414_v6  ;;  %v14905_v43 = vrot.slane %v17956_v48, %v18736_v10  ;;  %v22515_v13 = vpop.f32.mrb[154].mxu1  ;;  %v23429_v23 = vld [vmem:[#allocation24_spill] sm:$0xff] }
 0x315   : > { %v14040_v0 = vcombine.low %v13423_v47, %v13431_v32  ;;  %v14047_v60 = vrot.slane %v14037_v4, %v18736_v10  ;;  %v14054_v41 = vrot.slane %v14038_v2, %v18736_v10  ;;  %v14912_v14 = vrot.slane %v14898_v11, %v18736_v10  ;;  %v22522_v45 = vpop.f32.mrb[152].mxu0  ;;  %v18425_v22 = vpop.f32.mrb[155].mxu1 }
 0x316   : > { %v14061_v40 = vrot.slane %v14039_v62, %v18736_v10  ;;  %v14913_v27 = vcombine.high %v14905_v43, %v14905_v43  ;;  %v14946_v38 = vcombine.high %v22503_v52, %v22503_v52  ;;  %v15526_v48 = vcombine.low %v22352_v35, %v22356_v16  ;;  %v18474_v11 = vpop.f32.mrb[153].mxu0  ;;  %v17793_v16 = vld.sshfl [vmem:[%s18729_s21 + $0x64] sm:$0x33 pattern:$0x75316420] }
 0x317   : > { %v14068_v2 = vrot.slane %v14040_v0, %v18736_v10  ;;  %v14069_v4 = vcombine.low %v14047_v60, %v14054_v41  ;;  %v14914_v12 = vcombine.high %v14912_v14, %v14912_v14  ;;  %v22527_v6 = vadd.f32 %v21863_v19, %v23429_v23  ;;  %v22538_v43 = vpop.f32.mrb[154].mxu0  ;;  %v23432_v60 = vld [vmem:[#allocation26_spill] sm:$0xff] }
 0x318   : > { %v22530_v47 = vrot.slane %v14946_v38, %v18736_v10  ;;  %v15524_v32 = vcombine.low %v14912_v14, %v14913_v27  ;;  %v15548_v62 = vrot.slane %v15526_v48, %v18736_v10  ;;  %v22535_v35 = vadd.f32 %v21865_v21, %v22421_v49  ;;  %23431 = vst [vmem:[#allocation24_spill] sm:$0xff] %v22538_v43  ;;  %v17794_v38 = vld.sshfl [vmem:[%s18729_s21 + $0x68] sm:$0x33 pattern:$0x75316420]  ;;  %v18475_v14 = vpop.f32.mrb[155].mxu0 }
 0x319   : > { %v14070_v0 = vcombine.low %v14061_v40, %v14068_v2  ;;  %v14077_v37 = vrot.slane %v14069_v4, %v18736_v10  ;;  %v15525_v19 = vcombine.low %v14914_v12, %v22348_v34  ;;  %v22544_v41 = vadd.f32 %v21879_v3, %v23432_v60 }
 0x31a   : > { %23430 = vst [vmem:[#allocation8_spill] sm:$0xff] %v22535_v35  ;;  %v15527_v27 = vcombine.low %v22371_v51, %v22530_v47  ;;  %v15534_v21 = vrot.slane %v15524_v32, %v18736_v10  ;;  %v22552_v49 = vadd.f32 %v21881_v9, %v22435_v25  ;;  %v12676_v40 = vcombine.high %v22468_v53, %v22468_v53 }
 0x31b   : > { %v14084_v34 = vrot.slane %v14070_v0, %v18736_v10  ;;  %v15541_v48 = vrot.slane %v15525_v19, %v18736_v10  ;;  %v12684_v3 = vcombine.high %v17793_v16, %v17793_v16  ;;  %v22559_v22 = vrot.slane %v17793_v16, %v18736_v10 }
 0x31c   : > { %23433 = vst [vmem:[#allocation26_spill] sm:$0xff] %v22552_v49  ;;  %v15555_v2 = vrot.slane %v15527_v27, %v18736_v10  ;;  %v12708_v51 = vcombine.high %v17794_v38, %v17794_v38  ;;  %v12715_v4 = vrot.slane %v17794_v38, %v18736_v10  ;;  %v13432_v12 = vshrl.u32 %v22470_v55, 16 }
 0x31d   : > { %v14085_v9 = vcombine.low %v14077_v37, %v14084_v34  ;;  %v15556_v25 = vcombine.low %v15534_v21, %v15541_v48  ;;  %v22565_v23 = vrot.slane %v12684_v3, %v18736_v10  ;;  %v22569_v53 = vcombine.high %v22559_v22, %v22559_v22 }
 0x31e   : > { %v15557_v11 = vcombine.low %v15548_v62, %v15555_v2  ;;  %v12722_v32 = vrot.slane %v12708_v51, %v18736_v10  ;;  %v12723_v16 = vcombine.high %v12715_v4, %v12715_v4  ;;  %v13437_v0 = vshll.u32 %v12676_v40, 16  ;;  %v22587_v21 = vpop.f32.mrb[156].mxu1  ;;  %v17960_v2 = vld.sshfl [vmem:[%s18729_s21 + $0x60] sm:$0x32 pattern:$0x75316420] }
 0x31f   : > { %18539 = vmatmul.mubr.msk.bf16.gmra.mrb[212].mxu1 %vm2698_vm2, %v14085_v9  ;;  %v15564_v19 = vrot.slane %v15556_v25, %v18736_v10  ;;  %v22576_v55 = vcombine.high %v22565_v23, %v22565_v23  ;;  %v13440_v37 = vshrl.u32 %v12676_v40, 16  ;;  %v13445_v60 = vshll.u32 %v22559_v22, 16  ;;  %23434 = vst [vmem:[#allocation42_spill] sm:$0xff] %v22587_v21  ;;  %v18428_v51 = vpop.f32.mrb[157].mxu1 }
 0x320   : > { %v15571_v38 = vrot.slane %v15557_v11, %v18736_v10  ;;  %18542 = vmatprep.mubr.msk.bf16.mxu1 %vm18669_vm4, %v23290_v59  ;;  %v22582_v62 = vcombine.high %v12722_v32, %v12722_v32  ;;  %v13439_v14 = vsel %vm18764_vm1, %v13432_v12, %v13437_v0  ;;  %v13448_v27 = vshrl.u32 %v22559_v22, 16  ;;  %v22597_v0 = vpop.f32.mrb[158].mxu1 }
 0x321   : > { %v13447_v34 = vsel %vm18764_vm1, %v13440_v37, %v13445_v60  ;;  %v13453_v40 = vshll.u32 %v22565_v23, 16  ;;  %v13456_v48 = vshrl.u32 %v22565_v23, 16  ;;  %v13461_v3 = vshll.u32 %v22569_v53, 16  ;;  %v18429_v35 = vpop.f32.mrb[159].mxu1 }
 0x322   : > { %v15572_v9 = vcombine.low %v15564_v19, %v15571_v38  ;;  %v13464_v25 = vshrl.u32 %v22569_v53, 16  ;;  %v13469_v12 = vshll.u32 %v22576_v55, 16  ;;  %v13473_v11 = vshrl.u32 %v12715_v4, 16 }
 0x323   : > { %v13455_v49 = vsel %vm18764_vm1, %v13448_v27, %v13453_v40  ;;  %v13463_v37 = vsel %vm18764_vm1, %v13456_v48, %v13461_v3  ;;  %v13478_v60 = vshll.u32 %v12722_v32, 16  ;;  %v13481_v21 = vshrl.u32 %v12722_v32, 16  ;;  %v22607_v43 = vpop.f32.mrb[156].mxu0 }
 0x324   : > { %18589 = vmatmul.mubr.msk.bf16.gmra.mrb[212].mxu0 %vm2698_vm2, %v15572_v9  ;;  %v13471_v19 = vsel %vm18764_vm1, %v13464_v25, %v13469_v12  ;;  %v13486_v38 = vshll.u32 %v12723_v16, 16  ;;  %v13489_v51 = vshrl.u32 %v12723_v16, 16  ;;  %v13494_v4 = vshll.u32 %v22582_v62, 16  ;;  %23435 = vst [vmem:[#allocation43_spill] sm:$0xff] %v22607_v43  ;;  %v18478_v48 = vpop.f32.mrb[157].mxu0 }
 0x325   : > { %18592 = vmatprep.mubr.msk.bf16.mxu0 %vm18669_vm4, %v23290_v59  ;;  %v13480_v27 = vsel %vm18764_vm1, %v13473_v11, %v13478_v60  ;;  %v14086_v40 = vcombine.low %v13439_v14, %v13447_v34  ;;  %v14087_v32 = vcombine.low %v13455_v49, %v13463_v37  ;;  %v14953_v35 = vrot.slane %v22503_v52, %v18736_v10  ;;  %v22619_v12 = vpop.f32.mrb[158].mxu0 }
 0x326   : > { %v13488_v3 = vsel %vm18764_vm1, %v13481_v21, %v13486_v38  ;;  %v13496_v16 = vsel %vm18764_vm1, %v13489_v51, %v13494_v4  ;;  %v14088_v9 = vcombine.low %v13471_v19, %v13480_v27  ;;  %v14994_v25 = vcombine.high %v17960_v2, %v17960_v2  ;;  %v18479_v14 = vpop.f32.mrb[159].mxu0 }
 0x327   : > { %v14089_v43 = vcombine.low %v13488_v3, %v13496_v16  ;;  %v14096_v11 = vrot.slane %v14086_v40, %v18736_v10  ;;  %v14103_v49 = vrot.slane %v14087_v32, %v18736_v10  ;;  %v15001_v52 = vrot.slane %v17960_v2, %v18736_v10  ;;  %v17795_v2 = vld.sshfl [vmem:[%s18729_s21 + $0x6c] sm:$0x33 pattern:$0x75316420]  ;;  %v23436_v32 = vld [vmem:[#allocation6_spill] sm:$0xff] }
 0x328   : > { %v14110_v34 = vrot.slane %v14088_v9, %v18736_v10  ;;  %v22626_v21 = vrot.slane %v14994_v25, %v18736_v10  ;;  %v17977_v37 = vcombine.high %v14953_v35, %v22530_v47  ;;  %v15574_v60 = vcombine.low %v22454_v56, %v22461_v5  ;;  %v17796_v35 = vld.sshfl [vmem:[%s18729_s21 + $0x70] sm:$0x33 pattern:$0x75316420] }
 0x329   : > { %v14117_v19 = vrot.slane %v14089_v43, %v18736_v10  ;;  %v14118_v38 = vcombine.low %v14096_v11, %v14103_v49  ;;  %v15009_v51 = vcombine.high %v15001_v52, %v15001_v52  ;;  %v17978_v4 = vcombine.high %v22454_v56, %v22461_v5  ;;  %v22650_v5 = vld.sshfl [vmem:[%s18729_s21 + $0x74] sm:$0x33 pattern:$0x75316420]  ;;  %v23439_v11 = vld [vmem:[#allocation27_spill] sm:$0xff] }
 0x32a   : > { %v15583_v27 = vrot.slane %v17977_v37, %v18736_v10  ;;  %v15590_v40 = vrot.slane %v15574_v60, %v18736_v10  ;;  %v22639_v48 = vadd.f32 %v21964_v46, %v23436_v32  ;;  %v22643_v47 = vadd.f32 %v21966_v58, %v22527_v6  ;;  %v22652_v9 = vpop.f32.mrb[160].mxu1 }
 0x32b   : > { %v14119_v43 = vcombine.low %v14110_v34, %v14117_v19  ;;  %v14126_v3 = vrot.slane %v14118_v38, %v18736_v10  ;;  %v15576_v16 = vcombine.low %v22626_v21, %v15009_v51  ;;  %v15597_v56 = vrot.slane %v17978_v4, %v18736_v10  ;;  %23438 = vst [vmem:[#allocation44_spill] sm:$0xff] %v22652_v9  ;;  %v18432_v49 = vpop.f32.mrb[161].mxu1 }
 0x32c   : > { %23437 = vst [vmem:[#allocation6_spill] sm:$0xff] %v22643_v47  ;;  %v15605_v25 = vcombine.low %v15583_v27, %v15590_v40  ;;  %v22656_v46 = vadd.f32 %v21976_v20, %v23439_v11  ;;  %v22660_v58 = vadd.f32 %v21978_v31, %v22544_v41  ;;  %v12732_v6 = vcombine.high %v17795_v2, %v17795_v2  ;;  %v22667_v60 = vpop.f32.mrb[162].mxu1 }
 0x32d   : > { %v14133_v52 = vrot.slane %v14119_v43, %v18736_v10  ;;  %v15604_v14 = vrot.slane %v15576_v16, %v18736_v10  ;;  %v22665_v34 = vrot.slane %v17795_v2, %v18736_v10  ;;  %v12756_v37 = vcombine.high %v17796_v35, %v17796_v35  ;;  %23441 = vst [vmem:[#allocation45_spill] sm:$0xff] %v22667_v60  ;;  %v18433_v38 = vpop.f32.mrb[163].mxu1  ;;  %v17962_v60 = vld.sshfl [vmem:[%s18729_s21 + $0x68] sm:$0x32 pattern:$0x75316420] }
 0x32e   : > { %23440 = vst [vmem:[#allocation27_spill] sm:$0xff] %v22660_v58  ;;  %v15613_v19 = vrot.slane %v15605_v25, %v18736_v10  ;;  %v22671_v20 = vrot.slane %v12732_v6, %v18736_v10  ;;  %v12763_v31 = vrot.slane %v17796_v35, %v18736_v10  ;;  %v22676_v41 = vrot.slane %v22650_v5, %v18736_v10  ;;  %v22681_v40 = vpop.f32.mrb[160].mxu0 }
 0x32f   : > { %v14134_v51 = vcombine.low %v14126_v3, %v14133_v52  ;;  %v15606_v4 = vcombine.low %v15597_v56, %v15604_v14  ;;  %v12747_v2 = vcombine.high %v22665_v34, %v22665_v34  ;;  %v12770_v27 = vrot.slane %v12756_v37, %v18736_v10  ;;  %23442 = vst [vmem:[#allocation46_spill] sm:$0xff] %v22681_v40  ;;  %v18482_v25 = vpop.f32.mrb[161].mxu0 }
 0x330   : > { %v12748_v32 = vcombine.high %v22671_v20, %v22671_v20  ;;  %v12771_v43 = vcombine.high %v12763_v31, %v12763_v31  ;;  %v13497_v35 = vshrl.u32 %v22582_v62, 16  ;;  %v13502_v16 = vshll.u32 %v22665_v34, 16  ;;  %v22691_v49 = vpop.f32.mrb[162].mxu0 }
 0x331   : > { %18543 = vmatmul.mubr.msk.bf16.gmra.mrb[216].mxu1 %vm2698_vm2, %v14134_v51  ;;  %v15620_v3 = vrot.slane %v15606_v4, %v18736_v10  ;;  %v12772_v56 = vcombine.high %v12770_v27, %v12770_v27  ;;  %v13505_v11 = vshrl.u32 %v22665_v34, 16  ;;  %v13510_v6 = vshll.u32 %v22671_v20, 16  ;;  %23443 = vst [vmem:[#allocation47_spill] sm:$0xff] %v22691_v49  ;;  %v18483_v38 = vpop.f32.mrb[163].mxu0 }
 0x332   : > { %18546 = vmatprep.mubr.msk.bf16.mxu1 %vm18669_vm4, %v23290_v59  ;;  %v13504_v62 = vsel %vm18764_vm1, %v13497_v35, %v13502_v16  ;;  %v13513_v52 = vshrl.u32 %v22671_v20, 16  ;;  %v13518_v14 = vshll.u32 %v12747_v2, 16  ;;  %v13521_v37 = vshrl.u32 %v12747_v2, 16 }
 0x333   : > { %v15621_v51 = vcombine.low %v15613_v19, %v15620_v3  ;;  %v13512_v4 = vsel %vm18764_vm1, %v13505_v11, %v13510_v6  ;;  %v13526_v25 = vshll.u32 %v12748_v32, 16  ;;  %v13530_v40 = vshrl.u32 %v12763_v31, 16 }
 0x334   : > { %v13520_v49 = vsel %vm18764_vm1, %v13513_v52, %v13518_v14  ;;  %v13535_v58 = vshll.u32 %v12770_v27, 16  ;;  %v13538_v9 = vshrl.u32 %v12770_v27, 16  ;;  %v13543_v47 = vshll.u32 %v12771_v43, 16 }
 0x335   : > { %18593 = vmatmul.mubr.msk.bf16.gmra.mrb[216].mxu0 %vm2698_vm2, %v15621_v51  ;;  %v13528_v35 = vsel %vm18764_vm1, %v13521_v37, %v13526_v25  ;;  %v13546_v2 = vshrl.u32 %v12771_v43, 16  ;;  %v13551_v16 = vshll.u32 %v12772_v56, 16  ;;  %v13554_v19 = vshrl.u32 %v12772_v56, 16 }
 0x336   : > { %18596 = vmatprep.mubr.msk.bf16.mxu0 %vm18669_vm4, %v23290_v59  ;;  %v13537_v31 = vsel %vm18764_vm1, %v13530_v40, %v13535_v58  ;;  %v13545_v32 = vsel %vm18764_vm1, %v13538_v9, %v13543_v47  ;;  %v13559_v27 = vshll.u32 %v22676_v41, 16  ;;  %v14135_v3 = vcombine.low %v13504_v62, %v13512_v4  ;;  %v23444_v4 = vld [vmem:[#allocation28_spill] sm:$0xff] }
 0x337   : > { %v13553_v11 = vsel %vm18764_vm1, %v13546_v2, %v13551_v16  ;;  %v14136_v6 = vcombine.low %v13520_v49, %v13528_v35  ;;  %v14137_v52 = vcombine.low %v13537_v31, %v13545_v32  ;;  %v15010_v43 = vcombine.high %v22626_v21, %v22626_v21  ;;  %v22721_v47 = vpop.f32.mrb[164].mxu1 }
 0x338   : > { %v13561_v56 = vsel %vm18764_vm1, %v13554_v19, %v13559_v27  ;;  %v14145_v14 = vrot.slane %v14135_v3, %v18736_v10  ;;  %v15042_v58 = vcombine.high %v17962_v60, %v17962_v60  ;;  %v15049_v40 = vrot.slane %v17962_v60, %v18736_v10  ;;  %v18436_v38 = vpop.f32.mrb[165].mxu1  ;;  %v23445_v19 = vld [vmem:[#allocation5_spill] sm:$0xff] }
 0x339   : > { %v14138_v9 = vcombine.low %v13553_v11, %v13561_v56  ;;  %v14152_v62 = vrot.slane %v14136_v6, %v18736_v10  ;;  %v14159_v49 = vrot.slane %v14137_v52, %v18736_v10  ;;  %v15622_v37 = vcombine.low %v15010_v43, %v22559_v22  ;;  %v22737_v35 = vpop.f32.mrb[166].mxu1 }
 0x33a   : > { %v15056_v21 = vrot.slane %v15042_v58, %v18736_v10  ;;  %v15623_v51 = vcombine.low %v22565_v23, %v22569_v53  ;;  %v22731_v60 = vadd.f32 %v22054_v26, %v23444_v4  ;;  %v22735_v25 = vadd.f32 %v22056_v28, %v22639_v48  ;;  %v17798_v23 = vld.sshfl [vmem:[%s18729_s21 + $0x78] sm:$0x33 pattern:$0x75316420]  ;;  %v18437_v53 = vpop.f32.mrb[167].mxu1 }
 0x33b   : > { %v14166_v2 = vrot.slane %v14138_v9, %v18736_v10  ;;  %v14167_v22 = vcombine.low %v14145_v14, %v14152_v62  ;;  %v15632_v16 = vrot.slane %v15622_v37, %v18736_v10  ;;  %v22743_v31 = vadd.f32 %v22071_v44, %v23445_v19  ;;  %v17799_v48 = vld.sshfl [vmem:[%s18729_s21 + $0x7c] sm:$0x33 pattern:$0x75316420] }
 0x33c   : > { %v15624_v26 = vcombine.low %v22576_v55, %v15056_v21  ;;  %v17979_v32 = vcombine.high %v15049_v40, %v15056_v21  ;;  %v15639_v27 = vrot.slane %v15623_v51, %v18736_v10  ;;  %v22750_v28 = vadd.f32 %v22073_v24, %v22656_v46  ;;  %v22760_v52 = vpop.f32.mrb[164].mxu0 }
 0x33d   : > { %v14168_v3 = vcombine.low %v14159_v49, %v14166_v2  ;;  %v14175_v11 = vrot.slane %v14167_v22, %v18736_v10  ;;  %v12780_v6 = vcombine.high %v22650_v5, %v22650_v5  ;;  %v22758_v44 = vcombine.high %v22676_v41, %v22676_v41  ;;  %v18486_v46 = vpop.f32.mrb[165].mxu0 }
 0x33e   : > { %v15646_v55 = vrot.slane %v15624_v26, %v18736_v10  ;;  %v15653_v43 = vrot.slane %v17979_v32, %v18736_v10  ;;  %v15654_v56 = vcombine.low %v15632_v16, %v15639_v27  ;;  %v12804_v24 = vcombine.high %v17798_v23, %v17798_v23  ;;  %v22769_v9 = vpop.f32.mrb[166].mxu0 }
 0x33f   : > { %v14182_v14 = vrot.slane %v14168_v3, %v18736_v10  ;;  %v22766_v58 = vrot.slane %v12780_v6, %v18736_v10  ;;  %v12811_v5 = vrot.slane %v17798_v23, %v18736_v10  ;;  %v12828_v40 = vcombine.high %v17799_v48, %v17799_v48  ;;  %v18487_v21 = vpop.f32.mrb[167].mxu0  ;;  %v17964_v3 = vld.sshfl [vmem:[%s18729_s21 + $0x70] sm:$0x32 pattern:$0x75316420] }
 0x340   : > { %v15655_v62 = vcombine.low %v15646_v55, %v15653_v43  ;;  %v15662_v49 = vrot.slane %v15654_v56, %v18736_v10  ;;  %v12818_v37 = vrot.slane %v12804_v24, %v18736_v10  ;;  %v22774_v38 = vrot.slane %v17799_v48, %v18736_v10 }
 0x341   : > { %v14183_v51 = vcombine.low %v14175_v11, %v14182_v14  ;;  %v22778_v4 = vcombine.high %v22766_v58, %v22766_v58  ;;  %v12819_v2 = vcombine.high %v12811_v5, %v12811_v5  ;;  %v22781_v22 = vrot.slane %v12828_v40, %v18736_v10 }
 0x342   : > { %v15669_v16 = vrot.slane %v15655_v62, %v18736_v10  ;;  %v12820_v19 = vcombine.high %v12818_v37, %v12818_v37  ;;  %v13562_v23 = vshrl.u32 %v22676_v41, 16  ;;  %v13567_v53 = vshll.u32 %v22766_v58, 16 }
 0x343   : > { %18547 = vmatmul.mubr.msk.bf16.gmra.mrb[220].mxu1 %vm2698_vm2, %v14183_v51  ;;  %v13570_v26 = vshrl.u32 %v22766_v58, 16  ;;  %v13575_v32 = vshll.u32 %v22758_v44, 16  ;;  %v13578_v27 = vshrl.u32 %v22758_v44, 16  ;;  %v13583_v48 = vshll.u32 %v22778_v4, 16  ;;  %v22796_v56 = vpop.f32.mrb[168].mxu1 }
 0x344   : > { %v15670_v11 = vcombine.low %v15662_v49, %v15669_v16  ;;  %18550 = vmatprep.mubr.msk.bf16.mxu1 %vm18669_vm4, %v23290_v59  ;;  %v13569_v6 = vsel %vm18764_vm1, %v13562_v23, %v13567_v53  ;;  %v13587_v55 = vshrl.u32 %v12811_v5, 16  ;;  %v13592_v43 = vshll.u32 %v12818_v37, 16  ;;  %v18440_v62 = vpop.f32.mrb[169].mxu1 }
 0x345   : > { %v13577_v24 = vsel %vm18764_vm1, %v13570_v26, %v13575_v32  ;;  %v13585_v46 = vsel %vm18764_vm1, %v13578_v27, %v13583_v48  ;;  %v13595_v14 = vshrl.u32 %v12818_v37, 16  ;;  %v13600_v40 = vshll.u32 %v12819_v2, 16  ;;  %v22805_v16 = vpop.f32.mrb[170].mxu1 }
 0x346   : > { %18597 = vmatmul.mubr.msk.bf16.gmra.mrb[220].mxu0 %vm2698_vm2, %v15670_v11  ;;  %v13594_v49 = vsel %vm18764_vm1, %v13587_v55, %v13592_v43  ;;  %v13603_v21 = vshrl.u32 %v12819_v2, 16  ;;  %v13608_v51 = vshll.u32 %v12820_v19, 16  ;;  %v13611_v5 = vshrl.u32 %v12820_v19, 16  ;;  %23446 = vst [vmem:[#allocation28_spill] sm:$0xff] %v22805_v16  ;;  %v18441_v32 = vpop.f32.mrb[171].mxu1 }
 0x347   : > { %18600 = vmatprep.mubr.msk.bf16.mxu0 %vm18669_vm4, %v23290_v59  ;;  %v13602_v23 = vsel %vm18764_vm1, %v13595_v14, %v13600_v40  ;;  %v13616_v37 = vshll.u32 %v22774_v38, 16  ;;  %v13619_v53 = vshrl.u32 %v22774_v38, 16  ;;  %v13624_v26 = vshll.u32 %v22781_v22, 16  ;;  %v22816_v11 = vpop.f32.mrb[168].mxu0 }
 0x348   : > { %v13610_v2 = vsel %vm18764_vm1, %v13603_v21, %v13608_v51  ;;  %v14184_v27 = vcombine.low %v13569_v6, %v13577_v24  ;;  %v14185_v19 = vcombine.low %v13585_v46, %v13594_v49  ;;  %v15090_v48 = vcombine.high %v17964_v3, %v17964_v3  ;;  %v18490_v62 = vpop.f32.mrb[169].mxu0 }
 0x349   : > { %v13618_v55 = vsel %vm18764_vm1, %v13611_v5, %v13616_v37  ;;  %v13626_v43 = vsel %vm18764_vm1, %v13619_v53, %v13624_v26  ;;  %v14186_v14 = vcombine.low %v13602_v23, %v13610_v2  ;;  %v15097_v40 = vrot.slane %v17964_v3, %v18736_v10  ;;  %v22826_v24 = vpop.f32.mrb[170].mxu0  ;;  %v23447_v26 = vld [vmem:[#allocation29_spill] sm:$0xff] }
 0x34a   : > { %v14187_v16 = vcombine.low %v13618_v55, %v13626_v43  ;;  %v14194_v32 = vrot.slane %v14184_v27, %v18736_v10  ;;  %v14201_v21 = vrot.slane %v14185_v19, %v18736_v10  ;;  %v15104_v6 = vrot.slane %v15090_v48, %v18736_v10  ;;  %v18491_v5 = vpop.f32.mrb[171].mxu0 }
 0x34b   : > { %v14208_v46 = vrot.slane %v14186_v14, %v18736_v10  ;;  %v15105_v49 = vcombine.high %v15097_v40, %v15097_v40  ;;  %v15671_v51 = vcombine.low %v22665_v34, %v22671_v20  ;;  %v17980_v3 = vcombine.high %v22665_v34, %v22671_v20  ;;  %v17966_v40 = vld.sshfl [vmem:[%s18729_s21 + $0x78] sm:$0x32 pattern:$0x75316420] }
 0x34c   : > { %v14215_v23 = vrot.slane %v14187_v16, %v18736_v10  ;;  %v14216_v37 = vcombine.low %v14194_v32, %v14201_v21  ;;  %v15106_v53 = vcombine.high %v15104_v6, %v15104_v6  ;;  %v6718_v2 = vadd.f32 %v22151_v33, %v23447_v26  ;;  %v23448_v16 = vld [vmem:[#allocation30_spill] sm:$0xff] }
 0x34d   : > { %v15673_v27 = vcombine.low %v15104_v6, %v15105_v49  ;;  %v15681_v19 = vrot.slane %v15671_v51, %v18736_v10  ;;  %v15688_v48 = vrot.slane %v17980_v3, %v18736_v10  ;;  %v22840_v55 = vadd.f32 %v22153_v17, %v22731_v60 }
 0x34e   : > { %v14217_v43 = vcombine.low %v14208_v46, %v14215_v23  ;;  %v14224_v34 = vrot.slane %v14216_v37, %v18736_v10  ;;  %v15674_v20 = vcombine.low %v15106_v53, %v22676_v41  ;;  %v6719_v14 = vadd.f32 %v22161_v57, %v23448_v16  ;;  %v22854_v60 = vpop.f32.mrb[172].mxu1 }
 0x34f   : > { %v15695_v33 = vrot.slane %v15673_v27, %v18736_v10  ;;  %v15703_v62 = vcombine.low %v15681_v19, %v15688_v48  ;;  %v22850_v32 = vadd.f32 %v22163_v50, %v22743_v31  ;;  %v12843_v17 = vcombine.high %v22774_v38, %v22774_v38  ;;  %v18444_v46 = vpop.f32.mrb[173].mxu1 }
 0x350   : > { %v14231_v21 = vrot.slane %v14217_v43, %v18736_v10  ;;  %v15702_v41 = vrot.slane %v15674_v20, %v18736_v10  ;;  %v12844_v57 = vcombine.high %v22781_v22, %v22781_v22  ;;  %v13627_v6 = vshrl.u32 %v22781_v22, 16  ;;  %v22862_v3 = vpop.f32.mrb[174].mxu1 }
 0x351   : > { %v15711_v49 = vrot.slane %v15703_v62, %v18736_v10  ;;  %v13632_v51 = vshll.u32 %v12843_v17, 16  ;;  %v13635_v50 = vshrl.u32 %v12843_v17, 16  ;;  %v15138_v31 = vcombine.high %v17966_v40, %v17966_v40  ;;  %v18445_v26 = vpop.f32.mrb[175].mxu1 }
 0x352   : > { %v14232_v5 = vcombine.low %v14224_v34, %v14231_v21  ;;  %v15704_v23 = vcombine.low %v15695_v33, %v15702_v41  ;;  %v13640_v37 = vshll.u32 %v12844_v57, 16  ;;  %v15145_v53 = vrot.slane %v17966_v40, %v18736_v10  ;;  %v22872_v20 = vpop.f32.mrb[172].mxu0  ;;  %v23449_v40 = vld [vmem:[#allocation4_spill] sm:$0xff]  ;;  %v23456_v26 = vld [vmem:[#allocation14_spill] sm:$0xff] }
 0x353   : > { %v13634_v27 = vsel %vm18764_vm1, %v13627_v6, %v13632_v51  ;;  %v15152_v19 = vrot.slane %v15138_v31, %v18736_v10  ;;  %v15720_v48 = vcombine.low %v22766_v58, %v22758_v44  ;;  %v15723_v43 = vcombine.low %v22774_v38, %v22781_v22  ;;  %v18494_v17 = vpop.f32.mrb[173].mxu0 }
 0x354   : > { %18551 = vmatmul.mubr.msk.bf16.gmra.mrb[224].mxu1 %vm2698_vm2, %v14232_v5  ;;  %v15718_v34 = vrot.slane %v15704_v23, %v18736_v10  ;;  %v13642_v16 = vsel %vm18764_vm1, %v13635_v50, %v13640_v37  ;;  %v6720_v33 = vadd.f32 %v22193_v30, %v23449_v40  ;;  %v22881_v62 = vadd.f32 %v22195_v63, %v6718_v2  ;;  %v22887_v57 = vpop.f32.mrb[174].mxu0  ;;  %v23450_v50 = vld [vmem:[#allocation33_spill] sm:$0xff]  ;;  %v23454_v23 = vld [vmem:[#allocation23_spill] sm:$0xff] }
 0x355   : > { %18554 = vmatprep.mubr.msk.bf16.mxu1 %vm18669_vm4, %v23290_v59  ;;  %v14233_v44 = vcombine.low %v13634_v27, %v13642_v16  ;;  %v15721_v58 = vcombine.low %v22778_v4, %v15152_v19  ;;  %v17981_v21 = vcombine.high %v15145_v53, %v15152_v19  ;;  %v15730_v41 = vrot.slane %v15720_v48, %v18736_v10  ;;  %v18495_v2 = vpop.f32.mrb[175].mxu0  ;;  %v23455_v53 = vld [vmem:[#allocation31_spill] sm:$0xff]  ;;  %v23457_v16 = vld [vmem:[#allocation32_spill] sm:$0xff] }
 0x356   : > { %v15719_v8 = vcombine.low %v15711_v49, %v15718_v34  ;;  %v15751_v6 = vrot.slane %v15723_v43, %v18736_v10  ;;  %v22891_v30 = vadd.f32 %v22209_v36, %v6719_v14  ;;  %v17982_v63 = vcombine.high %v22774_v38, %v22781_v22  ;;  %v22901_v5 = vpop.f32.mrb[176].mxu1  ;;  %v23451_v14 = vld [vmem:[#allocation7_spill] sm:$0xff]  ;;  %v23452_v49 = vld [vmem:[#allocation34_spill] sm:$0xff]  ;;  %v23453_v22 = vld [vmem:[#allocation12_spill] sm:$0xff] }
 0x357   : > { %v14240_v46 = vrot.slane %v14233_v44, %v18736_v10  ;;  %v15737_v51 = vrot.slane %v15721_v58, %v18736_v10  ;;  %v15744_v4 = vrot.slane %v17981_v21, %v18736_v10  ;;  %v22899_v31 = vadd.f32 %v23450_v50, %v6720_v33  ;;  %v18448_v19 = vpop.f32.mrb[177].mxu1  ;;  %v23458_v44 = vld [vmem:[#allocation19_spill] sm:$0xff]  ;;  %v23459_v21 = vld [vmem:[#allocation21_spill] sm:$0xff] }
 0x358   : > { %18601 = vmatmul.mubr.msk.bf16.gmra.mrb[224].mxu0 %vm2698_vm2, %v15719_v8  ;;  %v22905_v36 = vrot.slane %v17982_v63, %v18736_v10  ;;  %v10566_v38 = vadd.f32 %v23452_v49, %v23451_v14  ;;  %v10567_v37 = vadd.f32 %v23454_v23, %v23453_v22  ;;  %v10568_v27 = vadd.f32 %v23456_v26, %v23455_v53  ;;  %v10563_v33 = vpop.f32.mrb[178].mxu1  ;;  %v23460_v63 = vld [vmem:[#allocation11_spill] sm:$0xff]  ;;  %v23463_v14 = vld [vmem:[#allocation13_spill] sm:$0xff]  ;;  %v23465_v22 = vld [vmem:[#allocation16_spill] sm:$0xff] }
 0x359   : > { %18604 = vmatprep.mubr.msk.bf16.mxu0 %vm18669_vm4, %v23290_v59  ;;  %v14247_v48 = vrot.slane %v14240_v46, %v18736_v10  ;;  %v15752_v43 = vcombine.low %v15730_v41, %v15737_v51  ;;  %v15753_v34 = vcombine.low %v15744_v4, %v15751_v6  ;;  %v10569_v40 = vadd.f32 %v22282_v1, %v23457_v16  ;;  %v18449_v50 = vpop.f32.mrb[179].mxu1  ;;  %v23461_v46 = vld [vmem:[#allocation10_spill] sm:$0xff]  ;;  %v23466_v23 = vld [vmem:[#allocation17_spill] sm:$0xff]  ;;  %v23468_v26 = vld [vmem:[#allocation3_spill] sm:$0xff] }
 0x35a   : > { %v15783_v17 = vrot.slane %v22905_v36, %v18736_v10  ;;  %v22921_v58 = vadd.f32 %v23458_v44, %v10566_v38  ;;  %v22924_v8 = vadd.f32 %v23459_v21, %v10567_v37  ;;  %v10570_v2 = vadd.f32 %v22290_v7, %v23460_v63  ;;  %v23462_v36 = vld [vmem:[#allocation15_spill] sm:$0xff]  ;;  %v23464_v7 = vld [vmem:[#allocation22_spill] sm:$0xff]  ;;  %v23470_v19 = vld [vmem:[#allocation20_spill] sm:$0xff] }
 0x35b   : > { %v15760_v41 = vrot.slane %v15752_v43, %v18736_v10  ;;  %v15767_v6 = vrot.slane %v15753_v34, %v18736_v10  ;;  %v22931_v1 = vadd.f32 %v22292_v54, %v10568_v27  ;;  %v10571_v51 = vadd.f32 %v22302_v42, %v23461_v46  ;;  %v23467_v54 = vld [vmem:[#allocation36_spill] sm:$0xff]  ;;  %v23469_v42 = vld [vmem:[#allocation38_spill] sm:$0xff]  ;;  %v23474_v44 = vld [vmem:[#allocation35_spill] sm:$0xff] }
 0x35c   : > { %18555 = vmatmul.mubr.msk.bf16.gmra.mrb[228].mxu1 %vm2698_vm2, %v14247_v48  ;;  %v22937_v4 = vadd.f32 %v22304_v39, %v10569_v40  ;;  %v10572_v49 = vadd.f32 %v23463_v14, %v23462_v36  ;;  %v22942_v38 = vadd.f32 %v23464_v7, %v10570_v2  ;;  %v10573_v10 = vadd.f32 %v23466_v23, %v23465_v22  ;;  %v23471_v48 = vld [vmem:[#allocation39_spill] sm:$0xff]  ;;  %v12078_v43 = vpop.f32.mrb[176].mxu0  ;;  %v23472_v34 = vld [vmem:[#allocation40_spill] sm:$0xff]  ;;  %v23473_v40 = vld [vmem:[#allocation41_spill] sm:$0xff] }
 0x35d   : > { %v15768_v37 = vcombine.low %v15760_v41, %v15767_v6  ;;  %v22947_v53 = vadd.f32 %v23467_v54, %v10571_v51  ;;  %v10574_v27 = vadd.f32 %v23469_v42, %v23468_v26  ;;  %v10575_v39 = vadd.f32 %v23471_v48, %v23470_v19  ;;  %v23475_v63 = vld [vmem:[#allocation37_spill] sm:$0xff]  ;;  %v18498_v50 = vpop.f32.mrb[177].mxu0  ;;  %v23478_v14 = vld [vmem:[#allocation18_spill] sm:$0xff]  ;;  %v23486_v48 = vld [vmem:[#allocation27_spill] sm:$0xff] }
 0x35e   : > { %v22954_v16 = vadd.f32 %v23472_v34, %v10572_v49  ;;  %v22957_v33 = vadd.f32 %v23473_v40, %v10573_v10  ;;  %v10576_v21 = vadd.f32 %v22425_v61, %v23474_v44  ;;  %v10577_v2 = vadd.f32 %v22442_v18, %v23475_v63  ;;  %v23476_v6 = vld [vmem:[#allocation9_spill] sm:$0xff]  ;;  %v12081_v7 = vpop.f32.mrb[178].mxu0  ;;  %v23479_v18 = vld [vmem:[#allocation24_spill] sm:$0xff]  ;;  %v23481_v23 = vld [vmem:[#allocation42_spill] sm:$0xff] }
 0x35f   : > { %v22964_v41 = vadd.f32 %v22465_v29, %v10574_v27  ;;  %v22967_v46 = vadd.f32 %v23476_v6, %v10575_v39  ;;  %v23477_v51 = vld [vmem:[#allocation25_spill] sm:$0xff]  ;;  %v10579_v49 = vadd.f32 %v22515_v13, %v23478_v14  ;;  %v23480_v29 = vld [vmem:[#allocation8_spill] sm:$0xff]  ;;  %v23482_v54 = vld [vmem:[#allocation26_spill] sm:$0xff]  ;;  %v18499_v42 = vpop.f32.mrb[179].mxu0  ;;  %v10585_v63 = vadd.f32 %v22737_v35, %v22750_v28 }
 0x360   : > { %v10578_v36 = vadd.f32 %v22505_v15, %v23477_v51  ;;  %18605 = vmatmul.mubr.msk.bf16.gmra.mrb[228].mxu0 %vm2698_vm2, %v15768_v37  ;;  %v22975_v61 = vadd.f32 %v22522_v45, %v10576_v21  ;;  %v22978_v22 = vadd.f32 %v23479_v18, %v10577_v2  ;;  %v10580_v10 = vadd.f32 %v23481_v23, %v23480_v29  ;;  %v23483_v15 = vld [vmem:[#allocation43_spill] sm:$0xff]  ;;  %v23484_v45 = vld [vmem:[#allocation6_spill] sm:$0xff]  ;;  %v23485_v27 = vld [vmem:[#allocation44_spill] sm:$0xff] }
 0x361   : > { %v10581_v26 = vadd.f32 %v22597_v0, %v23482_v54  ;;  %18608 = vmatprep.mubr.msk.bf16.mxu0 %vm18669_vm4, %v23290_v59  ;;  %v22990_v37 = vadd.f32 %v22619_v12, %v10579_v49  ;;  %v10582_v19 = vadd.f32 %v23485_v27, %v23484_v45  ;;  %v23487_v39 = vld [vmem:[#allocation45_spill] sm:$0xff]  ;;  %v23488_v40 = vld [vmem:[#allocation46_spill] sm:$0xff]  ;;  %v23489_v0 = vld [vmem:[#allocation47_spill] sm:$0xff]  ;;  %v10584_v59 = vadd.f32 %v22721_v47, %v22735_v25 }
 0x362   : > { %v22987_v13 = vadd.f32 %v23483_v15, %v10578_v36  ;;  %v10583_v34 = vadd.f32 %v23487_v39, %v23486_v48  ;;  %v22997_v44 = vadd.f32 %v23488_v40, %v10580_v10  ;;  %v10586_v50 = vadd.f32 %v22796_v56, %v22840_v55  ;;  %v23490_v6 = vld [vmem:[#allocation28_spill] sm:$0xff]  ;;  %v23491_v45 = vld [vmem:[#allocation2_spill] sm:$0xff] }
 0x363   : > { %v23000_v21 = vadd.f32 %v23489_v0, %v10581_v26  ;;  %v23007_v12 = vadd.f32 %v22760_v52, %v10582_v19  ;;  %v10587_v51 = vadd.f32 %v23490_v6, %v22850_v32  ;;  %v23017_v36 = vadd.f32 %v22816_v11, %v10584_v59 }
 0x364   : > { %v23010_v2 = vadd.f32 %v22769_v9, %v10583_v34  ;;  %v23020_v47 = vadd.f32 %v22826_v24, %v10585_v63  ;;  %v10588_v25 = vadd.f32 %v22854_v60, %v22881_v62  ;;  %v10589_v35 = vadd.f32 %v22862_v3, %v22891_v30  ;;  %v12086_v56 = vpop.f32.mrb[180].mxu0 }
 0x365   : > { %v23027_v28 = vadd.f32 %v22872_v20, %v10586_v50  ;;  %v23030_v52 = vadd.f32 %v22887_v57, %v10587_v51  ;;  %v10590_v9 = vadd.f32 %v22901_v5, %v22899_v31  ;;  %v18502_v55 = vpop.f32.mrb[181].mxu0  ;;  %v18670_v5 = vmov 1983009808  }
 0x366   : > { %v23034_v11 = vadd.f32 %v12078_v43, %v10588_v25  ;;  %v23036_v24 = vadd.f32 %v12081_v7, %v10589_v35  ;;  %v12089_v60 = vpop.f32.mrb[182].mxu0  ;;  %v16071_v43 = vunpack.c.l.s4 %v18670_v5 }
 0x367   : > { %v23038_v32 = vadd.f32 %v12086_v56, %v10590_v9  ;;  %v18503_v3 = vpop.f32.mrb[183].mxu0 }
 0x368   : > { %18609 = vmatmul.mubr.msk.bf16.gmra.mrb[232].mxu0 %vm2698_vm2, %v15783_v17  ;;  %v16072_v23 = vunpack.c.0.s8 %v16071_v43 }
 0x36a   : > { %v23052_v27 = vsub.s32 %v16072_v23, %v23491_v45 }
 0x36b   : > { %v14324_v20 = vpop.f32.mrb[180].mxu1 }
 0x36c   : > { %v14426_v62 = vadd.f32 %v14324_v20, %v22921_v58  ;;  %v18508_v57 = vpop.f32.mrb[181].mxu1  ;;  %v23048_v58 = vld [vmem:[%s23249_s2] ss:$0 sm:$0xff] }
 0x36d   : > { %v14327_v30 = vpop.f32.mrb[182].mxu1 }
 0x36e   : > { %v14427_v14 = vadd.f32 %v14327_v30, %v22924_v8  ;;  %v18509_v31 = vpop.f32.mrb[183].mxu1 }
 0x378   : > { %v14332_v49 = vpop.f32.mrb[184].mxu1 }
 0x379   : > { %v14428_v7 = vadd.f32 %v14332_v49, %v22931_v1  ;;  %v18512_v18 = vpop.f32.mrb[185].mxu1 }
 0x37a   : > { %v14335_v29 = vpop.f32.mrb[186].mxu1 }
 0x37b   : > { %v14429_v10 = vadd.f32 %v14335_v29, %v22937_v4  ;;  %v18513_v17 = vpop.f32.mrb[187].mxu1 }
 0x37c   : > { %v15860_v54 = vpop.f32.mrb[184].mxu0 }
 0x37d   : > { %v15962_v26 = vadd.f32 %v15860_v54, %v14426_v62  ;;  %v18562_v8 = vpop.f32.mrb[185].mxu0 }
 0x37e   : > { %v15863_v42 = vpop.f32.mrb[186].mxu0 }
 0x37f   : > { %v15994_v15 = vadd.f32 %v23048_v58, %v15962_v26  ;;  %v15963_v1 = vadd.f32 %v15863_v42, %v14427_v14  ;;  %v18563_v19 = vpop.f32.mrb[187].mxu0 }
 0x381   : > { %v16019_v48 = vmax.f32 %v15994_v15, 0.0  ;;  %v15995_v4 = vadd.f32 %v23048_v58, %v15963_v1 }
 0x383   : > { %v16069_v39 = vcombine.high %v16019_v48, %v16019_v48  ;;  %v16076_v34 = vrot.slane %v16019_v48, %v23052_v27  ;;  %v16020_v40 = vmax.f32 %v15995_v4, 0.0 }
 0x385   : > { %v16083_v0 = vrot.slane %v16069_v39, %v23052_v27  ;;  %v16084_v59 = vcombine.high %v16076_v34, %v16076_v34  ;;  %v16086_v63 = vcombine.high %v16020_v40, %v16020_v40  ;;  %v16093_v50 = vrot.slane %v16020_v40, %v23052_v27 }
 0x387   : > { %v16085_v6 = vcombine.high %v16083_v0, %v16083_v0  ;;  %v16485_v51 = vcombine.low %v16076_v34, %v16084_v59  ;;  %v16100_v25 = vrot.slane %v16086_v63, %v23052_v27  ;;  %v16101_v35 = vcombine.high %v16093_v50, %v16093_v50 }
 0x389   : > { %v16486_v9 = vcombine.low %v16083_v0, %v16085_v6  ;;  %v16502_v56 = vcombine.low %v16093_v50, %v16101_v35  ;;  %v16493_v55 = vrot.slane %v16485_v51, %v23052_v27  ;;  %v16516_v62 = vrot.slane %v16100_v25, %v23052_v27 }
 0x38a   : > { %v14340_v60 = vpop.f32.mrb[188].mxu1  ;;  %v16102_v15 = vcombine.high %v16100_v25, %v16100_v25 }
 0x38b   : > { %v16500_v3 = vrot.slane %v16486_v9, %v23052_v27  ;;  %v16509_v20 = vrot.slane %v16502_v56, %v23052_v27  ;;  %v14430_v57 = vadd.f32 %v14340_v60, %v22942_v38  ;;  %v18516_v30 = vpop.f32.mrb[189].mxu1 }
 0x38c   : > { %v14343_v14 = vpop.f32.mrb[190].mxu1 }
 0x38d   : > { %v16501_v31 = vcombine.low %v16493_v55, %v16500_v3  ;;  %v16517_v5 = vcombine.low %v16509_v20, %v16516_v62  ;;  %v15868_v43 = vpop.f32.mrb[188].mxu0  ;;  %v14431_v49 = vadd.f32 %v14343_v14, %v22947_v53  ;;  %v18517_v18 = vpop.f32.mrb[191].mxu1 }
 0x38e   : > { %v15964_v29 = vadd.f32 %v15868_v43, %v14428_v7  ;;  %v18566_v23 = vpop.f32.mrb[189].mxu0 }
 0x38f   : > { %16975 = vst [vmem:[%s23068_s20] sm:$0xff] %v16501_v31  ;;  %16976 = vst [vmem:[%s23068_s20 + $0x8] sm:$0x3f] %v16517_v5  ;;  %v15871_v38 = vpop.f32.mrb[190].mxu0 }
 0x390   : > { %v15996_v17 = vadd.f32 %v23048_v58, %v15964_v29  ;;  %v15965_v54 = vadd.f32 %v15871_v38, %v14429_v10  ;;  %v18567_v26 = vpop.f32.mrb[191].mxu0 }
 0x392   : > { %v16021_v8 = vmax.f32 %v15996_v17, 0.0  ;;  %v15997_v42 = vadd.f32 %v23048_v58, %v15965_v54 }
 0x394   : > { %v16103_v45 = vcombine.high %v16021_v8, %v16021_v8  ;;  %v16110_v1 = vrot.slane %v16021_v8, %v23052_v27  ;;  %v16022_v19 = vmax.f32 %v15997_v42, 0.0 }
 0x396   : > { %v16117_v53 = vrot.slane %v16103_v45, %v23052_v27  ;;  %v16118_v48 = vcombine.high %v16110_v1, %v16110_v1  ;;  %v16518_v7 = vcombine.low %v16102_v15, %v16110_v1  ;;  %v16127_v4 = vrot.slane %v16022_v19, %v23052_v27 }
 0x397   : > { %v16120_v63 = vcombine.high %v16022_v19, %v16022_v19 }
 0x398   : > { %v16519_v39 = vcombine.low %v16118_v48, %v16117_v53  ;;  %v16119_v34 = vcombine.high %v16117_v53, %v16117_v53  ;;  %v16135_v40 = vcombine.high %v16127_v4, %v16127_v4  ;;  %v16526_v10 = vrot.slane %v16518_v7, %v23052_v27 }
 0x399   : > { %v16134_v62 = vrot.slane %v16120_v63, %v23052_v27 }
 0x39a   : > { %v16533_v0 = vrot.slane %v16519_v39, %v23052_v27  ;;  %v16535_v59 = vcombine.low %v16119_v34, %v16127_v4  ;;  %v16549_v25 = vrot.slane %v16135_v40, %v23052_v27 }
 0x39b   : > { %v14348_v50 = vpop.f32.mrb[192].mxu1  ;;  %v16136_v29 = vcombine.high %v16134_v62, %v16134_v62 }
 0x39c   : > { %v16534_v6 = vcombine.low %v16526_v10, %v16533_v0  ;;  %v16542_v51 = vrot.slane %v16535_v59, %v23052_v27  ;;  %v14432_v35 = vadd.f32 %v14348_v50, %v22954_v16  ;;  %v18520_v9 = vpop.f32.mrb[193].mxu1 }
 0x39d   : > { %v14351_v56 = vpop.f32.mrb[194].mxu1 }
 0x39e   : > { %16977 = vst [vmem:[%s23068_s20 + $0x10] sm:$0xff] %v16534_v6  ;;  %v16550_v55 = vcombine.low %v16542_v51, %v16549_v25  ;;  %v15876_v60 = vpop.f32.mrb[192].mxu0  ;;  %v14433_v3 = vadd.f32 %v14351_v56, %v22957_v33  ;;  %v18521_v20 = vpop.f32.mrb[195].mxu1  ;;  %v16551_v33 = vcombine.low %v16134_v62, %v16136_v29 }
 0x39f   : > { %v15966_v30 = vadd.f32 %v15876_v60, %v14430_v57  ;;  %v18570_v14 = vpop.f32.mrb[193].mxu0 }
 0x3a0   : > { %16978 = vst [vmem:[%s23068_s20 + $0x18] sm:$0x3f] %v16550_v55  ;;  %v15879_v31 = vpop.f32.mrb[194].mxu0 }
 0x3a1   : > { %v15998_v5 = vadd.f32 %v23048_v58, %v15966_v30  ;;  %v15967_v43 = vadd.f32 %v15879_v31, %v14431_v49  ;;  %v18571_v18 = vpop.f32.mrb[195].mxu0  ;;  %v16559_v49 = vrot.slane %v16551_v33, %v23052_v27 }
 0x3a3   : > { %v16023_v16 = vmax.f32 %v15998_v5, 0.0  ;;  %v15999_v23 = vadd.f32 %v23048_v58, %v15967_v43 }
 0x3a5   : > { %v16137_v38 = vcombine.high %v16023_v16, %v16023_v16  ;;  %v16144_v17 = vrot.slane %v16023_v16, %v23052_v27  ;;  %v16024_v54 = vmax.f32 %v15999_v23, 0.0 }
 0x3a7   : > { %v16151_v26 = vrot.slane %v16137_v38, %v23052_v27  ;;  %v16152_v57 = vcombine.high %v16144_v17, %v16144_v17  ;;  %v16161_v15 = vrot.slane %v16024_v54, %v23052_v27  ;;  %v16154_v34 = vcombine.high %v16024_v54, %v16024_v54 }
 0x3a9   : > { %v16153_v8 = vcombine.high %v16151_v26, %v16151_v26  ;;  %v16552_v42 = vcombine.low %v16144_v17, %v16152_v57  ;;  %v16582_v48 = vrot.slane %v16161_v15, %v23052_v27  ;;  %v16168_v51 = vrot.slane %v16154_v34, %v23052_v27 }
 0x3aa   : > { %v16169_v25 = vcombine.high %v16161_v15, %v16161_v15 }
 0x3ab   : > { %v16566_v45 = vrot.slane %v16552_v42, %v23052_v27  ;;  %v16568_v1 = vcombine.low %v16151_v26, %v16153_v8  ;;  %v16170_v30 = vcombine.high %v16168_v51, %v16168_v51 }
 0x3ac   : > { %v16584_v62 = vcombine.low %v16169_v25, %v16168_v51 }
 0x3ad   : > { %v16567_v19 = vcombine.low %v16559_v49, %v16566_v45  ;;  %v16575_v53 = vrot.slane %v16568_v1, %v23052_v27  ;;  %v14356_v7 = vpop.f32.mrb[196].mxu1 }
 0x3ae   : > { %v14434_v4 = vadd.f32 %v14356_v7, %v22964_v41  ;;  %v18524_v39 = vpop.f32.mrb[197].mxu1  ;;  %v16592_v29 = vrot.slane %v16584_v62, %v23052_v27 }
 0x3af   : > { %16979 = vst [vmem:[%s23068_s20 + $0x20] sm:$0xff] %v16567_v19  ;;  %v16583_v40 = vcombine.low %v16575_v53, %v16582_v48  ;;  %v14359_v10 = vpop.f32.mrb[198].mxu1 }
 0x3b0   : > { %v14435_v0 = vadd.f32 %v14359_v10, %v22967_v46  ;;  %v18525_v59 = vpop.f32.mrb[199].mxu1 }
 0x3b1   : > { %16980 = vst [vmem:[%s23068_s20 + $0x28] sm:$0x3f] %v16583_v40  ;;  %v15884_v63 = vpop.f32.mrb[196].mxu0 }
 0x3b2   : > { %v15968_v50 = vadd.f32 %v15884_v63, %v14432_v35  ;;  %v18574_v6 = vpop.f32.mrb[197].mxu0 }
 0x3b3   : > { %v15887_v9 = vpop.f32.mrb[198].mxu0 }
 0x3b4   : > { %v16000_v56 = vadd.f32 %v23048_v58, %v15968_v50  ;;  %v15969_v55 = vadd.f32 %v15887_v9, %v14433_v3  ;;  %v18575_v41 = vpop.f32.mrb[199].mxu0 }
 0x3b6   : > { %v16025_v60 = vmax.f32 %v16000_v56, 0.0  ;;  %v16001_v20 = vadd.f32 %v23048_v58, %v15969_v55 }
 0x3b8   : > { %v16171_v14 = vcombine.high %v16025_v60, %v16025_v60  ;;  %v16178_v46 = vrot.slane %v16025_v60, %v23052_v27  ;;  %v16026_v31 = vmax.f32 %v16001_v20, 0.0 }
 0x3ba   : > { %v16185_v35 = vrot.slane %v16171_v14, %v23052_v27  ;;  %v16186_v5 = vcombine.high %v16178_v46, %v16178_v46  ;;  %v16585_v43 = vcombine.low %v16170_v30, %v16178_v46  ;;  %v16188_v18 = vcombine.high %v16026_v31, %v16026_v31 }
 0x3bb   : > { %v16195_v3 = vrot.slane %v16026_v31, %v23052_v27 }
 0x3bc   : > { %v16187_v16 = vcombine.high %v16185_v35, %v16185_v35  ;;  %v16599_v23 = vrot.slane %v16585_v43, %v23052_v27  ;;  %v16601_v38 = vcombine.low %v16186_v5, %v16185_v35  ;;  %v16202_v17 = vrot.slane %v16188_v18, %v23052_v27 }
 0x3bd   : > { %v16203_v54 = vcombine.high %v16195_v3, %v16195_v3 }
 0x3be   : > { %v16600_v33 = vcombine.low %v16592_v29, %v16599_v23  ;;  %v16608_v26 = vrot.slane %v16601_v38, %v23052_v27  ;;  %v16615_v57 = vrot.slane %v16187_v16, %v23052_v27  ;;  %v16204_v8 = vcombine.high %v16202_v17, %v16202_v17  ;;  %v14364_v42 = vpop.f32.mrb[200].mxu1 }
 0x3bf   : > { %v16617_v15 = vcombine.low %v16195_v3, %v16203_v54  ;;  %v14436_v49 = vadd.f32 %v14364_v42, %v22975_v61  ;;  %v18528_v45 = vpop.f32.mrb[201].mxu1 }
 0x3c0   : > { %v16616_v1 = vcombine.low %v16608_v26, %v16615_v57  ;;  %16981 = vst [vmem:[%s23068_s20 + $0x30] sm:$0xff] %v16600_v33  ;;  %v16618_v19 = vcombine.low %v16202_v17, %v16204_v8  ;;  %v15892_v53 = vpop.f32.mrb[200].mxu0  ;;  %v14367_v48 = vpop.f32.mrb[202].mxu1 }
 0x3c1   : > { %v15970_v7 = vadd.f32 %v15892_v53, %v14434_v4  ;;  %v18578_v39 = vpop.f32.mrb[201].mxu0  ;;  %v14437_v34 = vadd.f32 %v14367_v48, %v22978_v22  ;;  %v18529_v40 = vpop.f32.mrb[203].mxu1  ;;  %v16625_v10 = vrot.slane %v16617_v15, %v23052_v27 }
 0x3c2   : > { %16982 = vst [vmem:[%s23068_s20 + $0x38] sm:$0x3f] %v16616_v1  ;;  %v16632_v59 = vrot.slane %v16618_v19, %v23052_v27  ;;  %v15895_v63 = vpop.f32.mrb[202].mxu0 }
 0x3c3   : > { %v16002_v61 = vadd.f32 %v23048_v58, %v15970_v7  ;;  %v15971_v50 = vadd.f32 %v15895_v63, %v14435_v0  ;;  %v18579_v6 = vpop.f32.mrb[203].mxu0 }
 0x3c4   : > { %v16633_v51 = vcombine.low %v16625_v10, %v16632_v59 }
 0x3c5   : > { %v16027_v25 = vmax.f32 %v16002_v61, 0.0  ;;  %v16003_v9 = vadd.f32 %v23048_v58, %v15971_v50 }
 0x3c6   : > { %16983 = vst [vmem:[%s23068_s20 + $0x40] sm:$0xff] %v16633_v51 }
 0x3c7   : > { %v16205_v4 = vcombine.high %v16027_v25, %v16027_v25  ;;  %v16212_v56 = vrot.slane %v16027_v25, %v23052_v27  ;;  %v16028_v22 = vmax.f32 %v16003_v9, 0.0 }
 0x3c9   : > { %v16219_v55 = vrot.slane %v16205_v4, %v23052_v27  ;;  %v16220_v41 = vcombine.high %v16212_v56, %v16212_v56  ;;  %v16222_v60 = vcombine.high %v16028_v22, %v16028_v22  ;;  %v16229_v20 = vrot.slane %v16028_v22, %v23052_v27 }
 0x3cb   : > { %v16634_v62 = vcombine.low %v16212_v56, %v16220_v41  ;;  %v16221_v30 = vcombine.high %v16219_v55, %v16219_v55  ;;  %v16236_v0 = vrot.slane %v16222_v60, %v23052_v27  ;;  %v16237_v14 = vcombine.high %v16229_v20, %v16229_v20 }
 0x3cc   : > { %v16648_v31 = vrot.slane %v16219_v55, %v23052_v27 }
 0x3cd   : > { %v16641_v46 = vrot.slane %v16634_v62, %v23052_v27  ;;  %v16650_v35 = vcombine.low %v16221_v30, %v16229_v20  ;;  %v16651_v5 = vcombine.low %v16237_v14, %v16236_v0 }
 0x3cf   : > { %v16649_v43 = vcombine.low %v16641_v46, %v16648_v31  ;;  %v16658_v18 = vrot.slane %v16650_v35, %v23052_v27  ;;  %v14372_v29 = vpop.f32.mrb[204].mxu1  ;;  %v16665_v3 = vrot.slane %v16651_v5, %v23052_v27 }
 0x3d0   : > { %v14438_v16 = vadd.f32 %v14372_v29, %v22987_v13  ;;  %v18532_v23 = vpop.f32.mrb[205].mxu1  ;;  %v16238_v13 = vcombine.high %v16236_v0, %v16236_v0 }
 0x3d1   : > { %16984 = vst [vmem:[%s23068_s20 + $0x48] sm:$0x3f] %v16649_v43  ;;  %v14375_v38 = vpop.f32.mrb[206].mxu1  ;;  %v16666_v17 = vcombine.low %v16658_v18, %v16665_v3 }
 0x3d2   : > { %v14439_v54 = vadd.f32 %v14375_v38, %v22990_v37  ;;  %v18533_v33 = vpop.f32.mrb[207].mxu1 }
 0x3d3   : > { %v15900_v26 = vpop.f32.mrb[204].mxu0  ;;  %16985 = vst [vmem:[%s23068_s20 + $0x50] sm:$0xff] %v16666_v17 }
 0x3d4   : > { %v15972_v57 = vadd.f32 %v15900_v26, %v14436_v49  ;;  %v18582_v8 = vpop.f32.mrb[205].mxu0 }
 0x3d5   : > { %v15903_v42 = vpop.f32.mrb[206].mxu0 }
 0x3d6   : > { %v16004_v15 = vadd.f32 %v23048_v58, %v15972_v57  ;;  %v15973_v45 = vadd.f32 %v15903_v42, %v14437_v34  ;;  %v18583_v1 = vpop.f32.mrb[207].mxu0 }
 0x3d8   : > { %v16029_v19 = vmax.f32 %v16004_v15, 0.0  ;;  %v16005_v53 = vadd.f32 %v23048_v58, %v15973_v45 }
 0x3da   : > { %v16239_v48 = vcombine.high %v16029_v19, %v16029_v19  ;;  %v16246_v7 = vrot.slane %v16029_v19, %v23052_v27  ;;  %v16030_v39 = vmax.f32 %v16005_v53, 0.0 }
 0x3dc   : > { %v16253_v37 = vrot.slane %v16239_v48, %v23052_v27  ;;  %v16254_v40 = vcombine.high %v16246_v7, %v16246_v7  ;;  %v16667_v10 = vcombine.low %v16238_v13, %v16246_v7  ;;  %v16256_v49 = vcombine.high %v16030_v39, %v16030_v39 }
 0x3dd   : > { %v16263_v59 = vrot.slane %v16030_v39, %v23052_v27 }
 0x3de   : > { %v16255_v63 = vcombine.high %v16253_v37, %v16253_v37  ;;  %v16674_v34 = vrot.slane %v16667_v10, %v23052_v27  ;;  %v16681_v61 = vrot.slane %v16254_v40, %v23052_v27  ;;  %v16270_v50 = vrot.slane %v16256_v49, %v23052_v27 }
 0x3df   : > { %v16271_v6 = vcombine.high %v16263_v59, %v16263_v59 }
 0x3e0   : > { %v16682_v51 = vcombine.low %v16674_v34, %v16681_v61  ;;  %v16683_v25 = vcombine.low %v16253_v37, %v16255_v63  ;;  %v16272_v22 = vcombine.high %v16270_v50, %v16270_v50 }
 0x3e1   : > { %v16684_v9 = vcombine.low %v16263_v59, %v16271_v6  ;;  %v14380_v4 = vpop.f32.mrb[208].mxu1 }
 0x3e2   : > { %v16691_v56 = vrot.slane %v16683_v25, %v23052_v27  ;;  %16986 = vst [vmem:[%s23068_s20 + $0x58] sm:$0x3f] %v16682_v51  ;;  %v14440_v55 = vadd.f32 %v14380_v4, %v22997_v44  ;;  %v18536_v41 = vpop.f32.mrb[209].mxu1  ;;  %v16700_v5 = vcombine.low %v16270_v50, %v16272_v22 }
 0x3e3   : > { %v16698_v60 = vrot.slane %v16684_v9, %v23052_v27  ;;  %v15908_v20 = vpop.f32.mrb[208].mxu0  ;;  %v14383_v62 = vpop.f32.mrb[210].mxu1 }
 0x3e4   : > { %v15974_v30 = vadd.f32 %v15908_v20, %v14438_v16  ;;  %v18586_v0 = vpop.f32.mrb[209].mxu0  ;;  %v14441_v14 = vadd.f32 %v14383_v62, %v23000_v21  ;;  %v18537_v46 = vpop.f32.mrb[211].mxu1  ;;  %v16707_v16 = vrot.slane %v16700_v5, %v23052_v27 }
 0x3e5   : > { %v16699_v31 = vcombine.low %v16691_v56, %v16698_v60  ;;  %v15911_v35 = vpop.f32.mrb[210].mxu0 }
 0x3e6   : > { %v16006_v43 = vadd.f32 %v23048_v58, %v15974_v30  ;;  %v15975_v18 = vadd.f32 %v15911_v35, %v14439_v54  ;;  %v18587_v29 = vpop.f32.mrb[211].mxu0 }
 0x3e7   : > { %16987 = vst [vmem:[%s23068_s20 + $0x60] sm:$0xff] %v16699_v31 }
 0x3e8   : > { %v16031_v3 = vmax.f32 %v16006_v43, 0.0  ;;  %v16007_v44 = vadd.f32 %v23048_v58, %v15975_v18 }
 0x3ea   : > { %v16273_v23 = vcombine.high %v16031_v3, %v16031_v3  ;;  %v16280_v38 = vrot.slane %v16031_v3, %v23052_v27  ;;  %v16032_v17 = vmax.f32 %v16007_v44, 0.0 }
 0x3ec   : > { %v16287_v21 = vrot.slane %v16273_v23, %v23052_v27  ;;  %v16288_v33 = vcombine.high %v16280_v38, %v16280_v38  ;;  %v16714_v26 = vrot.slane %v16280_v38, %v23052_v27  ;;  %v16290_v57 = vcombine.high %v16032_v17, %v16032_v17 }
 0x3ed   : > { %v16297_v54 = vrot.slane %v16032_v17, %v23052_v27 }
 0x3ee   : > { %v16715_v8 = vcombine.low %v16707_v16, %v16714_v26  ;;  %v16716_v42 = vcombine.low %v16288_v33, %v16287_v21  ;;  %v16289_v15 = vcombine.high %v16287_v21, %v16287_v21  ;;  %v16304_v45 = vrot.slane %v16290_v57, %v23052_v27 }
 0x3ef   : > { %v16305_v1 = vcombine.high %v16297_v54, %v16297_v54 }
 0x3f0   : > { %16988 = vst [vmem:[%s23068_s20 + $0x68] sm:$0x3f] %v16715_v8  ;;  %v16306_v19 = vcombine.high %v16304_v45, %v16304_v45  ;;  %v16717_v53 = vcombine.low %v16289_v15, %v16297_v54  ;;  %v16724_v48 = vrot.slane %v16716_v42, %v23052_v27 }
 0x3f1   : > { %v16733_v13 = vcombine.low %v16305_v1, %v16304_v45 }
 0x3f2   : > { %v16731_v7 = vrot.slane %v16717_v53, %v23052_v27  ;;  %v16747_v39 = vrot.slane %v16306_v19, %v23052_v27  ;;  %v14388_v37 = vpop.f32.mrb[212].mxu1 }
 0x3f3   : > { %v16740_v40 = vrot.slane %v16733_v13, %v23052_v27  ;;  %v14442_v10 = vadd.f32 %v14388_v37, %v23007_v12  ;;  %v18540_v49 = vpop.f32.mrb[213].mxu1 }
 0x3f4   : > { %v16732_v59 = vcombine.low %v16724_v48, %v16731_v7  ;;  %v14391_v63 = vpop.f32.mrb[214].mxu1 }
 0x3f5   : > { %v16748_v34 = vcombine.low %v16740_v40, %v16747_v39  ;;  %v14443_v61 = vadd.f32 %v14391_v63, %v23010_v2  ;;  %v18541_v50 = vpop.f32.mrb[215].mxu1 }
 0x3f6   : > { %16989 = vst [vmem:[%s23068_s20 + $0x70] sm:$0xff] %v16732_v59 }
 0x3f7   : > { %16990 = vst [vmem:[%s23068_s20 + $0x78] sm:$0x3f] %v16748_v34  ;;  %v15916_v6 = vpop.f32.mrb[212].mxu0 }
 0x3f8   : > { %v15976_v51 = vadd.f32 %v15916_v6, %v14440_v55  ;;  %v18590_v25 = vpop.f32.mrb[213].mxu0 }
 0x3f9   : > { %v15919_v9 = vpop.f32.mrb[214].mxu0 }
 0x3fa   : > { %v16008_v4 = vadd.f32 %v23048_v58, %v15976_v51  ;;  %v15977_v56 = vadd.f32 %v15919_v9, %v14441_v14  ;;  %v18591_v22 = vpop.f32.mrb[215].mxu0 }
 0x3fc   : > { %v16033_v41 = vmax.f32 %v16008_v4, 0.0  ;;  %v16009_v12 = vadd.f32 %v23048_v58, %v15977_v56 }
 0x3fe   : > { %v16307_v60 = vcombine.high %v16033_v41, %v16033_v41  ;;  %v16314_v20 = vrot.slane %v16033_v41, %v23052_v27  ;;  %v16034_v62 = vmax.f32 %v16009_v12, 0.0 }
 0x400   : > { %v16321_v2 = vrot.slane %v16307_v60, %v23052_v27  ;;  %v16322_v30 = vcombine.high %v16314_v20, %v16314_v20  ;;  %v16324_v0 = vcombine.high %v16034_v62, %v16034_v62  ;;  %v16331_v46 = vrot.slane %v16034_v62, %v23052_v27 }
 0x402   : > { %v16323_v55 = vcombine.high %v16321_v2, %v16321_v2  ;;  %v16749_v31 = vcombine.low %v16314_v20, %v16322_v30  ;;  %v16338_v35 = vrot.slane %v16324_v0, %v23052_v27  ;;  %v16339_v5 = vcombine.high %v16331_v46, %v16331_v46 }
 0x404   : > { %v16750_v14 = vcombine.low %v16321_v2, %v16323_v55  ;;  %v16766_v43 = vcombine.low %v16331_v46, %v16339_v5  ;;  %v14396_v18 = vpop.f32.mrb[216].mxu1  ;;  %v16757_v44 = vrot.slane %v16749_v31, %v23052_v27  ;;  %v16780_v16 = vrot.slane %v16338_v35, %v23052_v27 }
 0x405   : > { %v14444_v29 = vadd.f32 %v14396_v18, %v23017_v36  ;;  %v18544_v3 = vpop.f32.mrb[217].mxu1  ;;  %v16340_v13 = vcombine.high %v16338_v35, %v16338_v35 }
 0x406   : > { %v16764_v23 = vrot.slane %v16750_v14, %v23052_v27  ;;  %v16773_v38 = vrot.slane %v16766_v43, %v23052_v27  ;;  %v14399_v17 = vpop.f32.mrb[218].mxu1 }
 0x407   : > { %v14445_v21 = vadd.f32 %v14399_v17, %v23020_v47  ;;  %v18545_v33 = vpop.f32.mrb[219].mxu1 }
 0x408   : > { %v16765_v26 = vcombine.low %v16757_v44, %v16764_v23  ;;  %v16781_v57 = vcombine.low %v16773_v38, %v16780_v16  ;;  %v15924_v54 = vpop.f32.mrb[216].mxu0 }
 0x409   : > { %v15978_v8 = vadd.f32 %v15924_v54, %v14442_v10  ;;  %v18594_v42 = vpop.f32.mrb[217].mxu0 }
 0x40a   : > { %16991 = vst [vmem:[%s23068_s20 + $0x80] sm:$0xff] %v16765_v26  ;;  %16992 = vst [vmem:[%s23068_s20 + $0x88] sm:$0x3f] %v16781_v57  ;;  %v15927_v36 = vpop.f32.mrb[218].mxu0 }
 0x40b   : > { %v16010_v15 = vadd.f32 %v23048_v58, %v15978_v8  ;;  %v15979_v45 = vadd.f32 %v15927_v36, %v14443_v61  ;;  %v18595_v1 = vpop.f32.mrb[219].mxu0 }
 0x40d   : > { %v16035_v19 = vmax.f32 %v16010_v15, 0.0  ;;  %v16011_v53 = vadd.f32 %v23048_v58, %v15979_v45 }
 0x40f   : > { %v16341_v48 = vcombine.high %v16035_v19, %v16035_v19  ;;  %v16348_v47 = vrot.slane %v16035_v19, %v23052_v27  ;;  %v16036_v7 = vmax.f32 %v16011_v53, 0.0 }
 0x411   : > { %v16355_v39 = vrot.slane %v16341_v48, %v23052_v27  ;;  %v16356_v37 = vcombine.high %v16348_v47, %v16348_v47  ;;  %v16782_v40 = vcombine.low %v16340_v13, %v16348_v47  ;;  %v16365_v10 = vrot.slane %v16036_v7, %v23052_v27 }
 0x412   : > { %v16358_v6 = vcombine.high %v16036_v7, %v16036_v7 }
 0x413   : > { %v16783_v49 = vcombine.low %v16356_v37, %v16355_v39  ;;  %v16357_v59 = vcombine.high %v16355_v39, %v16355_v39  ;;  %v16373_v63 = vcombine.high %v16365_v10, %v16365_v10  ;;  %v16790_v34 = vrot.slane %v16782_v40, %v23052_v27 }
 0x414   : > { %v16372_v2 = vrot.slane %v16358_v6, %v23052_v27 }
 0x415   : > { %v16797_v61 = vrot.slane %v16783_v49, %v23052_v27  ;;  %v16799_v50 = vcombine.low %v16357_v59, %v16365_v10  ;;  %v16813_v4 = vrot.slane %v16373_v63, %v23052_v27 }
 0x416   : > { %v14404_v51 = vpop.f32.mrb[220].mxu1  ;;  %v16374_v5 = vcombine.high %v16372_v2, %v16372_v2 }
 0x417   : > { %v16798_v25 = vcombine.low %v16790_v34, %v16797_v61  ;;  %v16806_v9 = vrot.slane %v16799_v50, %v23052_v27  ;;  %v14446_v56 = vadd.f32 %v14404_v51, %v23027_v28  ;;  %v18548_v22 = vpop.f32.mrb[221].mxu1 }
 0x418   : > { %v14407_v41 = vpop.f32.mrb[222].mxu1 }
 0x419   : > { %16993 = vst [vmem:[%s23068_s20 + $0x90] sm:$0xff] %v16798_v25  ;;  %v16814_v12 = vcombine.low %v16806_v9, %v16813_v4  ;;  %v15932_v60 = vpop.f32.mrb[220].mxu0  ;;  %v14447_v20 = vadd.f32 %v14407_v41, %v23030_v52  ;;  %v18549_v62 = vpop.f32.mrb[223].mxu1  ;;  %v16815_v52 = vcombine.low %v16372_v2, %v16374_v5 }
 0x41a   : > { %v15980_v30 = vadd.f32 %v15932_v60, %v14444_v29  ;;  %v18598_v0 = vpop.f32.mrb[221].mxu0 }
 0x41b   : > { %16994 = vst [vmem:[%s23068_s20 + $0x98] sm:$0x3f] %v16814_v12  ;;  %v15935_v46 = vpop.f32.mrb[222].mxu0  ;;  %v16823_v17 = vrot.slane %v16815_v52, %v23052_v27 }
 0x41c   : > { %v16012_v55 = vadd.f32 %v23048_v58, %v15980_v30  ;;  %v15981_v31 = vadd.f32 %v15935_v46, %v14445_v21  ;;  %v18599_v35 = vpop.f32.mrb[223].mxu0 }
 0x41e   : > { %v16037_v28 = vmax.f32 %v16012_v55, 0.0  ;;  %v16013_v14 = vadd.f32 %v23048_v58, %v15981_v31 }
 0x420   : > { %v16375_v43 = vcombine.high %v16037_v28, %v16037_v28  ;;  %v16382_v18 = vrot.slane %v16037_v28, %v23052_v27  ;;  %v16038_v3 = vmax.f32 %v16013_v14, 0.0 }
 0x422   : > { %v16389_v44 = vrot.slane %v16375_v43, %v23052_v27  ;;  %v16390_v29 = vcombine.high %v16382_v18, %v16382_v18  ;;  %v16399_v16 = vrot.slane %v16038_v3, %v23052_v27  ;;  %v16392_v15 = vcombine.high %v16038_v3, %v16038_v3 }
 0x424   : > { %v16391_v23 = vcombine.high %v16389_v44, %v16389_v44  ;;  %v16816_v38 = vcombine.low %v16382_v18, %v16390_v29  ;;  %v16846_v8 = vrot.slane %v16399_v16, %v23052_v27  ;;  %v16406_v7 = vrot.slane %v16392_v15, %v23052_v27 }
 0x425   : > { %v16407_v39 = vcombine.high %v16399_v16, %v16399_v16 }
 0x426   : > { %v16830_v21 = vrot.slane %v16816_v38, %v23052_v27  ;;  %v16832_v33 = vcombine.low %v16389_v44, %v16391_v23  ;;  %v16408_v6 = vcombine.high %v16406_v7, %v16406_v7 }
 0x427   : > { %v14412_v26 = vpop.f32.mrb[224].mxu1  ;;  %v16848_v61 = vcombine.low %v16407_v39, %v16406_v7 }
 0x428   : > { %v16831_v57 = vcombine.low %v16823_v17, %v16830_v21  ;;  %v16839_v54 = vrot.slane %v16832_v33, %v23052_v27  ;;  %v14448_v42 = vadd.f32 %v14412_v26, %v23034_v11  ;;  %v18552_v36 = vpop.f32.mrb[225].mxu1 }
 0x429   : > { %v14415_v45 = vpop.f32.mrb[226].mxu1  ;;  %v16856_v62 = vrot.slane %v16848_v61, %v23052_v27 }
 0x42a   : > { %16995 = vst [vmem:[%s23068_s20 + $0xa0] sm:$0xff] %v16831_v57  ;;  %v16847_v1 = vcombine.low %v16839_v54, %v16846_v8  ;;  %v14449_v19 = vadd.f32 %v14415_v45, %v23036_v24  ;;  %v18553_v53 = vpop.f32.mrb[227].mxu1 }
 0x42b   : > { %v15940_v13 = vpop.f32.mrb[224].mxu0 }
 0x42c   : > { %16996 = vst [vmem:[%s23068_s20 + $0xa8] sm:$0x3f] %v16847_v1  ;;  %v15982_v48 = vadd.f32 %v15940_v13, %v14446_v56  ;;  %v18602_v47 = vpop.f32.mrb[225].mxu0 }
 0x42d   : > { %v15943_v37 = vpop.f32.mrb[226].mxu0 }
 0x42e   : > { %v16014_v40 = vadd.f32 %v23048_v58, %v15982_v48  ;;  %v15983_v10 = vadd.f32 %v15943_v37, %v14447_v20  ;;  %v18603_v11 = vpop.f32.mrb[227].mxu0 }
 0x42f   : > { %v14420_v49 = vpop.f32.mrb[228].mxu1 }
 0x430   : > { %v16039_v59 = vmax.f32 %v16014_v40, 0.0  ;;  %v16015_v63 = vadd.f32 %v23048_v58, %v15983_v10  ;;  %v14450_v34 = vadd.f32 %v14420_v49, %v23038_v32  ;;  %v18556_v24 = vpop.f32.mrb[229].mxu1 }
 0x431   : > { %v14423_v50 = vpop.f32.mrb[230].mxu1 }
 0x432   : > { %v16409_v51 = vcombine.high %v16039_v59, %v16039_v59  ;;  %v16416_v25 = vrot.slane %v16039_v59, %v23052_v27  ;;  %v16040_v9 = vmax.f32 %v16015_v63, 0.0  ;;  %v18557_v4 = vpop.f32.mrb[231].mxu1 }
 0x433   : > { %v15948_v56 = vpop.f32.mrb[228].mxu0 }
 0x434   : > { %v16423_v22 = vrot.slane %v16409_v51, %v23052_v27  ;;  %v16424_v41 = vcombine.high %v16416_v25, %v16416_v25  ;;  %v16849_v12 = vcombine.low %v16408_v6, %v16416_v25  ;;  %v16426_v60 = vcombine.high %v16040_v9, %v16040_v9  ;;  %v18606_v20 = vpop.f32.mrb[229].mxu0 }
 0x435   : > { %v16433_v32 = vrot.slane %v16040_v9, %v23052_v27  ;;  %v15984_v2 = vadd.f32 %v15948_v56, %v14448_v42  ;;  %v15951_v30 = vpop.f32.mrb[230].mxu0 }
 0x436   : > { %v16425_v0 = vcombine.high %v16423_v22, %v16423_v22  ;;  %v16863_v46 = vrot.slane %v16849_v12, %v23052_v27  ;;  %v16865_v55 = vcombine.low %v16424_v41, %v16423_v22  ;;  %v16440_v31 = vrot.slane %v16426_v60, %v23052_v27  ;;  %v18607_v35 = vpop.f32.mrb[231].mxu0 }
 0x437   : > { %v16441_v5 = vcombine.high %v16433_v32, %v16433_v32  ;;  %v16016_v28 = vadd.f32 %v23048_v58, %v15984_v2  ;;  %v15985_v14 = vadd.f32 %v15951_v30, %v14449_v19 }
 0x438   : > { %v16864_v43 = vcombine.low %v16856_v62, %v16863_v46  ;;  %v16872_v18 = vrot.slane %v16865_v55, %v23052_v27  ;;  %v16879_v3 = vrot.slane %v16425_v0, %v23052_v27  ;;  %v16442_v52 = vcombine.high %v16440_v31, %v16440_v31 }
 0x439   : > { %v16881_v44 = vcombine.low %v16433_v32, %v16441_v5  ;;  %v16041_v29 = vmax.f32 %v16016_v28, 0.0  ;;  %v16017_v23 = vadd.f32 %v23048_v58, %v15985_v14 }
 0x43a   : > { %v16880_v38 = vcombine.low %v16872_v18, %v16879_v3  ;;  %16997 = vst [vmem:[%s23068_s20 + $0xb0] sm:$0xff] %v16864_v43  ;;  %v16882_v16 = vcombine.low %v16440_v31, %v16442_v52 }
 0x43b   : > { %v16443_v17 = vcombine.high %v16041_v29, %v16041_v29  ;;  %v16450_v21 = vrot.slane %v16041_v29, %v23052_v27  ;;  %v16042_v33 = vmax.f32 %v16017_v23, 0.0  ;;  %v15956_v26 = vpop.f32.mrb[232].mxu0  ;;  %v16889_v57 = vrot.slane %v16881_v44, %v23052_v27 }
 0x43c   : > { %16998 = vst [vmem:[%s23068_s20 + $0xb8] sm:$0x3f] %v16880_v38  ;;  %v16896_v54 = vrot.slane %v16882_v16, %v23052_v27  ;;  %v15986_v8 = vadd.f32 %v15956_v26, %v14450_v34  ;;  %v18610_v42 = vpop.f32.mrb[233].mxu0 }
 0x43d   : > { %v16457_v36 = vrot.slane %v16443_v17, %v23052_v27  ;;  %v16458_v15 = vcombine.high %v16450_v21, %v16450_v21  ;;  %v16460_v45 = vcombine.high %v16042_v33, %v16042_v33  ;;  %v16467_v1 = vrot.slane %v16042_v33, %v23052_v27  ;;  %v15959_v19 = vpop.f32.mrb[234].mxu0 }
 0x43e   : > { %v16897_v53 = vcombine.low %v16889_v57, %v16896_v54  ;;  %v16018_v13 = vadd.f32 %v23048_v58, %v15986_v8  ;;  %v18611_v48 = vpop.f32.mrb[235].mxu0 }
 0x43f   : > { %v16898_v47 = vcombine.low %v16450_v21, %v16458_v15  ;;  %v16459_v7 = vcombine.high %v16457_v36, %v16457_v36  ;;  %v16474_v39 = vrot.slane %v16460_v45, %v23052_v27  ;;  %v16475_v37 = vcombine.high %v16467_v1, %v16467_v1 }
 0x440   : > { %16999 = vst [vmem:[%s23068_s20 + $0xc0] sm:$0xff] %v16897_v53  ;;  %v16043_v40 = vmax.f32 %v16018_v13, 0.0  ;;  %v16912_v11 = vrot.slane %v16457_v36, %v23052_v27 }
 0x441   : > { %v16905_v10 = vrot.slane %v16898_v47, %v23052_v27  ;;  %v16914_v49 = vcombine.low %v16459_v7, %v16467_v1  ;;  %v16915_v59 = vcombine.low %v16475_v37, %v16474_v39  ;;  %v16476_v63 = vcombine.high %v16474_v39, %v16474_v39 }
 0x442   : > { %v16483_v58 = vrot.slane %v16043_v40, %v23052_v27 }
 0x443   : > { %v16913_v34 = vcombine.low %v16905_v10, %v16912_v11  ;;  %v16922_v24 = vrot.slane %v16914_v49, %v23052_v27  ;;  %v16929_v61 = vrot.slane %v16915_v59, %v23052_v27 }
 0x444   : > { %v16484_v50 = vcombine.high %v16483_v58, %v16483_v58  ;;  %v16931_v6 = vcombine.low %v16476_v63, %v16483_v58 }
 0x445   : > { %17000 = vst [vmem:[%s23068_s20 + $0xc8] sm:$0x3f] %v16913_v34  ;;  %v16930_v51 = vcombine.low %v16922_v24, %v16929_v61 }
 0x446   : > { %v16938_v25 = vrot.slane %v16931_v6, %v23052_v27  ;;  %v16945_v9 = vrot.slane %v16484_v50, %v23052_v27 }
 0x447   : > { %17001 = vst [vmem:[%s23068_s20 + $0xd0] sm:$0xff] %v16930_v51 }
 0x448   : > { %v16946_v4 = vcombine.low %v16938_v25, %v16945_v9 }
 0x44a   : > { %17002 = vst [vmem:[%s23068_s20 + $0xd8] sm:$0x3f] %v16946_v4 }
 0x44b PF: > { %s13_s14 = sadd.s32 1, %s18665_s14   ;;  %s23492_s12 = smov %s18661_s13 }
 0x44c   : > { %p10_p5 = scmp.ge.s32.totalorder %s13_s14, 4   ;;  %s23493_s13 = smov %s23495_s15 }
 0x44e   :  { %12 = sbr.rel (!%p10_p5) target bundleno = 2 (0x2), region = 73 }

</bundles_post_ra>
